<compile_context>
chip_gen: v7x
topology: tpu7x:2x2x1
jax: 0.10.0
libtpu: 0.0.40
codegen_flags: <defaults>
</compile_context>

<pallas_src>
import functools
import numpy as np
import jax
import jax.numpy as jnp
from jax import lax
from jax.experimental import pallas as pl
from jax.experimental.pallas import tpu as pltpu


# ----------------------------- host-side tree glue ---------------------------
class Tree:
    def __init__(self, op, children=()):
        self.op = op
        self.children = list(children)
        self.num_children = len(self.children)
        self.idx = -1


def flatten_preorder(tree):
    # mirrors get_tree_flat_nodes (preorder, sets node.idx)
    nodes = []

    def rec(n):
        n.idx = len(nodes)
        nodes.append(n.op)
        for ch in n.children:
            rec(ch)

    rec(tree)
    return nodes


def max_children_of(tree):
    m = tree.num_children
    for ch in tree.children:
        m = max(m, max_children_of(ch))
    return m


def build_tables(tree, max_children):
    """Returns (ops_ordered[N], child_slots[N, max_children]) in bottom-up
    (reverse preorder) processing order.  Slot N is the zero-state slot."""
    ops_pre = flatten_preorder(tree)
    n = len(ops_pre)
    child_pre = [[] for _ in range(n)]

    def rec(node):
        for ch in node.children:
            child_pre[node.idx].append(ch.idx)
            rec(ch)

    rec(tree)
    ops_ordered = np.array([ops_pre[n - 1 - s] for s in range(n)], dtype=np.int32)
    slots = np.full((n, max_children), n, dtype=np.int32)  # n == zero slot
    for s in range(n):
        p = n - 1 - s
        for k, cp in enumerate(child_pre[p]):
            slots[s, k] = n - 1 - cp
    return ops_ordered, slots


def pad_tables(ops, slots, n_total):
    """Prepend dummy leaf nodes so both trees have n_total nodes and both
    roots land on slot n_total - 1 (processed at the last loop step)."""
    n_tree, k = slots.shape
    pad = n_total - n_tree
    if pad == 0:
        return ops.astype(np.int32), slots.astype(np.int32)
    ops_p = np.concatenate([np.zeros(pad, np.int32), ops.astype(np.int32)])
    # old slot v -> v + pad; old zero slot n_tree -> n_tree + pad == n_total
    slots_p = np.concatenate(
        [np.full((pad, k), n_total, np.int32), slots.astype(np.int32) + pad],
        axis=0)
    return ops_p, slots_p


# --------------------- fused TreeLSTM + Similarity kernel ---------------------
def fused_tree_lstm_similarity_kernel(
        slots_ref, emb_ref, wx_ref, wh_ref, bg_ref,
        wh1_ref, wh2_ref, bwh_ref, wp_ref, bwp_ref,
        out_ref, state_buf,
        *, n_nodes, max_children, in_dim, mem_dim):
    K = max_children
    P = 2 * mem_dim            # packed state row: [c (0:mem) | h (mem:2*mem)]
    F32 = jnp.float32

    # Zero only the shared "absent child / leaf" slot (rows 2*n, 2*n+1);
    # every other row is written before it is read (children before parents).
    state_buf[pl.ds(2 * n_nodes, 2), :] = jnp.zeros((2, P), F32)

    # gate order in the stacked weight/bias tables: 0=f, 1=i, 2=o, 3=u
    def w_x(g):    # (in_dim, mem_dim)
        return wx_ref[pl.ds(g * in_dim, in_dim), :]

    def w_h(g):    # (P, mem_dim); rows 0:mem_dim are zero -> c half ignored
        return wh_ref[pl.ds(g * P, P), :]

    def b_g(g):    # (1, mem_dim) combined x-path + h-path bias
        return bg_ref[pl.ds(g, 1), :]

    def step(s, _):
        x = emb_ref[pl.ds(2 * s, 2), :]                     # (2, in_dim) [L; R]

        # Gather the packed [c | h] child rows for both trees (t-major).
        rows = []
        for t in range(2):
            for k in range(K):
                idx = slots_ref[s * (2 * K) + t * K + k]
                rows.append(state_buf[pl.ds(2 * idx + t, 1), :])
        block = jnp.concatenate(rows, axis=0)               # (2K, P)

        # Per-tree packed child-state sums (only the h half feeds the gates,
        # the zero-padded weights kill the c half).
        psums = []
        for t in range(2):
            acc = rows[t * K]
            for k in range(1, K):
                acc = acc + rows[t * K + k]
            psums.append(acc)
        psum = jnp.concatenate(psums, axis=0)               # (2, P)

        # Forget gates: ONE matmul + ONE sigmoid for all children of both trees.
        fx = jnp.dot(x, w_x(0), preferred_element_type=F32)            # (2, mem)
        fx_rep = jnp.concatenate([fx[0:1, :]] * K + [fx[1:2, :]] * K, axis=0)
        f = jax.nn.sigmoid(
            jnp.dot(block, w_h(0), preferred_element_type=F32) + fx_rep + b_g(0))
        fc = f * block[:, :mem_dim]                         # (2K, mem)
        fc_sum = jnp.concatenate(
            [jnp.sum(fc[t * K:(t + 1) * K, :], axis=0, keepdims=True)
             for t in range(2)], axis=0)                    # (2, mem)

        # i / o / u gates: per-gate lane-aligned matmuls (M = 2 trees).
        def gate(g):
            return (jnp.dot(x, w_x(g), preferred_element_type=F32)
                    + jnp.dot(psum, w_h(g), preferred_element_type=F32)
                    + b_g(g))

        i_g = jax.nn.sigmoid(gate(1))
        o_g = jax.nn.sigmoid(gate(2))
        u_g = jnp.tanh(gate(3))

        c = i_g * u_g + fc_sum                              # (2, mem)
        h = o_g * jnp.tanh(c)                               # (2, mem)
        packed = jnp.concatenate([c, h], axis=1)            # (2, P)
        state_buf[pl.ds(2 * s, 2), :] = packed
        return packed                                       # last carry = roots

    # TODO(synk): for very deep/large trees, level-schedule nodes (loop over
    # depth with block matmuls) and/or split the two trees across v7x's two
    # TensorCores via pl.core_map; here they are batched on sublanes instead.
    roots = lax.fori_loop(0, n_nodes, step, jnp.zeros((2, P), F32),
                          unroll=(n_nodes <= 16))

    # Similarity head on the two root *cell* states (matches lstate/rstate).
    root_c = roots[:, :mem_dim]                             # (2, mem)
    lvec = root_c[0:1, :]
    rvec = root_c[1:2, :]
    mult = lvec * rvec
    absd = jnp.abs(lvec - rvec)
    hid = jax.nn.sigmoid(
        jnp.dot(mult, wh1_ref[...], preferred_element_type=F32)
        + jnp.dot(absd, wh2_ref[...], preferred_element_type=F32)
        + bwh_ref[...])
    logits = jnp.dot(hid, wp_ref[...], preferred_element_type=F32) + bwp_ref[...]
    m = jnp.max(logits, axis=1, keepdims=True)
    e = jnp.exp(logits - m)
    out_ref[...] = e / jnp.sum(e, axis=1, keepdims=True)


# ------------------------------ parameter prep --------------------------------
def prepare_params(params):
    """Split / transpose / zero-pad the PyTorch-layout weights into the
    kernel-ready layout (done once, outside the jitted forward)."""
    f32 = jnp.float32
    mem = params["b_fx"].shape[0]
    wx_t = params["W_ioux"].T.astype(f32)   # (in, 3*mem), columns [i | o | u]
    wh_t = params["W_iouh"].T.astype(f32)   # (mem, 3*mem)
    zeros_c = jnp.zeros((mem, mem), f32)

    def pad_h(w):                           # (mem, mem) -> (2*mem, mem)
        return jnp.concatenate([zeros_c, w], axis=0)

    gx = [wx_t[:, g * mem:(g + 1) * mem] for g in range(3)]          # i, o, u
    gh = [wh_t[:, g * mem:(g + 1) * mem] for g in range(3)]
    bx = [params["b_ioux"][g * mem:(g + 1) * mem] for g in range(3)]
    bh = [params["b_iouh"][g * mem:(g + 1) * mem] for g in range(3)]

    wx = jnp.concatenate([params["W_fx"].T.astype(f32)] + gx, axis=0)   # (4*in, mem)
    wh = jnp.concatenate([pad_h(params["W_fh"].T.astype(f32))]
                         + [pad_h(g) for g in gh], axis=0)              # (4*2mem, mem)
    bg = jnp.stack([params["b_fx"] + params["b_fh"],
                    bx[0] + bh[0], bx[1] + bh[1], bx[2] + bh[2]],
                   axis=0).astype(f32)                                  # (4, mem)
    wwh_t = params["W_wh"].T.astype(f32)    # (2*mem, hidden)
    return dict(
        emb=params["emb"].astype(f32),
        wx=wx, wh=wh, bg=bg,
        wh1=wwh_t[:mem], wh2=wwh_t[mem:],
        bwh=params["b_wh"][None, :].astype(f32),
        wp=params["W_wp"].T.astype(f32),
        bwp=params["b_wp"][None, :].astype(f32),
    )


@functools.lru_cache(maxsize=None)
def _build_forward(n_nodes, max_children, in_dim, mem_dim, hidden_dim, num_classes):
    kern = functools.partial(
        fused_tree_lstm_similarity_kernel,
        n_nodes=n_nodes, max_children=max_children,
        in_dim=in_dim, mem_dim=mem_dim)
    vspec = pl.BlockSpec(memory_space=pltpu.MemorySpace.VMEM)
    sspec = pl.BlockSpec(memory_space=pltpu.MemorySpace.SMEM)
    call = pl.pallas_call(
        kern,
        out_shape=jax.ShapeDtypeStruct((1, num_classes), jnp.float32),
        in_specs=[sspec] + [vspec] * 9,
        out_specs=vspec,
        scratch_shapes=[pltpu.VMEM((2 * (n_nodes + 1), 2 * mem_dim), jnp.float32)],
    )

    @jax.jit
    def fwd(prep, ops_inter, slots_flat):
        node_emb = prep["emb"][ops_inter].astype(jnp.float32)   # (2n, in_dim)
        return call(slots_flat, node_emb,
                    prep["wx"], prep["wh"], prep["bg"],
                    prep["wh1"], prep["wh2"], prep["bwh"],
                    prep["wp"], prep["bwp"])

    return fwd


def similarity_tree_lstm_forward(ltree, rtree, params, prep=None):
    if prep is None:
        prep = prepare_params(params)
    K = max(1, max_children_of(ltree), max_children_of(rtree))
    l_ops, l_slots = build_tables(ltree, K)
    r_ops, r_slots = build_tables(rtree, K)
    n = max(l_ops.shape[0], r_ops.shape[0])
    l_ops, l_slots = pad_tables(l_ops, l_slots, n)
    r_ops, r_slots = pad_tables(r_ops, r_slots, n)
    # interleave left/right: emb row 2*s+t, slot entry s*(2K)+t*K+k
    ops_inter = np.stack([l_ops, r_ops], axis=1).reshape(-1).astype(np.int32)
    slots_flat = np.stack([l_slots, r_slots], axis=1).reshape(-1).astype(np.int32)

    mem_dim = params["b_fx"].shape[0]
    in_dim = params["W_ioux"].shape[1]
    hidden_dim = params["b_wh"].shape[0]
    num_classes = params["b_wp"].shape[0]
    fwd = _build_forward(n, K, in_dim, mem_dim, hidden_dim, num_classes)
    return fwd(prep, jnp.asarray(ops_inter), jnp.asarray(slots_flat))


# ------------------------------- pure-JAX reference ---------------------------
def _ref_node_forward(x, child_c, child_h, p):
    child_h_sum = jnp.sum(child_h, axis=0, keepdims=True)
    iou = (x @ p["W_ioux"].T + p["b_ioux"]
           + child_h_sum @ p["W_iouh"].T + p["b_iouh"])
    i, o, u = jnp.split(iou, 3, axis=1)
    i, o, u = jax.nn.sigmoid(i), jax.nn.sigmoid(o), jnp.tanh(u)
    f = jax.nn.sigmoid(child_h @ p["W_fh"].T + p["b_fh"]
                       + jnp.tile(x @ p["W_fx"].T + p["b_fx"],
                                  (child_h.shape[0], 1)))
    fc = f * child_c
    c = i * u + jnp.sum(fc, axis=0, keepdims=True)
    h = o * jnp.tanh(c)
    return c, h


def _ref_tree_lstm(node, p, mem_dim):
    states = [_ref_tree_lstm(ch, p, mem_dim) for ch in node.children]
    x = p["emb"][node.op][None, :]
    if not states:
        child_c = jnp.zeros((1, mem_dim), jnp.float32)
        child_h = jnp.zeros((1, mem_dim), jnp.float32)
    else:
        child_c = jnp.concatenate([s[0] for s in states], axis=0)
        child_h = jnp.concatenate([s[1] for s in states], axis=0)
    return _ref_node_forward(x, child_c, child_h, p)


def _ref_forward(ltree, rtree, p, mem_dim):
    lc, _ = _ref_tree_lstm(ltree, p, mem_dim)
    rc, _ = _ref_tree_lstm(rtree, p, mem_dim)
    mult = lc * rc
    absd = jnp.abs(lc - rc)
    vd = jnp.concatenate([mult, absd], axis=1)
    out = jax.nn.sigmoid(vd @ p["W_wh"].T + p["b_wh"])
    return jax.nn.softmax(out @ p["W_wp"].T + p["b_wp"], axis=1)


# --------------------------------------- main ---------------------------------
if __name__ == "__main__":
    vocab_size, in_dim, mem_dim, hidden_dim, num_classes = 50, 64, 64, 32, 5

    key = jax.random.PRNGKey(0)
    ks = jax.random.split(key, 13)

    def init(k, shape, scale=0.1):
        return (scale * jax.random.normal(k, shape)).astype(jnp.float32)

    params = {
        "emb":     init(ks[0],  (vocab_size, in_dim)),
        "W_ioux":  init(ks[1],  (3 * mem_dim, in_dim)),
        "b_ioux":  init(ks[2],  (3 * mem_dim,)),
        "W_iouh":  init(ks[3],  (3 * mem_dim, mem_dim)),
        "b_iouh":  init(ks[4],  (3 * mem_dim,)),
        "W_fx":    init(ks[5],  (mem_dim, in_dim)),
        "b_fx":    init(ks[6],  (mem_dim,)),
        "W_fh":    init(ks[7],  (mem_dim, mem_dim)),
        "b_fh":    init(ks[8],  (mem_dim,)),
        "W_wh":    init(ks[9],  (hidden_dim, 2 * mem_dim)),
        "b_wh":    init(ks[10], (hidden_dim,)),
        "W_wp":    init(ks[11], (num_classes, hidden_dim)),
        "b_wp":    init(ks[12], (num_classes,)),
    }

    # deterministic small example trees (node.op is a vocab id)
    ltree = Tree(3, [Tree(7, [Tree(1), Tree(4), Tree(9)]),
                     Tree(2, [Tree(5), Tree(6)])])            # 8 nodes
    rtree = Tree(11, [Tree(8),
                      Tree(13, [Tree(0), Tree(12)])])         # 5 nodes

    prep = prepare_params(params)                             # one-time weight prep
    out = similarity_tree_lstm_forward(ltree, rtree, params, prep=prep)
    out = jax.block_until_ready(out)

    ref = jax.block_until_ready(_ref_forward(ltree, rtree, params, mem_dim))
    assert out.shape == (1, num_classes)
    assert np.allclose(np.asarray(out), np.asarray(ref), atol=1e-4), (out, ref)
    assert np.isclose(float(np.asarray(out).sum()), 1.0, atol=1e-4)

    print("KERNEL_OK")
</pallas_src>

<mosaic_0001>
module attributes {stable_mosaic.version = 11 : i64} {
  func.func @fused_tree_lstm_similarity_kernel(%arg0: memref<48xi32, #tpu.memory_space<smem>>, %arg1: memref<16x64xf32, #tpu.memory_space<vmem>>, %arg2: memref<256x64xf32, #tpu.memory_space<vmem>>, %arg3: memref<512x64xf32, #tpu.memory_space<vmem>>, %arg4: memref<4x64xf32, #tpu.memory_space<vmem>>, %arg5: memref<64x32xf32, #tpu.memory_space<vmem>>, %arg6: memref<64x32xf32, #tpu.memory_space<vmem>>, %arg7: memref<1x32xf32, #tpu.memory_space<vmem>>, %arg8: memref<32x5xf32, #tpu.memory_space<vmem>>, %arg9: memref<1x5xf32, #tpu.memory_space<vmem>>, %arg10: memref<1x5xf32, #tpu.memory_space<vmem>>, %arg11: memref<18x128xf32, #tpu.memory_space<vmem>>) attributes {dimension_semantics = [], scalar_prefetch = 0 : i64, scratch_operands = 1 : i64, tpu.core_type = #tpu.core_type<tc>} {
    %cst = arith.constant 0.000000e+00 : f32
    %0 = vector.broadcast %cst : f32 to vector<2x128xf32>
    %c16 = arith.constant 16 : index
    %c0 = arith.constant 0 : index
    %1 = vector.load %arg11[%c16, %c0] : memref<18x128xf32, #tpu.memory_space<vmem>>, vector<2x128xf32>
    tpu.vector_store %arg11[%c16, %c0], %0 {strides = array<i32>} : memref<18x128xf32, #tpu.memory_space<vmem>>, vector<2x128xf32>,
    %cst_0 = arith.constant 0.000000e+00 : f32
    %2 = vector.broadcast %cst_0 : f32 to vector<2x128xf32>
    %c0_i32 = arith.constant 0 : i32
    %c2_i32 = arith.constant 2 : i32
    %3 = arith.muli %c2_i32, %c0_i32 : i32
    %4 = arith.index_cast %3 : i32 to index
    %c0_1 = arith.constant 0 : index
    %5 = vector.load %arg1[%4, %c0_1] : memref<16x64xf32, #tpu.memory_space<vmem>>, vector<2x64xf32>
    %c6_i32 = arith.constant 6 : i32
    %6 = arith.muli %c0_i32, %c6_i32 : i32
    %c0_i32_2 = arith.constant 0 : i32
    %7 = arith.addi %6, %c0_i32_2 : i32
    %c0_i32_3 = arith.constant 0 : i32
    %8 = arith.addi %7, %c0_i32_3 : i32
    %9 = arith.index_cast %8 : i32 to index
    %10 = memref.load %arg0[%9] : memref<48xi32, #tpu.memory_space<smem>>
    %c2_i32_4 = arith.constant 2 : i32
    %11 = arith.muli %c2_i32_4, %10 : i32
    %c0_i32_5 = arith.constant 0 : i32
    %12 = arith.addi %11, %c0_i32_5 : i32
    %13 = arith.index_cast %12 : i32 to index
    %c0_6 = arith.constant 0 : index
    %14 = vector.load %arg11[%13, %c0_6] : memref<18x128xf32, #tpu.memory_space<vmem>>, vector<1x128xf32>
    %c6_i32_7 = arith.constant 6 : i32
    %15 = arith.muli %c0_i32, %c6_i32_7 : i32
    %c0_i32_8 = arith.constant 0 : i32
    %16 = arith.addi %15, %c0_i32_8 : i32
    %c1_i32 = arith.constant 1 : i32
    %17 = arith.addi %16, %c1_i32 : i32
    %18 = arith.index_cast %17 : i32 to index
    %19 = memref.load %arg0[%18] : memref<48xi32, #tpu.memory_space<smem>>
    %c2_i32_9 = arith.constant 2 : i32
    %20 = arith.muli %c2_i32_9, %19 : i32
    %c0_i32_10 = arith.constant 0 : i32
    %21 = arith.addi %20, %c0_i32_10 : i32
    %22 = arith.index_cast %21 : i32 to index
    %c0_11 = arith.constant 0 : index
    %23 = vector.load %arg11[%22, %c0_11] : memref<18x128xf32, #tpu.memory_space<vmem>>, vector<1x128xf32>
    %c6_i32_12 = arith.constant 6 : i32
    %24 = arith.muli %c0_i32, %c6_i32_12 : i32
    %c0_i32_13 = arith.constant 0 : i32
    %25 = arith.addi %24, %c0_i32_13 : i32
    %c2_i32_14 = arith.constant 2 : i32
    %26 = arith.addi %25, %c2_i32_14 : i32
    %27 = arith.index_cast %26 : i32 to index
    %28 = memref.load %arg0[%27] : memref<48xi32, #tpu.memory_space<smem>>
    %c2_i32_15 = arith.constant 2 : i32
    %29 = arith.muli %c2_i32_15, %28 : i32
    %c0_i32_16 = arith.constant 0 : i32
    %30 = arith.addi %29, %c0_i32_16 : i32
    %31 = arith.index_cast %30 : i32 to index
    %c0_17 = arith.constant 0 : index
    %32 = vector.load %arg11[%31, %c0_17] : memref<18x128xf32, #tpu.memory_space<vmem>>, vector<1x128xf32>
    %c6_i32_18 = arith.constant 6 : i32
    %33 = arith.muli %c0_i32, %c6_i32_18 : i32
    %c3_i32 = arith.constant 3 : i32
    %34 = arith.addi %33, %c3_i32 : i32
    %c0_i32_19 = arith.constant 0 : i32
    %35 = arith.addi %34, %c0_i32_19 : i32
    %36 = arith.index_cast %35 : i32 to index
    %37 = memref.load %arg0[%36] : memref<48xi32, #tpu.memory_space<smem>>
    %c2_i32_20 = arith.constant 2 : i32
    %38 = arith.muli %c2_i32_20, %37 : i32
    %c1_i32_21 = arith.constant 1 : i32
    %39 = arith.addi %38, %c1_i32_21 : i32
    %40 = arith.index_cast %39 : i32 to index
    %c0_22 = arith.constant 0 : index
    %41 = vector.load %arg11[%40, %c0_22] : memref<18x128xf32, #tpu.memory_space<vmem>>, vector<1x128xf32>
    %c6_i32_23 = arith.constant 6 : i32
    %42 = arith.muli %c0_i32, %c6_i32_23 : i32
    %c3_i32_24 = arith.constant 3 : i32
    %43 = arith.addi %42, %c3_i32_24 : i32
    %c1_i32_25 = arith.constant 1 : i32
    %44 = arith.addi %43, %c1_i32_25 : i32
    %45 = arith.index_cast %44 : i32 to index
    %46 = memref.load %arg0[%45] : memref<48xi32, #tpu.memory_space<smem>>
    %c2_i32_26 = arith.constant 2 : i32
    %47 = arith.muli %c2_i32_26, %46 : i32
    %c1_i32_27 = arith.constant 1 : i32
    %48 = arith.addi %47, %c1_i32_27 : i32
    %49 = arith.index_cast %48 : i32 to index
    %c0_28 = arith.constant 0 : index
    %50 = vector.load %arg11[%49, %c0_28] : memref<18x128xf32, #tpu.memory_space<vmem>>, vector<1x128xf32>
    %c6_i32_29 = arith.constant 6 : i32
    %51 = arith.muli %c0_i32, %c6_i32_29 : i32
    %c3_i32_30 = arith.constant 3 : i32
    %52 = arith.addi %51, %c3_i32_30 : i32
    %c2_i32_31 = arith.constant 2 : i32
    %53 = arith.addi %52, %c2_i32_31 : i32
    %54 = arith.index_cast %53 : i32 to index
    %55 = memref.load %arg0[%54] : memref<48xi32, #tpu.memory_space<smem>>
    %c2_i32_32 = arith.constant 2 : i32
    %56 = arith.muli %c2_i32_32, %55 : i32
    %c1_i32_33 = arith.constant 1 : i32
    %57 = arith.addi %56, %c1_i32_33 : i32
    %58 = arith.index_cast %57 : i32 to index
    %c0_34 = arith.constant 0 : index
    %59 = vector.load %arg11[%58, %c0_34] : memref<18x128xf32, #tpu.memory_space<vmem>>, vector<1x128xf32>
    %60 = tpu.concatenate %14, %23, %32, %41, %50, %59 in 0 : vector<1x128xf32>, vector<1x128xf32>, vector<1x128xf32>, vector<1x128xf32>, vector<1x128xf32>, vector<1x128xf32> -> vector<6x128xf32>
    %61 = arith.addf %14, %23 : vector<1x128xf32>
    %62 = arith.addf %61, %32 : vector<1x128xf32>
    %63 = arith.addf %41, %50 : vector<1x128xf32>
    %64 = arith.addf %63, %59 : vector<1x128xf32>
    %65 = tpu.concatenate %62, %64 in 0 : vector<1x128xf32>, vector<1x128xf32> -> vector<2x128xf32>
    %c0_35 = arith.constant 0 : index
    %c0_36 = arith.constant 0 : index
    %66 = vector.load %arg2[%c0_35, %c0_36] : memref<256x64xf32, #tpu.memory_space<vmem>>, vector<64x64xf32>
    %cst_37 = arith.constant dense<0.000000e+00> : vector<2x64xf32>
    %67 = tpu.matmul %5, %66, %cst_37 {dimension_numbers = #tpu.dot_dimension_numbers<[1], [0], [0], [1], [0, 0, 1, 1], [], []>} : vector<2x64xf32>, vector<64x64xf32>, vector<2x64xf32> -> vector<2x64xf32>
    %68 = vector.extract_strided_slice %67 {offsets = [0, 0], sizes = [1, 64], strides = [1, 1]} : vector<2x64xf32> to vector<1x64xf32>
    %69 = vector.extract_strided_slice %67 {offsets = [1, 0], sizes = [1, 64], strides = [1, 1]} : vector<2x64xf32> to vector<1x64xf32>
    %70 = tpu.concatenate %68, %68, %68, %69, %69, %69 in 0 : vector<1x64xf32>, vector<1x64xf32>, vector<1x64xf32>, vector<1x64xf32>, vector<1x64xf32>, vector<1x64xf32> -> vector<6x64xf32>
    %c0_38 = arith.constant 0 : index
    %c0_39 = arith.constant 0 : index
    %71 = vector.load %arg3[%c0_38, %c0_39] : memref<512x64xf32, #tpu.memory_space<vmem>>, vector<128x64xf32>
    %cst_40 = arith.constant dense<0.000000e+00> : vector<6x64xf32>
    %72 = tpu.matmul %60, %71, %cst_40 {dimension_numbers = #tpu.dot_dimension_numbers<[1], [0], [0], [1], [0, 0, 1, 1], [], []>} : vector<6x128xf32>, vector<128x64xf32>, vector<6x64xf32> -> vector<6x64xf32>
    %73 = arith.addf %72, %70 : vector<6x64xf32>
    %c0_41 = arith.constant 0 : index
    %c0_42 = arith.constant 0 : index
    %74 = vector.load %arg4[%c0_41, %c0_42] : memref<4x64xf32, #tpu.memory_space<vmem>>, vector<1x64xf32>
    %75 = vector.broadcast %74 : vector<1x64xf32> to vector<6x64xf32>
    %76 = arith.addf %73, %75 : vector<6x64xf32>
    %77 = arith.negf %76 : vector<6x64xf32>
    %78 = math.exp %77 : vector<6x64xf32>
    %cst_43 = arith.constant 1.000000e+00 : f32
    %79 = vector.broadcast %cst_43 : f32 to vector<6x64xf32>
    %80 = arith.addf %79, %78 : vector<6x64xf32>
    %81 = arith.divf %79, %80 : vector<6x64xf32>
    %82 = vector.extract_strided_slice %60 {offsets = [0, 0], sizes = [6, 64], strides = [1, 1]} : vector<6x128xf32> to vector<6x64xf32>
    %83 = arith.mulf %81, %82 : vector<6x64xf32>
    %84 = vector.extract_strided_slice %83 {offsets = [0, 0], sizes = [3, 64], strides = [1, 1]} : vector<6x64xf32> to vector<3x64xf32>
    %cst_44 = arith.constant dense<0.000000e+00> : vector<64xf32>
    %85 = vector.multi_reduction <add>, %84, %cst_44 [0] : vector<3x64xf32> to vector<64xf32>
    %86 = vector.shape_cast %85 : vector<64xf32> to vector<1x64xf32>
    %87 = vector.extract_strided_slice %83 {offsets = [3, 0], sizes = [3, 64], strides = [1, 1]} : vector<6x64xf32> to vector<3x64xf32>
    %cst_45 = arith.constant dense<0.000000e+00> : vector<64xf32>
    %88 = vector.multi_reduction <add>, %87, %cst_45 [0] : vector<3x64xf32> to vector<64xf32>
    %89 = vector.shape_cast %88 : vector<64xf32> to vector<1x64xf32>
    %90 = tpu.concatenate %86, %89 in 0 : vector<1x64xf32>, vector<1x64xf32> -> vector<2x64xf32>
    %c64 = arith.constant 64 : index
    %c0_46 = arith.constant 0 : index
    %91 = vector.load %arg2[%c64, %c0_46] : memref<256x64xf32, #tpu.memory_space<vmem>>, vector<64x64xf32>
    %cst_47 = arith.constant dense<0.000000e+00> : vector<2x64xf32>
    %92 = tpu.matmul %5, %91, %cst_47 {dimension_numbers = #tpu.dot_dimension_numbers<[1], [0], [0], [1], [0, 0, 1, 1], [], []>} : vector<2x64xf32>, vector<64x64xf32>, vector<2x64xf32> -> vector<2x64xf32>
    %c128 = arith.constant 128 : index
    %c0_48 = arith.constant 0 : index
    %93 = vector.load %arg3[%c128, %c0_48] : memref<512x64xf32, #tpu.memory_space<vmem>>, vector<128x64xf32>
    %cst_49 = arith.constant dense<0.000000e+00> : vector<2x64xf32>
    %94 = tpu.matmul %65, %93, %cst_49 {dimension_numbers = #tpu.dot_dimension_numbers<[1], [0], [0], [1], [0, 0, 1, 1], [], []>} : vector<2x128xf32>, vector<128x64xf32>, vector<2x64xf32> -> vector<2x64xf32>
    %95 = arith.addf %92, %94 : vector<2x64xf32>
    %c1 = arith.constant 1 : index
    %c0_50 = arith.constant 0 : index
    %96 = vector.load %arg4[%c1, %c0_50] : memref<4x64xf32, #tpu.memory_space<vmem>>, vector<1x64xf32>
    %97 = vector.broadcast %96 : vector<1x64xf32> to vector<2x64xf32>
    %98 = arith.addf %95, %97 : vector<2x64xf32>
    %99 = arith.negf %98 : vector<2x64xf32>
    %100 = math.exp %99 : vector<2x64xf32>
    %cst_51 = arith.constant 1.000000e+00 : f32
    %101 = vector.broadcast %cst_51 : f32 to vector<2x64xf32>
    %102 = arith.addf %101, %100 : vector<2x64xf32>
    %103 = arith.divf %101, %102 : vector<2x64xf32>
    %c128_52 = arith.constant 128 : index
    %c0_53 = arith.constant 0 : index
    %104 = vector.load %arg2[%c128_52, %c0_53] : memref<256x64xf32, #tpu.memory_space<vmem>>, vector<64x64xf32>
    %cst_54 = arith.constant dense<0.000000e+00> : vector<2x64xf32>
    %105 = tpu.matmul %5, %104, %cst_54 {dimension_numbers = #tpu.dot_dimension_numbers<[1], [0], [0], [1], [0, 0, 1, 1], [], []>} : vector<2x64xf32>, vector<64x64xf32>, vector<2x64xf32> -> vector<2x64xf32>
    %c256 = arith.constant 256 : index
    %c0_55 = arith.constant 0 : index
    %106 = vector.load %arg3[%c256, %c0_55] : memref<512x64xf32, #tpu.memory_space<vmem>>, vector<128x64xf32>
    %cst_56 = arith.constant dense<0.000000e+00> : vector<2x64xf32>
    %107 = tpu.matmul %65, %106, %cst_56 {dimension_numbers = #tpu.dot_dimension_numbers<[1], [0], [0], [1], [0, 0, 1, 1], [], []>} : vector<2x128xf32>, vector<128x64xf32>, vector<2x64xf32> -> vector<2x64xf32>
    %108 = arith.addf %105, %107 : vector<2x64xf32>
    %c2 = arith.constant 2 : index
    %c0_57 = arith.constant 0 : index
    %109 = vector.load %arg4[%c2, %c0_57] : memref<4x64xf32, #tpu.memory_space<vmem>>, vector<1x64xf32>
    %110 = vector.broadcast %109 : vector<1x64xf32> to vector<2x64xf32>
    %111 = arith.addf %108, %110 : vector<2x64xf32>
    %112 = arith.negf %111 : vector<2x64xf32>
    %113 = math.exp %112 : vector<2x64xf32>
    %cst_58 = arith.constant 1.000000e+00 : f32
    %114 = vector.broadcast %cst_58 : f32 to vector<2x64xf32>
    %115 = arith.addf %114, %113 : vector<2x64xf32>
    %116 = arith.divf %114, %115 : vector<2x64xf32>
    %c192 = arith.constant 192 : index
    %c0_59 = arith.constant 0 : index
    %117 = vector.load %arg2[%c192, %c0_59] : memref<256x64xf32, #tpu.memory_space<vmem>>, vector<64x64xf32>
    %cst_60 = arith.constant dense<0.000000e+00> : vector<2x64xf32>
    %118 = tpu.matmul %5, %117, %cst_60 {dimension_numbers = #tpu.dot_dimension_numbers<[1], [0], [0], [1], [0, 0, 1, 1], [], []>} : vector<2x64xf32>, vector<64x64xf32>, vector<2x64xf32> -> vector<2x64xf32>
    %c384 = arith.constant 384 : index
    %c0_61 = arith.constant 0 : index
    %119 = vector.load %arg3[%c384, %c0_61] : memref<512x64xf32, #tpu.memory_space<vmem>>, vector<128x64xf32>
    %cst_62 = arith.constant dense<0.000000e+00> : vector<2x64xf32>
    %120 = tpu.matmul %65, %119, %cst_62 {dimension_numbers = #tpu.dot_dimension_numbers<[1], [0], [0], [1], [0, 0, 1, 1], [], []>} : vector<2x128xf32>, vector<128x64xf32>, vector<2x64xf32> -> vector<2x64xf32>
    %121 = arith.addf %118, %120 : vector<2x64xf32>
    %c3 = arith.constant 3 : index
    %c0_63 = arith.constant 0 : index
    %122 = vector.load %arg4[%c3, %c0_63] : memref<4x64xf32, #tpu.memory_space<vmem>>, vector<1x64xf32>
    %123 = vector.broadcast %122 : vector<1x64xf32> to vector<2x64xf32>
    %124 = arith.addf %121, %123 : vector<2x64xf32>
    %125 = math.tanh %124 : vector<2x64xf32>
    %126 = arith.mulf %103, %125 : vector<2x64xf32>
    %127 = arith.addf %126, %90 : vector<2x64xf32>
    %128 = math.tanh %127 : vector<2x64xf32>
    %129 = arith.mulf %116, %128 : vector<2x64xf32>
    %130 = tpu.concatenate %127, %129 in 1 : vector<2x64xf32>, vector<2x64xf32> -> vector<2x128xf32>
    %c2_i32_64 = arith.constant 2 : i32
    %131 = arith.muli %c2_i32_64, %c0_i32 : i32
    %132 = arith.index_cast %131 : i32 to index
    %c0_65 = arith.constant 0 : index
    %133 = vector.load %arg11[%132, %c0_65] : memref<18x128xf32, #tpu.memory_space<vmem>>, vector<2x128xf32>
    tpu.vector_store %arg11[%132, %c0_65], %130 {strides = array<i32>} : memref<18x128xf32, #tpu.memory_space<vmem>>, vector<2x128xf32>,
    %c1_i32_66 = arith.constant 1 : i32
    %c2_i32_67 = arith.constant 2 : i32
    %134 = arith.muli %c2_i32_67, %c1_i32_66 : i32
    %135 = arith.index_cast %134 : i32 to index
    %c0_68 = arith.constant 0 : index
    %136 = vector.load %arg1[%135, %c0_68] : memref<16x64xf32, #tpu.memory_space<vmem>>, vector<2x64xf32>
    %c6_i32_69 = arith.constant 6 : i32
    %137 = arith.muli %c1_i32_66, %c6_i32_69 : i32
    %c0_i32_70 = arith.constant 0 : i32
    %138 = arith.addi %137, %c0_i32_70 : i32
    %c0_i32_71 = arith.constant 0 : i32
    %139 = arith.addi %138, %c0_i32_71 : i32
    %140 = arith.index_cast %139 : i32 to index
    %141 = memref.load %arg0[%140] : memref<48xi32, #tpu.memory_space<smem>>
    %c2_i32_72 = arith.constant 2 : i32
    %142 = arith.muli %c2_i32_72, %141 : i32
    %c0_i32_73 = arith.constant 0 : i32
    %143 = arith.addi %142, %c0_i32_73 : i32
    %144 = arith.index_cast %143 : i32 to index
    %c0_74 = arith.constant 0 : index
    %145 = vector.load %arg11[%144, %c0_74] : memref<18x128xf32, #tpu.memory_space<vmem>>, vector<1x128xf32>
    %c6_i32_75 = arith.constant 6 : i32
    %146 = arith.muli %c1_i32_66, %c6_i32_75 : i32
    %c0_i32_76 = arith.constant 0 : i32
    %147 = arith.addi %146, %c0_i32_76 : i32
    %c1_i32_77 = arith.constant 1 : i32
    %148 = arith.addi %147, %c1_i32_77 : i32
    %149 = arith.index_cast %148 : i32 to index
    %150 = memref.load %arg0[%149] : memref<48xi32, #tpu.memory_space<smem>>
    %c2_i32_78 = arith.constant 2 : i32
    %151 = arith.muli %c2_i32_78, %150 : i32
    %c0_i32_79 = arith.constant 0 : i32
    %152 = arith.addi %151, %c0_i32_79 : i32
    %153 = arith.index_cast %152 : i32 to index
    %c0_80 = arith.constant 0 : index
    %154 = vector.load %arg11[%153, %c0_80] : memref<18x128xf32, #tpu.memory_space<vmem>>, vector<1x128xf32>
    %c6_i32_81 = arith.constant 6 : i32
    %155 = arith.muli %c1_i32_66, %c6_i32_81 : i32
    %c0_i32_82 = arith.constant 0 : i32
    %156 = arith.addi %155, %c0_i32_82 : i32
    %c2_i32_83 = arith.constant 2 : i32
    %157 = arith.addi %156, %c2_i32_83 : i32
    %158 = arith.index_cast %157 : i32 to index
    %159 = memref.load %arg0[%158] : memref<48xi32, #tpu.memory_space<smem>>
    %c2_i32_84 = arith.constant 2 : i32
    %160 = arith.muli %c2_i32_84, %159 : i32
    %c0_i32_85 = arith.constant 0 : i32
    %161 = arith.addi %160, %c0_i32_85 : i32
    %162 = arith.index_cast %161 : i32 to index
    %c0_86 = arith.constant 0 : index
    %163 = vector.load %arg11[%162, %c0_86] : memref<18x128xf32, #tpu.memory_space<vmem>>, vector<1x128xf32>
    %c6_i32_87 = arith.constant 6 : i32
    %164 = arith.muli %c1_i32_66, %c6_i32_87 : i32
    %c3_i32_88 = arith.constant 3 : i32
    %165 = arith.addi %164, %c3_i32_88 : i32
    %c0_i32_89 = arith.constant 0 : i32
    %166 = arith.addi %165, %c0_i32_89 : i32
    %167 = arith.index_cast %166 : i32 to index
    %168 = memref.load %arg0[%167] : memref<48xi32, #tpu.memory_space<smem>>
    %c2_i32_90 = arith.constant 2 : i32
    %169 = arith.muli %c2_i32_90, %168 : i32
    %c1_i32_91 = arith.constant 1 : i32
    %170 = arith.addi %169, %c1_i32_91 : i32
    %171 = arith.index_cast %170 : i32 to index
    %c0_92 = arith.constant 0 : index
    %172 = vector.load %arg11[%171, %c0_92] : memref<18x128xf32, #tpu.memory_space<vmem>>, vector<1x128xf32>
    %c6_i32_93 = arith.constant 6 : i32
    %173 = arith.muli %c1_i32_66, %c6_i32_93 : i32
    %c3_i32_94 = arith.constant 3 : i32
    %174 = arith.addi %173, %c3_i32_94 : i32
    %c1_i32_95 = arith.constant 1 : i32
    %175 = arith.addi %174, %c1_i32_95 : i32
    %176 = arith.index_cast %175 : i32 to index
    %177 = memref.load %arg0[%176] : memref<48xi32, #tpu.memory_space<smem>>
    %c2_i32_96 = arith.constant 2 : i32
    %178 = arith.muli %c2_i32_96, %177 : i32
    %c1_i32_97 = arith.constant 1 : i32
    %179 = arith.addi %178, %c1_i32_97 : i32
    %180 = arith.index_cast %179 : i32 to index
    %c0_98 = arith.constant 0 : index
    %181 = vector.load %arg11[%180, %c0_98] : memref<18x128xf32, #tpu.memory_space<vmem>>, vector<1x128xf32>
    %c6_i32_99 = arith.constant 6 : i32
    %182 = arith.muli %c1_i32_66, %c6_i32_99 : i32
    %c3_i32_100 = arith.constant 3 : i32
    %183 = arith.addi %182, %c3_i32_100 : i32
    %c2_i32_101 = arith.constant 2 : i32
    %184 = arith.addi %183, %c2_i32_101 : i32
    %185 = arith.index_cast %184 : i32 to index
    %186 = memref.load %arg0[%185] : memref<48xi32, #tpu.memory_space<smem>>
    %c2_i32_102 = arith.constant 2 : i32
    %187 = arith.muli %c2_i32_102, %186 : i32
    %c1_i32_103 = arith.constant 1 : i32
    %188 = arith.addi %187, %c1_i32_103 : i32
    %189 = arith.index_cast %188 : i32 to index
    %c0_104 = arith.constant 0 : index
    %190 = vector.load %arg11[%189, %c0_104] : memref<18x128xf32, #tpu.memory_space<vmem>>, vector<1x128xf32>
    %191 = tpu.concatenate %145, %154, %163, %172, %181, %190 in 0 : vector<1x128xf32>, vector<1x128xf32>, vector<1x128xf32>, vector<1x128xf32>, vector<1x128xf32>, vector<1x128xf32> -> vector<6x128xf32>
    %192 = arith.addf %145, %154 : vector<1x128xf32>
    %193 = arith.addf %192, %163 : vector<1x128xf32>
    %194 = arith.addf %172, %181 : vector<1x128xf32>
    %195 = arith.addf %194, %190 : vector<1x128xf32>
    %196 = tpu.concatenate %193, %195 in 0 : vector<1x128xf32>, vector<1x128xf32> -> vector<2x128xf32>
    %c0_105 = arith.constant 0 : index
    %c0_106 = arith.constant 0 : index
    %197 = vector.load %arg2[%c0_105, %c0_106] : memref<256x64xf32, #tpu.memory_space<vmem>>, vector<64x64xf32>
    %cst_107 = arith.constant dense<0.000000e+00> : vector<2x64xf32>
    %198 = tpu.matmul %136, %197, %cst_107 {dimension_numbers = #tpu.dot_dimension_numbers<[1], [0], [0], [1], [0, 0, 1, 1], [], []>} : vector<2x64xf32>, vector<64x64xf32>, vector<2x64xf32> -> vector<2x64xf32>
    %199 = vector.extract_strided_slice %198 {offsets = [0, 0], sizes = [1, 64], strides = [1, 1]} : vector<2x64xf32> to vector<1x64xf32>
    %200 = vector.extract_strided_slice %198 {offsets = [1, 0], sizes = [1, 64], strides = [1, 1]} : vector<2x64xf32> to vector<1x64xf32>
    %201 = tpu.concatenate %199, %199, %199, %200, %200, %200 in 0 : vector<1x64xf32>, vector<1x64xf32>, vector<1x64xf32>, vector<1x64xf32>, vector<1x64xf32>, vector<1x64xf32> -> vector<6x64xf32>
    %c0_108 = arith.constant 0 : index
    %c0_109 = arith.constant 0 : index
    %202 = vector.load %arg3[%c0_108, %c0_109] : memref<512x64xf32, #tpu.memory_space<vmem>>, vector<128x64xf32>
    %cst_110 = arith.constant dense<0.000000e+00> : vector<6x64xf32>
    %203 = tpu.matmul %191, %202, %cst_110 {dimension_numbers = #tpu.dot_dimension_numbers<[1], [0], [0], [1], [0, 0, 1, 1], [], []>} : vector<6x128xf32>, vector<128x64xf32>, vector<6x64xf32> -> vector<6x64xf32>
    %204 = arith.addf %203, %201 : vector<6x64xf32>
    %c0_111 = arith.constant 0 : index
    %c0_112 = arith.constant 0 : index
    %205 = vector.load %arg4[%c0_111, %c0_112] : memref<4x64xf32, #tpu.memory_space<vmem>>, vector<1x64xf32>
    %206 = vector.broadcast %205 : vector<1x64xf32> to vector<6x64xf32>
    %207 = arith.addf %204, %206 : vector<6x64xf32>
    %208 = arith.negf %207 : vector<6x64xf32>
    %209 = math.exp %208 : vector<6x64xf32>
    %cst_113 = arith.constant 1.000000e+00 : f32
    %210 = vector.broadcast %cst_113 : f32 to vector<6x64xf32>
    %211 = arith.addf %210, %209 : vector<6x64xf32>
    %212 = arith.divf %210, %211 : vector<6x64xf32>
    %213 = vector.extract_strided_slice %191 {offsets = [0, 0], sizes = [6, 64], strides = [1, 1]} : vector<6x128xf32> to vector<6x64xf32>
    %214 = arith.mulf %212, %213 : vector<6x64xf32>
    %215 = vector.extract_strided_slice %214 {offsets = [0, 0], sizes = [3, 64], strides = [1, 1]} : vector<6x64xf32> to vector<3x64xf32>
    %cst_114 = arith.constant dense<0.000000e+00> : vector<64xf32>
    %216 = vector.multi_reduction <add>, %215, %cst_114 [0] : vector<3x64xf32> to vector<64xf32>
    %217 = vector.shape_cast %216 : vector<64xf32> to vector<1x64xf32>
    %218 = vector.extract_strided_slice %214 {offsets = [3, 0], sizes = [3, 64], strides = [1, 1]} : vector<6x64xf32> to vector<3x64xf32>
    %cst_115 = arith.constant dense<0.000000e+00> : vector<64xf32>
    %219 = vector.multi_reduction <add>, %218, %cst_115 [0] : vector<3x64xf32> to vector<64xf32>
    %220 = vector.shape_cast %219 : vector<64xf32> to vector<1x64xf32>
    %221 = tpu.concatenate %217, %220 in 0 : vector<1x64xf32>, vector<1x64xf32> -> vector<2x64xf32>
    %c64_116 = arith.constant 64 : index
    %c0_117 = arith.constant 0 : index
    %222 = vector.load %arg2[%c64_116, %c0_117] : memref<256x64xf32, #tpu.memory_space<vmem>>, vector<64x64xf32>
    %cst_118 = arith.constant dense<0.000000e+00> : vector<2x64xf32>
    %223 = tpu.matmul %136, %222, %cst_118 {dimension_numbers = #tpu.dot_dimension_numbers<[1], [0], [0], [1], [0, 0, 1, 1], [], []>} : vector<2x64xf32>, vector<64x64xf32>, vector<2x64xf32> -> vector<2x64xf32>
    %c128_119 = arith.constant 128 : index
    %c0_120 = arith.constant 0 : index
    %224 = vector.load %arg3[%c128_119, %c0_120] : memref<512x64xf32, #tpu.memory_space<vmem>>, vector<128x64xf32>
    %cst_121 = arith.constant dense<0.000000e+00> : vector<2x64xf32>
    %225 = tpu.matmul %196, %224, %cst_121 {dimension_numbers = #tpu.dot_dimension_numbers<[1], [0], [0], [1], [0, 0, 1, 1], [], []>} : vector<2x128xf32>, vector<128x64xf32>, vector<2x64xf32> -> vector<2x64xf32>
    %226 = arith.addf %223, %225 : vector<2x64xf32>
    %c1_122 = arith.constant 1 : index
    %c0_123 = arith.constant 0 : index
    %227 = vector.load %arg4[%c1_122, %c0_123] : memref<4x64xf32, #tpu.memory_space<vmem>>, vector<1x64xf32>
    %228 = vector.broadcast %227 : vector<1x64xf32> to vector<2x64xf32>
    %229 = arith.addf %226, %228 : vector<2x64xf32>
    %230 = arith.negf %229 : vector<2x64xf32>
    %231 = math.exp %230 : vector<2x64xf32>
    %cst_124 = arith.constant 1.000000e+00 : f32
    %232 = vector.broadcast %cst_124 : f32 to vector<2x64xf32>
    %233 = arith.addf %232, %231 : vector<2x64xf32>
    %234 = arith.divf %232, %233 : vector<2x64xf32>
    %c128_125 = arith.constant 128 : index
    %c0_126 = arith.constant 0 : index
    %235 = vector.load %arg2[%c128_125, %c0_126] : memref<256x64xf32, #tpu.memory_space<vmem>>, vector<64x64xf32>
    %cst_127 = arith.constant dense<0.000000e+00> : vector<2x64xf32>
    %236 = tpu.matmul %136, %235, %cst_127 {dimension_numbers = #tpu.dot_dimension_numbers<[1], [0], [0], [1], [0, 0, 1, 1], [], []>} : vector<2x64xf32>, vector<64x64xf32>, vector<2x64xf32> -> vector<2x64xf32>
    %c256_128 = arith.constant 256 : index
    %c0_129 = arith.constant 0 : index
    %237 = vector.load %arg3[%c256_128, %c0_129] : memref<512x64xf32, #tpu.memory_space<vmem>>, vector<128x64xf32>
    %cst_130 = arith.constant dense<0.000000e+00> : vector<2x64xf32>
    %238 = tpu.matmul %196, %237, %cst_130 {dimension_numbers = #tpu.dot_dimension_numbers<[1], [0], [0], [1], [0, 0, 1, 1], [], []>} : vector<2x128xf32>, vector<128x64xf32>, vector<2x64xf32> -> vector<2x64xf32>
    %239 = arith.addf %236, %238 : vector<2x64xf32>
    %c2_131 = arith.constant 2 : index
    %c0_132 = arith.constant 0 : index
    %240 = vector.load %arg4[%c2_131, %c0_132] : memref<4x64xf32, #tpu.memory_space<vmem>>, vector<1x64xf32>
    %241 = vector.broadcast %240 : vector<1x64xf32> to vector<2x64xf32>
    %242 = arith.addf %239, %241 : vector<2x64xf32>
    %243 = arith.negf %242 : vector<2x64xf32>
    %244 = math.exp %243 : vector<2x64xf32>
    %cst_133 = arith.constant 1.000000e+00 : f32
    %245 = vector.broadcast %cst_133 : f32 to vector<2x64xf32>
    %246 = arith.addf %245, %244 : vector<2x64xf32>
    %247 = arith.divf %245, %246 : vector<2x64xf32>
    %c192_134 = arith.constant 192 : index
    %c0_135 = arith.constant 0 : index
    %248 = vector.load %arg2[%c192_134, %c0_135] : memref<256x64xf32, #tpu.memory_space<vmem>>, vector<64x64xf32>
    %cst_136 = arith.constant dense<0.000000e+00> : vector<2x64xf32>
    %249 = tpu.matmul %136, %248, %cst_136 {dimension_numbers = #tpu.dot_dimension_numbers<[1], [0], [0], [1], [0, 0, 1, 1], [], []>} : vector<2x64xf32>, vector<64x64xf32>, vector<2x64xf32> -> vector<2x64xf32>
    %c384_137 = arith.constant 384 : index
    %c0_138 = arith.constant 0 : index
    %250 = vector.load %arg3[%c384_137, %c0_138] : memref<512x64xf32, #tpu.memory_space<vmem>>, vector<128x64xf32>
    %cst_139 = arith.constant dense<0.000000e+00> : vector<2x64xf32>
    %251 = tpu.matmul %196, %250, %cst_139 {dimension_numbers = #tpu.dot_dimension_numbers<[1], [0], [0], [1], [0, 0, 1, 1], [], []>} : vector<2x128xf32>, vector<128x64xf32>, vector<2x64xf32> -> vector<2x64xf32>
    %252 = arith.addf %249, %251 : vector<2x64xf32>
    %c3_140 = arith.constant 3 : index
    %c0_141 = arith.constant 0 : index
    %253 = vector.load %arg4[%c3_140, %c0_141] : memref<4x64xf32, #tpu.memory_space<vmem>>, vector<1x64xf32>
    %254 = vector.broadcast %253 : vector<1x64xf32> to vector<2x64xf32>
    %255 = arith.addf %252, %254 : vector<2x64xf32>
    %256 = math.tanh %255 : vector<2x64xf32>
    %257 = arith.mulf %234, %256 : vector<2x64xf32>
    %258 = arith.addf %257, %221 : vector<2x64xf32>
    %259 = math.tanh %258 : vector<2x64xf32>
    %260 = arith.mulf %247, %259 : vector<2x64xf32>
    %261 = tpu.concatenate %258, %260 in 1 : vector<2x64xf32>, vector<2x64xf32> -> vector<2x128xf32>
    %c2_i32_142 = arith.constant 2 : i32
    %262 = arith.muli %c2_i32_142, %c1_i32_66 : i32
    %263 = arith.index_cast %262 : i32 to index
    %c0_143 = arith.constant 0 : index
    %264 = vector.load %arg11[%263, %c0_143] : memref<18x128xf32, #tpu.memory_space<vmem>>, vector<2x128xf32>
    tpu.vector_store %arg11[%263, %c0_143], %261 {strides = array<i32>} : memref<18x128xf32, #tpu.memory_space<vmem>>, vector<2x128xf32>,
    %c2_i32_144 = arith.constant 2 : i32
    %c2_i32_145 = arith.constant 2 : i32
    %265 = arith.muli %c2_i32_145, %c2_i32_144 : i32
    %266 = arith.index_cast %265 : i32 to index
    %c0_146 = arith.constant 0 : index
    %267 = vector.load %arg1[%266, %c0_146] : memref<16x64xf32, #tpu.memory_space<vmem>>, vector<2x64xf32>
    %c6_i32_147 = arith.constant 6 : i32
    %268 = arith.muli %c2_i32_144, %c6_i32_147 : i32
    %c0_i32_148 = arith.constant 0 : i32
    %269 = arith.addi %268, %c0_i32_148 : i32
    %c0_i32_149 = arith.constant 0 : i32
    %270 = arith.addi %269, %c0_i32_149 : i32
    %271 = arith.index_cast %270 : i32 to index
    %272 = memref.load %arg0[%271] : memref<48xi32, #tpu.memory_space<smem>>
    %c2_i32_150 = arith.constant 2 : i32
    %273 = arith.muli %c2_i32_150, %272 : i32
    %c0_i32_151 = arith.constant 0 : i32
    %274 = arith.addi %273, %c0_i32_151 : i32
    %275 = arith.index_cast %274 : i32 to index
    %c0_152 = arith.constant 0 : index
    %276 = vector.load %arg11[%275, %c0_152] : memref<18x128xf32, #tpu.memory_space<vmem>>, vector<1x128xf32>
    %c6_i32_153 = arith.constant 6 : i32
    %277 = arith.muli %c2_i32_144, %c6_i32_153 : i32
    %c0_i32_154 = arith.constant 0 : i32
    %278 = arith.addi %277, %c0_i32_154 : i32
    %c1_i32_155 = arith.constant 1 : i32
    %279 = arith.addi %278, %c1_i32_155 : i32
    %280 = arith.index_cast %279 : i32 to index
    %281 = memref.load %arg0[%280] : memref<48xi32, #tpu.memory_space<smem>>
    %c2_i32_156 = arith.constant 2 : i32
    %282 = arith.muli %c2_i32_156, %281 : i32
    %c0_i32_157 = arith.constant 0 : i32
    %283 = arith.addi %282, %c0_i32_157 : i32
    %284 = arith.index_cast %283 : i32 to index
    %c0_158 = arith.constant 0 : index
    %285 = vector.load %arg11[%284, %c0_158] : memref<18x128xf32, #tpu.memory_space<vmem>>, vector<1x128xf32>
    %c6_i32_159 = arith.constant 6 : i32
    %286 = arith.muli %c2_i32_144, %c6_i32_159 : i32
    %c0_i32_160 = arith.constant 0 : i32
    %287 = arith.addi %286, %c0_i32_160 : i32
    %c2_i32_161 = arith.constant 2 : i32
    %288 = arith.addi %287, %c2_i32_161 : i32
    %289 = arith.index_cast %288 : i32 to index
    %290 = memref.load %arg0[%289] : memref<48xi32, #tpu.memory_space<smem>>
    %c2_i32_162 = arith.constant 2 : i32
    %291 = arith.muli %c2_i32_162, %290 : i32
    %c0_i32_163 = arith.constant 0 : i32
    %292 = arith.addi %291, %c0_i32_163 : i32
    %293 = arith.index_cast %292 : i32 to index
    %c0_164 = arith.constant 0 : index
    %294 = vector.load %arg11[%293, %c0_164] : memref<18x128xf32, #tpu.memory_space<vmem>>, vector<1x128xf32>
    %c6_i32_165 = arith.constant 6 : i32
    %295 = arith.muli %c2_i32_144, %c6_i32_165 : i32
    %c3_i32_166 = arith.constant 3 : i32
    %296 = arith.addi %295, %c3_i32_166 : i32
    %c0_i32_167 = arith.constant 0 : i32
    %297 = arith.addi %296, %c0_i32_167 : i32
    %298 = arith.index_cast %297 : i32 to index
    %299 = memref.load %arg0[%298] : memref<48xi32, #tpu.memory_space<smem>>
    %c2_i32_168 = arith.constant 2 : i32
    %300 = arith.muli %c2_i32_168, %299 : i32
    %c1_i32_169 = arith.constant 1 : i32
    %301 = arith.addi %300, %c1_i32_169 : i32
    %302 = arith.index_cast %301 : i32 to index
    %c0_170 = arith.constant 0 : index
    %303 = vector.load %arg11[%302, %c0_170] : memref<18x128xf32, #tpu.memory_space<vmem>>, vector<1x128xf32>
    %c6_i32_171 = arith.constant 6 : i32
    %304 = arith.muli %c2_i32_144, %c6_i32_171 : i32
    %c3_i32_172 = arith.constant 3 : i32
    %305 = arith.addi %304, %c3_i32_172 : i32
    %c1_i32_173 = arith.constant 1 : i32
    %306 = arith.addi %305, %c1_i32_173 : i32
    %307 = arith.index_cast %306 : i32 to index
    %308 = memref.load %arg0[%307] : memref<48xi32, #tpu.memory_space<smem>>
    %c2_i32_174 = arith.constant 2 : i32
    %309 = arith.muli %c2_i32_174, %308 : i32
    %c1_i32_175 = arith.constant 1 : i32
    %310 = arith.addi %309, %c1_i32_175 : i32
    %311 = arith.index_cast %310 : i32 to index
    %c0_176 = arith.constant 0 : index
    %312 = vector.load %arg11[%311, %c0_176] : memref<18x128xf32, #tpu.memory_space<vmem>>, vector<1x128xf32>
    %c6_i32_177 = arith.constant 6 : i32
    %313 = arith.muli %c2_i32_144, %c6_i32_177 : i32
    %c3_i32_178 = arith.constant 3 : i32
    %314 = arith.addi %313, %c3_i32_178 : i32
    %c2_i32_179 = arith.constant 2 : i32
    %315 = arith.addi %314, %c2_i32_179 : i32
    %316 = arith.index_cast %315 : i32 to index
    %317 = memref.load %arg0[%316] : memref<48xi32, #tpu.memory_space<smem>>
    %c2_i32_180 = arith.constant 2 : i32
    %318 = arith.muli %c2_i32_180, %317 : i32
    %c1_i32_181 = arith.constant 1 : i32
    %319 = arith.addi %318, %c1_i32_181 : i32
    %320 = arith.index_cast %319 : i32 to index
    %c0_182 = arith.constant 0 : index
    %321 = vector.load %arg11[%320, %c0_182] : memref<18x128xf32, #tpu.memory_space<vmem>>, vector<1x128xf32>
    %322 = tpu.concatenate %276, %285, %294, %303, %312, %321 in 0 : vector<1x128xf32>, vector<1x128xf32>, vector<1x128xf32>, vector<1x128xf32>, vector<1x128xf32>, vector<1x128xf32> -> vector<6x128xf32>
    %323 = arith.addf %276, %285 : vector<1x128xf32>
    %324 = arith.addf %323, %294 : vector<1x128xf32>
    %325 = arith.addf %303, %312 : vector<1x128xf32>
    %326 = arith.addf %325, %321 : vector<1x128xf32>
    %327 = tpu.concatenate %324, %326 in 0 : vector<1x128xf32>, vector<1x128xf32> -> vector<2x128xf32>
    %c0_183 = arith.constant 0 : index
    %c0_184 = arith.constant 0 : index
    %328 = vector.load %arg2[%c0_183, %c0_184] : memref<256x64xf32, #tpu.memory_space<vmem>>, vector<64x64xf32>
    %cst_185 = arith.constant dense<0.000000e+00> : vector<2x64xf32>
    %329 = tpu.matmul %267, %328, %cst_185 {dimension_numbers = #tpu.dot_dimension_numbers<[1], [0], [0], [1], [0, 0, 1, 1], [], []>} : vector<2x64xf32>, vector<64x64xf32>, vector<2x64xf32> -> vector<2x64xf32>
    %330 = vector.extract_strided_slice %329 {offsets = [0, 0], sizes = [1, 64], strides = [1, 1]} : vector<2x64xf32> to vector<1x64xf32>
    %331 = vector.extract_strided_slice %329 {offsets = [1, 0], sizes = [1, 64], strides = [1, 1]} : vector<2x64xf32> to vector<1x64xf32>
    %332 = tpu.concatenate %330, %330, %330, %331, %331, %331 in 0 : vector<1x64xf32>, vector<1x64xf32>, vector<1x64xf32>, vector<1x64xf32>, vector<1x64xf32>, vector<1x64xf32> -> vector<6x64xf32>
    %c0_186 = arith.constant 0 : index
    %c0_187 = arith.constant 0 : index
    %333 = vector.load %arg3[%c0_186, %c0_187] : memref<512x64xf32, #tpu.memory_space<vmem>>, vector<128x64xf32>
    %cst_188 = arith.constant dense<0.000000e+00> : vector<6x64xf32>
    %334 = tpu.matmul %322, %333, %cst_188 {dimension_numbers = #tpu.dot_dimension_numbers<[1], [0], [0], [1], [0, 0, 1, 1], [], []>} : vector<6x128xf32>, vector<128x64xf32>, vector<6x64xf32> -> vector<6x64xf32>
    %335 = arith.addf %334, %332 : vector<6x64xf32>
    %c0_189 = arith.constant 0 : index
    %c0_190 = arith.constant 0 : index
    %336 = vector.load %arg4[%c0_189, %c0_190] : memref<4x64xf32, #tpu.memory_space<vmem>>, vector<1x64xf32>
    %337 = vector.broadcast %336 : vector<1x64xf32> to vector<6x64xf32>
    %338 = arith.addf %335, %337 : vector<6x64xf32>
    %339 = arith.negf %338 : vector<6x64xf32>
    %340 = math.exp %339 : vector<6x64xf32>
    %cst_191 = arith.constant 1.000000e+00 : f32
    %341 = vector.broadcast %cst_191 : f32 to vector<6x64xf32>
    %342 = arith.addf %341, %340 : vector<6x64xf32>
    %343 = arith.divf %341, %342 : vector<6x64xf32>
    %344 = vector.extract_strided_slice %322 {offsets = [0, 0], sizes = [6, 64], strides = [1, 1]} : vector<6x128xf32> to vector<6x64xf32>
    %345 = arith.mulf %343, %344 : vector<6x64xf32>
    %346 = vector.extract_strided_slice %345 {offsets = [0, 0], sizes = [3, 64], strides = [1, 1]} : vector<6x64xf32> to vector<3x64xf32>
    %cst_192 = arith.constant dense<0.000000e+00> : vector<64xf32>
    %347 = vector.multi_reduction <add>, %346, %cst_192 [0] : vector<3x64xf32> to vector<64xf32>
    %348 = vector.shape_cast %347 : vector<64xf32> to vector<1x64xf32>
    %349 = vector.extract_strided_slice %345 {offsets = [3, 0], sizes = [3, 64], strides = [1, 1]} : vector<6x64xf32> to vector<3x64xf32>
    %cst_193 = arith.constant dense<0.000000e+00> : vector<64xf32>
    %350 = vector.multi_reduction <add>, %349, %cst_193 [0] : vector<3x64xf32> to vector<64xf32>
    %351 = vector.shape_cast %350 : vector<64xf32> to vector<1x64xf32>
    %352 = tpu.concatenate %348, %351 in 0 : vector<1x64xf32>, vector<1x64xf32> -> vector<2x64xf32>
    %c64_194 = arith.constant 64 : index
    %c0_195 = arith.constant 0 : index
    %353 = vector.load %arg2[%c64_194, %c0_195] : memref<256x64xf32, #tpu.memory_space<vmem>>, vector<64x64xf32>
    %cst_196 = arith.constant dense<0.000000e+00> : vector<2x64xf32>
    %354 = tpu.matmul %267, %353, %cst_196 {dimension_numbers = #tpu.dot_dimension_numbers<[1], [0], [0], [1], [0, 0, 1, 1], [], []>} : vector<2x64xf32>, vector<64x64xf32>, vector<2x64xf32> -> vector<2x64xf32>
    %c128_197 = arith.constant 128 : index
    %c0_198 = arith.constant 0 : index
    %355 = vector.load %arg3[%c128_197, %c0_198] : memref<512x64xf32, #tpu.memory_space<vmem>>, vector<128x64xf32>
    %cst_199 = arith.constant dense<0.000000e+00> : vector<2x64xf32>
    %356 = tpu.matmul %327, %355, %cst_199 {dimension_numbers = #tpu.dot_dimension_numbers<[1], [0], [0], [1], [0, 0, 1, 1], [], []>} : vector<2x128xf32>, vector<128x64xf32>, vector<2x64xf32> -> vector<2x64xf32>
    %357 = arith.addf %354, %356 : vector<2x64xf32>
    %c1_200 = arith.constant 1 : index
    %c0_201 = arith.constant 0 : index
    %358 = vector.load %arg4[%c1_200, %c0_201] : memref<4x64xf32, #tpu.memory_space<vmem>>, vector<1x64xf32>
    %359 = vector.broadcast %358 : vector<1x64xf32> to vector<2x64xf32>
    %360 = arith.addf %357, %359 : vector<2x64xf32>
    %361 = arith.negf %360 : vector<2x64xf32>
    %362 = math.exp %361 : vector<2x64xf32>
    %cst_202 = arith.constant 1.000000e+00 : f32
    %363 = vector.broadcast %cst_202 : f32 to vector<2x64xf32>
    %364 = arith.addf %363, %362 : vector<2x64xf32>
    %365 = arith.divf %363, %364 : vector<2x64xf32>
    %c128_203 = arith.constant 128 : index
    %c0_204 = arith.constant 0 : index
    %366 = vector.load %arg2[%c128_203, %c0_204] : memref<256x64xf32, #tpu.memory_space<vmem>>, vector<64x64xf32>
    %cst_205 = arith.constant dense<0.000000e+00> : vector<2x64xf32>
    %367 = tpu.matmul %267, %366, %cst_205 {dimension_numbers = #tpu.dot_dimension_numbers<[1], [0], [0], [1], [0, 0, 1, 1], [], []>} : vector<2x64xf32>, vector<64x64xf32>, vector<2x64xf32> -> vector<2x64xf32>
    %c256_206 = arith.constant 256 : index
    %c0_207 = arith.constant 0 : index
    %368 = vector.load %arg3[%c256_206, %c0_207] : memref<512x64xf32, #tpu.memory_space<vmem>>, vector<128x64xf32>
    %cst_208 = arith.constant dense<0.000000e+00> : vector<2x64xf32>
    %369 = tpu.matmul %327, %368, %cst_208 {dimension_numbers = #tpu.dot_dimension_numbers<[1], [0], [0], [1], [0, 0, 1, 1], [], []>} : vector<2x128xf32>, vector<128x64xf32>, vector<2x64xf32> -> vector<2x64xf32>
    %370 = arith.addf %367, %369 : vector<2x64xf32>
    %c2_209 = arith.constant 2 : index
    %c0_210 = arith.constant 0 : index
    %371 = vector.load %arg4[%c2_209, %c0_210] : memref<4x64xf32, #tpu.memory_space<vmem>>, vector<1x64xf32>
    %372 = vector.broadcast %371 : vector<1x64xf32> to vector<2x64xf32>
    %373 = arith.addf %370, %372 : vector<2x64xf32>
    %374 = arith.negf %373 : vector<2x64xf32>
    %375 = math.exp %374 : vector<2x64xf32>
    %cst_211 = arith.constant 1.000000e+00 : f32
    %376 = vector.broadcast %cst_211 : f32 to vector<2x64xf32>
    %377 = arith.addf %376, %375 : vector<2x64xf32>
    %378 = arith.divf %376, %377 : vector<2x64xf32>
    %c192_212 = arith.constant 192 : index
    %c0_213 = arith.constant 0 : index
    %379 = vector.load %arg2[%c192_212, %c0_213] : memref<256x64xf32, #tpu.memory_space<vmem>>, vector<64x64xf32>
    %cst_214 = arith.constant dense<0.000000e+00> : vector<2x64xf32>
    %380 = tpu.matmul %267, %379, %cst_214 {dimension_numbers = #tpu.dot_dimension_numbers<[1], [0], [0], [1], [0, 0, 1, 1], [], []>} : vector<2x64xf32>, vector<64x64xf32>, vector<2x64xf32> -> vector<2x64xf32>
    %c384_215 = arith.constant 384 : index
    %c0_216 = arith.constant 0 : index
    %381 = vector.load %arg3[%c384_215, %c0_216] : memref<512x64xf32, #tpu.memory_space<vmem>>, vector<128x64xf32>
    %cst_217 = arith.constant dense<0.000000e+00> : vector<2x64xf32>
    %382 = tpu.matmul %327, %381, %cst_217 {dimension_numbers = #tpu.dot_dimension_numbers<[1], [0], [0], [1], [0, 0, 1, 1], [], []>} : vector<2x128xf32>, vector<128x64xf32>, vector<2x64xf32> -> vector<2x64xf32>
    %383 = arith.addf %380, %382 : vector<2x64xf32>
    %c3_218 = arith.constant 3 : index
    %c0_219 = arith.constant 0 : index
    %384 = vector.load %arg4[%c3_218, %c0_219] : memref<4x64xf32, #tpu.memory_space<vmem>>, vector<1x64xf32>
    %385 = vector.broadcast %384 : vector<1x64xf32> to vector<2x64xf32>
    %386 = arith.addf %383, %385 : vector<2x64xf32>
    %387 = math.tanh %386 : vector<2x64xf32>
    %388 = arith.mulf %365, %387 : vector<2x64xf32>
    %389 = arith.addf %388, %352 : vector<2x64xf32>
    %390 = math.tanh %389 : vector<2x64xf32>
    %391 = arith.mulf %378, %390 : vector<2x64xf32>
    %392 = tpu.concatenate %389, %391 in 1 : vector<2x64xf32>, vector<2x64xf32> -> vector<2x128xf32>
    %c2_i32_220 = arith.constant 2 : i32
    %393 = arith.muli %c2_i32_220, %c2_i32_144 : i32
    %394 = arith.index_cast %393 : i32 to index
    %c0_221 = arith.constant 0 : index
    %395 = vector.load %arg11[%394, %c0_221] : memref<18x128xf32, #tpu.memory_space<vmem>>, vector<2x128xf32>
    tpu.vector_store %arg11[%394, %c0_221], %392 {strides = array<i32>} : memref<18x128xf32, #tpu.memory_space<vmem>>, vector<2x128xf32>,
    %c3_i32_222 = arith.constant 3 : i32
    %c2_i32_223 = arith.constant 2 : i32
    %396 = arith.muli %c2_i32_223, %c3_i32_222 : i32
    %397 = arith.index_cast %396 : i32 to index
    %c0_224 = arith.constant 0 : index
    %398 = vector.load %arg1[%397, %c0_224] : memref<16x64xf32, #tpu.memory_space<vmem>>, vector<2x64xf32>
    %c6_i32_225 = arith.constant 6 : i32
    %399 = arith.muli %c3_i32_222, %c6_i32_225 : i32
    %c0_i32_226 = arith.constant 0 : i32
    %400 = arith.addi %399, %c0_i32_226 : i32
    %c0_i32_227 = arith.constant 0 : i32
    %401 = arith.addi %400, %c0_i32_227 : i32
    %402 = arith.index_cast %401 : i32 to index
    %403 = memref.load %arg0[%402] : memref<48xi32, #tpu.memory_space<smem>>
    %c2_i32_228 = arith.constant 2 : i32
    %404 = arith.muli %c2_i32_228, %403 : i32
    %c0_i32_229 = arith.constant 0 : i32
    %405 = arith.addi %404, %c0_i32_229 : i32
    %406 = arith.index_cast %405 : i32 to index
    %c0_230 = arith.constant 0 : index
    %407 = vector.load %arg11[%406, %c0_230] : memref<18x128xf32, #tpu.memory_space<vmem>>, vector<1x128xf32>
    %c6_i32_231 = arith.constant 6 : i32
    %408 = arith.muli %c3_i32_222, %c6_i32_231 : i32
    %c0_i32_232 = arith.constant 0 : i32
    %409 = arith.addi %408, %c0_i32_232 : i32
    %c1_i32_233 = arith.constant 1 : i32
    %410 = arith.addi %409, %c1_i32_233 : i32
    %411 = arith.index_cast %410 : i32 to index
    %412 = memref.load %arg0[%411] : memref<48xi32, #tpu.memory_space<smem>>
    %c2_i32_234 = arith.constant 2 : i32
    %413 = arith.muli %c2_i32_234, %412 : i32
    %c0_i32_235 = arith.constant 0 : i32
    %414 = arith.addi %413, %c0_i32_235 : i32
    %415 = arith.index_cast %414 : i32 to index
    %c0_236 = arith.constant 0 : index
    %416 = vector.load %arg11[%415, %c0_236] : memref<18x128xf32, #tpu.memory_space<vmem>>, vector<1x128xf32>
    %c6_i32_237 = arith.constant 6 : i32
    %417 = arith.muli %c3_i32_222, %c6_i32_237 : i32
    %c0_i32_238 = arith.constant 0 : i32
    %418 = arith.addi %417, %c0_i32_238 : i32
    %c2_i32_239 = arith.constant 2 : i32
    %419 = arith.addi %418, %c2_i32_239 : i32
    %420 = arith.index_cast %419 : i32 to index
    %421 = memref.load %arg0[%420] : memref<48xi32, #tpu.memory_space<smem>>
    %c2_i32_240 = arith.constant 2 : i32
    %422 = arith.muli %c2_i32_240, %421 : i32
    %c0_i32_241 = arith.constant 0 : i32
    %423 = arith.addi %422, %c0_i32_241 : i32
    %424 = arith.index_cast %423 : i32 to index
    %c0_242 = arith.constant 0 : index
    %425 = vector.load %arg11[%424, %c0_242] : memref<18x128xf32, #tpu.memory_space<vmem>>, vector<1x128xf32>
    %c6_i32_243 = arith.constant 6 : i32
    %426 = arith.muli %c3_i32_222, %c6_i32_243 : i32
    %c3_i32_244 = arith.constant 3 : i32
    %427 = arith.addi %426, %c3_i32_244 : i32
    %c0_i32_245 = arith.constant 0 : i32
    %428 = arith.addi %427, %c0_i32_245 : i32
    %429 = arith.index_cast %428 : i32 to index
    %430 = memref.load %arg0[%429] : memref<48xi32, #tpu.memory_space<smem>>
    %c2_i32_246 = arith.constant 2 : i32
    %431 = arith.muli %c2_i32_246, %430 : i32
    %c1_i32_247 = arith.constant 1 : i32
    %432 = arith.addi %431, %c1_i32_247 : i32
    %433 = arith.index_cast %432 : i32 to index
    %c0_248 = arith.constant 0 : index
    %434 = vector.load %arg11[%433, %c0_248] : memref<18x128xf32, #tpu.memory_space<vmem>>, vector<1x128xf32>
    %c6_i32_249 = arith.constant 6 : i32
    %435 = arith.muli %c3_i32_222, %c6_i32_249 : i32
    %c3_i32_250 = arith.constant 3 : i32
    %436 = arith.addi %435, %c3_i32_250 : i32
    %c1_i32_251 = arith.constant 1 : i32
    %437 = arith.addi %436, %c1_i32_251 : i32
    %438 = arith.index_cast %437 : i32 to index
    %439 = memref.load %arg0[%438] : memref<48xi32, #tpu.memory_space<smem>>
    %c2_i32_252 = arith.constant 2 : i32
    %440 = arith.muli %c2_i32_252, %439 : i32
    %c1_i32_253 = arith.constant 1 : i32
    %441 = arith.addi %440, %c1_i32_253 : i32
    %442 = arith.index_cast %441 : i32 to index
    %c0_254 = arith.constant 0 : index
    %443 = vector.load %arg11[%442, %c0_254] : memref<18x128xf32, #tpu.memory_space<vmem>>, vector<1x128xf32>
    %c6_i32_255 = arith.constant 6 : i32
    %444 = arith.muli %c3_i32_222, %c6_i32_255 : i32
    %c3_i32_256 = arith.constant 3 : i32
    %445 = arith.addi %444, %c3_i32_256 : i32
    %c2_i32_257 = arith.constant 2 : i32
    %446 = arith.addi %445, %c2_i32_257 : i32
    %447 = arith.index_cast %446 : i32 to index
    %448 = memref.load %arg0[%447] : memref<48xi32, #tpu.memory_space<smem>>
    %c2_i32_258 = arith.constant 2 : i32
    %449 = arith.muli %c2_i32_258, %448 : i32
    %c1_i32_259 = arith.constant 1 : i32
    %450 = arith.addi %449, %c1_i32_259 : i32
    %451 = arith.index_cast %450 : i32 to index
    %c0_260 = arith.constant 0 : index
    %452 = vector.load %arg11[%451, %c0_260] : memref<18x128xf32, #tpu.memory_space<vmem>>, vector<1x128xf32>
    %453 = tpu.concatenate %407, %416, %425, %434, %443, %452 in 0 : vector<1x128xf32>, vector<1x128xf32>, vector<1x128xf32>, vector<1x128xf32>, vector<1x128xf32>, vector<1x128xf32> -> vector<6x128xf32>
    %454 = arith.addf %407, %416 : vector<1x128xf32>
    %455 = arith.addf %454, %425 : vector<1x128xf32>
    %456 = arith.addf %434, %443 : vector<1x128xf32>
    %457 = arith.addf %456, %452 : vector<1x128xf32>
    %458 = tpu.concatenate %455, %457 in 0 : vector<1x128xf32>, vector<1x128xf32> -> vector<2x128xf32>
    %c0_261 = arith.constant 0 : index
    %c0_262 = arith.constant 0 : index
    %459 = vector.load %arg2[%c0_261, %c0_262] : memref<256x64xf32, #tpu.memory_space<vmem>>, vector<64x64xf32>
    %cst_263 = arith.constant dense<0.000000e+00> : vector<2x64xf32>
    %460 = tpu.matmul %398, %459, %cst_263 {dimension_numbers = #tpu.dot_dimension_numbers<[1], [0], [0], [1], [0, 0, 1, 1], [], []>} : vector<2x64xf32>, vector<64x64xf32>, vector<2x64xf32> -> vector<2x64xf32>
    %461 = vector.extract_strided_slice %460 {offsets = [0, 0], sizes = [1, 64], strides = [1, 1]} : vector<2x64xf32> to vector<1x64xf32>
    %462 = vector.extract_strided_slice %460 {offsets = [1, 0], sizes = [1, 64], strides = [1, 1]} : vector<2x64xf32> to vector<1x64xf32>
    %463 = tpu.concatenate %461, %461, %461, %462, %462, %462 in 0 : vector<1x64xf32>, vector<1x64xf32>, vector<1x64xf32>, vector<1x64xf32>, vector<1x64xf32>, vector<1x64xf32> -> vector<6x64xf32>
    %c0_264 = arith.constant 0 : index
    %c0_265 = arith.constant 0 : index
    %464 = vector.load %arg3[%c0_264, %c0_265] : memref<512x64xf32, #tpu.memory_space<vmem>>, vector<128x64xf32>
    %cst_266 = arith.constant dense<0.000000e+00> : vector<6x64xf32>
    %465 = tpu.matmul %453, %464, %cst_266 {dimension_numbers = #tpu.dot_dimension_numbers<[1], [0], [0], [1], [0, 0, 1, 1], [], []>} : vector<6x128xf32>, vector<128x64xf32>, vector<6x64xf32> -> vector<6x64xf32>
    %466 = arith.addf %465, %463 : vector<6x64xf32>
    %c0_267 = arith.constant 0 : index
    %c0_268 = arith.constant 0 : index
    %467 = vector.load %arg4[%c0_267, %c0_268] : memref<4x64xf32, #tpu.memory_space<vmem>>, vector<1x64xf32>
    %468 = vector.broadcast %467 : vector<1x64xf32> to vector<6x64xf32>
    %469 = arith.addf %466, %468 : vector<6x64xf32>
    %470 = arith.negf %469 : vector<6x64xf32>
    %471 = math.exp %470 : vector<6x64xf32>
    %cst_269 = arith.constant 1.000000e+00 : f32
    %472 = vector.broadcast %cst_269 : f32 to vector<6x64xf32>
    %473 = arith.addf %472, %471 : vector<6x64xf32>
    %474 = arith.divf %472, %473 : vector<6x64xf32>
    %475 = vector.extract_strided_slice %453 {offsets = [0, 0], sizes = [6, 64], strides = [1, 1]} : vector<6x128xf32> to vector<6x64xf32>
    %476 = arith.mulf %474, %475 : vector<6x64xf32>
    %477 = vector.extract_strided_slice %476 {offsets = [0, 0], sizes = [3, 64], strides = [1, 1]} : vector<6x64xf32> to vector<3x64xf32>
    %cst_270 = arith.constant dense<0.000000e+00> : vector<64xf32>
    %478 = vector.multi_reduction <add>, %477, %cst_270 [0] : vector<3x64xf32> to vector<64xf32>
    %479 = vector.shape_cast %478 : vector<64xf32> to vector<1x64xf32>
    %480 = vector.extract_strided_slice %476 {offsets = [3, 0], sizes = [3, 64], strides = [1, 1]} : vector<6x64xf32> to vector<3x64xf32>
    %cst_271 = arith.constant dense<0.000000e+00> : vector<64xf32>
    %481 = vector.multi_reduction <add>, %480, %cst_271 [0] : vector<3x64xf32> to vector<64xf32>
    %482 = vector.shape_cast %481 : vector<64xf32> to vector<1x64xf32>
    %483 = tpu.concatenate %479, %482 in 0 : vector<1x64xf32>, vector<1x64xf32> -> vector<2x64xf32>
    %c64_272 = arith.constant 64 : index
    %c0_273 = arith.constant 0 : index
    %484 = vector.load %arg2[%c64_272, %c0_273] : memref<256x64xf32, #tpu.memory_space<vmem>>, vector<64x64xf32>
    %cst_274 = arith.constant dense<0.000000e+00> : vector<2x64xf32>
    %485 = tpu.matmul %398, %484, %cst_274 {dimension_numbers = #tpu.dot_dimension_numbers<[1], [0], [0], [1], [0, 0, 1, 1], [], []>} : vector<2x64xf32>, vector<64x64xf32>, vector<2x64xf32> -> vector<2x64xf32>
    %c128_275 = arith.constant 128 : index
    %c0_276 = arith.constant 0 : index
    %486 = vector.load %arg3[%c128_275, %c0_276] : memref<512x64xf32, #tpu.memory_space<vmem>>, vector<128x64xf32>
    %cst_277 = arith.constant dense<0.000000e+00> : vector<2x64xf32>
    %487 = tpu.matmul %458, %486, %cst_277 {dimension_numbers = #tpu.dot_dimension_numbers<[1], [0], [0], [1], [0, 0, 1, 1], [], []>} : vector<2x128xf32>, vector<128x64xf32>, vector<2x64xf32> -> vector<2x64xf32>
    %488 = arith.addf %485, %487 : vector<2x64xf32>
    %c1_278 = arith.constant 1 : index
    %c0_279 = arith.constant 0 : index
    %489 = vector.load %arg4[%c1_278, %c0_279] : memref<4x64xf32, #tpu.memory_space<vmem>>, vector<1x64xf32>
    %490 = vector.broadcast %489 : vector<1x64xf32> to vector<2x64xf32>
    %491 = arith.addf %488, %490 : vector<2x64xf32>
    %492 = arith.negf %491 : vector<2x64xf32>
    %493 = math.exp %492 : vector<2x64xf32>
    %cst_280 = arith.constant 1.000000e+00 : f32
    %494 = vector.broadcast %cst_280 : f32 to vector<2x64xf32>
    %495 = arith.addf %494, %493 : vector<2x64xf32>
    %496 = arith.divf %494, %495 : vector<2x64xf32>
    %c128_281 = arith.constant 128 : index
    %c0_282 = arith.constant 0 : index
    %497 = vector.load %arg2[%c128_281, %c0_282] : memref<256x64xf32, #tpu.memory_space<vmem>>, vector<64x64xf32>
    %cst_283 = arith.constant dense<0.000000e+00> : vector<2x64xf32>
    %498 = tpu.matmul %398, %497, %cst_283 {dimension_numbers = #tpu.dot_dimension_numbers<[1], [0], [0], [1], [0, 0, 1, 1], [], []>} : vector<2x64xf32>, vector<64x64xf32>, vector<2x64xf32> -> vector<2x64xf32>
    %c256_284 = arith.constant 256 : index
    %c0_285 = arith.constant 0 : index
    %499 = vector.load %arg3[%c256_284, %c0_285] : memref<512x64xf32, #tpu.memory_space<vmem>>, vector<128x64xf32>
    %cst_286 = arith.constant dense<0.000000e+00> : vector<2x64xf32>
    %500 = tpu.matmul %458, %499, %cst_286 {dimension_numbers = #tpu.dot_dimension_numbers<[1], [0], [0], [1], [0, 0, 1, 1], [], []>} : vector<2x128xf32>, vector<128x64xf32>, vector<2x64xf32> -> vector<2x64xf32>
    %501 = arith.addf %498, %500 : vector<2x64xf32>
    %c2_287 = arith.constant 2 : index
    %c0_288 = arith.constant 0 : index
    %502 = vector.load %arg4[%c2_287, %c0_288] : memref<4x64xf32, #tpu.memory_space<vmem>>, vector<1x64xf32>
    %503 = vector.broadcast %502 : vector<1x64xf32> to vector<2x64xf32>
    %504 = arith.addf %501, %503 : vector<2x64xf32>
    %505 = arith.negf %504 : vector<2x64xf32>
    %506 = math.exp %505 : vector<2x64xf32>
    %cst_289 = arith.constant 1.000000e+00 : f32
    %507 = vector.broadcast %cst_289 : f32 to vector<2x64xf32>
    %508 = arith.addf %507, %506 : vector<2x64xf32>
    %509 = arith.divf %507, %508 : vector<2x64xf32>
    %c192_290 = arith.constant 192 : index
    %c0_291 = arith.constant 0 : index
    %510 = vector.load %arg2[%c192_290, %c0_291] : memref<256x64xf32, #tpu.memory_space<vmem>>, vector<64x64xf32>
    %cst_292 = arith.constant dense<0.000000e+00> : vector<2x64xf32>
    %511 = tpu.matmul %398, %510, %cst_292 {dimension_numbers = #tpu.dot_dimension_numbers<[1], [0], [0], [1], [0, 0, 1, 1], [], []>} : vector<2x64xf32>, vector<64x64xf32>, vector<2x64xf32> -> vector<2x64xf32>
    %c384_293 = arith.constant 384 : index
    %c0_294 = arith.constant 0 : index
    %512 = vector.load %arg3[%c384_293, %c0_294] : memref<512x64xf32, #tpu.memory_space<vmem>>, vector<128x64xf32>
    %cst_295 = arith.constant dense<0.000000e+00> : vector<2x64xf32>
    %513 = tpu.matmul %458, %512, %cst_295 {dimension_numbers = #tpu.dot_dimension_numbers<[1], [0], [0], [1], [0, 0, 1, 1], [], []>} : vector<2x128xf32>, vector<128x64xf32>, vector<2x64xf32> -> vector<2x64xf32>
    %514 = arith.addf %511, %513 : vector<2x64xf32>
    %c3_296 = arith.constant 3 : index
    %c0_297 = arith.constant 0 : index
    %515 = vector.load %arg4[%c3_296, %c0_297] : memref<4x64xf32, #tpu.memory_space<vmem>>, vector<1x64xf32>
    %516 = vector.broadcast %515 : vector<1x64xf32> to vector<2x64xf32>
    %517 = arith.addf %514, %516 : vector<2x64xf32>
    %518 = math.tanh %517 : vector<2x64xf32>
    %519 = arith.mulf %496, %518 : vector<2x64xf32>
    %520 = arith.addf %519, %483 : vector<2x64xf32>
    %521 = math.tanh %520 : vector<2x64xf32>
    %522 = arith.mulf %509, %521 : vector<2x64xf32>
    %523 = tpu.concatenate %520, %522 in 1 : vector<2x64xf32>, vector<2x64xf32> -> vector<2x128xf32>
    %c2_i32_298 = arith.constant 2 : i32
    %524 = arith.muli %c2_i32_298, %c3_i32_222 : i32
    %525 = arith.index_cast %524 : i32 to index
    %c0_299 = arith.constant 0 : index
    %526 = vector.load %arg11[%525, %c0_299] : memref<18x128xf32, #tpu.memory_space<vmem>>, vector<2x128xf32>
    tpu.vector_store %arg11[%525, %c0_299], %523 {strides = array<i32>} : memref<18x128xf32, #tpu.memory_space<vmem>>, vector<2x128xf32>,
    %c4_i32 = arith.constant 4 : i32
    %c2_i32_300 = arith.constant 2 : i32
    %527 = arith.muli %c2_i32_300, %c4_i32 : i32
    %528 = arith.index_cast %527 : i32 to index
    %c0_301 = arith.constant 0 : index
    %529 = vector.load %arg1[%528, %c0_301] : memref<16x64xf32, #tpu.memory_space<vmem>>, vector<2x64xf32>
    %c6_i32_302 = arith.constant 6 : i32
    %530 = arith.muli %c4_i32, %c6_i32_302 : i32
    %c0_i32_303 = arith.constant 0 : i32
    %531 = arith.addi %530, %c0_i32_303 : i32
    %c0_i32_304 = arith.constant 0 : i32
    %532 = arith.addi %531, %c0_i32_304 : i32
    %533 = arith.index_cast %532 : i32 to index
    %534 = memref.load %arg0[%533] : memref<48xi32, #tpu.memory_space<smem>>
    %c2_i32_305 = arith.constant 2 : i32
    %535 = arith.muli %c2_i32_305, %534 : i32
    %c0_i32_306 = arith.constant 0 : i32
    %536 = arith.addi %535, %c0_i32_306 : i32
    %537 = arith.index_cast %536 : i32 to index
    %c0_307 = arith.constant 0 : index
    %538 = vector.load %arg11[%537, %c0_307] : memref<18x128xf32, #tpu.memory_space<vmem>>, vector<1x128xf32>
    %c6_i32_308 = arith.constant 6 : i32
    %539 = arith.muli %c4_i32, %c6_i32_308 : i32
    %c0_i32_309 = arith.constant 0 : i32
    %540 = arith.addi %539, %c0_i32_309 : i32
    %c1_i32_310 = arith.constant 1 : i32
    %541 = arith.addi %540, %c1_i32_310 : i32
    %542 = arith.index_cast %541 : i32 to index
    %543 = memref.load %arg0[%542] : memref<48xi32, #tpu.memory_space<smem>>
    %c2_i32_311 = arith.constant 2 : i32
    %544 = arith.muli %c2_i32_311, %543 : i32
    %c0_i32_312 = arith.constant 0 : i32
    %545 = arith.addi %544, %c0_i32_312 : i32
    %546 = arith.index_cast %545 : i32 to index
    %c0_313 = arith.constant 0 : index
    %547 = vector.load %arg11[%546, %c0_313] : memref<18x128xf32, #tpu.memory_space<vmem>>, vector<1x128xf32>
    %c6_i32_314 = arith.constant 6 : i32
    %548 = arith.muli %c4_i32, %c6_i32_314 : i32
    %c0_i32_315 = arith.constant 0 : i32
    %549 = arith.addi %548, %c0_i32_315 : i32
    %c2_i32_316 = arith.constant 2 : i32
    %550 = arith.addi %549, %c2_i32_316 : i32
    %551 = arith.index_cast %550 : i32 to index
    %552 = memref.load %arg0[%551] : memref<48xi32, #tpu.memory_space<smem>>
    %c2_i32_317 = arith.constant 2 : i32
    %553 = arith.muli %c2_i32_317, %552 : i32
    %c0_i32_318 = arith.constant 0 : i32
    %554 = arith.addi %553, %c0_i32_318 : i32
    %555 = arith.index_cast %554 : i32 to index
    %c0_319 = arith.constant 0 : index
    %556 = vector.load %arg11[%555, %c0_319] : memref<18x128xf32, #tpu.memory_space<vmem>>, vector<1x128xf32>
    %c6_i32_320 = arith.constant 6 : i32
    %557 = arith.muli %c4_i32, %c6_i32_320 : i32
    %c3_i32_321 = arith.constant 3 : i32
    %558 = arith.addi %557, %c3_i32_321 : i32
    %c0_i32_322 = arith.constant 0 : i32
    %559 = arith.addi %558, %c0_i32_322 : i32
    %560 = arith.index_cast %559 : i32 to index
    %561 = memref.load %arg0[%560] : memref<48xi32, #tpu.memory_space<smem>>
    %c2_i32_323 = arith.constant 2 : i32
    %562 = arith.muli %c2_i32_323, %561 : i32
    %c1_i32_324 = arith.constant 1 : i32
    %563 = arith.addi %562, %c1_i32_324 : i32
    %564 = arith.index_cast %563 : i32 to index
    %c0_325 = arith.constant 0 : index
    %565 = vector.load %arg11[%564, %c0_325] : memref<18x128xf32, #tpu.memory_space<vmem>>, vector<1x128xf32>
    %c6_i32_326 = arith.constant 6 : i32
    %566 = arith.muli %c4_i32, %c6_i32_326 : i32
    %c3_i32_327 = arith.constant 3 : i32
    %567 = arith.addi %566, %c3_i32_327 : i32
    %c1_i32_328 = arith.constant 1 : i32
    %568 = arith.addi %567, %c1_i32_328 : i32
    %569 = arith.index_cast %568 : i32 to index
    %570 = memref.load %arg0[%569] : memref<48xi32, #tpu.memory_space<smem>>
    %c2_i32_329 = arith.constant 2 : i32
    %571 = arith.muli %c2_i32_329, %570 : i32
    %c1_i32_330 = arith.constant 1 : i32
    %572 = arith.addi %571, %c1_i32_330 : i32
    %573 = arith.index_cast %572 : i32 to index
    %c0_331 = arith.constant 0 : index
    %574 = vector.load %arg11[%573, %c0_331] : memref<18x128xf32, #tpu.memory_space<vmem>>, vector<1x128xf32>
    %c6_i32_332 = arith.constant 6 : i32
    %575 = arith.muli %c4_i32, %c6_i32_332 : i32
    %c3_i32_333 = arith.constant 3 : i32
    %576 = arith.addi %575, %c3_i32_333 : i32
    %c2_i32_334 = arith.constant 2 : i32
    %577 = arith.addi %576, %c2_i32_334 : i32
    %578 = arith.index_cast %577 : i32 to index
    %579 = memref.load %arg0[%578] : memref<48xi32, #tpu.memory_space<smem>>
    %c2_i32_335 = arith.constant 2 : i32
    %580 = arith.muli %c2_i32_335, %579 : i32
    %c1_i32_336 = arith.constant 1 : i32
    %581 = arith.addi %580, %c1_i32_336 : i32
    %582 = arith.index_cast %581 : i32 to index
    %c0_337 = arith.constant 0 : index
    %583 = vector.load %arg11[%582, %c0_337] : memref<18x128xf32, #tpu.memory_space<vmem>>, vector<1x128xf32>
    %584 = tpu.concatenate %538, %547, %556, %565, %574, %583 in 0 : vector<1x128xf32>, vector<1x128xf32>, vector<1x128xf32>, vector<1x128xf32>, vector<1x128xf32>, vector<1x128xf32> -> vector<6x128xf32>
    %585 = arith.addf %538, %547 : vector<1x128xf32>
    %586 = arith.addf %585, %556 : vector<1x128xf32>
    %587 = arith.addf %565, %574 : vector<1x128xf32>
    %588 = arith.addf %587, %583 : vector<1x128xf32>
    %589 = tpu.concatenate %586, %588 in 0 : vector<1x128xf32>, vector<1x128xf32> -> vector<2x128xf32>
    %c0_338 = arith.constant 0 : index
    %c0_339 = arith.constant 0 : index
    %590 = vector.load %arg2[%c0_338, %c0_339] : memref<256x64xf32, #tpu.memory_space<vmem>>, vector<64x64xf32>
    %cst_340 = arith.constant dense<0.000000e+00> : vector<2x64xf32>
    %591 = tpu.matmul %529, %590, %cst_340 {dimension_numbers = #tpu.dot_dimension_numbers<[1], [0], [0], [1], [0, 0, 1, 1], [], []>} : vector<2x64xf32>, vector<64x64xf32>, vector<2x64xf32> -> vector<2x64xf32>
    %592 = vector.extract_strided_slice %591 {offsets = [0, 0], sizes = [1, 64], strides = [1, 1]} : vector<2x64xf32> to vector<1x64xf32>
    %593 = vector.extract_strided_slice %591 {offsets = [1, 0], sizes = [1, 64], strides = [1, 1]} : vector<2x64xf32> to vector<1x64xf32>
    %594 = tpu.concatenate %592, %592, %592, %593, %593, %593 in 0 : vector<1x64xf32>, vector<1x64xf32>, vector<1x64xf32>, vector<1x64xf32>, vector<1x64xf32>, vector<1x64xf32> -> vector<6x64xf32>
    %c0_341 = arith.constant 0 : index
    %c0_342 = arith.constant 0 : index
    %595 = vector.load %arg3[%c0_341, %c0_342] : memref<512x64xf32, #tpu.memory_space<vmem>>, vector<128x64xf32>
    %cst_343 = arith.constant dense<0.000000e+00> : vector<6x64xf32>
    %596 = tpu.matmul %584, %595, %cst_343 {dimension_numbers = #tpu.dot_dimension_numbers<[1], [0], [0], [1], [0, 0, 1, 1], [], []>} : vector<6x128xf32>, vector<128x64xf32>, vector<6x64xf32> -> vector<6x64xf32>
    %597 = arith.addf %596, %594 : vector<6x64xf32>
    %c0_344 = arith.constant 0 : index
    %c0_345 = arith.constant 0 : index
    %598 = vector.load %arg4[%c0_344, %c0_345] : memref<4x64xf32, #tpu.memory_space<vmem>>, vector<1x64xf32>
    %599 = vector.broadcast %598 : vector<1x64xf32> to vector<6x64xf32>
    %600 = arith.addf %597, %599 : vector<6x64xf32>
    %601 = arith.negf %600 : vector<6x64xf32>
    %602 = math.exp %601 : vector<6x64xf32>
    %cst_346 = arith.constant 1.000000e+00 : f32
    %603 = vector.broadcast %cst_346 : f32 to vector<6x64xf32>
    %604 = arith.addf %603, %602 : vector<6x64xf32>
    %605 = arith.divf %603, %604 : vector<6x64xf32>
    %606 = vector.extract_strided_slice %584 {offsets = [0, 0], sizes = [6, 64], strides = [1, 1]} : vector<6x128xf32> to vector<6x64xf32>
    %607 = arith.mulf %605, %606 : vector<6x64xf32>
    %608 = vector.extract_strided_slice %607 {offsets = [0, 0], sizes = [3, 64], strides = [1, 1]} : vector<6x64xf32> to vector<3x64xf32>
    %cst_347 = arith.constant dense<0.000000e+00> : vector<64xf32>
    %609 = vector.multi_reduction <add>, %608, %cst_347 [0] : vector<3x64xf32> to vector<64xf32>
    %610 = vector.shape_cast %609 : vector<64xf32> to vector<1x64xf32>
    %611 = vector.extract_strided_slice %607 {offsets = [3, 0], sizes = [3, 64], strides = [1, 1]} : vector<6x64xf32> to vector<3x64xf32>
    %cst_348 = arith.constant dense<0.000000e+00> : vector<64xf32>
    %612 = vector.multi_reduction <add>, %611, %cst_348 [0] : vector<3x64xf32> to vector<64xf32>
    %613 = vector.shape_cast %612 : vector<64xf32> to vector<1x64xf32>
    %614 = tpu.concatenate %610, %613 in 0 : vector<1x64xf32>, vector<1x64xf32> -> vector<2x64xf32>
    %c64_349 = arith.constant 64 : index
    %c0_350 = arith.constant 0 : index
    %615 = vector.load %arg2[%c64_349, %c0_350] : memref<256x64xf32, #tpu.memory_space<vmem>>, vector<64x64xf32>
    %cst_351 = arith.constant dense<0.000000e+00> : vector<2x64xf32>
    %616 = tpu.matmul %529, %615, %cst_351 {dimension_numbers = #tpu.dot_dimension_numbers<[1], [0], [0], [1], [0, 0, 1, 1], [], []>} : vector<2x64xf32>, vector<64x64xf32>, vector<2x64xf32> -> vector<2x64xf32>
    %c128_352 = arith.constant 128 : index
    %c0_353 = arith.constant 0 : index
    %617 = vector.load %arg3[%c128_352, %c0_353] : memref<512x64xf32, #tpu.memory_space<vmem>>, vector<128x64xf32>
    %cst_354 = arith.constant dense<0.000000e+00> : vector<2x64xf32>
    %618 = tpu.matmul %589, %617, %cst_354 {dimension_numbers = #tpu.dot_dimension_numbers<[1], [0], [0], [1], [0, 0, 1, 1], [], []>} : vector<2x128xf32>, vector<128x64xf32>, vector<2x64xf32> -> vector<2x64xf32>
    %619 = arith.addf %616, %618 : vector<2x64xf32>
    %c1_355 = arith.constant 1 : index
    %c0_356 = arith.constant 0 : index
    %620 = vector.load %arg4[%c1_355, %c0_356] : memref<4x64xf32, #tpu.memory_space<vmem>>, vector<1x64xf32>
    %621 = vector.broadcast %620 : vector<1x64xf32> to vector<2x64xf32>
    %622 = arith.addf %619, %621 : vector<2x64xf32>
    %623 = arith.negf %622 : vector<2x64xf32>
    %624 = math.exp %623 : vector<2x64xf32>
    %cst_357 = arith.constant 1.000000e+00 : f32
    %625 = vector.broadcast %cst_357 : f32 to vector<2x64xf32>
    %626 = arith.addf %625, %624 : vector<2x64xf32>
    %627 = arith.divf %625, %626 : vector<2x64xf32>
    %c128_358 = arith.constant 128 : index
    %c0_359 = arith.constant 0 : index
    %628 = vector.load %arg2[%c128_358, %c0_359] : memref<256x64xf32, #tpu.memory_space<vmem>>, vector<64x64xf32>
    %cst_360 = arith.constant dense<0.000000e+00> : vector<2x64xf32>
    %629 = tpu.matmul %529, %628, %cst_360 {dimension_numbers = #tpu.dot_dimension_numbers<[1], [0], [0], [1], [0, 0, 1, 1], [], []>} : vector<2x64xf32>, vector<64x64xf32>, vector<2x64xf32> -> vector<2x64xf32>
    %c256_361 = arith.constant 256 : index
    %c0_362 = arith.constant 0 : index
    %630 = vector.load %arg3[%c256_361, %c0_362] : memref<512x64xf32, #tpu.memory_space<vmem>>, vector<128x64xf32>
    %cst_363 = arith.constant dense<0.000000e+00> : vector<2x64xf32>
    %631 = tpu.matmul %589, %630, %cst_363 {dimension_numbers = #tpu.dot_dimension_numbers<[1], [0], [0], [1], [0, 0, 1, 1], [], []>} : vector<2x128xf32>, vector<128x64xf32>, vector<2x64xf32> -> vector<2x64xf32>
    %632 = arith.addf %629, %631 : vector<2x64xf32>
    %c2_364 = arith.constant 2 : index
    %c0_365 = arith.constant 0 : index
    %633 = vector.load %arg4[%c2_364, %c0_365] : memref<4x64xf32, #tpu.memory_space<vmem>>, vector<1x64xf32>
    %634 = vector.broadcast %633 : vector<1x64xf32> to vector<2x64xf32>
    %635 = arith.addf %632, %634 : vector<2x64xf32>
    %636 = arith.negf %635 : vector<2x64xf32>
    %637 = math.exp %636 : vector<2x64xf32>
    %cst_366 = arith.constant 1.000000e+00 : f32
    %638 = vector.broadcast %cst_366 : f32 to vector<2x64xf32>
    %639 = arith.addf %638, %637 : vector<2x64xf32>
    %640 = arith.divf %638, %639 : vector<2x64xf32>
    %c192_367 = arith.constant 192 : index
    %c0_368 = arith.constant 0 : index
    %641 = vector.load %arg2[%c192_367, %c0_368] : memref<256x64xf32, #tpu.memory_space<vmem>>, vector<64x64xf32>
    %cst_369 = arith.constant dense<0.000000e+00> : vector<2x64xf32>
    %642 = tpu.matmul %529, %641, %cst_369 {dimension_numbers = #tpu.dot_dimension_numbers<[1], [0], [0], [1], [0, 0, 1, 1], [], []>} : vector<2x64xf32>, vector<64x64xf32>, vector<2x64xf32> -> vector<2x64xf32>
    %c384_370 = arith.constant 384 : index
    %c0_371 = arith.constant 0 : index
    %643 = vector.load %arg3[%c384_370, %c0_371] : memref<512x64xf32, #tpu.memory_space<vmem>>, vector<128x64xf32>
    %cst_372 = arith.constant dense<0.000000e+00> : vector<2x64xf32>
    %644 = tpu.matmul %589, %643, %cst_372 {dimension_numbers = #tpu.dot_dimension_numbers<[1], [0], [0], [1], [0, 0, 1, 1], [], []>} : vector<2x128xf32>, vector<128x64xf32>, vector<2x64xf32> -> vector<2x64xf32>
    %645 = arith.addf %642, %644 : vector<2x64xf32>
    %c3_373 = arith.constant 3 : index
    %c0_374 = arith.constant 0 : index
    %646 = vector.load %arg4[%c3_373, %c0_374] : memref<4x64xf32, #tpu.memory_space<vmem>>, vector<1x64xf32>
    %647 = vector.broadcast %646 : vector<1x64xf32> to vector<2x64xf32>
    %648 = arith.addf %645, %647 : vector<2x64xf32>
    %649 = math.tanh %648 : vector<2x64xf32>
    %650 = arith.mulf %627, %649 : vector<2x64xf32>
    %651 = arith.addf %650, %614 : vector<2x64xf32>
    %652 = math.tanh %651 : vector<2x64xf32>
    %653 = arith.mulf %640, %652 : vector<2x64xf32>
    %654 = tpu.concatenate %651, %653 in 1 : vector<2x64xf32>, vector<2x64xf32> -> vector<2x128xf32>
    %c2_i32_375 = arith.constant 2 : i32
    %655 = arith.muli %c2_i32_375, %c4_i32 : i32
    %656 = arith.index_cast %655 : i32 to index
    %c0_376 = arith.constant 0 : index
    %657 = vector.load %arg11[%656, %c0_376] : memref<18x128xf32, #tpu.memory_space<vmem>>, vector<2x128xf32>
    tpu.vector_store %arg11[%656, %c0_376], %654 {strides = array<i32>} : memref<18x128xf32, #tpu.memory_space<vmem>>, vector<2x128xf32>,
    %c5_i32 = arith.constant 5 : i32
    %c2_i32_377 = arith.constant 2 : i32
    %658 = arith.muli %c2_i32_377, %c5_i32 : i32
    %659 = arith.index_cast %658 : i32 to index
    %c0_378 = arith.constant 0 : index
    %660 = vector.load %arg1[%659, %c0_378] : memref<16x64xf32, #tpu.memory_space<vmem>>, vector<2x64xf32>
    %c6_i32_379 = arith.constant 6 : i32
    %661 = arith.muli %c5_i32, %c6_i32_379 : i32
    %c0_i32_380 = arith.constant 0 : i32
    %662 = arith.addi %661, %c0_i32_380 : i32
    %c0_i32_381 = arith.constant 0 : i32
    %663 = arith.addi %662, %c0_i32_381 : i32
    %664 = arith.index_cast %663 : i32 to index
    %665 = memref.load %arg0[%664] : memref<48xi32, #tpu.memory_space<smem>>
    %c2_i32_382 = arith.constant 2 : i32
    %666 = arith.muli %c2_i32_382, %665 : i32
    %c0_i32_383 = arith.constant 0 : i32
    %667 = arith.addi %666, %c0_i32_383 : i32
    %668 = arith.index_cast %667 : i32 to index
    %c0_384 = arith.constant 0 : index
    %669 = vector.load %arg11[%668, %c0_384] : memref<18x128xf32, #tpu.memory_space<vmem>>, vector<1x128xf32>
    %c6_i32_385 = arith.constant 6 : i32
    %670 = arith.muli %c5_i32, %c6_i32_385 : i32
    %c0_i32_386 = arith.constant 0 : i32
    %671 = arith.addi %670, %c0_i32_386 : i32
    %c1_i32_387 = arith.constant 1 : i32
    %672 = arith.addi %671, %c1_i32_387 : i32
    %673 = arith.index_cast %672 : i32 to index
    %674 = memref.load %arg0[%673] : memref<48xi32, #tpu.memory_space<smem>>
    %c2_i32_388 = arith.constant 2 : i32
    %675 = arith.muli %c2_i32_388, %674 : i32
    %c0_i32_389 = arith.constant 0 : i32
    %676 = arith.addi %675, %c0_i32_389 : i32
    %677 = arith.index_cast %676 : i32 to index
    %c0_390 = arith.constant 0 : index
    %678 = vector.load %arg11[%677, %c0_390] : memref<18x128xf32, #tpu.memory_space<vmem>>, vector<1x128xf32>
    %c6_i32_391 = arith.constant 6 : i32
    %679 = arith.muli %c5_i32, %c6_i32_391 : i32
    %c0_i32_392 = arith.constant 0 : i32
    %680 = arith.addi %679, %c0_i32_392 : i32
    %c2_i32_393 = arith.constant 2 : i32
    %681 = arith.addi %680, %c2_i32_393 : i32
    %682 = arith.index_cast %681 : i32 to index
    %683 = memref.load %arg0[%682] : memref<48xi32, #tpu.memory_space<smem>>
    %c2_i32_394 = arith.constant 2 : i32
    %684 = arith.muli %c2_i32_394, %683 : i32
    %c0_i32_395 = arith.constant 0 : i32
    %685 = arith.addi %684, %c0_i32_395 : i32
    %686 = arith.index_cast %685 : i32 to index
    %c0_396 = arith.constant 0 : index
    %687 = vector.load %arg11[%686, %c0_396] : memref<18x128xf32, #tpu.memory_space<vmem>>, vector<1x128xf32>
    %c6_i32_397 = arith.constant 6 : i32
    %688 = arith.muli %c5_i32, %c6_i32_397 : i32
    %c3_i32_398 = arith.constant 3 : i32
    %689 = arith.addi %688, %c3_i32_398 : i32
    %c0_i32_399 = arith.constant 0 : i32
    %690 = arith.addi %689, %c0_i32_399 : i32
    %691 = arith.index_cast %690 : i32 to index
    %692 = memref.load %arg0[%691] : memref<48xi32, #tpu.memory_space<smem>>
    %c2_i32_400 = arith.constant 2 : i32
    %693 = arith.muli %c2_i32_400, %692 : i32
    %c1_i32_401 = arith.constant 1 : i32
    %694 = arith.addi %693, %c1_i32_401 : i32
    %695 = arith.index_cast %694 : i32 to index
    %c0_402 = arith.constant 0 : index
    %696 = vector.load %arg11[%695, %c0_402] : memref<18x128xf32, #tpu.memory_space<vmem>>, vector<1x128xf32>
    %c6_i32_403 = arith.constant 6 : i32
    %697 = arith.muli %c5_i32, %c6_i32_403 : i32
    %c3_i32_404 = arith.constant 3 : i32
    %698 = arith.addi %697, %c3_i32_404 : i32
    %c1_i32_405 = arith.constant 1 : i32
    %699 = arith.addi %698, %c1_i32_405 : i32
    %700 = arith.index_cast %699 : i32 to index
    %701 = memref.load %arg0[%700] : memref<48xi32, #tpu.memory_space<smem>>
    %c2_i32_406 = arith.constant 2 : i32
    %702 = arith.muli %c2_i32_406, %701 : i32
    %c1_i32_407 = arith.constant 1 : i32
    %703 = arith.addi %702, %c1_i32_407 : i32
    %704 = arith.index_cast %703 : i32 to index
    %c0_408 = arith.constant 0 : index
    %705 = vector.load %arg11[%704, %c0_408] : memref<18x128xf32, #tpu.memory_space<vmem>>, vector<1x128xf32>
    %c6_i32_409 = arith.constant 6 : i32
    %706 = arith.muli %c5_i32, %c6_i32_409 : i32
    %c3_i32_410 = arith.constant 3 : i32
    %707 = arith.addi %706, %c3_i32_410 : i32
    %c2_i32_411 = arith.constant 2 : i32
    %708 = arith.addi %707, %c2_i32_411 : i32
    %709 = arith.index_cast %708 : i32 to index
    %710 = memref.load %arg0[%709] : memref<48xi32, #tpu.memory_space<smem>>
    %c2_i32_412 = arith.constant 2 : i32
    %711 = arith.muli %c2_i32_412, %710 : i32
    %c1_i32_413 = arith.constant 1 : i32
    %712 = arith.addi %711, %c1_i32_413 : i32
    %713 = arith.index_cast %712 : i32 to index
    %c0_414 = arith.constant 0 : index
    %714 = vector.load %arg11[%713, %c0_414] : memref<18x128xf32, #tpu.memory_space<vmem>>, vector<1x128xf32>
    %715 = tpu.concatenate %669, %678, %687, %696, %705, %714 in 0 : vector<1x128xf32>, vector<1x128xf32>, vector<1x128xf32>, vector<1x128xf32>, vector<1x128xf32>, vector<1x128xf32> -> vector<6x128xf32>
    %716 = arith.addf %669, %678 : vector<1x128xf32>
    %717 = arith.addf %716, %687 : vector<1x128xf32>
    %718 = arith.addf %696, %705 : vector<1x128xf32>
    %719 = arith.addf %718, %714 : vector<1x128xf32>
    %720 = tpu.concatenate %717, %719 in 0 : vector<1x128xf32>, vector<1x128xf32> -> vector<2x128xf32>
    %c0_415 = arith.constant 0 : index
    %c0_416 = arith.constant 0 : index
    %721 = vector.load %arg2[%c0_415, %c0_416] : memref<256x64xf32, #tpu.memory_space<vmem>>, vector<64x64xf32>
    %cst_417 = arith.constant dense<0.000000e+00> : vector<2x64xf32>
    %722 = tpu.matmul %660, %721, %cst_417 {dimension_numbers = #tpu.dot_dimension_numbers<[1], [0], [0], [1], [0, 0, 1, 1], [], []>} : vector<2x64xf32>, vector<64x64xf32>, vector<2x64xf32> -> vector<2x64xf32>
    %723 = vector.extract_strided_slice %722 {offsets = [0, 0], sizes = [1, 64], strides = [1, 1]} : vector<2x64xf32> to vector<1x64xf32>
    %724 = vector.extract_strided_slice %722 {offsets = [1, 0], sizes = [1, 64], strides = [1, 1]} : vector<2x64xf32> to vector<1x64xf32>
    %725 = tpu.concatenate %723, %723, %723, %724, %724, %724 in 0 : vector<1x64xf32>, vector<1x64xf32>, vector<1x64xf32>, vector<1x64xf32>, vector<1x64xf32>, vector<1x64xf32> -> vector<6x64xf32>
    %c0_418 = arith.constant 0 : index
    %c0_419 = arith.constant 0 : index
    %726 = vector.load %arg3[%c0_418, %c0_419] : memref<512x64xf32, #tpu.memory_space<vmem>>, vector<128x64xf32>
    %cst_420 = arith.constant dense<0.000000e+00> : vector<6x64xf32>
    %727 = tpu.matmul %715, %726, %cst_420 {dimension_numbers = #tpu.dot_dimension_numbers<[1], [0], [0], [1], [0, 0, 1, 1], [], []>} : vector<6x128xf32>, vector<128x64xf32>, vector<6x64xf32> -> vector<6x64xf32>
    %728 = arith.addf %727, %725 : vector<6x64xf32>
    %c0_421 = arith.constant 0 : index
    %c0_422 = arith.constant 0 : index
    %729 = vector.load %arg4[%c0_421, %c0_422] : memref<4x64xf32, #tpu.memory_space<vmem>>, vector<1x64xf32>
    %730 = vector.broadcast %729 : vector<1x64xf32> to vector<6x64xf32>
    %731 = arith.addf %728, %730 : vector<6x64xf32>
    %732 = arith.negf %731 : vector<6x64xf32>
    %733 = math.exp %732 : vector<6x64xf32>
    %cst_423 = arith.constant 1.000000e+00 : f32
    %734 = vector.broadcast %cst_423 : f32 to vector<6x64xf32>
    %735 = arith.addf %734, %733 : vector<6x64xf32>
    %736 = arith.divf %734, %735 : vector<6x64xf32>
    %737 = vector.extract_strided_slice %715 {offsets = [0, 0], sizes = [6, 64], strides = [1, 1]} : vector<6x128xf32> to vector<6x64xf32>
    %738 = arith.mulf %736, %737 : vector<6x64xf32>
    %739 = vector.extract_strided_slice %738 {offsets = [0, 0], sizes = [3, 64], strides = [1, 1]} : vector<6x64xf32> to vector<3x64xf32>
    %cst_424 = arith.constant dense<0.000000e+00> : vector<64xf32>
    %740 = vector.multi_reduction <add>, %739, %cst_424 [0] : vector<3x64xf32> to vector<64xf32>
    %741 = vector.shape_cast %740 : vector<64xf32> to vector<1x64xf32>
    %742 = vector.extract_strided_slice %738 {offsets = [3, 0], sizes = [3, 64], strides = [1, 1]} : vector<6x64xf32> to vector<3x64xf32>
    %cst_425 = arith.constant dense<0.000000e+00> : vector<64xf32>
    %743 = vector.multi_reduction <add>, %742, %cst_425 [0] : vector<3x64xf32> to vector<64xf32>
    %744 = vector.shape_cast %743 : vector<64xf32> to vector<1x64xf32>
    %745 = tpu.concatenate %741, %744 in 0 : vector<1x64xf32>, vector<1x64xf32> -> vector<2x64xf32>
    %c64_426 = arith.constant 64 : index
    %c0_427 = arith.constant 0 : index
    %746 = vector.load %arg2[%c64_426, %c0_427] : memref<256x64xf32, #tpu.memory_space<vmem>>, vector<64x64xf32>
    %cst_428 = arith.constant dense<0.000000e+00> : vector<2x64xf32>
    %747 = tpu.matmul %660, %746, %cst_428 {dimension_numbers = #tpu.dot_dimension_numbers<[1], [0], [0], [1], [0, 0, 1, 1], [], []>} : vector<2x64xf32>, vector<64x64xf32>, vector<2x64xf32> -> vector<2x64xf32>
    %c128_429 = arith.constant 128 : index
    %c0_430 = arith.constant 0 : index
    %748 = vector.load %arg3[%c128_429, %c0_430] : memref<512x64xf32, #tpu.memory_space<vmem>>, vector<128x64xf32>
    %cst_431 = arith.constant dense<0.000000e+00> : vector<2x64xf32>
    %749 = tpu.matmul %720, %748, %cst_431 {dimension_numbers = #tpu.dot_dimension_numbers<[1], [0], [0], [1], [0, 0, 1, 1], [], []>} : vector<2x128xf32>, vector<128x64xf32>, vector<2x64xf32> -> vector<2x64xf32>
    %750 = arith.addf %747, %749 : vector<2x64xf32>
    %c1_432 = arith.constant 1 : index
    %c0_433 = arith.constant 0 : index
    %751 = vector.load %arg4[%c1_432, %c0_433] : memref<4x64xf32, #tpu.memory_space<vmem>>, vector<1x64xf32>
    %752 = vector.broadcast %751 : vector<1x64xf32> to vector<2x64xf32>
    %753 = arith.addf %750, %752 : vector<2x64xf32>
    %754 = arith.negf %753 : vector<2x64xf32>
    %755 = math.exp %754 : vector<2x64xf32>
    %cst_434 = arith.constant 1.000000e+00 : f32
    %756 = vector.broadcast %cst_434 : f32 to vector<2x64xf32>
    %757 = arith.addf %756, %755 : vector<2x64xf32>
    %758 = arith.divf %756, %757 : vector<2x64xf32>
    %c128_435 = arith.constant 128 : index
    %c0_436 = arith.constant 0 : index
    %759 = vector.load %arg2[%c128_435, %c0_436] : memref<256x64xf32, #tpu.memory_space<vmem>>, vector<64x64xf32>
    %cst_437 = arith.constant dense<0.000000e+00> : vector<2x64xf32>
    %760 = tpu.matmul %660, %759, %cst_437 {dimension_numbers = #tpu.dot_dimension_numbers<[1], [0], [0], [1], [0, 0, 1, 1], [], []>} : vector<2x64xf32>, vector<64x64xf32>, vector<2x64xf32> -> vector<2x64xf32>
    %c256_438 = arith.constant 256 : index
    %c0_439 = arith.constant 0 : index
    %761 = vector.load %arg3[%c256_438, %c0_439] : memref<512x64xf32, #tpu.memory_space<vmem>>, vector<128x64xf32>
    %cst_440 = arith.constant dense<0.000000e+00> : vector<2x64xf32>
    %762 = tpu.matmul %720, %761, %cst_440 {dimension_numbers = #tpu.dot_dimension_numbers<[1], [0], [0], [1], [0, 0, 1, 1], [], []>} : vector<2x128xf32>, vector<128x64xf32>, vector<2x64xf32> -> vector<2x64xf32>
    %763 = arith.addf %760, %762 : vector<2x64xf32>
    %c2_441 = arith.constant 2 : index
    %c0_442 = arith.constant 0 : index
    %764 = vector.load %arg4[%c2_441, %c0_442] : memref<4x64xf32, #tpu.memory_space<vmem>>, vector<1x64xf32>
    %765 = vector.broadcast %764 : vector<1x64xf32> to vector<2x64xf32>
    %766 = arith.addf %763, %765 : vector<2x64xf32>
    %767 = arith.negf %766 : vector<2x64xf32>
    %768 = math.exp %767 : vector<2x64xf32>
    %cst_443 = arith.constant 1.000000e+00 : f32
    %769 = vector.broadcast %cst_443 : f32 to vector<2x64xf32>
    %770 = arith.addf %769, %768 : vector<2x64xf32>
    %771 = arith.divf %769, %770 : vector<2x64xf32>
    %c192_444 = arith.constant 192 : index
    %c0_445 = arith.constant 0 : index
    %772 = vector.load %arg2[%c192_444, %c0_445] : memref<256x64xf32, #tpu.memory_space<vmem>>, vector<64x64xf32>
    %cst_446 = arith.constant dense<0.000000e+00> : vector<2x64xf32>
    %773 = tpu.matmul %660, %772, %cst_446 {dimension_numbers = #tpu.dot_dimension_numbers<[1], [0], [0], [1], [0, 0, 1, 1], [], []>} : vector<2x64xf32>, vector<64x64xf32>, vector<2x64xf32> -> vector<2x64xf32>
    %c384_447 = arith.constant 384 : index
    %c0_448 = arith.constant 0 : index
    %774 = vector.load %arg3[%c384_447, %c0_448] : memref<512x64xf32, #tpu.memory_space<vmem>>, vector<128x64xf32>
    %cst_449 = arith.constant dense<0.000000e+00> : vector<2x64xf32>
    %775 = tpu.matmul %720, %774, %cst_449 {dimension_numbers = #tpu.dot_dimension_numbers<[1], [0], [0], [1], [0, 0, 1, 1], [], []>} : vector<2x128xf32>, vector<128x64xf32>, vector<2x64xf32> -> vector<2x64xf32>
    %776 = arith.addf %773, %775 : vector<2x64xf32>
    %c3_450 = arith.constant 3 : index
    %c0_451 = arith.constant 0 : index
    %777 = vector.load %arg4[%c3_450, %c0_451] : memref<4x64xf32, #tpu.memory_space<vmem>>, vector<1x64xf32>
    %778 = vector.broadcast %777 : vector<1x64xf32> to vector<2x64xf32>
    %779 = arith.addf %776, %778 : vector<2x64xf32>
    %780 = math.tanh %779 : vector<2x64xf32>
    %781 = arith.mulf %758, %780 : vector<2x64xf32>
    %782 = arith.addf %781, %745 : vector<2x64xf32>
    %783 = math.tanh %782 : vector<2x64xf32>
    %784 = arith.mulf %771, %783 : vector<2x64xf32>
    %785 = tpu.concatenate %782, %784 in 1 : vector<2x64xf32>, vector<2x64xf32> -> vector<2x128xf32>
    %c2_i32_452 = arith.constant 2 : i32
    %786 = arith.muli %c2_i32_452, %c5_i32 : i32
    %787 = arith.index_cast %786 : i32 to index
    %c0_453 = arith.constant 0 : index
    %788 = vector.load %arg11[%787, %c0_453] : memref<18x128xf32, #tpu.memory_space<vmem>>, vector<2x128xf32>
    tpu.vector_store %arg11[%787, %c0_453], %785 {strides = array<i32>} : memref<18x128xf32, #tpu.memory_space<vmem>>, vector<2x128xf32>,
    %c6_i32_454 = arith.constant 6 : i32
    %c2_i32_455 = arith.constant 2 : i32
    %789 = arith.muli %c2_i32_455, %c6_i32_454 : i32
    %790 = arith.index_cast %789 : i32 to index
    %c0_456 = arith.constant 0 : index
    %791 = vector.load %arg1[%790, %c0_456] : memref<16x64xf32, #tpu.memory_space<vmem>>, vector<2x64xf32>
    %c6_i32_457 = arith.constant 6 : i32
    %792 = arith.muli %c6_i32_454, %c6_i32_457 : i32
    %c0_i32_458 = arith.constant 0 : i32
    %793 = arith.addi %792, %c0_i32_458 : i32
    %c0_i32_459 = arith.constant 0 : i32
    %794 = arith.addi %793, %c0_i32_459 : i32
    %795 = arith.index_cast %794 : i32 to index
    %796 = memref.load %arg0[%795] : memref<48xi32, #tpu.memory_space<smem>>
    %c2_i32_460 = arith.constant 2 : i32
    %797 = arith.muli %c2_i32_460, %796 : i32
    %c0_i32_461 = arith.constant 0 : i32
    %798 = arith.addi %797, %c0_i32_461 : i32
    %799 = arith.index_cast %798 : i32 to index
    %c0_462 = arith.constant 0 : index
    %800 = vector.load %arg11[%799, %c0_462] : memref<18x128xf32, #tpu.memory_space<vmem>>, vector<1x128xf32>
    %c6_i32_463 = arith.constant 6 : i32
    %801 = arith.muli %c6_i32_454, %c6_i32_463 : i32
    %c0_i32_464 = arith.constant 0 : i32
    %802 = arith.addi %801, %c0_i32_464 : i32
    %c1_i32_465 = arith.constant 1 : i32
    %803 = arith.addi %802, %c1_i32_465 : i32
    %804 = arith.index_cast %803 : i32 to index
    %805 = memref.load %arg0[%804] : memref<48xi32, #tpu.memory_space<smem>>
    %c2_i32_466 = arith.constant 2 : i32
    %806 = arith.muli %c2_i32_466, %805 : i32
    %c0_i32_467 = arith.constant 0 : i32
    %807 = arith.addi %806, %c0_i32_467 : i32
    %808 = arith.index_cast %807 : i32 to index
    %c0_468 = arith.constant 0 : index
    %809 = vector.load %arg11[%808, %c0_468] : memref<18x128xf32, #tpu.memory_space<vmem>>, vector<1x128xf32>
    %c6_i32_469 = arith.constant 6 : i32
    %810 = arith.muli %c6_i32_454, %c6_i32_469 : i32
    %c0_i32_470 = arith.constant 0 : i32
    %811 = arith.addi %810, %c0_i32_470 : i32
    %c2_i32_471 = arith.constant 2 : i32
    %812 = arith.addi %811, %c2_i32_471 : i32
    %813 = arith.index_cast %812 : i32 to index
    %814 = memref.load %arg0[%813] : memref<48xi32, #tpu.memory_space<smem>>
    %c2_i32_472 = arith.constant 2 : i32
    %815 = arith.muli %c2_i32_472, %814 : i32
    %c0_i32_473 = arith.constant 0 : i32
    %816 = arith.addi %815, %c0_i32_473 : i32
    %817 = arith.index_cast %816 : i32 to index
    %c0_474 = arith.constant 0 : index
    %818 = vector.load %arg11[%817, %c0_474] : memref<18x128xf32, #tpu.memory_space<vmem>>, vector<1x128xf32>
    %c6_i32_475 = arith.constant 6 : i32
    %819 = arith.muli %c6_i32_454, %c6_i32_475 : i32
    %c3_i32_476 = arith.constant 3 : i32
    %820 = arith.addi %819, %c3_i32_476 : i32
    %c0_i32_477 = arith.constant 0 : i32
    %821 = arith.addi %820, %c0_i32_477 : i32
    %822 = arith.index_cast %821 : i32 to index
    %823 = memref.load %arg0[%822] : memref<48xi32, #tpu.memory_space<smem>>
    %c2_i32_478 = arith.constant 2 : i32
    %824 = arith.muli %c2_i32_478, %823 : i32
    %c1_i32_479 = arith.constant 1 : i32
    %825 = arith.addi %824, %c1_i32_479 : i32
    %826 = arith.index_cast %825 : i32 to index
    %c0_480 = arith.constant 0 : index
    %827 = vector.load %arg11[%826, %c0_480] : memref<18x128xf32, #tpu.memory_space<vmem>>, vector<1x128xf32>
    %c6_i32_481 = arith.constant 6 : i32
    %828 = arith.muli %c6_i32_454, %c6_i32_481 : i32
    %c3_i32_482 = arith.constant 3 : i32
    %829 = arith.addi %828, %c3_i32_482 : i32
    %c1_i32_483 = arith.constant 1 : i32
    %830 = arith.addi %829, %c1_i32_483 : i32
    %831 = arith.index_cast %830 : i32 to index
    %832 = memref.load %arg0[%831] : memref<48xi32, #tpu.memory_space<smem>>
    %c2_i32_484 = arith.constant 2 : i32
    %833 = arith.muli %c2_i32_484, %832 : i32
    %c1_i32_485 = arith.constant 1 : i32
    %834 = arith.addi %833, %c1_i32_485 : i32
    %835 = arith.index_cast %834 : i32 to index
    %c0_486 = arith.constant 0 : index
    %836 = vector.load %arg11[%835, %c0_486] : memref<18x128xf32, #tpu.memory_space<vmem>>, vector<1x128xf32>
    %c6_i32_487 = arith.constant 6 : i32
    %837 = arith.muli %c6_i32_454, %c6_i32_487 : i32
    %c3_i32_488 = arith.constant 3 : i32
    %838 = arith.addi %837, %c3_i32_488 : i32
    %c2_i32_489 = arith.constant 2 : i32
    %839 = arith.addi %838, %c2_i32_489 : i32
    %840 = arith.index_cast %839 : i32 to index
    %841 = memref.load %arg0[%840] : memref<48xi32, #tpu.memory_space<smem>>
    %c2_i32_490 = arith.constant 2 : i32
    %842 = arith.muli %c2_i32_490, %841 : i32
    %c1_i32_491 = arith.constant 1 : i32
    %843 = arith.addi %842, %c1_i32_491 : i32
    %844 = arith.index_cast %843 : i32 to index
    %c0_492 = arith.constant 0 : index
    %845 = vector.load %arg11[%844, %c0_492] : memref<18x128xf32, #tpu.memory_space<vmem>>, vector<1x128xf32>
    %846 = tpu.concatenate %800, %809, %818, %827, %836, %845 in 0 : vector<1x128xf32>, vector<1x128xf32>, vector<1x128xf32>, vector<1x128xf32>, vector<1x128xf32>, vector<1x128xf32> -> vector<6x128xf32>
    %847 = arith.addf %800, %809 : vector<1x128xf32>
    %848 = arith.addf %847, %818 : vector<1x128xf32>
    %849 = arith.addf %827, %836 : vector<1x128xf32>
    %850 = arith.addf %849, %845 : vector<1x128xf32>
    %851 = tpu.concatenate %848, %850 in 0 : vector<1x128xf32>, vector<1x128xf32> -> vector<2x128xf32>
    %c0_493 = arith.constant 0 : index
    %c0_494 = arith.constant 0 : index
    %852 = vector.load %arg2[%c0_493, %c0_494] : memref<256x64xf32, #tpu.memory_space<vmem>>, vector<64x64xf32>
    %cst_495 = arith.constant dense<0.000000e+00> : vector<2x64xf32>
    %853 = tpu.matmul %791, %852, %cst_495 {dimension_numbers = #tpu.dot_dimension_numbers<[1], [0], [0], [1], [0, 0, 1, 1], [], []>} : vector<2x64xf32>, vector<64x64xf32>, vector<2x64xf32> -> vector<2x64xf32>
    %854 = vector.extract_strided_slice %853 {offsets = [0, 0], sizes = [1, 64], strides = [1, 1]} : vector<2x64xf32> to vector<1x64xf32>
    %855 = vector.extract_strided_slice %853 {offsets = [1, 0], sizes = [1, 64], strides = [1, 1]} : vector<2x64xf32> to vector<1x64xf32>
    %856 = tpu.concatenate %854, %854, %854, %855, %855, %855 in 0 : vector<1x64xf32>, vector<1x64xf32>, vector<1x64xf32>, vector<1x64xf32>, vector<1x64xf32>, vector<1x64xf32> -> vector<6x64xf32>
    %c0_496 = arith.constant 0 : index
    %c0_497 = arith.constant 0 : index
    %857 = vector.load %arg3[%c0_496, %c0_497] : memref<512x64xf32, #tpu.memory_space<vmem>>, vector<128x64xf32>
    %cst_498 = arith.constant dense<0.000000e+00> : vector<6x64xf32>
    %858 = tpu.matmul %846, %857, %cst_498 {dimension_numbers = #tpu.dot_dimension_numbers<[1], [0], [0], [1], [0, 0, 1, 1], [], []>} : vector<6x128xf32>, vector<128x64xf32>, vector<6x64xf32> -> vector<6x64xf32>
    %859 = arith.addf %858, %856 : vector<6x64xf32>
    %c0_499 = arith.constant 0 : index
    %c0_500 = arith.constant 0 : index
    %860 = vector.load %arg4[%c0_499, %c0_500] : memref<4x64xf32, #tpu.memory_space<vmem>>, vector<1x64xf32>
    %861 = vector.broadcast %860 : vector<1x64xf32> to vector<6x64xf32>
    %862 = arith.addf %859, %861 : vector<6x64xf32>
    %863 = arith.negf %862 : vector<6x64xf32>
    %864 = math.exp %863 : vector<6x64xf32>
    %cst_501 = arith.constant 1.000000e+00 : f32
    %865 = vector.broadcast %cst_501 : f32 to vector<6x64xf32>
    %866 = arith.addf %865, %864 : vector<6x64xf32>
    %867 = arith.divf %865, %866 : vector<6x64xf32>
    %868 = vector.extract_strided_slice %846 {offsets = [0, 0], sizes = [6, 64], strides = [1, 1]} : vector<6x128xf32> to vector<6x64xf32>
    %869 = arith.mulf %867, %868 : vector<6x64xf32>
    %870 = vector.extract_strided_slice %869 {offsets = [0, 0], sizes = [3, 64], strides = [1, 1]} : vector<6x64xf32> to vector<3x64xf32>
    %cst_502 = arith.constant dense<0.000000e+00> : vector<64xf32>
    %871 = vector.multi_reduction <add>, %870, %cst_502 [0] : vector<3x64xf32> to vector<64xf32>
    %872 = vector.shape_cast %871 : vector<64xf32> to vector<1x64xf32>
    %873 = vector.extract_strided_slice %869 {offsets = [3, 0], sizes = [3, 64], strides = [1, 1]} : vector<6x64xf32> to vector<3x64xf32>
    %cst_503 = arith.constant dense<0.000000e+00> : vector<64xf32>
    %874 = vector.multi_reduction <add>, %873, %cst_503 [0] : vector<3x64xf32> to vector<64xf32>
    %875 = vector.shape_cast %874 : vector<64xf32> to vector<1x64xf32>
    %876 = tpu.concatenate %872, %875 in 0 : vector<1x64xf32>, vector<1x64xf32> -> vector<2x64xf32>
    %c64_504 = arith.constant 64 : index
    %c0_505 = arith.constant 0 : index
    %877 = vector.load %arg2[%c64_504, %c0_505] : memref<256x64xf32, #tpu.memory_space<vmem>>, vector<64x64xf32>
    %cst_506 = arith.constant dense<0.000000e+00> : vector<2x64xf32>
    %878 = tpu.matmul %791, %877, %cst_506 {dimension_numbers = #tpu.dot_dimension_numbers<[1], [0], [0], [1], [0, 0, 1, 1], [], []>} : vector<2x64xf32>, vector<64x64xf32>, vector<2x64xf32> -> vector<2x64xf32>
    %c128_507 = arith.constant 128 : index
    %c0_508 = arith.constant 0 : index
    %879 = vector.load %arg3[%c128_507, %c0_508] : memref<512x64xf32, #tpu.memory_space<vmem>>, vector<128x64xf32>
    %cst_509 = arith.constant dense<0.000000e+00> : vector<2x64xf32>
    %880 = tpu.matmul %851, %879, %cst_509 {dimension_numbers = #tpu.dot_dimension_numbers<[1], [0], [0], [1], [0, 0, 1, 1], [], []>} : vector<2x128xf32>, vector<128x64xf32>, vector<2x64xf32> -> vector<2x64xf32>
    %881 = arith.addf %878, %880 : vector<2x64xf32>
    %c1_510 = arith.constant 1 : index
    %c0_511 = arith.constant 0 : index
    %882 = vector.load %arg4[%c1_510, %c0_511] : memref<4x64xf32, #tpu.memory_space<vmem>>, vector<1x64xf32>
    %883 = vector.broadcast %882 : vector<1x64xf32> to vector<2x64xf32>
    %884 = arith.addf %881, %883 : vector<2x64xf32>
    %885 = arith.negf %884 : vector<2x64xf32>
    %886 = math.exp %885 : vector<2x64xf32>
    %cst_512 = arith.constant 1.000000e+00 : f32
    %887 = vector.broadcast %cst_512 : f32 to vector<2x64xf32>
    %888 = arith.addf %887, %886 : vector<2x64xf32>
    %889 = arith.divf %887, %888 : vector<2x64xf32>
    %c128_513 = arith.constant 128 : index
    %c0_514 = arith.constant 0 : index
    %890 = vector.load %arg2[%c128_513, %c0_514] : memref<256x64xf32, #tpu.memory_space<vmem>>, vector<64x64xf32>
    %cst_515 = arith.constant dense<0.000000e+00> : vector<2x64xf32>
    %891 = tpu.matmul %791, %890, %cst_515 {dimension_numbers = #tpu.dot_dimension_numbers<[1], [0], [0], [1], [0, 0, 1, 1], [], []>} : vector<2x64xf32>, vector<64x64xf32>, vector<2x64xf32> -> vector<2x64xf32>
    %c256_516 = arith.constant 256 : index
    %c0_517 = arith.constant 0 : index
    %892 = vector.load %arg3[%c256_516, %c0_517] : memref<512x64xf32, #tpu.memory_space<vmem>>, vector<128x64xf32>
    %cst_518 = arith.constant dense<0.000000e+00> : vector<2x64xf32>
    %893 = tpu.matmul %851, %892, %cst_518 {dimension_numbers = #tpu.dot_dimension_numbers<[1], [0], [0], [1], [0, 0, 1, 1], [], []>} : vector<2x128xf32>, vector<128x64xf32>, vector<2x64xf32> -> vector<2x64xf32>
    %894 = arith.addf %891, %893 : vector<2x64xf32>
    %c2_519 = arith.constant 2 : index
    %c0_520 = arith.constant 0 : index
    %895 = vector.load %arg4[%c2_519, %c0_520] : memref<4x64xf32, #tpu.memory_space<vmem>>, vector<1x64xf32>
    %896 = vector.broadcast %895 : vector<1x64xf32> to vector<2x64xf32>
    %897 = arith.addf %894, %896 : vector<2x64xf32>
    %898 = arith.negf %897 : vector<2x64xf32>
    %899 = math.exp %898 : vector<2x64xf32>
    %cst_521 = arith.constant 1.000000e+00 : f32
    %900 = vector.broadcast %cst_521 : f32 to vector<2x64xf32>
    %901 = arith.addf %900, %899 : vector<2x64xf32>
    %902 = arith.divf %900, %901 : vector<2x64xf32>
    %c192_522 = arith.constant 192 : index
    %c0_523 = arith.constant 0 : index
    %903 = vector.load %arg2[%c192_522, %c0_523] : memref<256x64xf32, #tpu.memory_space<vmem>>, vector<64x64xf32>
    %cst_524 = arith.constant dense<0.000000e+00> : vector<2x64xf32>
    %904 = tpu.matmul %791, %903, %cst_524 {dimension_numbers = #tpu.dot_dimension_numbers<[1], [0], [0], [1], [0, 0, 1, 1], [], []>} : vector<2x64xf32>, vector<64x64xf32>, vector<2x64xf32> -> vector<2x64xf32>
    %c384_525 = arith.constant 384 : index
    %c0_526 = arith.constant 0 : index
    %905 = vector.load %arg3[%c384_525, %c0_526] : memref<512x64xf32, #tpu.memory_space<vmem>>, vector<128x64xf32>
    %cst_527 = arith.constant dense<0.000000e+00> : vector<2x64xf32>
    %906 = tpu.matmul %851, %905, %cst_527 {dimension_numbers = #tpu.dot_dimension_numbers<[1], [0], [0], [1], [0, 0, 1, 1], [], []>} : vector<2x128xf32>, vector<128x64xf32>, vector<2x64xf32> -> vector<2x64xf32>
    %907 = arith.addf %904, %906 : vector<2x64xf32>
    %c3_528 = arith.constant 3 : index
    %c0_529 = arith.constant 0 : index
    %908 = vector.load %arg4[%c3_528, %c0_529] : memref<4x64xf32, #tpu.memory_space<vmem>>, vector<1x64xf32>
    %909 = vector.broadcast %908 : vector<1x64xf32> to vector<2x64xf32>
    %910 = arith.addf %907, %909 : vector<2x64xf32>
    %911 = math.tanh %910 : vector<2x64xf32>
    %912 = arith.mulf %889, %911 : vector<2x64xf32>
    %913 = arith.addf %912, %876 : vector<2x64xf32>
    %914 = math.tanh %913 : vector<2x64xf32>
    %915 = arith.mulf %902, %914 : vector<2x64xf32>
    %916 = tpu.concatenate %913, %915 in 1 : vector<2x64xf32>, vector<2x64xf32> -> vector<2x128xf32>
    %c2_i32_530 = arith.constant 2 : i32
    %917 = arith.muli %c2_i32_530, %c6_i32_454 : i32
    %918 = arith.index_cast %917 : i32 to index
    %c0_531 = arith.constant 0 : index
    %919 = vector.load %arg11[%918, %c0_531] : memref<18x128xf32, #tpu.memory_space<vmem>>, vector<2x128xf32>
    tpu.vector_store %arg11[%918, %c0_531], %916 {strides = array<i32>} : memref<18x128xf32, #tpu.memory_space<vmem>>, vector<2x128xf32>,
    %c7_i32 = arith.constant 7 : i32
    %c2_i32_532 = arith.constant 2 : i32
    %920 = arith.muli %c2_i32_532, %c7_i32 : i32
    %921 = arith.index_cast %920 : i32 to index
    %c0_533 = arith.constant 0 : index
    %922 = vector.load %arg1[%921, %c0_533] : memref<16x64xf32, #tpu.memory_space<vmem>>, vector<2x64xf32>
    %c6_i32_534 = arith.constant 6 : i32
    %923 = arith.muli %c7_i32, %c6_i32_534 : i32
    %c0_i32_535 = arith.constant 0 : i32
    %924 = arith.addi %923, %c0_i32_535 : i32
    %c0_i32_536 = arith.constant 0 : i32
    %925 = arith.addi %924, %c0_i32_536 : i32
    %926 = arith.index_cast %925 : i32 to index
    %927 = memref.load %arg0[%926] : memref<48xi32, #tpu.memory_space<smem>>
    %c2_i32_537 = arith.constant 2 : i32
    %928 = arith.muli %c2_i32_537, %927 : i32
    %c0_i32_538 = arith.constant 0 : i32
    %929 = arith.addi %928, %c0_i32_538 : i32
    %930 = arith.index_cast %929 : i32 to index
    %c0_539 = arith.constant 0 : index
    %931 = vector.load %arg11[%930, %c0_539] : memref<18x128xf32, #tpu.memory_space<vmem>>, vector<1x128xf32>
    %c6_i32_540 = arith.constant 6 : i32
    %932 = arith.muli %c7_i32, %c6_i32_540 : i32
    %c0_i32_541 = arith.constant 0 : i32
    %933 = arith.addi %932, %c0_i32_541 : i32
    %c1_i32_542 = arith.constant 1 : i32
    %934 = arith.addi %933, %c1_i32_542 : i32
    %935 = arith.index_cast %934 : i32 to index
    %936 = memref.load %arg0[%935] : memref<48xi32, #tpu.memory_space<smem>>
    %c2_i32_543 = arith.constant 2 : i32
    %937 = arith.muli %c2_i32_543, %936 : i32
    %c0_i32_544 = arith.constant 0 : i32
    %938 = arith.addi %937, %c0_i32_544 : i32
    %939 = arith.index_cast %938 : i32 to index
    %c0_545 = arith.constant 0 : index
    %940 = vector.load %arg11[%939, %c0_545] : memref<18x128xf32, #tpu.memory_space<vmem>>, vector<1x128xf32>
    %c6_i32_546 = arith.constant 6 : i32
    %941 = arith.muli %c7_i32, %c6_i32_546 : i32
    %c0_i32_547 = arith.constant 0 : i32
    %942 = arith.addi %941, %c0_i32_547 : i32
    %c2_i32_548 = arith.constant 2 : i32
    %943 = arith.addi %942, %c2_i32_548 : i32
    %944 = arith.index_cast %943 : i32 to index
    %945 = memref.load %arg0[%944] : memref<48xi32, #tpu.memory_space<smem>>
    %c2_i32_549 = arith.constant 2 : i32
    %946 = arith.muli %c2_i32_549, %945 : i32
    %c0_i32_550 = arith.constant 0 : i32
    %947 = arith.addi %946, %c0_i32_550 : i32
    %948 = arith.index_cast %947 : i32 to index
    %c0_551 = arith.constant 0 : index
    %949 = vector.load %arg11[%948, %c0_551] : memref<18x128xf32, #tpu.memory_space<vmem>>, vector<1x128xf32>
    %c6_i32_552 = arith.constant 6 : i32
    %950 = arith.muli %c7_i32, %c6_i32_552 : i32
    %c3_i32_553 = arith.constant 3 : i32
    %951 = arith.addi %950, %c3_i32_553 : i32
    %c0_i32_554 = arith.constant 0 : i32
    %952 = arith.addi %951, %c0_i32_554 : i32
    %953 = arith.index_cast %952 : i32 to index
    %954 = memref.load %arg0[%953] : memref<48xi32, #tpu.memory_space<smem>>
    %c2_i32_555 = arith.constant 2 : i32
    %955 = arith.muli %c2_i32_555, %954 : i32
    %c1_i32_556 = arith.constant 1 : i32
    %956 = arith.addi %955, %c1_i32_556 : i32
    %957 = arith.index_cast %956 : i32 to index
    %c0_557 = arith.constant 0 : index
    %958 = vector.load %arg11[%957, %c0_557] : memref<18x128xf32, #tpu.memory_space<vmem>>, vector<1x128xf32>
    %c6_i32_558 = arith.constant 6 : i32
    %959 = arith.muli %c7_i32, %c6_i32_558 : i32
    %c3_i32_559 = arith.constant 3 : i32
    %960 = arith.addi %959, %c3_i32_559 : i32
    %c1_i32_560 = arith.constant 1 : i32
    %961 = arith.addi %960, %c1_i32_560 : i32
    %962 = arith.index_cast %961 : i32 to index
    %963 = memref.load %arg0[%962] : memref<48xi32, #tpu.memory_space<smem>>
    %c2_i32_561 = arith.constant 2 : i32
    %964 = arith.muli %c2_i32_561, %963 : i32
    %c1_i32_562 = arith.constant 1 : i32
    %965 = arith.addi %964, %c1_i32_562 : i32
    %966 = arith.index_cast %965 : i32 to index
    %c0_563 = arith.constant 0 : index
    %967 = vector.load %arg11[%966, %c0_563] : memref<18x128xf32, #tpu.memory_space<vmem>>, vector<1x128xf32>
    %c6_i32_564 = arith.constant 6 : i32
    %968 = arith.muli %c7_i32, %c6_i32_564 : i32
    %c3_i32_565 = arith.constant 3 : i32
    %969 = arith.addi %968, %c3_i32_565 : i32
    %c2_i32_566 = arith.constant 2 : i32
    %970 = arith.addi %969, %c2_i32_566 : i32
    %971 = arith.index_cast %970 : i32 to index
    %972 = memref.load %arg0[%971] : memref<48xi32, #tpu.memory_space<smem>>
    %c2_i32_567 = arith.constant 2 : i32
    %973 = arith.muli %c2_i32_567, %972 : i32
    %c1_i32_568 = arith.constant 1 : i32
    %974 = arith.addi %973, %c1_i32_568 : i32
    %975 = arith.index_cast %974 : i32 to index
    %c0_569 = arith.constant 0 : index
    %976 = vector.load %arg11[%975, %c0_569] : memref<18x128xf32, #tpu.memory_space<vmem>>, vector<1x128xf32>
    %977 = tpu.concatenate %931, %940, %949, %958, %967, %976 in 0 : vector<1x128xf32>, vector<1x128xf32>, vector<1x128xf32>, vector<1x128xf32>, vector<1x128xf32>, vector<1x128xf32> -> vector<6x128xf32>
    %978 = arith.addf %931, %940 : vector<1x128xf32>
    %979 = arith.addf %978, %949 : vector<1x128xf32>
    %980 = arith.addf %958, %967 : vector<1x128xf32>
    %981 = arith.addf %980, %976 : vector<1x128xf32>
    %982 = tpu.concatenate %979, %981 in 0 : vector<1x128xf32>, vector<1x128xf32> -> vector<2x128xf32>
    %c0_570 = arith.constant 0 : index
    %c0_571 = arith.constant 0 : index
    %983 = vector.load %arg2[%c0_570, %c0_571] : memref<256x64xf32, #tpu.memory_space<vmem>>, vector<64x64xf32>
    %cst_572 = arith.constant dense<0.000000e+00> : vector<2x64xf32>
    %984 = tpu.matmul %922, %983, %cst_572 {dimension_numbers = #tpu.dot_dimension_numbers<[1], [0], [0], [1], [0, 0, 1, 1], [], []>} : vector<2x64xf32>, vector<64x64xf32>, vector<2x64xf32> -> vector<2x64xf32>
    %985 = vector.extract_strided_slice %984 {offsets = [0, 0], sizes = [1, 64], strides = [1, 1]} : vector<2x64xf32> to vector<1x64xf32>
    %986 = vector.extract_strided_slice %984 {offsets = [1, 0], sizes = [1, 64], strides = [1, 1]} : vector<2x64xf32> to vector<1x64xf32>
    %987 = tpu.concatenate %985, %985, %985, %986, %986, %986 in 0 : vector<1x64xf32>, vector<1x64xf32>, vector<1x64xf32>, vector<1x64xf32>, vector<1x64xf32>, vector<1x64xf32> -> vector<6x64xf32>
    %c0_573 = arith.constant 0 : index
    %c0_574 = arith.constant 0 : index
    %988 = vector.load %arg3[%c0_573, %c0_574] : memref<512x64xf32, #tpu.memory_space<vmem>>, vector<128x64xf32>
    %cst_575 = arith.constant dense<0.000000e+00> : vector<6x64xf32>
    %989 = tpu.matmul %977, %988, %cst_575 {dimension_numbers = #tpu.dot_dimension_numbers<[1], [0], [0], [1], [0, 0, 1, 1], [], []>} : vector<6x128xf32>, vector<128x64xf32>, vector<6x64xf32> -> vector<6x64xf32>
    %990 = arith.addf %989, %987 : vector<6x64xf32>
    %c0_576 = arith.constant 0 : index
    %c0_577 = arith.constant 0 : index
    %991 = vector.load %arg4[%c0_576, %c0_577] : memref<4x64xf32, #tpu.memory_space<vmem>>, vector<1x64xf32>
    %992 = vector.broadcast %991 : vector<1x64xf32> to vector<6x64xf32>
    %993 = arith.addf %990, %992 : vector<6x64xf32>
    %994 = arith.negf %993 : vector<6x64xf32>
    %995 = math.exp %994 : vector<6x64xf32>
    %cst_578 = arith.constant 1.000000e+00 : f32
    %996 = vector.broadcast %cst_578 : f32 to vector<6x64xf32>
    %997 = arith.addf %996, %995 : vector<6x64xf32>
    %998 = arith.divf %996, %997 : vector<6x64xf32>
    %999 = vector.extract_strided_slice %977 {offsets = [0, 0], sizes = [6, 64], strides = [1, 1]} : vector<6x128xf32> to vector<6x64xf32>
    %1000 = arith.mulf %998, %999 : vector<6x64xf32>
    %1001 = vector.extract_strided_slice %1000 {offsets = [0, 0], sizes = [3, 64], strides = [1, 1]} : vector<6x64xf32> to vector<3x64xf32>
    %cst_579 = arith.constant dense<0.000000e+00> : vector<64xf32>
    %1002 = vector.multi_reduction <add>, %1001, %cst_579 [0] : vector<3x64xf32> to vector<64xf32>
    %1003 = vector.shape_cast %1002 : vector<64xf32> to vector<1x64xf32>
    %1004 = vector.extract_strided_slice %1000 {offsets = [3, 0], sizes = [3, 64], strides = [1, 1]} : vector<6x64xf32> to vector<3x64xf32>
    %cst_580 = arith.constant dense<0.000000e+00> : vector<64xf32>
    %1005 = vector.multi_reduction <add>, %1004, %cst_580 [0] : vector<3x64xf32> to vector<64xf32>
    %1006 = vector.shape_cast %1005 : vector<64xf32> to vector<1x64xf32>
    %1007 = tpu.concatenate %1003, %1006 in 0 : vector<1x64xf32>, vector<1x64xf32> -> vector<2x64xf32>
    %c64_581 = arith.constant 64 : index
    %c0_582 = arith.constant 0 : index
    %1008 = vector.load %arg2[%c64_581, %c0_582] : memref<256x64xf32, #tpu.memory_space<vmem>>, vector<64x64xf32>
    %cst_583 = arith.constant dense<0.000000e+00> : vector<2x64xf32>
    %1009 = tpu.matmul %922, %1008, %cst_583 {dimension_numbers = #tpu.dot_dimension_numbers<[1], [0], [0], [1], [0, 0, 1, 1], [], []>} : vector<2x64xf32>, vector<64x64xf32>, vector<2x64xf32> -> vector<2x64xf32>
    %c128_584 = arith.constant 128 : index
    %c0_585 = arith.constant 0 : index
    %1010 = vector.load %arg3[%c128_584, %c0_585] : memref<512x64xf32, #tpu.memory_space<vmem>>, vector<128x64xf32>
    %cst_586 = arith.constant dense<0.000000e+00> : vector<2x64xf32>
    %1011 = tpu.matmul %982, %1010, %cst_586 {dimension_numbers = #tpu.dot_dimension_numbers<[1], [0], [0], [1], [0, 0, 1, 1], [], []>} : vector<2x128xf32>, vector<128x64xf32>, vector<2x64xf32> -> vector<2x64xf32>
    %1012 = arith.addf %1009, %1011 : vector<2x64xf32>
    %c1_587 = arith.constant 1 : index
    %c0_588 = arith.constant 0 : index
    %1013 = vector.load %arg4[%c1_587, %c0_588] : memref<4x64xf32, #tpu.memory_space<vmem>>, vector<1x64xf32>
    %1014 = vector.broadcast %1013 : vector<1x64xf32> to vector<2x64xf32>
    %1015 = arith.addf %1012, %1014 : vector<2x64xf32>
    %1016 = arith.negf %1015 : vector<2x64xf32>
    %1017 = math.exp %1016 : vector<2x64xf32>
    %cst_589 = arith.constant 1.000000e+00 : f32
    %1018 = vector.broadcast %cst_589 : f32 to vector<2x64xf32>
    %1019 = arith.addf %1018, %1017 : vector<2x64xf32>
    %1020 = arith.divf %1018, %1019 : vector<2x64xf32>
    %c128_590 = arith.constant 128 : index
    %c0_591 = arith.constant 0 : index
    %1021 = vector.load %arg2[%c128_590, %c0_591] : memref<256x64xf32, #tpu.memory_space<vmem>>, vector<64x64xf32>
    %cst_592 = arith.constant dense<0.000000e+00> : vector<2x64xf32>
    %1022 = tpu.matmul %922, %1021, %cst_592 {dimension_numbers = #tpu.dot_dimension_numbers<[1], [0], [0], [1], [0, 0, 1, 1], [], []>} : vector<2x64xf32>, vector<64x64xf32>, vector<2x64xf32> -> vector<2x64xf32>
    %c256_593 = arith.constant 256 : index
    %c0_594 = arith.constant 0 : index
    %1023 = vector.load %arg3[%c256_593, %c0_594] : memref<512x64xf32, #tpu.memory_space<vmem>>, vector<128x64xf32>
    %cst_595 = arith.constant dense<0.000000e+00> : vector<2x64xf32>
    %1024 = tpu.matmul %982, %1023, %cst_595 {dimension_numbers = #tpu.dot_dimension_numbers<[1], [0], [0], [1], [0, 0, 1, 1], [], []>} : vector<2x128xf32>, vector<128x64xf32>, vector<2x64xf32> -> vector<2x64xf32>
    %1025 = arith.addf %1022, %1024 : vector<2x64xf32>
    %c2_596 = arith.constant 2 : index
    %c0_597 = arith.constant 0 : index
    %1026 = vector.load %arg4[%c2_596, %c0_597] : memref<4x64xf32, #tpu.memory_space<vmem>>, vector<1x64xf32>
    %1027 = vector.broadcast %1026 : vector<1x64xf32> to vector<2x64xf32>
    %1028 = arith.addf %1025, %1027 : vector<2x64xf32>
    %1029 = arith.negf %1028 : vector<2x64xf32>
    %1030 = math.exp %1029 : vector<2x64xf32>
    %cst_598 = arith.constant 1.000000e+00 : f32
    %1031 = vector.broadcast %cst_598 : f32 to vector<2x64xf32>
    %1032 = arith.addf %1031, %1030 : vector<2x64xf32>
    %1033 = arith.divf %1031, %1032 : vector<2x64xf32>
    %c192_599 = arith.constant 192 : index
    %c0_600 = arith.constant 0 : index
    %1034 = vector.load %arg2[%c192_599, %c0_600] : memref<256x64xf32, #tpu.memory_space<vmem>>, vector<64x64xf32>
    %cst_601 = arith.constant dense<0.000000e+00> : vector<2x64xf32>
    %1035 = tpu.matmul %922, %1034, %cst_601 {dimension_numbers = #tpu.dot_dimension_numbers<[1], [0], [0], [1], [0, 0, 1, 1], [], []>} : vector<2x64xf32>, vector<64x64xf32>, vector<2x64xf32> -> vector<2x64xf32>
    %c384_602 = arith.constant 384 : index
    %c0_603 = arith.constant 0 : index
    %1036 = vector.load %arg3[%c384_602, %c0_603] : memref<512x64xf32, #tpu.memory_space<vmem>>, vector<128x64xf32>
    %cst_604 = arith.constant dense<0.000000e+00> : vector<2x64xf32>
    %1037 = tpu.matmul %982, %1036, %cst_604 {dimension_numbers = #tpu.dot_dimension_numbers<[1], [0], [0], [1], [0, 0, 1, 1], [], []>} : vector<2x128xf32>, vector<128x64xf32>, vector<2x64xf32> -> vector<2x64xf32>
    %1038 = arith.addf %1035, %1037 : vector<2x64xf32>
    %c3_605 = arith.constant 3 : index
    %c0_606 = arith.constant 0 : index
    %1039 = vector.load %arg4[%c3_605, %c0_606] : memref<4x64xf32, #tpu.memory_space<vmem>>, vector<1x64xf32>
    %1040 = vector.broadcast %1039 : vector<1x64xf32> to vector<2x64xf32>
    %1041 = arith.addf %1038, %1040 : vector<2x64xf32>
    %1042 = math.tanh %1041 : vector<2x64xf32>
    %1043 = arith.mulf %1020, %1042 : vector<2x64xf32>
    %1044 = arith.addf %1043, %1007 : vector<2x64xf32>
    %1045 = math.tanh %1044 : vector<2x64xf32>
    %1046 = arith.mulf %1033, %1045 : vector<2x64xf32>
    %1047 = tpu.concatenate %1044, %1046 in 1 : vector<2x64xf32>, vector<2x64xf32> -> vector<2x128xf32>
    %c2_i32_607 = arith.constant 2 : i32
    %1048 = arith.muli %c2_i32_607, %c7_i32 : i32
    %1049 = arith.index_cast %1048 : i32 to index
    %c0_608 = arith.constant 0 : index
    %1050 = vector.load %arg11[%1049, %c0_608] : memref<18x128xf32, #tpu.memory_space<vmem>>, vector<2x128xf32>
    tpu.vector_store %arg11[%1049, %c0_608], %1047 {strides = array<i32>} : memref<18x128xf32, #tpu.memory_space<vmem>>, vector<2x128xf32>,
    %c8_i32 = arith.constant 8 : i32
    %1051 = vector.extract_strided_slice %1047 {offsets = [0, 0], sizes = [2, 64], strides = [1, 1]} : vector<2x128xf32> to vector<2x64xf32>
    %1052 = vector.extract_strided_slice %1051 {offsets = [0, 0], sizes = [1, 64], strides = [1, 1]} : vector<2x64xf32> to vector<1x64xf32>
    %1053 = vector.extract_strided_slice %1051 {offsets = [1, 0], sizes = [1, 64], strides = [1, 1]} : vector<2x64xf32> to vector<1x64xf32>
    %1054 = arith.mulf %1052, %1053 : vector<1x64xf32>
    %1055 = arith.subf %1052, %1053 : vector<1x64xf32>
    %1056 = math.absf %1055 : vector<1x64xf32>
    %c0_609 = arith.constant 0 : index
    %c0_610 = arith.constant 0 : index
    %1057 = vector.load %arg5[%c0_609, %c0_610] : memref<64x32xf32, #tpu.memory_space<vmem>>, vector<64x32xf32>
    %cst_611 = arith.constant dense<0.000000e+00> : vector<1x32xf32>
    %1058 = tpu.matmul %1054, %1057, %cst_611 {dimension_numbers = #tpu.dot_dimension_numbers<[1], [0], [0], [1], [0, 0, 1, 1], [], []>} : vector<1x64xf32>, vector<64x32xf32>, vector<1x32xf32> -> vector<1x32xf32>
    %c0_612 = arith.constant 0 : index
    %c0_613 = arith.constant 0 : index
    %1059 = vector.load %arg6[%c0_612, %c0_613] : memref<64x32xf32, #tpu.memory_space<vmem>>, vector<64x32xf32>
    %cst_614 = arith.constant dense<0.000000e+00> : vector<1x32xf32>
    %1060 = tpu.matmul %1056, %1059, %cst_614 {dimension_numbers = #tpu.dot_dimension_numbers<[1], [0], [0], [1], [0, 0, 1, 1], [], []>} : vector<1x64xf32>, vector<64x32xf32>, vector<1x32xf32> -> vector<1x32xf32>
    %1061 = arith.addf %1058, %1060 : vector<1x32xf32>
    %c0_615 = arith.constant 0 : index
    %c0_616 = arith.constant 0 : index
    %1062 = vector.load %arg7[%c0_615, %c0_616] : memref<1x32xf32, #tpu.memory_space<vmem>>, vector<1x32xf32>
    %1063 = arith.addf %1061, %1062 : vector<1x32xf32>
    %1064 = arith.negf %1063 : vector<1x32xf32>
    %1065 = math.exp %1064 : vector<1x32xf32>
    %cst_617 = arith.constant 1.000000e+00 : f32
    %1066 = vector.broadcast %cst_617 : f32 to vector<1x32xf32>
    %1067 = arith.addf %1066, %1065 : vector<1x32xf32>
    %1068 = arith.divf %1066, %1067 : vector<1x32xf32>
    %c0_618 = arith.constant 0 : index
    %c0_619 = arith.constant 0 : index
    %1069 = vector.load %arg8[%c0_618, %c0_619] : memref<32x5xf32, #tpu.memory_space<vmem>>, vector<32x5xf32>
    %cst_620 = arith.constant dense<0.000000e+00> : vector<1x5xf32>
    %1070 = tpu.matmul %1068, %1069, %cst_620 {dimension_numbers = #tpu.dot_dimension_numbers<[1], [0], [0], [1], [0, 0, 1, 1], [], []>} : vector<1x32xf32>, vector<32x5xf32>, vector<1x5xf32> -> vector<1x5xf32>
    %c0_621 = arith.constant 0 : index
    %c0_622 = arith.constant 0 : index
    %1071 = vector.load %arg9[%c0_621, %c0_622] : memref<1x5xf32, #tpu.memory_space<vmem>>, vector<1x5xf32>
    %1072 = arith.addf %1070, %1071 : vector<1x5xf32>
    %cst_623 = arith.constant dense<0xFF800000> : vector<1xf32>
    %1073 = vector.multi_reduction <maximumf>, %1072, %cst_623 [1] : vector<1x5xf32> to vector<1xf32>
    %1074 = vector.shape_cast %1073 : vector<1xf32> to vector<1x1xf32>
    %1075 = vector.broadcast %1074 : vector<1x1xf32> to vector<1x5xf32>
    %1076 = arith.subf %1072, %1075 : vector<1x5xf32>
    %1077 = math.exp %1076 : vector<1x5xf32>
    %cst_624 = arith.constant dense<0.000000e+00> : vector<1xf32>
    %1078 = vector.multi_reduction <add>, %1077, %cst_624 [1] : vector<1x5xf32> to vector<1xf32>
    %1079 = vector.shape_cast %1078 : vector<1xf32> to vector<1x1xf32>
    %1080 = vector.broadcast %1079 : vector<1x1xf32> to vector<1x5xf32>
    %1081 = arith.divf %1077, %1080 : vector<1x5xf32>
    %c0_625 = arith.constant 0 : index
    %c0_626 = arith.constant 0 : index
    %1082 = vector.load %arg10[%c0_625, %c0_626] : memref<1x5xf32, #tpu.memory_space<vmem>>, vector<1x5xf32>
    tpu.vector_store %arg10[%c0_625, %c0_626], %1081 {strides = array<i32>} : memref<1x5xf32, #tpu.memory_space<vmem>>, vector<1x5xf32>,
    return
  }
}

</mosaic_0001>

<bundles_post_ra>
// kernel: fwd.1
= control target key start
LH: loop header
LB: loop body
LE: loop exit
PB: predicated region body
PF: predicated region fallthrough
CT: control target
= control target key end

     0   :  { %15 = vsyncpa [#allocation5], 0  ;;  %s14164_s0 = inlined_call_operand.vmem [shape: s32[48], index: 0, kind: input, shape index: {}]   ;;  %s14165_s1 = inlined_call_operand.vmem [shape: f32[16,64], index: 1, kind: input, shape index: {}]   ;;  %s14166_s2 = inlined_call_operand.vmem [shape: f32[256,64], index: 2, kind: input, shape index: {}]   ;;  %s14167_s3 = inlined_call_operand.vmem [shape: f32[512,64], index: 3, kind: input, shape index: {}]   ;;  %s14168_s4 = inlined_call_operand.vmem [shape: f32[4,64], index: 4, kind: input, shape index: {}]   ;;  %s14169_s5 = inlined_call_operand.vmem [shape: f32[64,32], index: 5, kind: input, shape index: {}]   ;;  %s14170_s6 = inlined_call_operand.vmem [shape: f32[64,32], index: 6, kind: input, shape index: {}]   ;;  %s14171_s7 = inlined_call_operand.vmem [shape: f32[1,32], index: 7, kind: input, shape index: {}]   ;;  %s14172_s8 = inlined_call_operand.vmem [shape: f32[32,5], index: 8, kind: input, shape index: {}]   ;;  %s14173_s9 = inlined_call_operand.vmem [shape: f32[1,5], index: 9, kind: input, shape index: {}]   ;;  %s14174_s10 = inlined_call_operand.hbm [shape: f32[1,5], index: 10, kind: output, shape index: {}]  }
   0x1   :  { %16 = vsyncpa [#allocation4], 0  ;;  %s23_s15 = sshll.u32 %s14164_s0, 4  ;;  %s24_s15 = int_to_ptr.vmem [resolvable:$true] %s23_s15 }
   0x2   :  { %s11035_s16 = scalar_lea.vmem %s24_s15, 16  ;;  %p11040_p1 = scmp.lt.s32.totalorder %s24_s15, %s24_s15 }
   0x3   :  { %p11036_p0 = scmp.ne.s32.totalorder %s24_s15, %s11035_s16  ;;  %p11041_p2 = scmp.lt.s32.totalorder %s11035_s16, %s11035_s16 }
   0x5   :  { %p11042_p3 = por %p11041_p2, %p11040_p1 }
   0x7   :  { %p11043_p4 = pnand %p11042_p3, %p11036_p0 }
   0x9   :  { %11046 = shalt.err (!%p11043_p4)
}
   0xa   :  { %s11073_s17 = smov [#allocation3]  }
   0xb   :  { %26 = dma.vmem_to_smem %s24_s15, 16, %s11073_s17, [#allocation5]  }
   0xc   :  { %11069 = dma.done.wait [#allocation5], 16  }
   0xd   :  { %11070 = vsyncadd [#allocation5], 4294967280 }
   0xe   :  { %48 = sfence }
   0xf   :  { %v111_v0 = vld [vmem:[%s14166_s2] sm:$0xff]  ;;  %v112_v1 = vld [vmem:[%s14166_s2 + $0x8] sm:$0xff]  ;;  %v11074_v3 = vmov 0.0|0.0   ;;  %v113_v6 = vld [vmem:[%s14166_s2 + $0x10] sm:$0xff]  ;;  %v11075_v8 = vmov 0.0   ;;  %vm11076_vm0 = vmmov 0  }
  0x10   :  { %v207_v2 = vld [vmem:[%s14167_s3] sm:$0xff]  ;;  %9711 = vmatprep.subr.bf16.mxu0 %v11074_v3  ;;  %9723 = vmatprep.subr.bf16.mxu1 %v11074_v3  ;;  %v11148_v4 = vpack.c.bf16 %v112_v1, %v111_v0  ;;  %v208_v5 = vld [vmem:[%s14167_s3 + $0x8] sm:$0xff]  ;;  %v114_v7 = vld [vmem:[%s14166_s2 + $0x18] sm:$0xff]  ;;  %49 = vst [vmem:[#allocation2 + $0x10] sm:$0x3] %v11075_v8  ;;  %s11172_s13 = sld [smem:[#allocation3 + $0x1]] }
  0x11   :  { %v11160_v9 = vpack.c.bf16 %v208_v5, %v207_v2  ;;  %v209_v10 = vld [vmem:[%s14167_s3 + $0x10] sm:$0xff]  ;;  %v210_v11 = vld [vmem:[%s14167_s3 + $0x18] sm:$0xff]  ;;  %7950 = vmatprep.mubr.msk.f32.mxu0 %vm11076_vm0, %v11075_v8  ;;  %7985 = vmatprep.mubr.msk.f32.mxu1 %vm11076_vm0, %v11075_v8  ;;  %v11175_v12 = vpack.c.bf16 %v114_v7, %v113_v6  ;;  %s11177_s14 = sld [smem:[#allocation3]]  ;;  %s11179_s15 = sld [smem:[#allocation3 + $0x2]]  ;;  %v115_v14 = vld [vmem:[%s14166_s2 + $0x20] sm:$0xff]  ;;  %vm119_vm1 = vcmask 523264  }
  0x12   :  { %9713 = vmatpush3.bf16.msra.mxu0 %v11148_v4  ;;  %v11183_v13 = vpack.c.bf16 %v210_v11, %v209_v10  ;;  %v116_v15 = vld [vmem:[%s14166_s2 + $0x28] sm:$0xff]  ;;  %v211_v16 = vld [vmem:[%s14167_s3 + $0x20] sm:$0xff]  ;;  %s11198_s23 = sld [smem:[#allocation3 + $0x3]]  ;;  %v117_v20 = vld [vmem:[%s14166_s2 + $0x30] sm:$0xff]  ;;  %s11214_s29 = sld [smem:[#allocation3 + $0x4]]  ;;  %vm93_vm2 = vcmask 1040384  }
  0x13   :  { %9725 = vmatpush3.bf16.msra.mxu1 %v11160_v9  ;;  %9714 = vmatprep.subr.bf16.mxu0 %v11074_v3  ;;  %v212_v17 = vld [vmem:[%s14167_s3 + $0x28] sm:$0xff]  ;;  %v11201_v18 = vpack.c.bf16 %v116_v15, %v115_v14  ;;  %v118_v21 = vld [vmem:[%s14166_s2 + $0x38] sm:$0xff]  ;;  %v213_v22 = vld [vmem:[%s14167_s3 + $0x30] sm:$0xff]  ;;  %vm95_vm3 = vcmask 1041408   ;;  %vm97_vm4 = vcmask 1042432   ;;  %vm99_vm5 = vcmask 1043456  }
  0x14   :  { %9726 = vmatprep.subr.bf16.mxu1 %v11074_v3  ;;  %v11205_v19 = vpack.c.bf16 %v212_v17, %v211_v16  ;;  %v214_v23 = vld [vmem:[%s14167_s3 + $0x38] sm:$0xff]  ;;  %v11225_v24 = vpack.c.bf16 %v118_v21, %v117_v20  ;;  %v333_v26 = vld [vmem:[%s14167_s3 + $0x80] sm:$0xff]  ;;  %v334_v27 = vld [vmem:[%s14167_s3 + $0x88] sm:$0xff]  ;;  %vm101_vm6 = vcmask 1044480   ;;  %vm306_vm7 = vcmask 518144   ;;  %s11077_s12 = smov 64  }
  0x15   :  { %v11232_v25 = vpack.c.bf16 %v214_v23, %v213_v22  ;;  %v215_v28 = vld [vmem:[%s14167_s3 + $0x40] sm:$0xff]  ;;  %v216_v29 = vld [vmem:[%s14167_s3 + $0x48] sm:$0xff]  ;;  %v11256_v32 = vpack.c.bf16 %v334_v27, %v333_v26  ;;  %v335_v33 = vld [vmem:[%s14167_s3 + $0x90] sm:$0xff]  ;;  %s6902_s20 = sld [smem:[#allocation3 + $0xa]]  ;;  %s6905_s21 = sld [smem:[#allocation3 + $0xb]]  ;;  %vm6646_vm8 = vcmask 261120  }
  0x16   :  { %9716 = vmatpush3.bf16.msra.mxu0 %v11175_v12  ;;  %s6870_s28 = sshll.u32 %s11172_s13, 1  ;;  %s11228_s13 = sld [smem:[#allocation3 + $0x5]]  ;;  %v11254_v31 = vld [vmem:[%s14165_s1] sm:$0x3]  ;;  %v11263_v34 = vpack.c.bf16 %v216_v29, %v215_v28  ;;  %v336_v35 = vld [vmem:[%s14167_s3 + $0x98] sm:$0xff]  ;;  %v217_v38 = vld [vmem:[%s14167_s3 + $0x50] sm:$0xff] }
  0x17   :  { %9728 = vmatpush3.bf16.msra.mxu1 %v11183_v13  ;;  %9717 = vmatprep.subr.bf16.mxu0 %v11074_v3  ;;  %s6872_s17 = sshll.u32 %s11179_s15, 1  ;;  %s6868_s18 = sshll.u32 %s11177_s14, 1  ;;  %v218_v39 = vld [vmem:[%s14167_s3 + $0x58] sm:$0xff]  ;;  %v11284_v41 = vpack.c.bf16 %v336_v35, %v335_v33  ;;  %v337_v45 = vld [vmem:[%s14167_s3 + $0xa0] sm:$0xff]  ;;  %v338_v46 = vld [vmem:[%s14167_s3 + $0xa8] sm:$0xff]  ;;  %vm6720_vm9 = vcmask 32768  }
  0x18   :  { %9729 = vmatprep.subr.bf16.mxu1 %v11074_v3  ;;  %s57_s25 = scalar_lea.vmem [#allocation2], %s6870_s28  ;;  %s6874_s26 = sshll.u32 %s11198_s23, 1  ;;  %v11292_v44 = vpack.c.bf16 %v218_v39, %v217_v38  ;;  %v219_v48 = vld [vmem:[%s14167_s3 + $0x60] sm:$0xff]  ;;  %v220_v49 = vld [vmem:[%s14167_s3 + $0x68] sm:$0xff]  ;;  %v11310_v52 = vpack.c.bf16 %v338_v46, %v337_v45  ;;  %v339_v55 = vld [vmem:[%s14167_s3 + $0xb0] sm:$0xff] }
  0x19   :  { %v11247_v30 = vld [vmem:[%s57_s25] sm:$0x1]  ;;  %s61_s16 = scalar_lea.vmem [#allocation2], %s6872_s17  ;;  %s6877_s19 = sshll.u32 %s11214_s29, 1  ;;  %v11315_v54 = vpack.c.bf16 %v220_v49, %v219_v48  ;;  %v340_v56 = vld [vmem:[%s14167_s3 + $0xb8] sm:$0xff]  ;;  %v221_v57 = vld [vmem:[%s14167_s3 + $0x70] sm:$0xff] }
  0x1a   :  { %9719 = vmatpush3.bf16.msra.mxu0 %v11201_v18  ;;  %v11268_v36 = vld [vmem:[%s61_s16] sm:$0x1]  ;;  %v79_v37 = vrot.slane %v11247_v30, 7  ;;  %s53_s14 = scalar_lea.vmem [#allocation2], %s6868_s18  ;;  %s6755_s29 = scalar_lea.vmem [#allocation2], %s6874_s26  ;;  %v222_v58 = vld [vmem:[%s14167_s3 + $0x78] sm:$0xff]  ;;  %v11332_v62 = vpack.c.bf16 %v340_v56, %v339_v55 }
  0x1b   :  { %9731 = vmatpush3.bf16.msra.mxu1 %v11205_v19  ;;  %9720 = vmatprep.subr.bf16.mxu0 %v11074_v3  ;;  %v11279_v40 = vld [vmem:[%s53_s14] sm:$0x1]  ;;  %v6875_v42 = vld [vmem:[%s6755_s29 + $0x1] sm:$0x1]  ;;  %v82_v43 = vrot.slane %v11268_v36, 6  ;;  %s6758_s11 = scalar_lea.vmem [#allocation2], %s6877_s19  ;;  %v11336_v63 = vpack.c.bf16 %v222_v58, %v221_v57 }
  0x1c   :  { %9732 = vmatprep.subr.bf16.mxu1 %v11074_v3  ;;  %s6880_s17 = sshll.u32 %s11228_s13, 1  ;;  %v94_v47 = vsel %vm93_vm2, %v11279_v40, %v79_v37  ;;  %v6878_v50 = vld [vmem:[%s6758_s11 + $0x1] sm:$0x1]  ;;  %v85_v51 = vrot.slane %v6875_v42, 5  ;;  %v342_v2 = vld [vmem:[%s14167_s3 + $0xc8] sm:$0xff]  ;;  %v343_v15 = vld [vmem:[%s14167_s3 + $0xd0] sm:$0xff]  ;;  %v103_v35 = vadd.f32 %v11247_v30, %v11279_v40 }
  0x1d   :  { %v96_v53 = vsel %vm95_vm3, %v94_v47, %v82_v43  ;;  %s6761_s15 = scalar_lea.vmem [#allocation2], %s6880_s17  ;;  %v88_v60 = vrot.slane %v6878_v50, 4  ;;  %v341_v1 = vld [vmem:[%s14167_s3 + $0xc0] sm:$0xff]  ;;  %v326_v7 = vld [vmem:[%s14166_s2 + $0x48] sm:$0xff]  ;;  %v344_v16 = vld [vmem:[%s14167_s3 + $0xd8] sm:$0xff]  ;;  %v105_v22 = vadd.f32 %v6878_v50, %v6875_v42  ;;  %s6893_s23 = sld [smem:[#allocation3 + $0x6]] }
  0x1e   :  { %9722 = vmatpush3.bf16.msra.mxu0 %v11225_v24  ;;  %v6881_v59 = vld [vmem:[%s6761_s15 + $0x1] sm:$0x1]  ;;  %v98_v61 = vsel %vm97_vm4, %v96_v53, %v85_v51  ;;  %v11353_v10 = vpack.c.bf16 %v342_v2, %v341_v1  ;;  %v327_v17 = vld [vmem:[%s14166_s2 + $0x50] sm:$0xff]  ;;  %v328_v20 = vld [vmem:[%s14166_s2 + $0x58] sm:$0xff]  ;;  %v11377_v21 = vpack.c.bf16 %v344_v16, %v343_v15  ;;  %v104_v45 = vadd.f32 %v103_v35, %v11268_v36  ;;  %s6895_s28 = sld [smem:[#allocation3 + $0x7]]  ;;  %s6897_s16 = sld [smem:[#allocation3 + $0x8]] }
  0x1f   :  { %9734 = vmatpush3.bf16.msra.mxu1 %v11232_v25  ;;  %9747 = vmatprep.subr.bf16.mxu0 %v11074_v3  ;;  %v91_v0 = vrot.slane %v6881_v59, 3  ;;  %v100_v5 = vsel %vm99_vm5, %v98_v61, %v88_v60  ;;  %v325_v6 = vld [vmem:[%s14166_s2 + $0x40] sm:$0xff]  ;;  %v11381_v23 = vpack.c.bf16 %v328_v20, %v327_v17  ;;  %v346_v27 = vld [vmem:[%s14167_s3 + $0xe8] sm:$0xff]  ;;  %v106_v37 = vadd.f32 %v6881_v59, %v105_v22  ;;  %v347_v39 = vld [vmem:[%s14167_s3 + $0xf0] sm:$0xff]  ;;  %s6899_s19 = sld [smem:[#allocation3 + $0x9]]  ;;  %s6903_s17 = sshll.u32 %s6902_s20, 1 }
  0x20   :  { %9735 = vmatprep.subr.bf16.mxu1 %v11074_v3  ;;  %v11360_v14 = vpack.c.bf16 %v326_v7, %v325_v6  ;;  %v345_v26 = vld [vmem:[%s14167_s3 + $0xe0] sm:$0xff]  ;;  %v330_v29 = vld [vmem:[%s14166_s2 + $0x68] sm:$0xff]  ;;  %v348_v42 = vld [vmem:[%s14167_s3 + $0xf8] sm:$0xff]  ;;  %s6906_s18 = sshll.u32 %s6905_s21, 1  ;;  %s6773_s26 = scalar_lea.vmem [#allocation2], %s6903_s17 }
  0x21   :  { %7951 = vmatmul.mubr.msk.f32.vlgmr.msra.gmra.mrb[0].mxu0 %vm119_vm1, %v11254_v31  ;;  %v11357_v11 = vsel %vm101_vm6, %v100_v5, %v91_v0  ;;  %v329_v28 = vld [vmem:[%s14166_s2 + $0x60] sm:$0xff]  ;;  %v11399_v33 = vpack.c.bf16 %v346_v27, %v345_v26  ;;  %v331_v30 = vld [vmem:[%s14166_s2 + $0x70] sm:$0xff]  ;;  %v332_v40 = vld [vmem:[%s14166_s2 + $0x78] sm:$0xff]  ;;  %v11421_v43 = vpack.c.bf16 %v348_v42, %v347_v39  ;;  %v108_v46 = vrot.slane %v106_v37, 7  ;;  %s6776_s27 = scalar_lea.vmem [#allocation2], %s6906_s18  ;;  %s6928_s20 = sld [smem:[#allocation3 + $0x10]] }
  0x22   :  { %9749 = vmatpush3.bf16.msra.mxu0 %v11256_v32  ;;  %8020 = vmatprep.mubr.msk.f32.mxu0 %vm11076_vm0, %v11075_v8  ;;  %v11405_v38 = vpack.c.bf16 %v330_v29, %v329_v28  ;;  %v11426_v47 = vpack.c.bf16 %v332_v40, %v331_v30  ;;  %v509_v48 = vld [vmem:[%s14167_s3 + $0x100] sm:$0xff]  ;;  %v510_v49 = vld [vmem:[%s14167_s3 + $0x108] sm:$0xff]  ;;  %v511_v56 = vld [vmem:[%s14167_s3 + $0x110] sm:$0xff]  ;;  %s6931_s21 = sld [smem:[#allocation3 + $0x11]]  ;;  %s7055_s30 = sld [smem:[#allocation3 + $0x2d]] }
  0x23   :  { %9737 = vmatpush3.bf16.msra.mxu1 %v11263_v34  ;;  %9750 = vmatprep.subr.bf16.mxu0 %v11074_v3  ;;  %v501_v36 = vld [vmem:[%s14166_s2 + $0x80] sm:$0xff]  ;;  %v502_v50 = vld [vmem:[%s14166_s2 + $0x88] sm:$0xff]  ;;  %v11443_v51 = vsel %vm93_vm2, %v104_v45, %v108_v46  ;;  %v11445_v53 = vpack.c.bf16 %v510_v49, %v509_v48  ;;  %v512_v57 = vld [vmem:[%s14167_s3 + $0x118] sm:$0xff]  ;;  %s6894_s0 = sshll.u32 %s6893_s23, 1  ;;  %s6919_s23 = sld [smem:[#allocation3 + $0xc]] }
  0x24   :  { %9738 = vmatprep.subr.bf16.mxu1 %v11074_v3  ;;  %v11449_v55 = vpack.c.bf16 %v502_v50, %v501_v36  ;;  %v503_v58 = vld [vmem:[%s14166_s2 + $0x90] sm:$0xff]  ;;  %v504_v59 = vld [vmem:[%s14166_s2 + $0x98] sm:$0xff]  ;;  %v11468_v60 = vpack.c.bf16 %v512_v57, %v511_v56  ;;  %v513_v0 = vld [vmem:[%s14167_s3 + $0x120] sm:$0xff]  ;;  %s6896_s15 = sshll.u32 %s6895_s28, 1  ;;  %s6898_s14 = sshll.u32 %s6897_s16, 1 }
  0x25   :  { %v11472_v61 = vpack.c.bf16 %v504_v59, %v503_v58  ;;  %v514_v1 = vld [vmem:[%s14167_s3 + $0x128] sm:$0xff]  ;;  %v505_v2 = vld [vmem:[%s14166_s2 + $0xa0] sm:$0xff]  ;;  %v515_v15 = vld [vmem:[%s14167_s3 + $0x130] sm:$0xff]  ;;  %s6900_s29 = sshll.u32 %s6899_s19, 1  ;;  %s861_s22 = scalar_lea.vmem [#allocation2], %s6894_s0 }
  0x26   :  { %9752 = vmatpush3.bf16.msra.mxu0 %v11284_v41  ;;  %v506_v5 = vld [vmem:[%s14166_s2 + $0xa8] sm:$0xff]  ;;  %v11492_v6 = vpack.c.bf16 %v514_v1, %v513_v0  ;;  %v516_v16 = vld [vmem:[%s14167_s3 + $0x138] sm:$0xff]  ;;  %v507_v17 = vld [vmem:[%s14166_s2 + $0xb0] sm:$0xff]  ;;  %s865_s24 = scalar_lea.vmem [#allocation2], %s6896_s15  ;;  %s869_s25 = scalar_lea.vmem [#allocation2], %s6898_s14 }
  0x27   :  { %9740 = vmatpush3.bf16.msra.mxu1 %v11292_v44  ;;  %9753 = vmatprep.subr.bf16.mxu0 %v11074_v3  ;;  %v11496_v7 = vpack.c.bf16 %v506_v5, %v505_v2  ;;  %v508_v20 = vld [vmem:[%s14166_s2 + $0xb8] sm:$0xff]  ;;  %v11512_v22 = vpack.c.bf16 %v516_v16, %v515_v15  ;;  %v517_v27 = vld [vmem:[%s14167_s3 + $0x140] sm:$0xff]  ;;  %v518_v28 = vld [vmem:[%s14167_s3 + $0x148] sm:$0xff]  ;;  %s6770_s13 = scalar_lea.vmem [#allocation2], %s6900_s29  ;;  %s6921_s28 = sld [smem:[#allocation3 + $0xd]] }
  0x28   :  { %9741 = vmatprep.subr.bf16.mxu1 %v11074_v3  ;;  %v11516_v26 = vpack.c.bf16 %v508_v20, %v507_v17  ;;  %v685_v29 = vld [vmem:[%s14167_s3 + $0x180] sm:$0xff]  ;;  %v686_v35 = vld [vmem:[%s14167_s3 + $0x188] sm:$0xff]  ;;  %v11532_v37 = vpack.c.bf16 %v518_v28, %v517_v27  ;;  %v519_v42 = vld [vmem:[%s14167_s3 + $0x150] sm:$0xff]  ;;  %s6923_s16 = sld [smem:[#allocation3 + $0xe]]  ;;  %s6925_s19 = sld [smem:[#allocation3 + $0xf]] }
  0x29   :  { %v11536_v39 = vpack.c.bf16 %v686_v35, %v685_v29  ;;  %v520_v30 = vld [vmem:[%s14167_s3 + $0x158] sm:$0xff]  ;;  %v687_v40 = vld [vmem:[%s14167_s3 + $0x190] sm:$0xff]  ;;  %v521_v49 = vld [vmem:[%s14167_s3 + $0x160] sm:$0xff]  ;;  %s6920_s0 = sshll.u32 %s6919_s23, 1  ;;  %s6929_s17 = sshll.u32 %s6928_s20, 1 }
  0x2a   :  { %9755 = vmatpush3.bf16.msra.mxu0 %v11310_v52  ;;  %v688_v45 = vld [vmem:[%s14167_s3 + $0x198] sm:$0xff]  ;;  %v11554_v46 = vpack.c.bf16 %v520_v30, %v519_v42  ;;  %v522_v36 = vld [vmem:[%s14167_s3 + $0x168] sm:$0xff]  ;;  %v689_v50 = vld [vmem:[%s14167_s3 + $0x1a0] sm:$0xff]  ;;  %s6932_s18 = sshll.u32 %s6931_s21, 1  ;;  %s6945_s23 = sld [smem:[#allocation3 + $0x12]] }
  0x2b   :  { %9743 = vmatpush3.bf16.msra.mxu1 %v11315_v54  ;;  %9756 = vmatprep.subr.bf16.mxu0 %v11074_v3  ;;  %v11558_v48 = vpack.c.bf16 %v688_v45, %v687_v40  ;;  %v690_v56 = vld [vmem:[%s14167_s3 + $0x1a8] sm:$0xff]  ;;  %v11576_v57 = vpack.c.bf16 %v522_v36, %v521_v49  ;;  %v523_v59 = vld [vmem:[%s14167_s3 + $0x170] sm:$0xff]  ;;  %v524_v0 = vld [vmem:[%s14167_s3 + $0x178] sm:$0xff]  ;;  %s6954_s20 = sld [smem:[#allocation3 + $0x16]]  ;;  %s6957_s21 = sld [smem:[#allocation3 + $0x17]] }
  0x2c   :  { %9744 = vmatprep.subr.bf16.mxu1 %v11074_v3  ;;  %v11580_v58 = vpack.c.bf16 %v690_v56, %v689_v50  ;;  %v691_v1 = vld [vmem:[%s14167_s3 + $0x1b0] sm:$0xff]  ;;  %v692_v2 = vld [vmem:[%s14167_s3 + $0x1b8] sm:$0xff]  ;;  %v11596_v5 = vpack.c.bf16 %v524_v0, %v523_v59  ;;  %v677_v16 = vld [vmem:[%s14166_s2 + $0xc0] sm:$0xff]  ;;  %s7058_s11 = sld [smem:[#allocation3 + $0x2e]] }
  0x2d   :  { %v11600_v15 = vpack.c.bf16 %v692_v2, %v691_v1  ;;  %v678_v17 = vld [vmem:[%s14166_s2 + $0xc8] sm:$0xff]  ;;  %v693_v20 = vld [vmem:[%s14167_s3 + $0x1c0] sm:$0xff]  ;;  %v679_v35 = vld [vmem:[%s14166_s2 + $0xd0] sm:$0xff]  ;;  %s6922_s15 = sshll.u32 %s6921_s28, 1  ;;  %s6947_s28 = sld [smem:[#allocation3 + $0x13]] }
  0x2e   :  { %9758 = vmatpush3.bf16.msra.mxu0 %v11332_v62  ;;  %v694_v27 = vld [vmem:[%s14167_s3 + $0x1c8] sm:$0xff]  ;;  %v11616_v28 = vpack.c.bf16 %v678_v17, %v677_v16  ;;  %v680_v42 = vld [vmem:[%s14166_s2 + $0xd8] sm:$0xff]  ;;  %v695_v30 = vld [vmem:[%s14167_s3 + $0x1d0] sm:$0xff]  ;;  %s6924_s14 = sshll.u32 %s6923_s16, 1  ;;  %s6926_s29 = sshll.u32 %s6925_s19, 1 }
  0x2f   :  { %9746 = vmatpush3.bf16.msra.mxu1 %v11336_v63  ;;  %9759 = vmatprep.subr.bf16.mxu0 %v11074_v3  ;;  %v11620_v29 = vpack.c.bf16 %v694_v27, %v693_v20  ;;  %v696_v40 = vld [vmem:[%s14167_s3 + $0x1d8] sm:$0xff]  ;;  %v11637_v45 = vpack.c.bf16 %v680_v42, %v679_v35  ;;  %v681_v36 = vld [vmem:[%s14166_s2 + $0xe0] sm:$0xff]  ;;  %v682_v50 = vld [vmem:[%s14166_s2 + $0xe8] sm:$0xff]  ;;  %s6949_s16 = sld [smem:[#allocation3 + $0x14]]  ;;  %s6951_s19 = sld [smem:[#allocation3 + $0x15]] }
  0x30   :  { %9771 = vmatprep.subr.bf16.mxu1 %v11074_v3  ;;  %v11643_v49 = vpack.c.bf16 %v696_v40, %v695_v30  ;;  %v697_v56 = vld [vmem:[%s14167_s3 + $0x1e0] sm:$0xff]  ;;  %v698_v59 = vld [vmem:[%s14167_s3 + $0x1e8] sm:$0xff]  ;;  %v11659_v0 = vpack.c.bf16 %v682_v50, %v681_v36  ;;  %v683_v2 = vld [vmem:[%s14166_s2 + $0xf0] sm:$0xff] }
  0x31   :  { %v11663_v1 = vpack.c.bf16 %v698_v59, %v697_v56  ;;  %v684_v16 = vld [vmem:[%s14166_s2 + $0xf8] sm:$0xff]  ;;  %v699_v17 = vld [vmem:[%s14167_s3 + $0x1f0] sm:$0xff]  ;;  %v11760_v56 = vld [vmem:[%s14168_s4 + $0x1] ss:$0 sm:$0xff] }
  0x32   :  { %7986 = vmatmul.mubr.f32.vlgmr.msra.gmra.mrb[0].mxu1 %v11357_v11  ;;  %9761 = vmatpush3.bf16.msra.mxu0 %v11353_v10  ;;  %v700_v20 = vld [vmem:[%s14167_s3 + $0x1f8] sm:$0xff]  ;;  %v11679_v27 = vpack.c.bf16 %v684_v16, %v683_v2 }
  0x33   :  { %9773 = vmatpush3.bf16.msra.mxu1 %v11360_v14  ;;  %9762 = vmatprep.subr.bf16.mxu0 %v11074_v3  ;;  %v11683_v35 = vpack.c.bf16 %v700_v20, %v699_v17 }
  0x34   :  { %9774 = vmatprep.subr.bf16.mxu1 %v11074_v3  ;;  %8039 = vmatprep.mubr.msk.f32.mxu1 %vm11076_vm0, %v11075_v8 }
  0x36   :  { %9764 = vmatpush3.bf16.msra.mxu0 %v11377_v21 }
  0x37   :  { %9776 = vmatpush3.bf16.msra.mxu1 %v11381_v23  ;;  %9765 = vmatprep.subr.bf16.mxu0 %v11074_v3 }
  0x38   :  { %9777 = vmatprep.subr.bf16.mxu1 %v11074_v3 }
  0x3a   :  { %9767 = vmatpush3.bf16.msra.mxu0 %v11399_v33 }
  0x3b   :  { %9779 = vmatpush3.bf16.msra.mxu1 %v11405_v38  ;;  %9768 = vmatprep.subr.bf16.mxu0 %v11074_v3 }
  0x3c   :  { %9780 = vmatprep.subr.bf16.mxu1 %v11074_v3 }
  0x3e   :  { %9770 = vmatpush3.bf16.msra.mxu0 %v11421_v43 }
  0x3f   :  { %9782 = vmatpush3.bf16.msra.mxu1 %v11426_v47  ;;  %9783 = vmatprep.subr.bf16.mxu0 %v11074_v3 }
  0x40   :  { %9807 = vmatprep.subr.bf16.mxu1 %v11074_v3 }
  0x41   :  { %8021 = vmatmul.mubr.f32.vlgmr.msra.gmra.mrb[2].mxu0 %v11443_v51 }
  0x42   :  { %8040 = vmatmul.mubr.msk.f32.vlgmr.msra.gmra.mrb[2].mxu1 %vm119_vm1, %v11254_v31  ;;  %9785 = vmatpush3.bf16.msra.mxu0 %v11445_v53 }
  0x43   :  { %9809 = vmatpush3.bf16.msra.mxu1 %v11449_v55  ;;  %9786 = vmatprep.subr.bf16.mxu0 %v11074_v3 }
  0x44   :  { %9810 = vmatprep.subr.bf16.mxu1 %v11074_v3  ;;  %8093 = vmatprep.mubr.msk.f32.mxu1 %vm11076_vm0, %v11075_v8 }
  0x45   :  { %8074 = vmatprep.mubr.msk.f32.mxu0 %vm11076_vm0, %v11075_v8 }
  0x46   :  { %9788 = vmatpush3.bf16.msra.mxu0 %v11468_v60 }
  0x47   :  { %9812 = vmatpush3.bf16.msra.mxu1 %v11472_v61  ;;  %9789 = vmatprep.subr.bf16.mxu0 %v11074_v3 }
  0x48   :  { %9813 = vmatprep.subr.bf16.mxu1 %v11074_v3 }
  0x4a   :  { %9791 = vmatpush3.bf16.msra.mxu0 %v11492_v6 }
  0x4b   :  { %9815 = vmatpush3.bf16.msra.mxu1 %v11496_v7  ;;  %9792 = vmatprep.subr.bf16.mxu0 %v11074_v3 }
  0x4c   :  { %9816 = vmatprep.subr.bf16.mxu1 %v11074_v3 }
  0x4e   :  { %9794 = vmatpush3.bf16.msra.mxu0 %v11512_v22 }
  0x4f   :  { %9818 = vmatpush3.bf16.msra.mxu1 %v11516_v26  ;;  %9795 = vmatprep.subr.bf16.mxu0 %v11074_v3 }
  0x50   :  { %9819 = vmatprep.subr.bf16.mxu1 %v11074_v3 }
  0x52   :  { %8094 = vmatmul.mubr.msk.f32.vlgmr.msra.gmra.mrb[4].mxu1 %vm119_vm1, %v11254_v31  ;;  %9797 = vmatpush3.bf16.msra.mxu0 %v11532_v37 }
  0x53   :  { %9821 = vmatpush3.bf16.msra.mxu1 %v11536_v39  ;;  %9798 = vmatprep.subr.bf16.mxu0 %v11074_v3 }
  0x54   :  { %9822 = vmatprep.subr.bf16.mxu1 %v11074_v3  ;;  %8128 = vmatprep.mubr.msk.f32.mxu1 %vm11076_vm0, %v11075_v8 }
  0x56   :  { %9800 = vmatpush3.bf16.msra.mxu0 %v11554_v46 }
  0x57   :  { %9824 = vmatpush3.bf16.msra.mxu1 %v11558_v48  ;;  %9801 = vmatprep.subr.bf16.mxu0 %v11074_v3 }
  0x58   :  { %9825 = vmatprep.subr.bf16.mxu1 %v11074_v3 }
  0x5a   :  { %9803 = vmatpush3.bf16.msra.mxu0 %v11576_v57 }
  0x5b   :  { %9827 = vmatpush3.bf16.msra.mxu1 %v11580_v58  ;;  %9804 = vmatprep.subr.bf16.mxu0 %v11074_v3 }
  0x5c   :  { %9828 = vmatprep.subr.bf16.mxu1 %v11074_v3 }
  0x5e   :  { %9806 = vmatpush3.bf16.msra.mxu0 %v11596_v5 }
  0x5f   :  { %9830 = vmatpush3.bf16.msra.mxu1 %v11600_v15  ;;  %9843 = vmatprep.subr.bf16.mxu0 %v11074_v3 }
  0x60   :  { %9831 = vmatprep.subr.bf16.mxu1 %v11074_v3 }
  0x61   :  { %8075 = vmatmul.mubr.f32.vlgmr.msra.gmra.mrb[4].mxu0 %v11443_v51 }
  0x62   :  { %9845 = vmatpush3.bf16.msra.mxu0 %v11616_v28  ;;  %8147 = vmatprep.mubr.msk.f32.mxu0 %vm11076_vm0, %v11075_v8 }
  0x63   :  { %9833 = vmatpush3.bf16.msra.mxu1 %v11620_v29  ;;  %9846 = vmatprep.subr.bf16.mxu0 %v11074_v3 }
  0x64   :  { %9834 = vmatprep.subr.bf16.mxu1 %v11074_v3 }
  0x66   :  { %9848 = vmatpush3.bf16.msra.mxu0 %v11637_v45 }
  0x67   :  { %9836 = vmatpush3.bf16.msra.mxu1 %v11643_v49  ;;  %9849 = vmatprep.subr.bf16.mxu0 %v11074_v3 }
  0x68   :  { %9837 = vmatprep.subr.bf16.mxu1 %v11074_v3 }
  0x6a   :  { %9851 = vmatpush3.bf16.msra.mxu0 %v11659_v0 }
  0x6b   :  { %9839 = vmatpush3.bf16.msra.mxu1 %v11663_v1  ;;  %9852 = vmatprep.subr.bf16.mxu0 %v11074_v3 }
  0x6c   :  { %9840 = vmatprep.subr.bf16.mxu1 %v11074_v3 }
  0x6e   :  { %9854 = vmatpush3.bf16.msra.mxu0 %v11679_v27 }
  0x6f   :  { %9842 = vmatpush3.bf16.msra.mxu1 %v11683_v35  ;;  %9855 = vmatprep.subr.bf16.mxu0 %v11074_v3 }
  0x70   :  { %9867 = vmatprep.subr.bf16.mxu1 %v11074_v3 }
  0x71   :  { %8148 = vmatmul.mubr.msk.f32.vlgmr.msra.gmra.mrb[6].mxu0 %vm119_vm1, %v11254_v31 }
  0x72   :  { %8129 = vmatmul.mubr.f32.vlgmr.msra.gmra.mrb[6].mxu1 %v11443_v51  ;;  %9857 = vmatpush3.bf16.msra.mxu0 %v11148_v4  ;;  %v11724_v4 = vld [vmem:[%s14165_s1 + $0x2] sm:$0x3] }
  0x73   :  { %9858 = vmatprep.subr.bf16.mxu0 %v11074_v3  ;;  %8166 = vmatprep.mubr.msk.f32.mxu0 %vm11076_vm0, %v11075_v8 }
  0x74   :  { %9869 = vmatpush3.bf16.msra.mxu1 %v11160_v9  ;;  %8201 = vmatprep.mubr.msk.f32.mxu1 %vm11076_vm0, %v11075_v8 }
  0x75   :  { %9870 = vmatprep.subr.bf16.mxu1 %v11074_v3 }
  0x76   :  { %9860 = vmatpush3.bf16.msra.mxu0 %v11175_v12 }
  0x77   :  { %9861 = vmatprep.subr.bf16.mxu0 %v11074_v3 }
  0x78   :  { %9872 = vmatpush3.bf16.msra.mxu1 %v11183_v13 }
  0x79   :  { %9873 = vmatprep.subr.bf16.mxu1 %v11074_v3 }
  0x7a   :  { %9863 = vmatpush3.bf16.msra.mxu0 %v11201_v18 }
  0x7b   :  { %9864 = vmatprep.subr.bf16.mxu0 %v11074_v3 }
  0x7c   :  { %9875 = vmatpush3.bf16.msra.mxu1 %v11205_v19 }
  0x7d   :  { %9876 = vmatprep.subr.bf16.mxu1 %v11074_v3 }
  0x7e   :  { %9866 = vmatpush3.bf16.msra.mxu0 %v11225_v24 }
  0x7f   :  { %9891 = vmatprep.subr.bf16.mxu0 %v11074_v3 }
  0x80   :  { %9878 = vmatpush3.bf16.msra.mxu1 %v11232_v25 }
  0x81   :  { %9879 = vmatprep.subr.bf16.mxu1 %v11074_v3  ;;  %8167 = vmatmul.mubr.msk.f32.vlgmr.msra.gmra.mrb[8].mxu0 %vm119_vm1, %v11724_v4 }
  0x82   :  { %9893 = vmatpush3.bf16.msra.mxu0 %v11256_v32  ;;  %8236 = vmatprep.mubr.msk.f32.mxu0 %vm11076_vm0, %v11075_v8 }
  0x83   :  { %9894 = vmatprep.subr.bf16.mxu0 %v11074_v3 }
  0x84   :  { %9881 = vmatpush3.bf16.msra.mxu1 %v11263_v34 }
  0x85   :  { %9882 = vmatprep.subr.bf16.mxu1 %v11074_v3 }
  0x86   :  { %9896 = vmatpush3.bf16.msra.mxu0 %v11284_v41 }
  0x87   :  { %9897 = vmatprep.subr.bf16.mxu0 %v11074_v3 }
  0x88   :  { %9884 = vmatpush3.bf16.msra.mxu1 %v11292_v44 }
  0x89   :  { %9885 = vmatprep.subr.bf16.mxu1 %v11074_v3 }
  0x8a   :  { %9899 = vmatpush3.bf16.msra.mxu0 %v11310_v52 }
  0x8b   :  { %9900 = vmatprep.subr.bf16.mxu0 %v11074_v3 }
  0x8c   :  { %9887 = vmatpush3.bf16.msra.mxu1 %v11315_v54 }
  0x8d   :  { %9888 = vmatprep.subr.bf16.mxu1 %v11074_v3 }
  0x8e   :  { %9902 = vmatpush3.bf16.msra.mxu0 %v11332_v62  ;;  %v11754_v62 = vld [vmem:[%s14168_s4] ss:$0 sm:$0xff] }
  0x8f   :  { %9903 = vmatprep.subr.bf16.mxu0 %v11074_v3 }
  0x90   :  { %9890 = vmatpush3.bf16.msra.mxu1 %v11336_v63 }
  0x91   :  { %9915 = vmatprep.subr.bf16.mxu1 %v11074_v3 }
  0x92   :  { %9905 = vmatpush3.bf16.msra.mxu0 %v11353_v10 }
  0x93   :  { %9906 = vmatprep.subr.bf16.mxu0 %v11074_v3 }
  0x96   :  { %9908 = vmatpush3.bf16.msra.mxu0 %v11377_v21 }
  0x97   :  { %9909 = vmatprep.subr.bf16.mxu0 %v11074_v3 }
  0x9a   :  { %9911 = vmatpush3.bf16.msra.mxu0 %v11399_v33 }
  0x9b   :  { %9912 = vmatprep.subr.bf16.mxu0 %v11074_v3 }
  0x9e   :  { %9914 = vmatpush3.bf16.msra.mxu0 %v11421_v43 }
  0x9f   :  { %9927 = vmatprep.subr.bf16.mxu0 %v11074_v3 }
  0xf4   :  { %v189_v9 = vpop.f32.mrb[0].mxu0 }
  0xf5   :  { %v194_v12 = vrot.slane %v189_v9, 7  ;;  %v7952_v13 = vpop.f32.mrb[1].mxu0  ;;  %v196_v18 = vrot.slane %v189_v9, 6  ;;  %v198_v31 = vrot.slane %v189_v9, 5  ;;  %v200_v34 = vrot.slane %v189_v9, 4 }
  0xf7   :  { %v202_v19 = vsel %vm93_vm2, %v189_v9, %v194_v12 }
  0xf8   :  { %v203_v24 = vsel %vm95_vm3, %v202_v19, %v196_v18  ;;  %v11768_v19 = vld [vmem:[%s14168_s4 + $0x2] ss:$0 sm:$0xff] }
  0xf9   :  { %v204_v25 = vsel %vm97_vm4, %v203_v24, %v196_v18 }
  0xfa   :  { %v205_v32 = vsel %vm99_vm5, %v204_v25, %v198_v31 }
  0xfb   :  { %v206_v41 = vsel %vm101_vm6, %v205_v32, %v200_v34 }
 0x105   :  { %v289_v44 = vpop.f32.mrb[0].mxu1 }
 0x106   :  { %v290_v52 = vadd.f32 %v289_v44, %v206_v41  ;;  %v7987_v54 = vpop.f32.mrb[1].mxu1 }
 0x108   :  { %v298_v63 = vadd.f32 %v11754_v62, %v290_v52 }
 0x10a   :  { %v6884_v10 = vmul.f32 -1.442695, %v298_v63 }
 0x10c   :  { %10899 = vpow2.f32 %v6884_v10  ;;  %v11775_v10 = vld [vmem:[%s14168_s4 + $0x3] ss:$0 sm:$0xff] }
 0x114   :  { %v415_v21 = vpop.f32.mrb[2].mxu0 }
 0x115   :  { %v485_v33 = vpop.f32.mrb[2].mxu1  ;;  %v8022_v51 = vpop.f32.mrb[3].mxu0 }
 0x116   :  { %v486_v43 = vadd.f32 %v485_v33, %v415_v21  ;;  %v8041_v42 = vpop.f32.mrb[3].mxu1  ;;  %v10900_v30 = vpop.eup %10899 }
 0x117   :  { %v302_v40 = vadd.f32 1.0, %v10900_v30 }
 0x118   :  { %v494_v2 = vadd.f32 %v11760_v56, %v486_v43 }
 0x119   :  { %10901 = vrcp.f32 %v302_v40 }
 0x11a   :  { %v6887_v17 = vmul.f32 -1.442695, %v494_v2 }
 0x11c   :  { %10903 = vpow2.f32 %v6887_v17 }
 0x123   :  { %v10902_v59 = vpop.eup %10901 }
 0x124   :  { %v305_v16 = vmul.f32 %v10902_v59, %v11357_v11 }
 0x125   :  { %v661_v36 = vpop.f32.mrb[4].mxu1 }
 0x126   :  { %v8095_v50 = vpop.f32.mrb[5].mxu1  ;;  %v315_v13 = vrot.slane %v305_v16, 3  ;;  %v307_v24 = vsel %vm306_vm7, %v305_v16, 0.0  ;;  %v10904_v32 = vpop.eup %10903 }
 0x127   :  { %v308_v11 = vrot.slane %v307_v24, 4  ;;  %v498_v54 = vadd.f32 1.0, %v10904_v32 }
 0x128   :  { %v317_v18 = vsel %vm306_vm7, %v315_v13, 0.0 }
 0x129   :  { %v318_v25 = vrot.slane %v317_v18, 4  ;;  %v309_v44 = vadd.f32 %v308_v11, %v307_v24 }
 0x12b   :  { %v319_v34 = vadd.f32 %v318_v25, %v317_v18  ;;  %v310_v42 = vrot.slane %v309_v44, 2 }
 0x12d   :  { %v320_v43 = vrot.slane %v319_v34, 2 }
 0x12f   :  { %v321_v40 = vadd.f32 %v320_v43, %v319_v34 }
 0x131   :  { %v322_v50 = vrot.slane %v321_v40, 1 }
 0x133   :  { %v323_v16 = vadd.f32 %v322_v50, %v321_v40 }
 0x134   :  { %v591_v20 = vpop.f32.mrb[4].mxu0 }
 0x135   :  { %v662_v9 = vadd.f32 %v661_v36, %v591_v20  ;;  %v8076_v12 = vpop.f32.mrb[5].mxu0  ;;  %v311_v36 = vadd.f32 %v310_v42, %v309_v44 }
 0x137   :  { %v670_v31 = vadd.f32 %v11768_v19, %v662_v9  ;;  %v312_v59 = vrot.slane %v311_v36, 1 }
 0x139   :  { %v6890_v41 = vmul.f32 -1.442695, %v670_v31  ;;  %v313_v12 = vadd.f32 %v312_v59, %v311_v36 }
 0x13b   :  { %10905 = vpow2.f32 %v6890_v41  ;;  %v324_v18 = vsel %vm93_vm2, %v313_v12, %v323_v16 }
 0x13c   :  { %10907 = vrcp.f32 %v498_v54 }
 0x144   :  { %v837_v52 = vpop.f32.mrb[6].mxu0 }
 0x145   :  { %v767_v63 = vpop.f32.mrb[6].mxu1  ;;  %v8149_v21 = vpop.f32.mrb[7].mxu0 }
 0x146   :  { %v838_v33 = vadd.f32 %v837_v52, %v767_v63  ;;  %v8130_v51 = vpop.f32.mrb[7].mxu1  ;;  %v10906_v2 = vpop.eup %10905 }
 0x147   :  { %v10908_v17 = vpop.eup %10907  ;;  %v674_v9 = vadd.f32 1.0, %v10906_v2 }
 0x148   :  { %v846_v30 = vadd.f32 %v11775_v10, %v838_v33 }
 0x14a   :  { %10909 = vtanh.f32 %v846_v30 }
 0x14b   :  { %10911 = vrcp.f32 %v674_v9 }
 0x154   :  { %v10910_v20 = vpop.eup %10909  ;;  %v11780_v32 = vpop.f32.mrb[8].mxu0 }
 0x155   :  { %v848_v13 = vmul.f32 %v10910_v20, %v10908_v17  ;;  %v10912_v25 = vpop.eup %10911  ;;  %v8168_v34 = vpop.f32.mrb[9].mxu0 }
 0x157   :  { %v849_v24 = vadd.f32 %v848_v13, %v324_v18 }
 0x159   :  { %10913 = vtanh.f32 %v849_v24 }
 0x163   :  { %v10914_v31 = vpop.eup %10913 }
 0x164   :  { %v851_v11 = vmul.f32 %v10914_v31, %v10912_v25  ;;  %v1937_v25 = vld [vmem:[%s14167_s3 + $0x90] sm:$0xff]  ;;  %v1938_v31 = vld [vmem:[%s14167_s3 + $0x98] sm:$0xff] }
 0x166   :  { %853 = vrot.lane.b32.xlu0 %v851_v11, %s11077_s12  ;;  %v998_v11 = vrot.slane %v11780_v32, 6 }
 0x1d8   :  { %v854_v41 = vpop.permute.xlu0 %853 }
 0x1d9   :  { %v856_v44 = vsel %vm119_vm1, %v849_v24, %v854_v41  ;;  %v11978_v41 = vpack.c.bf16 %v1938_v31, %v1937_v25 }
 0x1da   :  { %857 = vst [vmem:[#allocation2] sm:$0x3] %v856_v44  ;;  %v1939_v44 = vld [vmem:[%s14167_s3 + $0xa0] sm:$0xff] }
 0x1e1   :  { %v862_v52 = vld [vmem:[%s861_s22] sm:$0x1]  ;;  %v6901_v21 = vld [vmem:[%s6770_s13 + $0x1] sm:$0x1]  ;;  %s1662_s22 = scalar_lea.vmem [#allocation2], %s6920_s0  ;;  %s6785_s13 = scalar_lea.vmem [#allocation2], %s6926_s29 }
 0x1e2   :  { %v866_v54 = vld [vmem:[%s865_s24] sm:$0x1]  ;;  %v6904_v33 = vld [vmem:[%s6773_s26 + $0x1] sm:$0x1]  ;;  %v893_v36 = vrot.slane %v6901_v21, 5  ;;  %s1666_s24 = scalar_lea.vmem [#allocation2], %s6922_s15 }
 0x1e3   :  { %v870_v63 = vld [vmem:[%s869_s25] sm:$0x1]  ;;  %v887_v51 = vrot.slane %v866_v54, 7  ;;  %v6907_v42 = vld [vmem:[%s6776_s27 + $0x1] sm:$0x1]  ;;  %v906_v30 = vadd.f32 %v866_v54, %v862_v52  ;;  %v908_v40 = vadd.f32 %v6904_v33, %v6901_v21  ;;  %v896_v59 = vrot.slane %v6904_v33, 4 }
 0x1e4   :  { %v890_v43 = vrot.slane %v870_v63, 6  ;;  %v899_v17 = vrot.slane %v6907_v42, 3  ;;  %v1000_v21 = vrot.slane %v11780_v32, 5  ;;  %v1941_v33 = vld [vmem:[%s14167_s3 + $0xb0] sm:$0xff]  ;;  %s1670_s25 = scalar_lea.vmem [#allocation2], %s6924_s14  ;;  %s6788_s26 = scalar_lea.vmem [#allocation2], %s6929_s17 }
 0x1e5   :  { %v901_v50 = vsel %vm93_vm2, %v862_v52, %v887_v51  ;;  %v909_v16 = vadd.f32 %v6907_v42, %v908_v40  ;;  %v907_v12 = vadd.f32 %v906_v30, %v870_v63  ;;  %v1940_v52 = vld [vmem:[%s14167_s3 + $0xa8] sm:$0xff]  ;;  %v1942_v51 = vld [vmem:[%s14167_s3 + $0xb8] sm:$0xff]  ;;  %v1002_v42 = vrot.slane %v11780_v32, 4  ;;  %s6791_s27 = scalar_lea.vmem [#allocation2], %s6932_s18  ;;  %s6946_s0 = sshll.u32 %s6945_s23, 1 }
 0x1e6   :  { %v902_v2 = vsel %vm95_vm3, %v901_v50, %v890_v43  ;;  %v11992_v63 = vpack.c.bf16 %v1940_v52, %v1939_v44  ;;  %v12005_v30 = vpack.c.bf16 %v1942_v51, %v1941_v33  ;;  %s6948_s15 = sshll.u32 %s6947_s28, 1  ;;  %s6950_s14 = sshll.u32 %s6949_s16, 1 }
 0x1e7   :  { %v903_v20 = vsel %vm97_vm4, %v902_v2, %v893_v36  ;;  %v911_v13 = vrot.slane %v909_v16, 7  ;;  %s6952_s29 = sshll.u32 %s6951_s19, 1  ;;  %s6955_s17 = sshll.u32 %s6954_s20, 1 }
 0x1e8   :  { %v904_v9 = vsel %vm99_vm5, %v903_v20, %v896_v59  ;;  %s6958_s18 = sshll.u32 %s6957_s21, 1  ;;  %s6971_s23 = sld [smem:[#allocation3 + $0x18]] }
 0x1e9   :  { %v11788_v18 = vsel %vm101_vm6, %v904_v9, %v899_v17  ;;  %v11792_v24 = vsel %vm93_vm2, %v907_v12, %v911_v13  ;;  %s6973_s28 = sld [smem:[#allocation3 + $0x19]]  ;;  %s6975_s16 = sld [smem:[#allocation3 + $0x1a]] }
 0x1ea   :  { %8202 = vmatmul.mubr.f32.vlgmr.msra.gmra.mrb[8].mxu1 %v11788_v18  ;;  %8237 = vmatmul.mubr.f32.vlgmr.msra.gmra.mrb[10].mxu0 %v11792_v24  ;;  %s6977_s19 = sld [smem:[#allocation3 + $0x1b]]  ;;  %s6980_s20 = sld [smem:[#allocation3 + $0x1c]] }
 0x1eb   :  { %9917 = vmatpush3.bf16.msra.mxu1 %v11360_v14  ;;  %9929 = vmatpush3.bf16.msra.mxu0 %v11445_v53  ;;  %v1715_v14 = vld [vmem:[%s14166_s2] sm:$0xff]  ;;  %v1718_v53 = vld [vmem:[%s14166_s2 + $0x18] sm:$0xff]  ;;  %s6983_s21 = sld [smem:[#allocation3 + $0x1d]] }
 0x1ec   :  { %9918 = vmatprep.subr.bf16.mxu1 %v11074_v3  ;;  %9930 = vmatprep.subr.bf16.mxu0 %v11074_v3 }
 0x1ed   :  { %8255 = vmatprep.mubr.msk.f32.mxu1 %vm11076_vm0, %v11075_v8  ;;  %8290 = vmatprep.mubr.msk.f32.mxu0 %vm11076_vm0, %v11075_v8 }
 0x1ef   :  { %9920 = vmatpush3.bf16.msra.mxu1 %v11381_v23  ;;  %9932 = vmatpush3.bf16.msra.mxu0 %v11468_v60  ;;  %v1716_v23 = vld [vmem:[%s14166_s2 + $0x8] sm:$0xff]  ;;  %v1719_v60 = vld [vmem:[%s14166_s2 + $0x20] sm:$0xff] }
 0x1f0   :  { %9921 = vmatprep.subr.bf16.mxu1 %v11074_v3  ;;  %9933 = vmatprep.subr.bf16.mxu0 %v11074_v3 }
 0x1f3   :  { %9923 = vmatpush3.bf16.msra.mxu1 %v11405_v38  ;;  %9935 = vmatpush3.bf16.msra.mxu0 %v11492_v6  ;;  %v1717_v38 = vld [vmem:[%s14166_s2 + $0x10] sm:$0xff]  ;;  %v1811_v6 = vld [vmem:[%s14167_s3 + $0x8] sm:$0xff] }
 0x1f4   :  { %9924 = vmatprep.subr.bf16.mxu1 %v11074_v3  ;;  %9936 = vmatprep.subr.bf16.mxu0 %v11074_v3 }
 0x1f7   :  { %9926 = vmatpush3.bf16.msra.mxu1 %v11426_v47  ;;  %9938 = vmatpush3.bf16.msra.mxu0 %v11512_v22  ;;  %v11882_v47 = vpack.c.bf16 %v1716_v23, %v1715_v14 }
 0x1f8   :  { %9951 = vmatprep.subr.bf16.mxu1 %v11074_v3  ;;  %9939 = vmatprep.subr.bf16.mxu0 %v11074_v3 }
 0x1fa   :  { %8256 = vmatmul.mubr.msk.f32.vlgmr.msra.gmra.mrb[10].mxu1 %vm119_vm1, %v11724_v4 }
 0x1fb   :  { %9953 = vmatpush3.bf16.msra.mxu1 %v11449_v55  ;;  %8309 = vmatprep.mubr.msk.f32.mxu1 %vm11076_vm0, %v11075_v8  ;;  %v11888_v55 = vpack.c.bf16 %v1718_v53, %v1717_v38 }
 0x1fc   :  { %9941 = vmatpush3.bf16.msra.mxu0 %v11532_v37  ;;  %9954 = vmatprep.subr.bf16.mxu1 %v11074_v3  ;;  %v1813_v37 = vld [vmem:[%s14167_s3 + $0x18] sm:$0xff] }
 0x1fd   :  { %9942 = vmatprep.subr.bf16.mxu0 %v11074_v3 }
 0x1ff   :  { %9956 = vmatpush3.bf16.msra.mxu1 %v11472_v61  ;;  %v1810_v61 = vld [vmem:[%s14167_s3] sm:$0xff] }
 0x200   :  { %9944 = vmatpush3.bf16.msra.mxu0 %v11554_v46  ;;  %9957 = vmatprep.subr.bf16.mxu1 %v11074_v3  ;;  %v11903_v22 = vpack.c.bf16 %v1811_v6, %v1810_v61 }
 0x201   :  { %9945 = vmatprep.subr.bf16.mxu0 %v11074_v3 }
 0x203   :  { %9959 = vmatpush3.bf16.msra.mxu1 %v11496_v7  ;;  %v1720_v7 = vld [vmem:[%s14166_s2 + $0x28] sm:$0xff] }
 0x204   :  { %9947 = vmatpush3.bf16.msra.mxu0 %v11576_v57  ;;  %9960 = vmatprep.subr.bf16.mxu1 %v11074_v3  ;;  %v11915_v46 = vpack.c.bf16 %v1720_v7, %v1719_v60  ;;  %v1815_v57 = vld [vmem:[%s14167_s3 + $0x28] sm:$0xff] }
 0x205   :  { %9948 = vmatprep.subr.bf16.mxu0 %v11074_v3 }
 0x207   :  { %9962 = vmatpush3.bf16.msra.mxu1 %v11516_v26  ;;  %v1812_v26 = vld [vmem:[%s14167_s3 + $0x10] sm:$0xff] }
 0x208   :  { %9950 = vmatpush3.bf16.msra.mxu0 %v11596_v5  ;;  %9963 = vmatprep.subr.bf16.mxu1 %v11074_v3  ;;  %v1722_v5 = vld [vmem:[%s14166_s2 + $0x38] sm:$0xff] }
 0x209   :  { %9987 = vmatprep.subr.bf16.mxu0 %v11074_v3 }
 0x20a   :  { %8310 = vmatmul.mubr.msk.f32.vlgmr.msra.gmra.mrb[12].mxu1 %vm119_vm1, %v11724_v4 }
 0x20b   :  { %8291 = vmatmul.mubr.f32.vlgmr.msra.gmra.mrb[12].mxu0 %v11792_v24  ;;  %9965 = vmatpush3.bf16.msra.mxu1 %v11536_v39  ;;  %v11912_v39 = vpack.c.bf16 %v1813_v37, %v1812_v26 }
 0x20c   :  { %9966 = vmatprep.subr.bf16.mxu1 %v11074_v3  ;;  %9989 = vmatpush3.bf16.msra.mxu0 %v11616_v28 }
 0x20d   :  { %9990 = vmatprep.subr.bf16.mxu0 %v11074_v3  ;;  %8363 = vmatprep.mubr.msk.f32.mxu0 %vm11076_vm0, %v11075_v8 }
 0x20e   :  { %8344 = vmatprep.mubr.msk.f32.mxu1 %vm11076_vm0, %v11075_v8 }
 0x20f   :  { %9968 = vmatpush3.bf16.msra.mxu1 %v11558_v48  ;;  %v1814_v48 = vld [vmem:[%s14167_s3 + $0x20] sm:$0xff] }
 0x210   :  { %9969 = vmatprep.subr.bf16.mxu1 %v11074_v3  ;;  %9992 = vmatpush3.bf16.msra.mxu0 %v11637_v45  ;;  %v1817_v45 = vld [vmem:[%s14167_s3 + $0x38] sm:$0xff] }
 0x211   :  { %9993 = vmatprep.subr.bf16.mxu0 %v11074_v3 }
 0x213   :  { %9971 = vmatpush3.bf16.msra.mxu1 %v11580_v58  ;;  %v1721_v58 = vld [vmem:[%s14166_s2 + $0x30] sm:$0xff] }
 0x214   :  { %9972 = vmatprep.subr.bf16.mxu1 %v11074_v3  ;;  %9995 = vmatpush3.bf16.msra.mxu0 %v11659_v0  ;;  %v11935_v28 = vpack.c.bf16 %v1722_v5, %v1721_v58  ;;  %v1936_v0 = vld [vmem:[%s14167_s3 + $0x88] sm:$0xff] }
 0x215   :  { %9996 = vmatprep.subr.bf16.mxu0 %v11074_v3 }
 0x217   :  { %9974 = vmatpush3.bf16.msra.mxu1 %v11600_v15  ;;  %v11932_v15 = vpack.c.bf16 %v1815_v57, %v1814_v48 }
 0x218   :  { %9975 = vmatprep.subr.bf16.mxu1 %v11074_v3  ;;  %9998 = vmatpush3.bf16.msra.mxu0 %v11679_v27  ;;  %v996_v27 = vrot.slane %v11780_v32, 7 }
 0x219   :  { %9999 = vmatprep.subr.bf16.mxu0 %v11074_v3 }
 0x21a   :  { %v1004_v34 = vsel %vm93_vm2, %v11780_v32, %v996_v27 }
 0x21b   :  { %9977 = vmatpush3.bf16.msra.mxu1 %v11620_v29  ;;  %8364 = vmatmul.mubr.msk.f32.vlgmr.msra.gmra.mrb[14].mxu0 %vm119_vm1, %v11724_v4  ;;  %v1816_v29 = vld [vmem:[%s14167_s3 + $0x30] sm:$0xff]  ;;  %v1005_v54 = vsel %vm95_vm3, %v1004_v34, %v998_v11 }
 0x21c   :  { %9978 = vmatprep.subr.bf16.mxu1 %v11074_v3  ;;  %8382 = vmatprep.mubr.msk.f32.mxu0 %vm11076_vm0, %v11075_v8  ;;  %v1006_v43 = vsel %vm97_vm4, %v1005_v54, %v998_v11 }
 0x21d   :  { %10001 = vmatpush3.bf16.msra.mxu0 %v11882_v47  ;;  %v1007_v40 = vsel %vm99_vm5, %v1006_v43, %v1000_v21 }
 0x21e   :  { %10002 = vmatprep.subr.bf16.mxu0 %v11074_v3  ;;  %v1008_v36 = vsel %vm101_vm6, %v1007_v40, %v1002_v42 }
 0x21f   :  { %9980 = vmatpush3.bf16.msra.mxu1 %v11643_v49  ;;  %v1935_v49 = vld [vmem:[%s14167_s3 + $0x80] sm:$0xff] }
 0x220   :  { %9981 = vmatprep.subr.bf16.mxu1 %v11074_v3  ;;  %v11961_v4 = vpack.c.bf16 %v1936_v0, %v1935_v49 }
 0x221   :  { %10004 = vmatpush3.bf16.msra.mxu0 %v11888_v55 }
 0x222   :  { %10005 = vmatprep.subr.bf16.mxu0 %v11074_v3 }
 0x223   :  { %9983 = vmatpush3.bf16.msra.mxu1 %v11663_v1  ;;  %v11952_v1 = vpack.c.bf16 %v1817_v45, %v1816_v29 }
 0x224   :  { %9984 = vmatprep.subr.bf16.mxu1 %v11074_v3 }
 0x225   :  { %10007 = vmatpush3.bf16.msra.mxu0 %v11915_v46 }
 0x226   :  { %10008 = vmatprep.subr.bf16.mxu0 %v11074_v3 }
 0x227   :  { %9986 = vmatpush3.bf16.msra.mxu1 %v11683_v35  ;;  %v11959_v35 = vld [vmem:[%s14165_s1 + $0x4] sm:$0x3] }
 0x228   :  { %10011 = vmatprep.subr.bf16.mxu1 %v11074_v3 }
 0x229   :  { %10010 = vmatpush3.bf16.msra.mxu0 %v11935_v28 }
 0x22a   :  { %8345 = vmatmul.mubr.f32.vlgmr.msra.gmra.mrb[14].mxu1 %v11792_v24  ;;  %10035 = vmatprep.subr.bf16.mxu0 %v11074_v3 }
 0x22b   :  { %8417 = vmatprep.mubr.msk.f32.mxu1 %vm11076_vm0, %v11075_v8  ;;  %10013 = vmatpush3.bf16.msra.mxu1 %v11903_v22 }
 0x22c   :  { %10014 = vmatprep.subr.bf16.mxu1 %v11074_v3  ;;  %8383 = vmatmul.mubr.msk.f32.vlgmr.msra.gmra.mrb[16].mxu0 %vm119_vm1, %v11959_v35 }
 0x22d   :  { %10037 = vmatpush3.bf16.msra.mxu0 %v11961_v4  ;;  %8452 = vmatprep.mubr.msk.f32.mxu0 %vm11076_vm0, %v11075_v8 }
 0x22e   :  { %10038 = vmatprep.subr.bf16.mxu0 %v11074_v3 }
 0x22f   :  { %10016 = vmatpush3.bf16.msra.mxu1 %v11912_v39 }
 0x230   :  { %10017 = vmatprep.subr.bf16.mxu1 %v11074_v3 }
 0x231   :  { %10040 = vmatpush3.bf16.msra.mxu0 %v11978_v41 }
 0x232   :  { %10041 = vmatprep.subr.bf16.mxu0 %v11074_v3 }
 0x233   :  { %10019 = vmatpush3.bf16.msra.mxu1 %v11932_v15 }
 0x234   :  { %10020 = vmatprep.subr.bf16.mxu1 %v11074_v3 }
 0x235   :  { %10043 = vmatpush3.bf16.msra.mxu0 %v11992_v63 }
 0x236   :  { %10044 = vmatprep.subr.bf16.mxu0 %v11074_v3 }
 0x237   :  { %10022 = vmatpush3.bf16.msra.mxu1 %v11952_v1 }
 0x238   :  { %10023 = vmatprep.subr.bf16.mxu1 %v11074_v3 }
 0x239   :  { %10046 = vmatpush3.bf16.msra.mxu0 %v12005_v30 }
 0x23a   :  { %10047 = vmatprep.subr.bf16.mxu0 %v11074_v3 }
 0x2bd   :  { %v1091_v50 = vpop.f32.mrb[8].mxu1  ;;  %v1216_v2 = vpop.f32.mrb[10].mxu0 }
 0x2be   :  { %v1092_v59 = vadd.f32 %v1091_v50, %v1008_v36  ;;  %v8203_v16 = vpop.f32.mrb[9].mxu1  ;;  %v8238_v17 = vpop.f32.mrb[11].mxu0 }
 0x2c0   :  { %v1100_v32 = vadd.f32 %v11754_v62, %v1092_v59 }
 0x2c2   :  { %v6910_v20 = vmul.f32 -1.442695, %v1100_v32  ;;  %v1819_v32 = vld [vmem:[%s14167_s3 + $0x48] sm:$0xff] }
 0x2c4   :  { %10915 = vpow2.f32 %v6910_v20  ;;  %v1943_v20 = vld [vmem:[%s14167_s3 + $0xc0] sm:$0xff] }
 0x2cd   :  { %v1286_v9 = vpop.f32.mrb[10].mxu1 }
 0x2ce   :  { %v1287_v12 = vadd.f32 %v1286_v9, %v1216_v2  ;;  %v8257_v13 = vpop.f32.mrb[11].mxu1  ;;  %v10916_v24 = vpop.eup %10915 }
 0x2cf   :  { %v1104_v14 = vadd.f32 1.0, %v10916_v24  ;;  %v1820_v24 = vld [vmem:[%s14167_s3 + $0x50] sm:$0xff] }
 0x2d0   :  { %v1295_v7 = vadd.f32 %v11760_v56, %v1287_v12  ;;  %v1944_v12 = vld [vmem:[%s14167_s3 + $0xc8] sm:$0xff] }
 0x2d1   :  { %10917 = vrcp.f32 %v1104_v14  ;;  %v12034_v13 = vpack.c.bf16 %v1944_v12, %v1943_v20  ;;  %v1821_v14 = vld [vmem:[%s14167_s3 + $0x58] sm:$0xff] }
 0x2d2   :  { %v6913_v37 = vmul.f32 -1.442695, %v1295_v7  ;;  %v1947_v7 = vld [vmem:[%s14167_s3 + $0xe0] sm:$0xff] }
 0x2d3   :  { %10049 = vmatpush3.bf16.msra.mxu0 %v12034_v13 }
 0x2d4   :  { %10919 = vpow2.f32 %v6913_v37  ;;  %10050 = vmatprep.subr.bf16.mxu0 %v11074_v3 }
 0x2db   :  { %v10918_v6 = vpop.eup %10917 }
 0x2dc   :  { %v1107_v26 = vmul.f32 %v10918_v6, %v11788_v18 }
 0x2dd   :  { %v1462_v23 = vpop.f32.mrb[12].mxu1 }
 0x2de   :  { %v1392_v38 = vpop.f32.mrb[12].mxu0  ;;  %v8311_v53 = vpop.f32.mrb[13].mxu1  ;;  %v1116_v48 = vrot.slane %v1107_v26, 3  ;;  %v1108_v5 = vsel %vm306_vm7, %v1107_v26, 0.0  ;;  %v1948_v26 = vld [vmem:[%s14167_s3 + $0xe8] sm:$0xff] }
 0x2df   :  { %v1463_v60 = vadd.f32 %v1462_v23, %v1392_v38  ;;  %v8292_v61 = vpop.f32.mrb[13].mxu0  ;;  %v1109_v49 = vrot.slane %v1108_v5, 4  ;;  %v10920_v0 = vpop.eup %10919  ;;  %v1945_v23 = vld [vmem:[%s14167_s3 + $0xd0] sm:$0xff]  ;;  %v12048_v38 = vpack.c.bf16 %v1821_v14, %v1820_v24  ;;  %v1946_v53 = vld [vmem:[%s14167_s3 + $0xd8] sm:$0xff] }
 0x2e0   :  { %v1118_v58 = vsel %vm306_vm7, %v1116_v48, 0.0  ;;  %v1299_v56 = vadd.f32 1.0, %v10920_v0  ;;  %v1823_v61 = vld [vmem:[%s14167_s3 + $0x68] sm:$0xff]  ;;  %v12060_v6 = vpack.c.bf16 %v1946_v53, %v1945_v23  ;;  %v1824_v48 = vld [vmem:[%s14167_s3 + $0x70] sm:$0xff] }
 0x2e1   :  { %v1119_v29 = vrot.slane %v1118_v58, 4  ;;  %v1471_v45 = vadd.f32 %v11768_v19, %v1463_v60  ;;  %v1110_v31 = vadd.f32 %v1109_v49, %v1108_v5  ;;  %v1822_v60 = vld [vmem:[%s14167_s3 + $0x60] sm:$0xff]  ;;  %v1950_v5 = vld [vmem:[%s14167_s3 + $0xf8] sm:$0xff] }
 0x2e2   :  { %v12069_v37 = vpack.c.bf16 %v1823_v61, %v1822_v60  ;;  %10052 = vmatpush3.bf16.msra.mxu0 %v12060_v6  ;;  %v1929_v60 = vld [vmem:[%s14166_s2 + $0x50] sm:$0xff]  ;;  %v1930_v61 = vld [vmem:[%s14166_s2 + $0x58] sm:$0xff] }
 0x2e3   :  { %v1120_v27 = vadd.f32 %v1119_v29, %v1118_v58  ;;  %v6916_v25 = vmul.f32 -1.442695, %v1471_v45  ;;  %v1111_v52 = vrot.slane %v1110_v31, 2  ;;  %10053 = vmatprep.subr.bf16.mxu0 %v11074_v3  ;;  %v1949_v58 = vld [vmem:[%s14167_s3 + $0xf0] sm:$0xff] }
 0x2e4   :  { %v12093_v0 = vpack.c.bf16 %v1950_v5, %v1949_v58  ;;  %v12145_v58 = vpack.c.bf16 %v1930_v61, %v1929_v60  ;;  %v2109_v60 = vld [vmem:[%s14166_s2 + $0xb0] sm:$0xff]  ;;  %v2110_v61 = vld [vmem:[%s14166_s2 + $0xb8] sm:$0xff] }
 0x2e5   :  { %v1121_v18 = vrot.slane %v1120_v27, 2  ;;  %10921 = vpow2.f32 %v6916_v25  ;;  %v1112_v33 = vadd.f32 %v1111_v52, %v1110_v31 }
 0x2e6   :  { %10923 = vrcp.f32 %v1299_v56 }
 0x2e7   :  { %v1122_v21 = vadd.f32 %v1121_v18, %v1120_v27  ;;  %v1113_v19 = vrot.slane %v1112_v33, 1 }
 0x2e9   :  { %v1123_v51 = vrot.slane %v1122_v21, 1  ;;  %v1114_v59 = vadd.f32 %v1113_v19, %v1112_v33 }
 0x2eb   :  { %v1124_v42 = vadd.f32 %v1123_v51, %v1122_v21 }
 0x2ed   :  { %v1125_v16 = vsel %vm93_vm2, %v1114_v59, %v1124_v42  ;;  %v1927_v42 = vld [vmem:[%s14166_s2 + $0x40] sm:$0xff] }
 0x2ee   :  { %v1638_v62 = vpop.f32.mrb[14].mxu0  ;;  %v2111_v59 = vld [vmem:[%s14167_s3 + $0x100] sm:$0xff] }
 0x2ef   :  { %v8365_v57 = vpop.f32.mrb[15].mxu0  ;;  %v10922_v43 = vpop.eup %10921 }
 0x2f0   :  { %v10924_v40 = vpop.eup %10923  ;;  %v1475_v50 = vadd.f32 1.0, %v10922_v43  ;;  %v1825_v57 = vld [vmem:[%s14167_s3 + $0x78] sm:$0xff] }
 0x2f1   :  { %v12089_v45 = vpack.c.bf16 %v1825_v57, %v1824_v48  ;;  %v2114_v48 = vld [vmem:[%s14167_s3 + $0x118] sm:$0xff] }
 0x2fd   :  { %v1568_v11 = vpop.f32.mrb[14].mxu1 }
 0x2fe   :  { %v1639_v34 = vadd.f32 %v1638_v62, %v1568_v11  ;;  %v8346_v44 = vpop.f32.mrb[15].mxu1  ;;  %v12073_v62 = vpack.c.bf16 %v1948_v26, %v1947_v7  ;;  %v2113_v26 = vld [vmem:[%s14167_s3 + $0x110] sm:$0xff] }
 0x2ff   :  { %v12101_v25 = vpop.f32.mrb[16].mxu0  ;;  %v12149_v5 = vpack.c.bf16 %v2114_v48, %v2113_v26  ;;  %v2125_v26 = vld [vmem:[%s14167_s3 + $0x170] sm:$0xff]  ;;  %v2126_v48 = vld [vmem:[%s14167_s3 + $0x178] sm:$0xff] }
 0x300   :  { %v1647_v54 = vadd.f32 %v11775_v10, %v1639_v34  ;;  %v1818_v10 = vld [vmem:[%s14167_s3 + $0x40] sm:$0xff]  ;;  %10055 = vmatpush3.bf16.msra.mxu0 %v12073_v62  ;;  %v8384_v31 = vpop.f32.mrb[17].mxu0 }
 0x301   :  { %v12029_v9 = vpack.c.bf16 %v1819_v32, %v1818_v10  ;;  %10056 = vmatprep.subr.bf16.mxu0 %v11074_v3  ;;  %v2116_v31 = vld [vmem:[%s14167_s3 + $0x128] sm:$0xff] }
 0x302   :  { %10925 = vtanh.f32 %v1647_v54 }
 0x303   :  { %10927 = vrcp.f32 %v1475_v50  ;;  %10025 = vmatpush3.bf16.msra.mxu1 %v12029_v9 }
 0x304   :  { %10026 = vmatprep.subr.bf16.mxu1 %v11074_v3  ;;  %10058 = vmatpush3.bf16.msra.mxu0 %v12093_v0 }
 0x305   :  { %10071 = vmatprep.subr.bf16.mxu0 %v11074_v3 }
 0x307   :  { %10028 = vmatpush3.bf16.msra.mxu1 %v12048_v38 }
 0x308   :  { %10029 = vmatprep.subr.bf16.mxu1 %v11074_v3 }
 0x30b   :  { %10031 = vmatpush3.bf16.msra.mxu1 %v12069_v37 }
 0x30c   :  { %v10926_v36 = vpop.eup %10925  ;;  %10032 = vmatprep.subr.bf16.mxu1 %v11074_v3 }
 0x30d   :  { %v1649_v2 = vmul.f32 %v10926_v36, %v10924_v40  ;;  %v10928_v29 = vpop.eup %10927  ;;  %v1928_v40 = vld [vmem:[%s14166_s2 + $0x48] sm:$0xff] }
 0x30e   :  { %v12119_v12 = vpack.c.bf16 %v1928_v40, %v1927_v42 }
 0x30f   :  { %v1650_v17 = vadd.f32 %v1649_v2, %v1125_v16  ;;  %10034 = vmatpush3.bf16.msra.mxu1 %v12089_v45  ;;  %v2112_v2 = vld [vmem:[%s14167_s3 + $0x108] sm:$0xff] }
 0x310   :  { %10059 = vmatprep.subr.bf16.mxu1 %v11074_v3  ;;  %v12122_v53 = vpack.c.bf16 %v2112_v2, %v2111_v59  ;;  %v2121_v59 = vld [vmem:[%s14167_s3 + $0x150] sm:$0xff]  ;;  %v2122_v2 = vld [vmem:[%s14167_s3 + $0x158] sm:$0xff] }
 0x311   :  { %10929 = vtanh.f32 %v1650_v17 }
 0x31b   :  { %v10930_v49 = vpop.eup %10929 }
 0x31c   :  { %v1652_v27 = vmul.f32 %v10930_v49, %v10928_v29  ;;  %v1931_v29 = vld [vmem:[%s14166_s2 + $0x60] sm:$0xff]  ;;  %v1932_v49 = vld [vmem:[%s14166_s2 + $0x68] sm:$0xff] }
 0x31e   :  { %1654 = vrot.lane.b32.xlu0 %v1652_v27, %s11077_s12  ;;  %v2115_v27 = vld [vmem:[%s14167_s3 + $0x120] sm:$0xff] }
 0x390   :  { %v1655_v56 = vpop.permute.xlu0 %1654 }
 0x391   :  { %v1657_v11 = vsel %vm119_vm1, %v1650_v17, %v1655_v56  ;;  %v12169_v56 = vpack.c.bf16 %v1932_v49, %v1931_v29  ;;  %v12273_v29 = vpack.c.bf16 %v2110_v61, %v2109_v60  ;;  %v12277_v49 = vpack.c.bf16 %v2126_v48, %v2125_v26  ;;  %v2294_v60 = vld [vmem:[%s14167_s3 + $0x1b8] sm:$0xff]  ;;  %v2285_v26 = vld [vmem:[%s14166_s2 + $0xf0] sm:$0xff] }
 0x392   :  { %1658 = vst [vmem:[#allocation2 + $0x2] sm:$0x3] %v1657_v11  ;;  %v12173_v11 = vpack.c.bf16 %v2116_v31, %v2115_v27  ;;  %v2287_v27 = vld [vmem:[%s14167_s3 + $0x180] sm:$0xff]  ;;  %v2288_v31 = vld [vmem:[%s14167_s3 + $0x188] sm:$0xff]  ;;  %v2286_v48 = vld [vmem:[%s14166_s2 + $0xf8] sm:$0xff] }
 0x399   :  { %v1663_v18 = vld [vmem:[%s1662_s22] sm:$0x1]  ;;  %v6927_v52 = vld [vmem:[%s6785_s13 + $0x1] sm:$0x1]  ;;  %s2463_s22 = scalar_lea.vmem [#allocation2], %s6946_s0  ;;  %s6800_s13 = scalar_lea.vmem [#allocation2], %s6952_s29 }
 0x39a   :  { %v1667_v34 = vld [vmem:[%s1666_s24] sm:$0x1]  ;;  %v6930_v54 = vld [vmem:[%s6788_s26 + $0x1] sm:$0x1]  ;;  %v1694_v36 = vrot.slane %v6927_v52, 5  ;;  %s2467_s24 = scalar_lea.vmem [#allocation2], %s6948_s15 }
 0x39b   :  { %v1671_v44 = vld [vmem:[%s1670_s25] sm:$0x1]  ;;  %v1688_v21 = vrot.slane %v1667_v34, 7  ;;  %v6933_v51 = vld [vmem:[%s6791_s27 + $0x1] sm:$0x1]  ;;  %v1707_v19 = vadd.f32 %v1667_v34, %v1663_v18  ;;  %v1709_v43 = vadd.f32 %v6930_v54, %v6927_v52  ;;  %v1697_v16 = vrot.slane %v6930_v54, 4 }
 0x39c   :  { %v1691_v33 = vrot.slane %v1671_v44, 6  ;;  %v1700_v32 = vrot.slane %v6933_v51, 3  ;;  %v1934_v34 = vld [vmem:[%s14166_s2 + $0x78] sm:$0xff]  ;;  %s2471_s25 = scalar_lea.vmem [#allocation2], %s6950_s14  ;;  %s6803_s26 = scalar_lea.vmem [#allocation2], %s6955_s17 }
 0x39d   :  { %v1702_v50 = vsel %vm93_vm2, %v1663_v18, %v1688_v21  ;;  %v1710_v10 = vadd.f32 %v6933_v51, %v1709_v43  ;;  %v1708_v14 = vadd.f32 %v1707_v19, %v1671_v44  ;;  %v1933_v18 = vld [vmem:[%s14166_s2 + $0x70] sm:$0xff]  ;;  %v2118_v52 = vld [vmem:[%s14167_s3 + $0x138] sm:$0xff]  ;;  %v2104_v51 = vld [vmem:[%s14166_s2 + $0x88] sm:$0xff]  ;;  %s6806_s27 = scalar_lea.vmem [#allocation2], %s6958_s18  ;;  %s6972_s0 = sshll.u32 %s6971_s23, 1 }
 0x39e   :  { %v1703_v17 = vsel %vm95_vm3, %v1702_v50, %v1691_v33  ;;  %v2117_v44 = vld [vmem:[%s14167_s3 + $0x130] sm:$0xff]  ;;  %v12189_v54 = vpack.c.bf16 %v1934_v34, %v1933_v18  ;;  %v2103_v33 = vld [vmem:[%s14166_s2 + $0x80] sm:$0xff]  ;;  %v2120_v43 = vld [vmem:[%s14167_s3 + $0x148] sm:$0xff]  ;;  %s6974_s15 = sshll.u32 %s6973_s28, 1  ;;  %s6976_s14 = sshll.u32 %s6975_s16, 1 }
 0x39f   :  { %v1704_v20 = vsel %vm97_vm4, %v1703_v17, %v1694_v36  ;;  %v1712_v23 = vrot.slane %v1710_v10, 7  ;;  %v12193_v21 = vpack.c.bf16 %v2118_v52, %v2117_v44  ;;  %v2119_v19 = vld [vmem:[%s14167_s3 + $0x140] sm:$0xff]  ;;  %v12209_v42 = vpack.c.bf16 %v2104_v51, %v2103_v33  ;;  %v2105_v36 = vld [vmem:[%s14166_s2 + $0x90] sm:$0xff]  ;;  %v2106_v50 = vld [vmem:[%s14166_s2 + $0x98] sm:$0xff]  ;;  %s6978_s29 = sshll.u32 %s6977_s19, 1  ;;  %s6981_s17 = sshll.u32 %s6980_s20, 1 }
 0x3a0   :  { %v1705_v24 = vsel %vm99_vm5, %v1704_v20, %v1697_v16  ;;  %v12213_v40 = vpack.c.bf16 %v2120_v43, %v2119_v19  ;;  %v12231_v16 = vpack.c.bf16 %v2106_v50, %v2105_v36  ;;  %v12237_v17 = vpack.c.bf16 %v2122_v2, %v2121_v59  ;;  %v2107_v10 = vld [vmem:[%s14166_s2 + $0xa0] sm:$0xff]  ;;  %v2280_v34 = vld [vmem:[%s14166_s2 + $0xc8] sm:$0xff]  ;;  %v2289_v52 = vld [vmem:[%s14167_s3 + $0x190] sm:$0xff]  ;;  %s6984_s18 = sshll.u32 %s6983_s21, 1  ;;  %s6997_s23 = sld [smem:[#allocation3 + $0x1e]] }
 0x3a1   :  { %v12131_v7 = vsel %vm101_vm6, %v1705_v24, %v1700_v32  ;;  %v12141_v57 = vsel %vm93_vm2, %v1708_v14, %v1712_v23  ;;  %v2108_v32 = vld [vmem:[%s14166_s2 + $0xa8] sm:$0xff]  ;;  %v2123_v20 = vld [vmem:[%s14167_s3 + $0x160] sm:$0xff]  ;;  %v12293_v44 = vpack.c.bf16 %v2288_v31, %v2287_v27  ;;  %v2290_v33 = vld [vmem:[%s14167_s3 + $0x198] sm:$0xff]  ;;  %s6999_s28 = sld [smem:[#allocation3 + $0x1f]]  ;;  %s7001_s16 = sld [smem:[#allocation3 + $0x20]] }
 0x3a2   :  { %8418 = vmatmul.mubr.f32.vlgmr.msra.gmra.mrb[16].mxu1 %v12131_v7  ;;  %8453 = vmatmul.mubr.f32.vlgmr.msra.gmra.mrb[18].mxu0 %v12141_v57  ;;  %v2124_v24 = vld [vmem:[%s14167_s3 + $0x168] sm:$0xff]  ;;  %v12253_v14 = vpack.c.bf16 %v2108_v32, %v2107_v10  ;;  %v2279_v18 = vld [vmem:[%s14166_s2 + $0xc0] sm:$0xff]  ;;  %v2281_v19 = vld [vmem:[%s14166_s2 + $0xd0] sm:$0xff]  ;;  %v12316_v36 = vpack.c.bf16 %v2290_v33, %v2289_v52  ;;  %s7003_s19 = sld [smem:[#allocation3 + $0x21]]  ;;  %s7006_s20 = sld [smem:[#allocation3 + $0x22]] }
 0x3a3   :  { %10061 = vmatpush3.bf16.msra.mxu1 %v12119_v12  ;;  %10073 = vmatpush3.bf16.msra.mxu0 %v12122_v53  ;;  %v12257_v23 = vpack.c.bf16 %v2124_v24, %v2123_v20  ;;  %v12303_v51 = vpack.c.bf16 %v2280_v34, %v2279_v18  ;;  %v2282_v43 = vld [vmem:[%s14166_s2 + $0xd8] sm:$0xff]  ;;  %v2291_v50 = vld [vmem:[%s14167_s3 + $0x1a0] sm:$0xff]  ;;  %v2292_v59 = vld [vmem:[%s14167_s3 + $0x1a8] sm:$0xff]  ;;  %v12370_v34 = vpack.c.bf16 %v2286_v48, %v2285_v26  ;;  %s7009_s21 = sld [smem:[#allocation3 + $0x23]] }
 0x3a4   :  { %10062 = vmatprep.subr.bf16.mxu1 %v11074_v3  ;;  %10074 = vmatprep.subr.bf16.mxu0 %v11074_v3  ;;  %v12326_v2 = vpack.c.bf16 %v2282_v43, %v2281_v19  ;;  %v2283_v10 = vld [vmem:[%s14166_s2 + $0xe0] sm:$0xff]  ;;  %v2284_v32 = vld [vmem:[%s14166_s2 + $0xe8] sm:$0xff]  ;;  %v12340_v20 = vpack.c.bf16 %v2292_v59, %v2291_v50  ;;  %v2293_v24 = vld [vmem:[%s14167_s3 + $0x1b0] sm:$0xff] }
 0x3a5   :  { %8471 = vmatprep.mubr.msk.f32.mxu1 %vm11076_vm0, %v11075_v8  ;;  %8506 = vmatprep.mubr.msk.f32.mxu0 %vm11076_vm0, %v11075_v8  ;;  %v12350_v61 = vpack.c.bf16 %v2284_v32, %v2283_v10  ;;  %v12360_v27 = vpack.c.bf16 %v2294_v60, %v2293_v24  ;;  %v2295_v31 = vld [vmem:[%s14167_s3 + $0x1c0] sm:$0xff]  ;;  %v2296_v18 = vld [vmem:[%s14167_s3 + $0x1c8] sm:$0xff]  ;;  %v2297_v33 = vld [vmem:[%s14167_s3 + $0x1d0] sm:$0xff] }
 0x3a6   :  { %v12374_v52 = vpack.c.bf16 %v2296_v18, %v2295_v31  ;;  %v2298_v19 = vld [vmem:[%s14167_s3 + $0x1d8] sm:$0xff]  ;;  %v2299_v50 = vld [vmem:[%s14167_s3 + $0x1e0] sm:$0xff]  ;;  %v2300_v59 = vld [vmem:[%s14167_s3 + $0x1e8] sm:$0xff] }
 0x3a7   :  { %10064 = vmatpush3.bf16.msra.mxu1 %v12145_v58  ;;  %10076 = vmatpush3.bf16.msra.mxu0 %v12149_v5  ;;  %v12386_v43 = vpack.c.bf16 %v2298_v19, %v2297_v33  ;;  %v2301_v10 = vld [vmem:[%s14167_s3 + $0x1f0] sm:$0xff]  ;;  %v2302_v32 = vld [vmem:[%s14167_s3 + $0x1f8] sm:$0xff]  ;;  %v12486_v19 = vld [vmem:[%s14168_s4 + $0x1] ss:$0 sm:$0xff] }
 0x3a8   :  { %10065 = vmatprep.subr.bf16.mxu1 %v11074_v3  ;;  %10077 = vmatprep.subr.bf16.mxu0 %v11074_v3 }
 0x3ab   :  { %10067 = vmatpush3.bf16.msra.mxu1 %v12169_v56  ;;  %10079 = vmatpush3.bf16.msra.mxu0 %v12173_v11 }
 0x3ac   :  { %10068 = vmatprep.subr.bf16.mxu1 %v11074_v3  ;;  %10080 = vmatprep.subr.bf16.mxu0 %v11074_v3 }
 0x3af   :  { %10070 = vmatpush3.bf16.msra.mxu1 %v12189_v54  ;;  %10082 = vmatpush3.bf16.msra.mxu0 %v12193_v21 }
 0x3b0   :  { %10095 = vmatprep.subr.bf16.mxu1 %v11074_v3  ;;  %10083 = vmatprep.subr.bf16.mxu0 %v11074_v3 }
 0x3b2   :  { %8472 = vmatmul.mubr.msk.f32.vlgmr.msra.gmra.mrb[18].mxu1 %vm119_vm1, %v11959_v35 }
 0x3b3   :  { %10097 = vmatpush3.bf16.msra.mxu1 %v12209_v42  ;;  %8525 = vmatprep.mubr.msk.f32.mxu1 %vm11076_vm0, %v11075_v8 }
 0x3b4   :  { %10085 = vmatpush3.bf16.msra.mxu0 %v12213_v40  ;;  %10098 = vmatprep.subr.bf16.mxu1 %v11074_v3 }
 0x3b5   :  { %10086 = vmatprep.subr.bf16.mxu0 %v11074_v3 }
 0x3b7   :  { %10100 = vmatpush3.bf16.msra.mxu1 %v12231_v16 }
 0x3b8   :  { %10088 = vmatpush3.bf16.msra.mxu0 %v12237_v17  ;;  %10101 = vmatprep.subr.bf16.mxu1 %v11074_v3 }
 0x3b9   :  { %10089 = vmatprep.subr.bf16.mxu0 %v11074_v3 }
 0x3bb   :  { %10103 = vmatpush3.bf16.msra.mxu1 %v12253_v14 }
 0x3bc   :  { %10091 = vmatpush3.bf16.msra.mxu0 %v12257_v23  ;;  %10104 = vmatprep.subr.bf16.mxu1 %v11074_v3 }
 0x3bd   :  { %10092 = vmatprep.subr.bf16.mxu0 %v11074_v3 }
 0x3bf   :  { %10106 = vmatpush3.bf16.msra.mxu1 %v12273_v29 }
 0x3c0   :  { %10094 = vmatpush3.bf16.msra.mxu0 %v12277_v49  ;;  %10107 = vmatprep.subr.bf16.mxu1 %v11074_v3 }
 0x3c1   :  { %10131 = vmatprep.subr.bf16.mxu0 %v11074_v3 }
 0x3c2   :  { %8526 = vmatmul.mubr.msk.f32.vlgmr.msra.gmra.mrb[20].mxu1 %vm119_vm1, %v11959_v35 }
 0x3c3   :  { %8507 = vmatmul.mubr.f32.vlgmr.msra.gmra.mrb[20].mxu0 %v12141_v57  ;;  %10109 = vmatpush3.bf16.msra.mxu1 %v12293_v44 }
 0x3c4   :  { %10110 = vmatprep.subr.bf16.mxu1 %v11074_v3  ;;  %10133 = vmatpush3.bf16.msra.mxu0 %v12303_v51 }
 0x3c5   :  { %10134 = vmatprep.subr.bf16.mxu0 %v11074_v3  ;;  %8579 = vmatprep.mubr.msk.f32.mxu0 %vm11076_vm0, %v11075_v8 }
 0x3c6   :  { %8560 = vmatprep.mubr.msk.f32.mxu1 %vm11076_vm0, %v11075_v8 }
 0x3c7   :  { %10112 = vmatpush3.bf16.msra.mxu1 %v12316_v36 }
 0x3c8   :  { %10113 = vmatprep.subr.bf16.mxu1 %v11074_v3  ;;  %10136 = vmatpush3.bf16.msra.mxu0 %v12326_v2 }
 0x3c9   :  { %10137 = vmatprep.subr.bf16.mxu0 %v11074_v3 }
 0x3cb   :  { %10115 = vmatpush3.bf16.msra.mxu1 %v12340_v20 }
 0x3cc   :  { %10116 = vmatprep.subr.bf16.mxu1 %v11074_v3  ;;  %10139 = vmatpush3.bf16.msra.mxu0 %v12350_v61 }
 0x3cd   :  { %10140 = vmatprep.subr.bf16.mxu0 %v11074_v3 }
 0x3cf   :  { %10118 = vmatpush3.bf16.msra.mxu1 %v12360_v27 }
 0x3d0   :  { %10119 = vmatprep.subr.bf16.mxu1 %v11074_v3  ;;  %10142 = vmatpush3.bf16.msra.mxu0 %v12370_v34 }
 0x3d1   :  { %10143 = vmatprep.subr.bf16.mxu0 %v11074_v3 }
 0x3d3   :  { %10121 = vmatpush3.bf16.msra.mxu1 %v12374_v52  ;;  %8580 = vmatmul.mubr.msk.f32.vlgmr.msra.gmra.mrb[22].mxu0 %vm119_vm1, %v11959_v35  ;;  %v12402_v35 = vpack.c.bf16 %v2300_v59, %v2299_v50 }
 0x3d4   :  { %10122 = vmatprep.subr.bf16.mxu1 %v11074_v3  ;;  %10145 = vmatpush3.bf16.msra.mxu0 %v11882_v47  ;;  %v12414_v47 = vpack.c.bf16 %v2302_v32, %v2301_v10 }
 0x3d5   :  { %10146 = vmatprep.subr.bf16.mxu0 %v11074_v3  ;;  %8598 = vmatprep.mubr.msk.f32.mxu0 %vm11076_vm0, %v11075_v8 }
 0x3d7   :  { %10124 = vmatpush3.bf16.msra.mxu1 %v12386_v43 }
 0x3d8   :  { %10125 = vmatprep.subr.bf16.mxu1 %v11074_v3  ;;  %10148 = vmatpush3.bf16.msra.mxu0 %v11888_v55  ;;  %v12445_v55 = vld [vmem:[%s14165_s1 + $0x6] sm:$0x3] }
 0x3d9   :  { %10149 = vmatprep.subr.bf16.mxu0 %v11074_v3 }
 0x3db   :  { %10127 = vmatpush3.bf16.msra.mxu1 %v12402_v35 }
 0x3dc   :  { %10128 = vmatprep.subr.bf16.mxu1 %v11074_v3  ;;  %10151 = vmatpush3.bf16.msra.mxu0 %v11915_v46 }
 0x3dd   :  { %10152 = vmatprep.subr.bf16.mxu0 %v11074_v3 }
 0x3df   :  { %10130 = vmatpush3.bf16.msra.mxu1 %v12414_v47 }
 0x3e0   :  { %10154 = vmatpush3.bf16.msra.mxu0 %v11935_v28  ;;  %10155 = vmatprep.subr.bf16.mxu1 %v11074_v3  ;;  %v1801_v28 = vrot.slane %v12101_v25, 5 }
 0x3e1   :  { %10179 = vmatprep.subr.bf16.mxu0 %v11074_v3 }
 0x3e2   :  { %8561 = vmatmul.mubr.f32.vlgmr.msra.gmra.mrb[22].mxu1 %v12141_v57 }
 0x3e3   :  { %10157 = vmatpush3.bf16.msra.mxu1 %v11903_v22  ;;  %8633 = vmatprep.mubr.msk.f32.mxu1 %vm11076_vm0, %v11075_v8  ;;  %v1797_v22 = vrot.slane %v12101_v25, 7 }
 0x3e4   :  { %10158 = vmatprep.subr.bf16.mxu1 %v11074_v3  ;;  %8599 = vmatmul.mubr.msk.f32.vlgmr.msra.gmra.mrb[24].mxu0 %vm119_vm1, %v12445_v55 }
 0x3e5   :  { %10181 = vmatpush3.bf16.msra.mxu0 %v11961_v4  ;;  %8668 = vmatprep.mubr.msk.f32.mxu0 %vm11076_vm0, %v11075_v8  ;;  %v1805_v46 = vsel %vm93_vm2, %v12101_v25, %v1797_v22  ;;  %v1803_v4 = vrot.slane %v12101_v25, 4 }
 0x3e6   :  { %10182 = vmatprep.subr.bf16.mxu0 %v11074_v3 }
 0x3e7   :  { %10160 = vmatpush3.bf16.msra.mxu1 %v11912_v39  ;;  %v1799_v39 = vrot.slane %v12101_v25, 6 }
 0x3e8   :  { %10161 = vmatprep.subr.bf16.mxu1 %v11074_v3 }
 0x3e9   :  { %10184 = vmatpush3.bf16.msra.mxu0 %v11978_v41 }
 0x3ea   :  { %10185 = vmatprep.subr.bf16.mxu0 %v11074_v3 }
 0x3eb   :  { %10163 = vmatpush3.bf16.msra.mxu1 %v11932_v15  ;;  %v1806_v15 = vsel %vm95_vm3, %v1805_v46, %v1799_v39 }
 0x3ec   :  { %10164 = vmatprep.subr.bf16.mxu1 %v11074_v3 }
 0x3ed   :  { %10187 = vmatpush3.bf16.msra.mxu0 %v11992_v63 }
 0x3ee   :  { %10188 = vmatprep.subr.bf16.mxu0 %v11074_v3 }
 0x3ef   :  { %10166 = vmatpush3.bf16.msra.mxu1 %v11952_v1  ;;  %v1807_v1 = vsel %vm97_vm4, %v1806_v15, %v1799_v39 }
 0x3f0   :  { %10167 = vmatprep.subr.bf16.mxu1 %v11074_v3  ;;  %v1808_v41 = vsel %vm99_vm5, %v1807_v1, %v1801_v28  ;;  %v12494_v28 = vld [vmem:[%s14168_s4 + $0x2] ss:$0 sm:$0xff] }
 0x3f1   :  { %10190 = vmatpush3.bf16.msra.mxu0 %v12005_v30  ;;  %v1809_v63 = vsel %vm101_vm6, %v1808_v41, %v1803_v4 }
 0x3f2   :  { %10191 = vmatprep.subr.bf16.mxu0 %v11074_v3 }
 0x3f3   :  { %10169 = vmatpush3.bf16.msra.mxu1 %v12029_v9 }
 0x3f4   :  { %10170 = vmatprep.subr.bf16.mxu1 %v11074_v3 }
 0x3f5   :  { %10193 = vmatpush3.bf16.msra.mxu0 %v12034_v13 }
 0x3f6   :  { %10194 = vmatprep.subr.bf16.mxu0 %v11074_v3 }
 0x3f7   :  { %10172 = vmatpush3.bf16.msra.mxu1 %v12048_v38 }
 0x3f8   :  { %10173 = vmatprep.subr.bf16.mxu1 %v11074_v3 }
 0x3f9   :  { %10196 = vmatpush3.bf16.msra.mxu0 %v12060_v6 }
 0x3fa   :  { %10197 = vmatprep.subr.bf16.mxu0 %v11074_v3 }
 0x3fb   :  { %10175 = vmatpush3.bf16.msra.mxu1 %v12069_v37  ;;  %v12480_v37 = vld [vmem:[%s14168_s4] ss:$0 sm:$0xff] }
 0x3fc   :  { %10176 = vmatprep.subr.bf16.mxu1 %v11074_v3 }
 0x3fd   :  { %10199 = vmatpush3.bf16.msra.mxu0 %v12073_v62 }
 0x3fe   :  { %10200 = vmatprep.subr.bf16.mxu0 %v11074_v3 }
 0x3ff   :  { %10178 = vmatpush3.bf16.msra.mxu1 %v12089_v45 }
 0x400   :  { %10203 = vmatprep.subr.bf16.mxu1 %v11074_v3 }
 0x401   :  { %10202 = vmatpush3.bf16.msra.mxu0 %v12093_v0 }
 0x402   :  { %10215 = vmatprep.subr.bf16.mxu0 %v11074_v3 }
 0x475   :  { %v1892_v30 = vpop.f32.mrb[16].mxu1  ;;  %v2017_v13 = vpop.f32.mrb[18].mxu0 }
 0x476   :  { %v1893_v9 = vadd.f32 %v1892_v30, %v1809_v63  ;;  %v8419_v38 = vpop.f32.mrb[17].mxu1  ;;  %v8454_v6 = vpop.f32.mrb[19].mxu0 }
 0x478   :  { %v1901_v62 = vadd.f32 %v12480_v37, %v1893_v9 }
 0x47a   :  { %v6936_v45 = vmul.f32 -1.442695, %v1901_v62  ;;  %v12501_v62 = vld [vmem:[%s14168_s4 + $0x3] ss:$0 sm:$0xff] }
 0x47c   :  { %10931 = vpow2.f32 %v6936_v45 }
 0x485   :  { %v2087_v25 = vpop.f32.mrb[18].mxu1 }
 0x486   :  { %v2088_v0 = vadd.f32 %v2087_v25, %v2017_v13  ;;  %v8473_v57 = vpop.f32.mrb[19].mxu1  ;;  %v10932_v24 = vpop.eup %10931 }
 0x487   :  { %v1905_v60 = vadd.f32 1.0, %v10932_v24 }
 0x488   :  { %v2096_v59 = vadd.f32 %v12486_v19, %v2088_v0 }
 0x489   :  { %10933 = vrcp.f32 %v1905_v60 }
 0x48a   :  { %v6939_v32 = vmul.f32 -1.442695, %v2096_v59 }
 0x48c   :  { %10935 = vpow2.f32 %v6939_v32 }
 0x493   :  { %v10934_v50 = vpop.eup %10933 }
 0x494   :  { %v1908_v10 = vmul.f32 %v10934_v50, %v12131_v7 }
 0x495   :  { %v2263_v26 = vpop.f32.mrb[20].mxu1 }
 0x496   :  { %v2193_v48 = vpop.f32.mrb[20].mxu0  ;;  %v8527_v31 = vpop.f32.mrb[21].mxu1  ;;  %v1917_v39 = vrot.slane %v1908_v10, 3  ;;  %v1909_v1 = vsel %vm306_vm7, %v1908_v10, 0.0 }
 0x497   :  { %v2264_v18 = vadd.f32 %v2263_v26, %v2193_v48  ;;  %v8508_v33 = vpop.f32.mrb[21].mxu0  ;;  %v1910_v63 = vrot.slane %v1909_v1, 4  ;;  %v10936_v30 = vpop.eup %10935 }
 0x498   :  { %v1919_v15 = vsel %vm306_vm7, %v1917_v39, 0.0  ;;  %v2100_v38 = vadd.f32 1.0, %v10936_v30 }
 0x499   :  { %v1920_v4 = vrot.slane %v1919_v15, 4  ;;  %v2272_v41 = vadd.f32 %v12494_v28, %v2264_v18  ;;  %v1911_v13 = vadd.f32 %v1910_v63, %v1909_v1 }
 0x49b   :  { %v1921_v7 = vadd.f32 %v1920_v4, %v1919_v15  ;;  %v6942_v9 = vmul.f32 -1.442695, %v2272_v41  ;;  %v1912_v57 = vrot.slane %v1911_v13, 2 }
 0x49d   :  { %v1922_v0 = vrot.slane %v1921_v7, 2  ;;  %10937 = vpow2.f32 %v6942_v9  ;;  %v1913_v26 = vadd.f32 %v1912_v57, %v1911_v13 }
 0x49e   :  { %10939 = vrcp.f32 %v2100_v38 }
 0x49f   :  { %v1923_v60 = vadd.f32 %v1922_v0, %v1921_v7  ;;  %v1914_v31 = vrot.slane %v1913_v26, 1 }
 0x4a1   :  { %v1924_v48 = vrot.slane %v1923_v60, 1  ;;  %v1915_v32 = vadd.f32 %v1914_v31, %v1913_v26 }
 0x4a3   :  { %v1925_v33 = vadd.f32 %v1924_v48, %v1923_v60 }
 0x4a6   :  { %v2439_v22 = vpop.f32.mrb[22].mxu0 }
 0x4a7   :  { %v8581_v46 = vpop.f32.mrb[23].mxu0  ;;  %v10938_v18 = vpop.eup %10937 }
 0x4a8   :  { %v10940_v50 = vpop.eup %10939  ;;  %v2276_v10 = vadd.f32 1.0, %v10938_v18 }
 0x4b5   :  { %v2369_v6 = vpop.f32.mrb[22].mxu1 }
 0x4b6   :  { %v2440_v45 = vadd.f32 %v2439_v22, %v2369_v6  ;;  %v8562_v25 = vpop.f32.mrb[23].mxu1  ;;  %v1926_v22 = vsel %vm93_vm2, %v1915_v32, %v1925_v33 }
 0x4b7   :  { %v12506_v41 = vpop.f32.mrb[24].mxu0 }
 0x4b8   :  { %v2448_v24 = vadd.f32 %v12501_v62, %v2440_v45  ;;  %v8600_v63 = vpop.f32.mrb[25].mxu0 }
 0x4ba   :  { %10941 = vtanh.f32 %v2448_v24 }
 0x4bb   :  { %10943 = vrcp.f32 %v2276_v10 }
 0x4c4   :  { %v10942_v59 = vpop.eup %10941 }
 0x4c5   :  { %v2450_v39 = vmul.f32 %v10942_v59, %v10940_v50  ;;  %v10944_v15 = vpop.eup %10943 }
 0x4c7   :  { %v2451_v46 = vadd.f32 %v2450_v39, %v1926_v22 }
 0x4c9   :  { %10945 = vtanh.f32 %v2451_v46 }
 0x4d3   :  { %v10946_v1 = vpop.eup %10945 }
 0x4d4   :  { %v2453_v4 = vmul.f32 %v10946_v1, %v10944_v15  ;;  %v3539_v15 = vld [vmem:[%s14167_s3 + $0x90] sm:$0xff]  ;;  %v3540_v1 = vld [vmem:[%s14167_s3 + $0x98] sm:$0xff] }
 0x4d6   :  { %2455 = vrot.lane.b32.xlu1 %v2453_v4, %s11077_s12  ;;  %v2600_v4 = vrot.slane %v12506_v41, 6 }
 0x548   :  { %v2456_v30 = vpop.permute.xlu1 %2455 }
 0x549   :  { %v2458_v7 = vsel %vm119_vm1, %v2451_v46, %v2456_v30  ;;  %v12704_v30 = vpack.c.bf16 %v3540_v1, %v3539_v15 }
 0x54a   :  { %2459 = vst [vmem:[#allocation2 + $0x4] sm:$0x3] %v2458_v7  ;;  %v3541_v7 = vld [vmem:[%s14167_s3 + $0xa0] sm:$0xff] }
 0x551   :  { %v2464_v9 = vld [vmem:[%s2463_s22] sm:$0x1]  ;;  %v6953_v6 = vld [vmem:[%s6800_s13 + $0x1] sm:$0x1]  ;;  %s3264_s22 = scalar_lea.vmem [#allocation2], %s6972_s0  ;;  %s6815_s13 = scalar_lea.vmem [#allocation2], %s6978_s29 }
 0x552   :  { %v2468_v13 = vld [vmem:[%s2467_s24] sm:$0x1]  ;;  %v6956_v45 = vld [vmem:[%s6803_s26 + $0x1] sm:$0x1]  ;;  %v2495_v26 = vrot.slane %v6953_v6, 5  ;;  %s3268_s24 = scalar_lea.vmem [#allocation2], %s6974_s15 }
 0x553   :  { %v2472_v38 = vld [vmem:[%s2471_s25] sm:$0x1]  ;;  %v2489_v25 = vrot.slane %v2468_v13, 7  ;;  %v6959_v57 = vld [vmem:[%s6806_s27 + $0x1] sm:$0x1]  ;;  %v2508_v24 = vadd.f32 %v2468_v13, %v2464_v9  ;;  %v2510_v60 = vadd.f32 %v6956_v45, %v6953_v6  ;;  %v2498_v31 = vrot.slane %v6956_v45, 4 }
 0x554   :  { %v2492_v0 = vrot.slane %v2472_v38, 6  ;;  %v2501_v50 = vrot.slane %v6959_v57, 3  ;;  %v2602_v6 = vrot.slane %v12506_v41, 5  ;;  %v3543_v45 = vld [vmem:[%s14167_s3 + $0xb0] sm:$0xff]  ;;  %s3272_s25 = scalar_lea.vmem [#allocation2], %s6976_s14  ;;  %s6818_s26 = scalar_lea.vmem [#allocation2], %s6981_s17 }
 0x555   :  { %v2503_v48 = vsel %vm93_vm2, %v2464_v9, %v2489_v25  ;;  %v2511_v33 = vadd.f32 %v6959_v57, %v2510_v60  ;;  %v2509_v32 = vadd.f32 %v2508_v24, %v2472_v38  ;;  %v3542_v9 = vld [vmem:[%s14167_s3 + $0xa8] sm:$0xff]  ;;  %v3544_v25 = vld [vmem:[%s14167_s3 + $0xb8] sm:$0xff]  ;;  %v2604_v57 = vrot.slane %v12506_v41, 4  ;;  %s6821_s27 = scalar_lea.vmem [#allocation2], %s6984_s18  ;;  %s6998_s0 = sshll.u32 %s6997_s23, 1 }
 0x556   :  { %v2504_v18 = vsel %vm95_vm3, %v2503_v48, %v2492_v0  ;;  %v12718_v38 = vpack.c.bf16 %v3542_v9, %v3541_v7  ;;  %v12731_v24 = vpack.c.bf16 %v3544_v25, %v3543_v45  ;;  %s7000_s15 = sshll.u32 %s6999_s28, 1  ;;  %s7002_s14 = sshll.u32 %s7001_s16, 1 }
 0x557   :  { %v2505_v59 = vsel %vm97_vm4, %v2504_v18, %v2495_v26  ;;  %v2513_v39 = vrot.slane %v2511_v33, 7  ;;  %s7004_s29 = sshll.u32 %s7003_s19, 1  ;;  %s7007_s17 = sshll.u32 %s7006_s20, 1 }
 0x558   :  { %v2506_v10 = vsel %vm99_vm5, %v2505_v59, %v2498_v31  ;;  %s7010_s18 = sshll.u32 %s7009_s21, 1  ;;  %s7023_s23 = sld [smem:[#allocation3 + $0x24]] }
 0x559   :  { %v12514_v22 = vsel %vm101_vm6, %v2506_v10, %v2501_v50  ;;  %v12518_v46 = vsel %vm93_vm2, %v2509_v32, %v2513_v39  ;;  %s7025_s28 = sld [smem:[#allocation3 + $0x25]]  ;;  %s7027_s16 = sld [smem:[#allocation3 + $0x26]] }
 0x55a   :  { %8634 = vmatmul.mubr.f32.vlgmr.msra.gmra.mrb[24].mxu1 %v12514_v22  ;;  %8669 = vmatmul.mubr.f32.vlgmr.msra.gmra.mrb[26].mxu0 %v12518_v46  ;;  %s7029_s19 = sld [smem:[#allocation3 + $0x27]]  ;;  %s7032_s20 = sld [smem:[#allocation3 + $0x28]] }
 0x55b   :  { %10205 = vmatpush3.bf16.msra.mxu1 %v12119_v12  ;;  %10217 = vmatpush3.bf16.msra.mxu0 %v12122_v53  ;;  %v3317_v12 = vld [vmem:[%s14166_s2] sm:$0xff]  ;;  %v3318_v53 = vld [vmem:[%s14166_s2 + $0x8] sm:$0xff]  ;;  %s7035_s21 = sld [smem:[#allocation3 + $0x29]] }
 0x55c   :  { %10206 = vmatprep.subr.bf16.mxu1 %v11074_v3  ;;  %10218 = vmatprep.subr.bf16.mxu0 %v11074_v3 }
 0x55d   :  { %8687 = vmatprep.mubr.msk.f32.mxu1 %vm11076_vm0, %v11075_v8  ;;  %8722 = vmatprep.mubr.msk.f32.mxu0 %vm11076_vm0, %v11075_v8 }
 0x55f   :  { %10208 = vmatpush3.bf16.msra.mxu1 %v12145_v58  ;;  %10220 = vmatpush3.bf16.msra.mxu0 %v12149_v5  ;;  %v3319_v58 = vld [vmem:[%s14166_s2 + $0x10] sm:$0xff]  ;;  %v12608_v5 = vpack.c.bf16 %v3318_v53, %v3317_v12 }
 0x560   :  { %10209 = vmatprep.subr.bf16.mxu1 %v11074_v3  ;;  %10221 = vmatprep.subr.bf16.mxu0 %v11074_v3 }
 0x563   :  { %10211 = vmatpush3.bf16.msra.mxu1 %v12169_v56  ;;  %10223 = vmatpush3.bf16.msra.mxu0 %v12173_v11  ;;  %v3320_v56 = vld [vmem:[%s14166_s2 + $0x18] sm:$0xff] }
 0x564   :  { %10212 = vmatprep.subr.bf16.mxu1 %v11074_v3  ;;  %10224 = vmatprep.subr.bf16.mxu0 %v11074_v3  ;;  %v12614_v11 = vpack.c.bf16 %v3320_v56, %v3319_v58 }
 0x567   :  { %10214 = vmatpush3.bf16.msra.mxu1 %v12189_v54  ;;  %10226 = vmatpush3.bf16.msra.mxu0 %v12193_v21  ;;  %v3321_v54 = vld [vmem:[%s14166_s2 + $0x20] sm:$0xff] }
 0x568   :  { %10239 = vmatprep.subr.bf16.mxu1 %v11074_v3  ;;  %10227 = vmatprep.subr.bf16.mxu0 %v11074_v3  ;;  %v3412_v21 = vld [vmem:[%s14167_s3] sm:$0xff] }
 0x56a   :  { %8688 = vmatmul.mubr.msk.f32.vlgmr.msra.gmra.mrb[26].mxu1 %vm119_vm1, %v12445_v55 }
 0x56b   :  { %10241 = vmatpush3.bf16.msra.mxu1 %v12209_v42  ;;  %8741 = vmatprep.mubr.msk.f32.mxu1 %vm11076_vm0, %v11075_v8  ;;  %v3413_v42 = vld [vmem:[%s14167_s3 + $0x8] sm:$0xff] }
 0x56c   :  { %10229 = vmatpush3.bf16.msra.mxu0 %v12213_v40  ;;  %10242 = vmatprep.subr.bf16.mxu1 %v11074_v3  ;;  %v3322_v40 = vld [vmem:[%s14166_s2 + $0x28] sm:$0xff] }
 0x56d   :  { %10230 = vmatprep.subr.bf16.mxu0 %v11074_v3 }
 0x56f   :  { %10244 = vmatpush3.bf16.msra.mxu1 %v12231_v16  ;;  %v12629_v16 = vpack.c.bf16 %v3413_v42, %v3412_v21 }
 0x570   :  { %10232 = vmatpush3.bf16.msra.mxu0 %v12237_v17  ;;  %10245 = vmatprep.subr.bf16.mxu1 %v11074_v3  ;;  %v3414_v17 = vld [vmem:[%s14167_s3 + $0x10] sm:$0xff] }
 0x571   :  { %10233 = vmatprep.subr.bf16.mxu0 %v11074_v3 }
 0x573   :  { %10247 = vmatpush3.bf16.msra.mxu1 %v12253_v14  ;;  %v3415_v14 = vld [vmem:[%s14167_s3 + $0x18] sm:$0xff] }
 0x574   :  { %10235 = vmatpush3.bf16.msra.mxu0 %v12257_v23  ;;  %10248 = vmatprep.subr.bf16.mxu1 %v11074_v3  ;;  %v12638_v23 = vpack.c.bf16 %v3415_v14, %v3414_v17 }
 0x575   :  { %10236 = vmatprep.subr.bf16.mxu0 %v11074_v3 }
 0x577   :  { %10250 = vmatpush3.bf16.msra.mxu1 %v12273_v29  ;;  %v12641_v29 = vpack.c.bf16 %v3322_v40, %v3321_v54 }
 0x578   :  { %10238 = vmatpush3.bf16.msra.mxu0 %v12277_v49  ;;  %10251 = vmatprep.subr.bf16.mxu1 %v11074_v3  ;;  %v3416_v49 = vld [vmem:[%s14167_s3 + $0x20] sm:$0xff] }
 0x579   :  { %10275 = vmatprep.subr.bf16.mxu0 %v11074_v3 }
 0x57a   :  { %8742 = vmatmul.mubr.msk.f32.vlgmr.msra.gmra.mrb[28].mxu1 %vm119_vm1, %v12445_v55 }
 0x57b   :  { %8723 = vmatmul.mubr.f32.vlgmr.msra.gmra.mrb[28].mxu0 %v12518_v46  ;;  %10253 = vmatpush3.bf16.msra.mxu1 %v12293_v44  ;;  %v3417_v44 = vld [vmem:[%s14167_s3 + $0x28] sm:$0xff] }
 0x57c   :  { %10254 = vmatprep.subr.bf16.mxu1 %v11074_v3  ;;  %10277 = vmatpush3.bf16.msra.mxu0 %v12303_v51  ;;  %v3323_v51 = vld [vmem:[%s14166_s2 + $0x30] sm:$0xff] }
 0x57d   :  { %10278 = vmatprep.subr.bf16.mxu0 %v11074_v3  ;;  %8795 = vmatprep.mubr.msk.f32.mxu0 %vm11076_vm0, %v11075_v8 }
 0x57e   :  { %8776 = vmatprep.mubr.msk.f32.mxu1 %vm11076_vm0, %v11075_v8 }
 0x57f   :  { %10256 = vmatpush3.bf16.msra.mxu1 %v12316_v36  ;;  %v3324_v36 = vld [vmem:[%s14166_s2 + $0x38] sm:$0xff] }
 0x580   :  { %10257 = vmatprep.subr.bf16.mxu1 %v11074_v3  ;;  %10280 = vmatpush3.bf16.msra.mxu0 %v12326_v2  ;;  %v12658_v2 = vpack.c.bf16 %v3417_v44, %v3416_v49 }
 0x581   :  { %10281 = vmatprep.subr.bf16.mxu0 %v11074_v3 }
 0x583   :  { %10259 = vmatpush3.bf16.msra.mxu1 %v12340_v20  ;;  %v12661_v20 = vpack.c.bf16 %v3324_v36, %v3323_v51 }
 0x584   :  { %10260 = vmatprep.subr.bf16.mxu1 %v11074_v3  ;;  %10283 = vmatpush3.bf16.msra.mxu0 %v12350_v61  ;;  %v3418_v61 = vld [vmem:[%s14167_s3 + $0x30] sm:$0xff] }
 0x585   :  { %10284 = vmatprep.subr.bf16.mxu0 %v11074_v3 }
 0x587   :  { %10262 = vmatpush3.bf16.msra.mxu1 %v12360_v27  ;;  %v3419_v27 = vld [vmem:[%s14167_s3 + $0x38] sm:$0xff] }
 0x588   :  { %10263 = vmatprep.subr.bf16.mxu1 %v11074_v3  ;;  %10286 = vmatpush3.bf16.msra.mxu0 %v12370_v34  ;;  %v3537_v34 = vld [vmem:[%s14167_s3 + $0x80] sm:$0xff] }
 0x589   :  { %10287 = vmatprep.subr.bf16.mxu0 %v11074_v3 }
 0x58b   :  { %10265 = vmatpush3.bf16.msra.mxu1 %v12374_v52  ;;  %8796 = vmatmul.mubr.msk.f32.vlgmr.msra.gmra.mrb[30].mxu0 %vm119_vm1, %v12445_v55  ;;  %v3538_v52 = vld [vmem:[%s14167_s3 + $0x88] sm:$0xff] }
 0x58c   :  { %10266 = vmatprep.subr.bf16.mxu1 %v11074_v3  ;;  %8814 = vmatprep.mubr.msk.f32.mxu0 %vm11076_vm0, %v11075_v8  ;;  %v12687_v55 = vpack.c.bf16 %v3538_v52, %v3537_v34 }
 0x58d   :  { %10289 = vmatpush3.bf16.msra.mxu0 %v12608_v5 }
 0x58e   :  { %10290 = vmatprep.subr.bf16.mxu0 %v11074_v3 }
 0x58f   :  { %10268 = vmatpush3.bf16.msra.mxu1 %v12386_v43  ;;  %v12678_v43 = vpack.c.bf16 %v3419_v27, %v3418_v61 }
 0x590   :  { %10269 = vmatprep.subr.bf16.mxu1 %v11074_v3 }
 0x591   :  { %10292 = vmatpush3.bf16.msra.mxu0 %v12614_v11 }
 0x592   :  { %10293 = vmatprep.subr.bf16.mxu0 %v11074_v3 }
 0x593   :  { %10271 = vmatpush3.bf16.msra.mxu1 %v12402_v35  ;;  %v2598_v35 = vrot.slane %v12506_v41, 7 }
 0x594   :  { %10272 = vmatprep.subr.bf16.mxu1 %v11074_v3 }
 0x595   :  { %10295 = vmatpush3.bf16.msra.mxu0 %v12641_v29  ;;  %v2606_v63 = vsel %vm93_vm2, %v12506_v41, %v2598_v35 }
 0x596   :  { %10296 = vmatprep.subr.bf16.mxu0 %v11074_v3  ;;  %v2607_v13 = vsel %vm95_vm3, %v2606_v63, %v2600_v4 }
 0x597   :  { %10274 = vmatpush3.bf16.msra.mxu1 %v12414_v47  ;;  %v12685_v47 = vld [vmem:[%s14165_s1 + $0x8] sm:$0x3]  ;;  %v2608_v0 = vsel %vm97_vm4, %v2607_v13, %v2600_v4 }
 0x598   :  { %10299 = vmatprep.subr.bf16.mxu1 %v11074_v3  ;;  %v2609_v60 = vsel %vm99_vm5, %v2608_v0, %v2602_v6 }
 0x599   :  { %10298 = vmatpush3.bf16.msra.mxu0 %v12661_v20  ;;  %v2610_v26 = vsel %vm101_vm6, %v2609_v60, %v2604_v57 }
 0x59a   :  { %8777 = vmatmul.mubr.f32.vlgmr.msra.gmra.mrb[30].mxu1 %v12518_v46  ;;  %10323 = vmatprep.subr.bf16.mxu0 %v11074_v3 }
 0x59b   :  { %8849 = vmatprep.mubr.msk.f32.mxu1 %vm11076_vm0, %v11075_v8  ;;  %10301 = vmatpush3.bf16.msra.mxu1 %v12629_v16 }
 0x59c   :  { %10302 = vmatprep.subr.bf16.mxu1 %v11074_v3  ;;  %8815 = vmatmul.mubr.msk.f32.vlgmr.msra.gmra.mrb[32].mxu0 %vm119_vm1, %v12685_v47 }
 0x59d   :  { %10325 = vmatpush3.bf16.msra.mxu0 %v12687_v55  ;;  %8884 = vmatprep.mubr.msk.f32.mxu0 %vm11076_vm0, %v11075_v8 }
 0x59e   :  { %10326 = vmatprep.subr.bf16.mxu0 %v11074_v3 }
 0x59f   :  { %10304 = vmatpush3.bf16.msra.mxu1 %v12638_v23 }
 0x5a0   :  { %10305 = vmatprep.subr.bf16.mxu1 %v11074_v3 }
 0x5a1   :  { %10328 = vmatpush3.bf16.msra.mxu0 %v12704_v30 }
 0x5a2   :  { %10329 = vmatprep.subr.bf16.mxu0 %v11074_v3 }
 0x5a3   :  { %10307 = vmatpush3.bf16.msra.mxu1 %v12658_v2 }
 0x5a4   :  { %10308 = vmatprep.subr.bf16.mxu1 %v11074_v3 }
 0x5a5   :  { %10331 = vmatpush3.bf16.msra.mxu0 %v12718_v38 }
 0x5a6   :  { %10332 = vmatprep.subr.bf16.mxu0 %v11074_v3 }
 0x5a7   :  { %10310 = vmatpush3.bf16.msra.mxu1 %v12678_v43 }
 0x5a8   :  { %10311 = vmatprep.subr.bf16.mxu1 %v11074_v3 }
 0x5a9   :  { %10334 = vmatpush3.bf16.msra.mxu0 %v12731_v24 }
 0x5aa   :  { %10335 = vmatprep.subr.bf16.mxu0 %v11074_v3 }
 0x62d   :  { %v2693_v48 = vpop.f32.mrb[24].mxu1  ;;  %v2818_v18 = vpop.f32.mrb[26].mxu0 }
 0x62e   :  { %v2694_v31 = vadd.f32 %v2693_v48, %v2610_v26  ;;  %v8635_v33 = vpop.f32.mrb[25].mxu1  ;;  %v8670_v50 = vpop.f32.mrb[27].mxu0 }
 0x630   :  { %v2702_v41 = vadd.f32 %v12480_v37, %v2694_v31 }
 0x632   :  { %v6962_v59 = vmul.f32 -1.442695, %v2702_v41  ;;  %v3421_v41 = vld [vmem:[%s14167_s3 + $0x48] sm:$0xff] }
 0x634   :  { %10947 = vpow2.f32 %v6962_v59  ;;  %v3545_v59 = vld [vmem:[%s14167_s3 + $0xc0] sm:$0xff] }
 0x63d   :  { %v2888_v10 = vpop.f32.mrb[26].mxu1 }
 0x63e   :  { %v2889_v32 = vadd.f32 %v2888_v10, %v2818_v18  ;;  %v8689_v39 = vpop.f32.mrb[27].mxu1  ;;  %v10948_v46 = vpop.eup %10947 }
 0x63f   :  { %v2706_v12 = vadd.f32 1.0, %v10948_v46  ;;  %v3422_v46 = vld [vmem:[%s14167_s3 + $0x50] sm:$0xff] }
 0x640   :  { %v2897_v40 = vadd.f32 %v12486_v19, %v2889_v32  ;;  %v3546_v32 = vld [vmem:[%s14167_s3 + $0xc8] sm:$0xff] }
 0x641   :  { %10949 = vrcp.f32 %v2706_v12  ;;  %v12760_v39 = vpack.c.bf16 %v3546_v32, %v3545_v59  ;;  %v3423_v12 = vld [vmem:[%s14167_s3 + $0x58] sm:$0xff] }
 0x642   :  { %v6965_v14 = vmul.f32 -1.442695, %v2897_v40  ;;  %v3549_v40 = vld [vmem:[%s14167_s3 + $0xe0] sm:$0xff] }
 0x643   :  { %10337 = vmatpush3.bf16.msra.mxu0 %v12760_v39 }
 0x644   :  { %10951 = vpow2.f32 %v6965_v14  ;;  %10338 = vmatprep.subr.bf16.mxu0 %v11074_v3 }
 0x64b   :  { %v10950_v42 = vpop.eup %10949 }
 0x64c   :  { %v2709_v17 = vmul.f32 %v10950_v42, %v12514_v22 }
 0x64d   :  { %v3064_v53 = vpop.f32.mrb[28].mxu1 }
 0x64e   :  { %v2994_v58 = vpop.f32.mrb[28].mxu0  ;;  %v8743_v56 = vpop.f32.mrb[29].mxu1  ;;  %v2718_v49 = vrot.slane %v2709_v17, 3  ;;  %v2710_v36 = vsel %vm306_vm7, %v2709_v17, 0.0  ;;  %v3550_v17 = vld [vmem:[%s14167_s3 + $0xe8] sm:$0xff] }
 0x64f   :  { %v3065_v54 = vadd.f32 %v3064_v53, %v2994_v58  ;;  %v8724_v21 = vpop.f32.mrb[29].mxu0  ;;  %v2711_v34 = vrot.slane %v2710_v36, 4  ;;  %v10952_v52 = vpop.eup %10951  ;;  %v3547_v53 = vld [vmem:[%s14167_s3 + $0xd0] sm:$0xff]  ;;  %v12774_v58 = vpack.c.bf16 %v3423_v12, %v3422_v46  ;;  %v3548_v56 = vld [vmem:[%s14167_s3 + $0xd8] sm:$0xff] }
 0x650   :  { %v2720_v51 = vsel %vm306_vm7, %v2718_v49, 0.0  ;;  %v2901_v19 = vadd.f32 1.0, %v10952_v52  ;;  %v3425_v21 = vld [vmem:[%s14167_s3 + $0x68] sm:$0xff]  ;;  %v12786_v42 = vpack.c.bf16 %v3548_v56, %v3547_v53  ;;  %v3426_v49 = vld [vmem:[%s14167_s3 + $0x70] sm:$0xff] }
 0x651   :  { %v2721_v61 = vrot.slane %v2720_v51, 4  ;;  %v3073_v27 = vadd.f32 %v12494_v28, %v3065_v54  ;;  %v2712_v1 = vadd.f32 %v2711_v34, %v2710_v36  ;;  %v3424_v54 = vld [vmem:[%s14167_s3 + $0x60] sm:$0xff]  ;;  %v3552_v36 = vld [vmem:[%s14167_s3 + $0xf8] sm:$0xff] }
 0x652   :  { %v12795_v14 = vpack.c.bf16 %v3425_v21, %v3424_v54  ;;  %10340 = vmatpush3.bf16.msra.mxu0 %v12786_v42  ;;  %v3531_v54 = vld [vmem:[%s14166_s2 + $0x50] sm:$0xff]  ;;  %v3532_v21 = vld [vmem:[%s14166_s2 + $0x58] sm:$0xff] }
 0x653   :  { %v2722_v35 = vadd.f32 %v2721_v61, %v2720_v51  ;;  %v6968_v15 = vmul.f32 -1.442695, %v3073_v27  ;;  %v2713_v9 = vrot.slane %v2712_v1, 2  ;;  %10341 = vmatprep.subr.bf16.mxu0 %v11074_v3  ;;  %v3551_v51 = vld [vmem:[%s14167_s3 + $0xf0] sm:$0xff] }
 0x654   :  { %v12819_v52 = vpack.c.bf16 %v3552_v36, %v3551_v51  ;;  %v12871_v51 = vpack.c.bf16 %v3532_v21, %v3531_v54  ;;  %v3711_v54 = vld [vmem:[%s14166_s2 + $0xb0] sm:$0xff]  ;;  %v3712_v21 = vld [vmem:[%s14166_s2 + $0xb8] sm:$0xff] }
 0x655   :  { %v2723_v22 = vrot.slane %v2722_v35, 2  ;;  %10953 = vpow2.f32 %v6968_v15  ;;  %v2714_v45 = vadd.f32 %v2713_v9, %v2712_v1 }
 0x656   :  { %10955 = vrcp.f32 %v2901_v19 }
 0x657   :  { %v2724_v6 = vadd.f32 %v2723_v22, %v2722_v35  ;;  %v2715_v28 = vrot.slane %v2714_v45, 1 }
 0x659   :  { %v2725_v25 = vrot.slane %v2724_v6, 1  ;;  %v2716_v31 = vadd.f32 %v2715_v28, %v2714_v45 }
 0x65b   :  { %v2726_v57 = vadd.f32 %v2725_v25, %v2724_v6 }
 0x65d   :  { %v2727_v33 = vsel %vm93_vm2, %v2716_v31, %v2726_v57  ;;  %v3529_v57 = vld [vmem:[%s14166_s2 + $0x40] sm:$0xff] }
 0x65e   :  { %v3240_v37 = vpop.f32.mrb[30].mxu0  ;;  %v3713_v31 = vld [vmem:[%s14167_s3 + $0x100] sm:$0xff] }
 0x65f   :  { %v8797_v44 = vpop.f32.mrb[31].mxu0  ;;  %v10954_v0 = vpop.eup %10953 }
 0x660   :  { %v10956_v60 = vpop.eup %10955  ;;  %v3077_v48 = vadd.f32 1.0, %v10954_v0  ;;  %v3427_v44 = vld [vmem:[%s14167_s3 + $0x78] sm:$0xff] }
 0x661   :  { %v12815_v27 = vpack.c.bf16 %v3427_v44, %v3426_v49  ;;  %v3716_v49 = vld [vmem:[%s14167_s3 + $0x118] sm:$0xff] }
 0x66d   :  { %v3170_v4 = vpop.f32.mrb[30].mxu1 }
 0x66e   :  { %v3241_v63 = vadd.f32 %v3240_v37, %v3170_v4  ;;  %v8778_v7 = vpop.f32.mrb[31].mxu1  ;;  %v12799_v37 = vpack.c.bf16 %v3550_v17, %v3549_v40  ;;  %v3715_v17 = vld [vmem:[%s14167_s3 + $0x110] sm:$0xff] }
 0x66f   :  { %v12827_v15 = vpop.f32.mrb[32].mxu0  ;;  %v12875_v36 = vpack.c.bf16 %v3716_v49, %v3715_v17  ;;  %v3727_v17 = vld [vmem:[%s14167_s3 + $0x170] sm:$0xff]  ;;  %v3728_v49 = vld [vmem:[%s14167_s3 + $0x178] sm:$0xff] }
 0x670   :  { %v3249_v13 = vadd.f32 %v12501_v62, %v3241_v63  ;;  %v3420_v62 = vld [vmem:[%s14167_s3 + $0x40] sm:$0xff]  ;;  %10343 = vmatpush3.bf16.msra.mxu0 %v12799_v37  ;;  %v8816_v1 = vpop.f32.mrb[33].mxu0 }
 0x671   :  { %v12755_v10 = vpack.c.bf16 %v3421_v41, %v3420_v62  ;;  %10344 = vmatprep.subr.bf16.mxu0 %v11074_v3  ;;  %v3718_v1 = vld [vmem:[%s14167_s3 + $0x128] sm:$0xff] }
 0x672   :  { %10957 = vtanh.f32 %v3249_v13 }
 0x673   :  { %10959 = vrcp.f32 %v3077_v48  ;;  %10313 = vmatpush3.bf16.msra.mxu1 %v12755_v10 }
 0x674   :  { %10314 = vmatprep.subr.bf16.mxu1 %v11074_v3  ;;  %10346 = vmatpush3.bf16.msra.mxu0 %v12819_v52 }
 0x675   :  { %10359 = vmatprep.subr.bf16.mxu0 %v11074_v3 }
 0x677   :  { %10316 = vmatpush3.bf16.msra.mxu1 %v12774_v58 }
 0x678   :  { %10317 = vmatprep.subr.bf16.mxu1 %v11074_v3 }
 0x67b   :  { %10319 = vmatpush3.bf16.msra.mxu1 %v12795_v14 }
 0x67c   :  { %v10958_v26 = vpop.eup %10957  ;;  %10320 = vmatprep.subr.bf16.mxu1 %v11074_v3 }
 0x67d   :  { %v3251_v18 = vmul.f32 %v10958_v26, %v10956_v60  ;;  %v10960_v61 = vpop.eup %10959  ;;  %v3530_v60 = vld [vmem:[%s14166_s2 + $0x48] sm:$0xff] }
 0x67e   :  { %v12845_v32 = vpack.c.bf16 %v3530_v60, %v3529_v57 }
 0x67f   :  { %v3252_v50 = vadd.f32 %v3251_v18, %v2727_v33  ;;  %10322 = vmatpush3.bf16.msra.mxu1 %v12815_v27  ;;  %v3714_v18 = vld [vmem:[%s14167_s3 + $0x108] sm:$0xff] }
 0x680   :  { %10347 = vmatprep.subr.bf16.mxu1 %v11074_v3  ;;  %v12848_v56 = vpack.c.bf16 %v3714_v18, %v3713_v31  ;;  %v3723_v31 = vld [vmem:[%s14167_s3 + $0x150] sm:$0xff]  ;;  %v3724_v18 = vld [vmem:[%s14167_s3 + $0x158] sm:$0xff] }
 0x681   :  { %10961 = vtanh.f32 %v3252_v50 }
 0x68b   :  { %v10962_v34 = vpop.eup %10961 }
 0x68c   :  { %v3254_v35 = vmul.f32 %v10962_v34, %v10960_v61  ;;  %v3533_v61 = vld [vmem:[%s14166_s2 + $0x60] sm:$0xff]  ;;  %v3534_v34 = vld [vmem:[%s14166_s2 + $0x68] sm:$0xff] }
 0x68e   :  { %3256 = vrot.lane.b32.xlu1 %v3254_v35, %s11077_s12  ;;  %v3717_v35 = vld [vmem:[%s14167_s3 + $0x120] sm:$0xff] }
 0x700   :  { %v3257_v19 = vpop.permute.xlu1 %3256 }
 0x701   :  { %v3259_v4 = vsel %vm119_vm1, %v3252_v50, %v3257_v19  ;;  %v12895_v19 = vpack.c.bf16 %v3534_v34, %v3533_v61  ;;  %v12999_v61 = vpack.c.bf16 %v3712_v21, %v3711_v54  ;;  %v13003_v34 = vpack.c.bf16 %v3728_v49, %v3727_v17  ;;  %v3896_v54 = vld [vmem:[%s14167_s3 + $0x1b8] sm:$0xff]  ;;  %v3887_v17 = vld [vmem:[%s14166_s2 + $0xf0] sm:$0xff] }
 0x702   :  { %3260 = vst [vmem:[#allocation2 + $0x6] sm:$0x3] %v3259_v4  ;;  %v12899_v4 = vpack.c.bf16 %v3718_v1, %v3717_v35  ;;  %v3889_v35 = vld [vmem:[%s14167_s3 + $0x180] sm:$0xff]  ;;  %v3890_v1 = vld [vmem:[%s14167_s3 + $0x188] sm:$0xff]  ;;  %v3888_v49 = vld [vmem:[%s14166_s2 + $0xf8] sm:$0xff] }
 0x709   :  { %v3265_v22 = vld [vmem:[%s3264_s22] sm:$0x1]  ;;  %v6979_v9 = vld [vmem:[%s6815_s13 + $0x1] sm:$0x1]  ;;  %s4065_s22 = scalar_lea.vmem [#allocation2], %s6998_s0  ;;  %s6830_s13 = scalar_lea.vmem [#allocation2], %s7004_s29 }
 0x70a   :  { %v3269_v63 = vld [vmem:[%s3268_s24] sm:$0x1]  ;;  %v6982_v13 = vld [vmem:[%s6818_s26 + $0x1] sm:$0x1]  ;;  %v3296_v26 = vrot.slane %v6979_v9, 5  ;;  %s4069_s24 = scalar_lea.vmem [#allocation2], %s7000_s15 }
 0x70b   :  { %v3273_v7 = vld [vmem:[%s3272_s25] sm:$0x1]  ;;  %v3290_v6 = vrot.slane %v3269_v63, 7  ;;  %v6985_v25 = vld [vmem:[%s6821_s27 + $0x1] sm:$0x1]  ;;  %v3309_v28 = vadd.f32 %v3269_v63, %v3265_v22  ;;  %v3311_v0 = vadd.f32 %v6982_v13, %v6979_v9  ;;  %v3299_v33 = vrot.slane %v6982_v13, 4 }
 0x70c   :  { %v3293_v45 = vrot.slane %v3273_v7, 6  ;;  %v3302_v41 = vrot.slane %v6985_v25, 3  ;;  %v3536_v63 = vld [vmem:[%s14166_s2 + $0x78] sm:$0xff]  ;;  %s4073_s25 = scalar_lea.vmem [#allocation2], %s7002_s14  ;;  %s6833_s26 = scalar_lea.vmem [#allocation2], %s7007_s17 }
 0x70d   :  { %v3304_v48 = vsel %vm93_vm2, %v3265_v22, %v3290_v6  ;;  %v3312_v62 = vadd.f32 %v6985_v25, %v3311_v0  ;;  %v3310_v12 = vadd.f32 %v3309_v28, %v3273_v7  ;;  %v3535_v22 = vld [vmem:[%s14166_s2 + $0x70] sm:$0xff]  ;;  %v3720_v9 = vld [vmem:[%s14167_s3 + $0x138] sm:$0xff]  ;;  %v3706_v25 = vld [vmem:[%s14166_s2 + $0x88] sm:$0xff]  ;;  %s6836_s27 = scalar_lea.vmem [#allocation2], %s7010_s18  ;;  %s7024_s0 = sshll.u32 %s7023_s23, 1 }
 0x70e   :  { %v3305_v50 = vsel %vm95_vm3, %v3304_v48, %v3293_v45  ;;  %v3719_v7 = vld [vmem:[%s14167_s3 + $0x130] sm:$0xff]  ;;  %v12915_v13 = vpack.c.bf16 %v3536_v63, %v3535_v22  ;;  %v3705_v45 = vld [vmem:[%s14166_s2 + $0x80] sm:$0xff]  ;;  %v3722_v0 = vld [vmem:[%s14167_s3 + $0x148] sm:$0xff]  ;;  %s7026_s15 = sshll.u32 %s7025_s28, 1  ;;  %s7028_s14 = sshll.u32 %s7027_s16, 1 }
 0x70f   :  { %v3306_v59 = vsel %vm97_vm4, %v3305_v50, %v3296_v26  ;;  %v3314_v53 = vrot.slane %v3312_v62, 7  ;;  %v12919_v6 = vpack.c.bf16 %v3720_v9, %v3719_v7  ;;  %v3721_v28 = vld [vmem:[%s14167_s3 + $0x140] sm:$0xff]  ;;  %v12935_v57 = vpack.c.bf16 %v3706_v25, %v3705_v45  ;;  %v3707_v26 = vld [vmem:[%s14166_s2 + $0x90] sm:$0xff]  ;;  %v3708_v48 = vld [vmem:[%s14166_s2 + $0x98] sm:$0xff]  ;;  %s7030_s29 = sshll.u32 %s7029_s19, 1  ;;  %s7033_s17 = sshll.u32 %s7032_s20, 1 }
 0x710   :  { %v3307_v46 = vsel %vm99_vm5, %v3306_v59, %v3299_v33  ;;  %v12939_v60 = vpack.c.bf16 %v3722_v0, %v3721_v28  ;;  %v12957_v33 = vpack.c.bf16 %v3708_v48, %v3707_v26  ;;  %v12963_v50 = vpack.c.bf16 %v3724_v18, %v3723_v31  ;;  %v3709_v62 = vld [vmem:[%s14166_s2 + $0xa0] sm:$0xff]  ;;  %v3882_v63 = vld [vmem:[%s14166_s2 + $0xc8] sm:$0xff]  ;;  %v3891_v9 = vld [vmem:[%s14167_s3 + $0x190] sm:$0xff]  ;;  %s7036_s18 = sshll.u32 %s7035_s21, 1  ;;  %s7061_s23 = sld [smem:[#allocation3 + $0x2f]] }
 0x711   :  { %v12857_v40 = vsel %vm101_vm6, %v3307_v46, %v3302_v41  ;;  %v12867_v44 = vsel %vm93_vm2, %v3310_v12, %v3314_v53  ;;  %v3710_v41 = vld [vmem:[%s14166_s2 + $0xa8] sm:$0xff]  ;;  %v3725_v59 = vld [vmem:[%s14167_s3 + $0x160] sm:$0xff]  ;;  %v13019_v7 = vpack.c.bf16 %v3890_v1, %v3889_v35  ;;  %v3892_v45 = vld [vmem:[%s14167_s3 + $0x198] sm:$0xff]  ;;  %s7056_s20 = sshll.u32 %s7055_s30, 1  ;;  %s7059_s21 = sshll.u32 %s7058_s11, 1 }
 0x712   :  { %8850 = vmatmul.mubr.f32.vlgmr.msra.gmra.mrb[32].mxu1 %v12857_v40  ;;  %8885 = vmatmul.mubr.f32.vlgmr.msra.gmra.mrb[34].mxu0 %v12867_v44  ;;  %v3726_v46 = vld [vmem:[%s14167_s3 + $0x168] sm:$0xff]  ;;  %v12979_v12 = vpack.c.bf16 %v3710_v41, %v3709_v62  ;;  %v3881_v22 = vld [vmem:[%s14166_s2 + $0xc0] sm:$0xff]  ;;  %v3883_v28 = vld [vmem:[%s14166_s2 + $0xd0] sm:$0xff]  ;;  %v13042_v26 = vpack.c.bf16 %v3892_v45, %v3891_v9 }
 0x713   :  { %10349 = vmatpush3.bf16.msra.mxu1 %v12845_v32  ;;  %10361 = vmatpush3.bf16.msra.mxu0 %v12848_v56  ;;  %v12983_v53 = vpack.c.bf16 %v3726_v46, %v3725_v59  ;;  %v13029_v25 = vpack.c.bf16 %v3882_v63, %v3881_v22  ;;  %v3884_v0 = vld [vmem:[%s14166_s2 + $0xd8] sm:$0xff]  ;;  %v3893_v48 = vld [vmem:[%s14167_s3 + $0x1a0] sm:$0xff]  ;;  %v3894_v31 = vld [vmem:[%s14167_s3 + $0x1a8] sm:$0xff]  ;;  %v13096_v63 = vpack.c.bf16 %v3888_v49, %v3887_v17 }
 0x714   :  { %10350 = vmatprep.subr.bf16.mxu1 %v11074_v3  ;;  %10362 = vmatprep.subr.bf16.mxu0 %v11074_v3  ;;  %v13052_v18 = vpack.c.bf16 %v3884_v0, %v3883_v28  ;;  %v3885_v62 = vld [vmem:[%s14166_s2 + $0xe0] sm:$0xff]  ;;  %v3886_v41 = vld [vmem:[%s14166_s2 + $0xe8] sm:$0xff]  ;;  %v13066_v59 = vpack.c.bf16 %v3894_v31, %v3893_v48  ;;  %v3895_v46 = vld [vmem:[%s14167_s3 + $0x1b0] sm:$0xff] }
 0x715   :  { %8903 = vmatprep.mubr.msk.f32.mxu1 %vm11076_vm0, %v11075_v8  ;;  %8938 = vmatprep.mubr.msk.f32.mxu0 %vm11076_vm0, %v11075_v8  ;;  %v13076_v21 = vpack.c.bf16 %v3886_v41, %v3885_v62  ;;  %v13086_v35 = vpack.c.bf16 %v3896_v54, %v3895_v46  ;;  %v3897_v1 = vld [vmem:[%s14167_s3 + $0x1c0] sm:$0xff]  ;;  %v3898_v22 = vld [vmem:[%s14167_s3 + $0x1c8] sm:$0xff]  ;;  %v3899_v45 = vld [vmem:[%s14167_s3 + $0x1d0] sm:$0xff] }
 0x716   :  { %v13100_v9 = vpack.c.bf16 %v3898_v22, %v3897_v1  ;;  %v3900_v28 = vld [vmem:[%s14167_s3 + $0x1d8] sm:$0xff]  ;;  %v3901_v48 = vld [vmem:[%s14167_s3 + $0x1e0] sm:$0xff]  ;;  %v3902_v31 = vld [vmem:[%s14167_s3 + $0x1e8] sm:$0xff] }
 0x717   :  { %10352 = vmatpush3.bf16.msra.mxu1 %v12871_v51  ;;  %10364 = vmatpush3.bf16.msra.mxu0 %v12875_v36  ;;  %v13112_v0 = vpack.c.bf16 %v3900_v28, %v3899_v45  ;;  %v3903_v62 = vld [vmem:[%s14167_s3 + $0x1f0] sm:$0xff]  ;;  %v3904_v41 = vld [vmem:[%s14167_s3 + $0x1f8] sm:$0xff]  ;;  %v13212_v28 = vld [vmem:[%s14168_s4 + $0x1] ss:$0 sm:$0xff] }
 0x718   :  { %10353 = vmatprep.subr.bf16.mxu1 %v11074_v3  ;;  %10365 = vmatprep.subr.bf16.mxu0 %v11074_v3 }
 0x71b   :  { %10355 = vmatpush3.bf16.msra.mxu1 %v12895_v19  ;;  %10367 = vmatpush3.bf16.msra.mxu0 %v12899_v4 }
 0x71c   :  { %10356 = vmatprep.subr.bf16.mxu1 %v11074_v3  ;;  %10368 = vmatprep.subr.bf16.mxu0 %v11074_v3 }
 0x71f   :  { %10358 = vmatpush3.bf16.msra.mxu1 %v12915_v13  ;;  %10370 = vmatpush3.bf16.msra.mxu0 %v12919_v6 }
 0x720   :  { %10383 = vmatprep.subr.bf16.mxu1 %v11074_v3  ;;  %10371 = vmatprep.subr.bf16.mxu0 %v11074_v3 }
 0x722   :  { %8904 = vmatmul.mubr.msk.f32.vlgmr.msra.gmra.mrb[34].mxu1 %vm119_vm1, %v12685_v47 }
 0x723   :  { %10385 = vmatpush3.bf16.msra.mxu1 %v12935_v57  ;;  %8957 = vmatprep.mubr.msk.f32.mxu1 %vm11076_vm0, %v11075_v8 }
 0x724   :  { %10373 = vmatpush3.bf16.msra.mxu0 %v12939_v60  ;;  %10386 = vmatprep.subr.bf16.mxu1 %v11074_v3 }
 0x725   :  { %10374 = vmatprep.subr.bf16.mxu0 %v11074_v3 }
 0x727   :  { %10388 = vmatpush3.bf16.msra.mxu1 %v12957_v33 }
 0x728   :  { %10376 = vmatpush3.bf16.msra.mxu0 %v12963_v50  ;;  %10389 = vmatprep.subr.bf16.mxu1 %v11074_v3 }
 0x729   :  { %10377 = vmatprep.subr.bf16.mxu0 %v11074_v3 }
 0x72b   :  { %10391 = vmatpush3.bf16.msra.mxu1 %v12979_v12 }
 0x72c   :  { %10379 = vmatpush3.bf16.msra.mxu0 %v12983_v53  ;;  %10392 = vmatprep.subr.bf16.mxu1 %v11074_v3 }
 0x72d   :  { %10380 = vmatprep.subr.bf16.mxu0 %v11074_v3 }
 0x72f   :  { %10394 = vmatpush3.bf16.msra.mxu1 %v12999_v61 }
 0x730   :  { %10382 = vmatpush3.bf16.msra.mxu0 %v13003_v34  ;;  %10395 = vmatprep.subr.bf16.mxu1 %v11074_v3 }
 0x731   :  { %10419 = vmatprep.subr.bf16.mxu0 %v11074_v3 }
 0x732   :  { %8958 = vmatmul.mubr.msk.f32.vlgmr.msra.gmra.mrb[36].mxu1 %vm119_vm1, %v12685_v47 }
 0x733   :  { %8939 = vmatmul.mubr.f32.vlgmr.msra.gmra.mrb[36].mxu0 %v12867_v44  ;;  %10397 = vmatpush3.bf16.msra.mxu1 %v13019_v7 }
 0x734   :  { %10398 = vmatprep.subr.bf16.mxu1 %v11074_v3  ;;  %10421 = vmatpush3.bf16.msra.mxu0 %v13029_v25 }
 0x735   :  { %10422 = vmatprep.subr.bf16.mxu0 %v11074_v3  ;;  %9011 = vmatprep.mubr.msk.f32.mxu0 %vm11076_vm0, %v11075_v8 }
 0x736   :  { %8992 = vmatprep.mubr.msk.f32.mxu1 %vm11076_vm0, %v11075_v8 }
 0x737   :  { %10400 = vmatpush3.bf16.msra.mxu1 %v13042_v26 }
 0x738   :  { %10401 = vmatprep.subr.bf16.mxu1 %v11074_v3  ;;  %10424 = vmatpush3.bf16.msra.mxu0 %v13052_v18 }
 0x739   :  { %10425 = vmatprep.subr.bf16.mxu0 %v11074_v3 }
 0x73b   :  { %10403 = vmatpush3.bf16.msra.mxu1 %v13066_v59 }
 0x73c   :  { %10404 = vmatprep.subr.bf16.mxu1 %v11074_v3  ;;  %10427 = vmatpush3.bf16.msra.mxu0 %v13076_v21 }
 0x73d   :  { %10428 = vmatprep.subr.bf16.mxu0 %v11074_v3 }
 0x73f   :  { %10406 = vmatpush3.bf16.msra.mxu1 %v13086_v35 }
 0x740   :  { %10407 = vmatprep.subr.bf16.mxu1 %v11074_v3  ;;  %10430 = vmatpush3.bf16.msra.mxu0 %v13096_v63 }
 0x741   :  { %10431 = vmatprep.subr.bf16.mxu0 %v11074_v3 }
 0x743   :  { %10409 = vmatpush3.bf16.msra.mxu1 %v13100_v9  ;;  %9012 = vmatmul.mubr.msk.f32.vlgmr.msra.gmra.mrb[38].mxu0 %vm119_vm1, %v12685_v47  ;;  %v13128_v47 = vpack.c.bf16 %v3902_v31, %v3901_v48 }
 0x744   :  { %10410 = vmatprep.subr.bf16.mxu1 %v11074_v3  ;;  %10433 = vmatpush3.bf16.msra.mxu0 %v12608_v5  ;;  %v13140_v5 = vpack.c.bf16 %v3904_v41, %v3903_v62 }
 0x745   :  { %10434 = vmatprep.subr.bf16.mxu0 %v11074_v3  ;;  %9030 = vmatprep.mubr.msk.f32.mxu0 %vm11076_vm0, %v11075_v8 }
 0x747   :  { %10412 = vmatpush3.bf16.msra.mxu1 %v13112_v0 }
 0x748   :  { %10413 = vmatprep.subr.bf16.mxu1 %v11074_v3  ;;  %10436 = vmatpush3.bf16.msra.mxu0 %v12614_v11  ;;  %v13171_v11 = vld [vmem:[%s14165_s1 + $0xa] sm:$0x3] }
 0x749   :  { %10437 = vmatprep.subr.bf16.mxu0 %v11074_v3 }
 0x74b   :  { %10415 = vmatpush3.bf16.msra.mxu1 %v13128_v47 }
 0x74c   :  { %10416 = vmatprep.subr.bf16.mxu1 %v11074_v3  ;;  %10439 = vmatpush3.bf16.msra.mxu0 %v12641_v29 }
 0x74d   :  { %10440 = vmatprep.subr.bf16.mxu0 %v11074_v3 }
 0x74f   :  { %10418 = vmatpush3.bf16.msra.mxu1 %v13140_v5 }
 0x750   :  { %10442 = vmatpush3.bf16.msra.mxu0 %v12661_v20  ;;  %10443 = vmatprep.subr.bf16.mxu1 %v11074_v3  ;;  %v3403_v20 = vrot.slane %v12827_v15, 5 }
 0x751   :  { %10467 = vmatprep.subr.bf16.mxu0 %v11074_v3 }
 0x752   :  { %8993 = vmatmul.mubr.f32.vlgmr.msra.gmra.mrb[38].mxu1 %v12867_v44 }
 0x753   :  { %10445 = vmatpush3.bf16.msra.mxu1 %v12629_v16  ;;  %9065 = vmatprep.mubr.msk.f32.mxu1 %vm11076_vm0, %v11075_v8  ;;  %v3399_v16 = vrot.slane %v12827_v15, 7 }
 0x754   :  { %10446 = vmatprep.subr.bf16.mxu1 %v11074_v3  ;;  %9031 = vmatmul.mubr.msk.f32.vlgmr.msra.gmra.mrb[40].mxu0 %vm119_vm1, %v13171_v11 }
 0x755   :  { %10469 = vmatpush3.bf16.msra.mxu0 %v12687_v55  ;;  %9100 = vmatprep.mubr.msk.f32.mxu0 %vm11076_vm0, %v11075_v8  ;;  %v3407_v29 = vsel %vm93_vm2, %v12827_v15, %v3399_v16  ;;  %v3405_v55 = vrot.slane %v12827_v15, 4 }
 0x756   :  { %10470 = vmatprep.subr.bf16.mxu0 %v11074_v3 }
 0x757   :  { %10448 = vmatpush3.bf16.msra.mxu1 %v12638_v23  ;;  %v3401_v23 = vrot.slane %v12827_v15, 6 }
 0x758   :  { %10449 = vmatprep.subr.bf16.mxu1 %v11074_v3 }
 0x759   :  { %10472 = vmatpush3.bf16.msra.mxu0 %v12704_v30 }
 0x75a   :  { %10473 = vmatprep.subr.bf16.mxu0 %v11074_v3 }
 0x75b   :  { %10451 = vmatpush3.bf16.msra.mxu1 %v12658_v2  ;;  %v3408_v2 = vsel %vm95_vm3, %v3407_v29, %v3401_v23 }
 0x75c   :  { %10452 = vmatprep.subr.bf16.mxu1 %v11074_v3 }
 0x75d   :  { %10475 = vmatpush3.bf16.msra.mxu0 %v12718_v38 }
 0x75e   :  { %10476 = vmatprep.subr.bf16.mxu0 %v11074_v3 }
 0x75f   :  { %10454 = vmatpush3.bf16.msra.mxu1 %v12678_v43  ;;  %v3409_v43 = vsel %vm97_vm4, %v3408_v2, %v3401_v23 }
 0x760   :  { %10455 = vmatprep.subr.bf16.mxu1 %v11074_v3  ;;  %v3410_v30 = vsel %vm99_vm5, %v3409_v43, %v3403_v20  ;;  %v13220_v20 = vld [vmem:[%s14168_s4 + $0x2] ss:$0 sm:$0xff] }
 0x761   :  { %10478 = vmatpush3.bf16.msra.mxu0 %v12731_v24  ;;  %v3411_v38 = vsel %vm101_vm6, %v3410_v30, %v3405_v55 }
 0x762   :  { %10479 = vmatprep.subr.bf16.mxu0 %v11074_v3 }
 0x763   :  { %10457 = vmatpush3.bf16.msra.mxu1 %v12755_v10 }
 0x764   :  { %10458 = vmatprep.subr.bf16.mxu1 %v11074_v3 }
 0x765   :  { %10481 = vmatpush3.bf16.msra.mxu0 %v12760_v39 }
 0x766   :  { %10482 = vmatprep.subr.bf16.mxu0 %v11074_v3 }
 0x767   :  { %10460 = vmatpush3.bf16.msra.mxu1 %v12774_v58 }
 0x768   :  { %10461 = vmatprep.subr.bf16.mxu1 %v11074_v3 }
 0x769   :  { %10484 = vmatpush3.bf16.msra.mxu0 %v12786_v42 }
 0x76a   :  { %10485 = vmatprep.subr.bf16.mxu0 %v11074_v3 }
 0x76b   :  { %10463 = vmatpush3.bf16.msra.mxu1 %v12795_v14  ;;  %v13206_v14 = vld [vmem:[%s14168_s4] ss:$0 sm:$0xff] }
 0x76c   :  { %10464 = vmatprep.subr.bf16.mxu1 %v11074_v3 }
 0x76d   :  { %10487 = vmatpush3.bf16.msra.mxu0 %v12799_v37 }
 0x76e   :  { %10488 = vmatprep.subr.bf16.mxu0 %v11074_v3 }
 0x76f   :  { %10466 = vmatpush3.bf16.msra.mxu1 %v12815_v27 }
 0x770   :  { %10491 = vmatprep.subr.bf16.mxu1 %v11074_v3 }
 0x771   :  { %10490 = vmatpush3.bf16.msra.mxu0 %v12819_v52 }
 0x772   :  { %10503 = vmatprep.subr.bf16.mxu0 %v11074_v3 }
 0x7e5   :  { %v3494_v24 = vpop.f32.mrb[32].mxu1  ;;  %v3619_v39 = vpop.f32.mrb[34].mxu0 }
 0x7e6   :  { %v3495_v10 = vadd.f32 %v3494_v24, %v3411_v38  ;;  %v8851_v58 = vpop.f32.mrb[33].mxu1  ;;  %v8886_v42 = vpop.f32.mrb[35].mxu0 }
 0x7e8   :  { %v3503_v37 = vadd.f32 %v13206_v14, %v3495_v10 }
 0x7ea   :  { %v6988_v27 = vmul.f32 -1.442695, %v3503_v37  ;;  %v13227_v37 = vld [vmem:[%s14168_s4 + $0x3] ss:$0 sm:$0xff] }
 0x7ec   :  { %10963 = vpow2.f32 %v6988_v27 }
 0x7f5   :  { %v3689_v15 = vpop.f32.mrb[34].mxu1 }
 0x7f6   :  { %v3690_v52 = vadd.f32 %v3689_v15, %v3619_v39  ;;  %v8905_v44 = vpop.f32.mrb[35].mxu1  ;;  %v10964_v46 = vpop.eup %10963 }
 0x7f7   :  { %v3507_v54 = vadd.f32 1.0, %v10964_v46 }
 0x7f8   :  { %v3698_v31 = vadd.f32 %v13212_v28, %v3690_v52 }
 0x7f9   :  { %10965 = vrcp.f32 %v3507_v54 }
 0x7fa   :  { %v6991_v41 = vmul.f32 -1.442695, %v3698_v31 }
 0x7fc   :  { %10967 = vpow2.f32 %v6991_v41 }
 0x803   :  { %v10966_v48 = vpop.eup %10965 }
 0x804   :  { %v3510_v62 = vmul.f32 %v10966_v48, %v12857_v40 }
 0x805   :  { %v3865_v17 = vpop.f32.mrb[36].mxu1 }
 0x806   :  { %v3795_v49 = vpop.f32.mrb[36].mxu0  ;;  %v8959_v1 = vpop.f32.mrb[37].mxu1  ;;  %v3519_v23 = vrot.slane %v3510_v62, 3  ;;  %v3511_v43 = vsel %vm306_vm7, %v3510_v62, 0.0 }
 0x807   :  { %v3866_v22 = vadd.f32 %v3865_v17, %v3795_v49  ;;  %v8940_v45 = vpop.f32.mrb[37].mxu0  ;;  %v3512_v38 = vrot.slane %v3511_v43, 4  ;;  %v10968_v24 = vpop.eup %10967 }
 0x808   :  { %v3521_v2 = vsel %vm306_vm7, %v3519_v23, 0.0  ;;  %v3702_v58 = vadd.f32 1.0, %v10968_v24 }
 0x809   :  { %v3522_v55 = vrot.slane %v3521_v2, 4  ;;  %v3874_v30 = vadd.f32 %v13220_v20, %v3866_v22  ;;  %v3513_v39 = vadd.f32 %v3512_v38, %v3511_v43 }
 0x80b   :  { %v3523_v40 = vadd.f32 %v3522_v55, %v3521_v2  ;;  %v6994_v10 = vmul.f32 -1.442695, %v3874_v30  ;;  %v3514_v44 = vrot.slane %v3513_v39, 2 }
 0x80d   :  { %v3524_v27 = vrot.slane %v3523_v40, 2  ;;  %10969 = vpow2.f32 %v6994_v10  ;;  %v3515_v17 = vadd.f32 %v3514_v44, %v3513_v39 }
 0x80e   :  { %10971 = vrcp.f32 %v3702_v58 }
 0x80f   :  { %v3525_v54 = vadd.f32 %v3524_v27, %v3523_v40  ;;  %v3516_v1 = vrot.slane %v3515_v17, 1 }
 0x811   :  { %v3526_v49 = vrot.slane %v3525_v54, 1  ;;  %v3517_v41 = vadd.f32 %v3516_v1, %v3515_v17 }
 0x813   :  { %v3527_v45 = vadd.f32 %v3526_v49, %v3525_v54 }
 0x816   :  { %v4041_v16 = vpop.f32.mrb[38].mxu0 }
 0x817   :  { %v9013_v29 = vpop.f32.mrb[39].mxu0  ;;  %v10970_v22 = vpop.eup %10969 }
 0x818   :  { %v10972_v48 = vpop.eup %10971  ;;  %v3878_v62 = vadd.f32 1.0, %v10970_v22 }
 0x825   :  { %v3971_v42 = vpop.f32.mrb[38].mxu1 }
 0x826   :  { %v4042_v15 = vadd.f32 %v4041_v16, %v3971_v42  ;;  %v8994_v52 = vpop.f32.mrb[39].mxu1  ;;  %v3528_v16 = vsel %vm93_vm2, %v3517_v41, %v3527_v45 }
 0x827   :  { %v13232_v30 = vpop.f32.mrb[40].mxu0 }
 0x828   :  { %v4050_v46 = vadd.f32 %v13227_v37, %v4042_v15  ;;  %v9032_v38 = vpop.f32.mrb[41].mxu0 }
 0x82a   :  { %10973 = vtanh.f32 %v4050_v46 }
 0x82b   :  { %10975 = vrcp.f32 %v3878_v62 }
 0x834   :  { %v10974_v31 = vpop.eup %10973 }
 0x835   :  { %v4052_v23 = vmul.f32 %v10974_v31, %v10972_v48  ;;  %v10976_v2 = vpop.eup %10975 }
 0x837   :  { %v4053_v29 = vadd.f32 %v4052_v23, %v3528_v16 }
 0x839   :  { %10977 = vtanh.f32 %v4053_v29 }
 0x843   :  { %v10978_v43 = vpop.eup %10977 }
 0x844   :  { %v4055_v55 = vmul.f32 %v10978_v43, %v10976_v2  ;;  %v5141_v2 = vld [vmem:[%s14167_s3 + $0x90] sm:$0xff]  ;;  %v5142_v43 = vld [vmem:[%s14167_s3 + $0x98] sm:$0xff] }
 0x846   :  { %4057 = vrot.lane.b32.xlu0 %v4055_v55, %s11077_s12  ;;  %v4202_v55 = vrot.slane %v13232_v30, 6 }
 0x8b8   :  { %v4058_v24 = vpop.permute.xlu0 %4057 }
 0x8b9   :  { %v4060_v40 = vsel %vm119_vm1, %v4053_v29, %v4058_v24  ;;  %v13430_v24 = vpack.c.bf16 %v5142_v43, %v5141_v2 }
 0x8ba   :  { %4061 = vst [vmem:[#allocation2 + $0x8] sm:$0x3] %v4060_v40  ;;  %v5143_v40 = vld [vmem:[%s14167_s3 + $0xa0] sm:$0xff] }
 0x8c1   :  { %v4066_v10 = vld [vmem:[%s4065_s22] sm:$0x1]  ;;  %v7005_v42 = vld [vmem:[%s6830_s13 + $0x1] sm:$0x1]  ;;  %s4866_s22 = scalar_lea.vmem [#allocation2], %s7024_s0  ;;  %s6845_s13 = scalar_lea.vmem [#allocation2], %s7030_s29 }
 0x8c2   :  { %v4070_v39 = vld [vmem:[%s4069_s24] sm:$0x1]  ;;  %v7008_v27 = vld [vmem:[%s6833_s26 + $0x1] sm:$0x1]  ;;  %v4097_v17 = vrot.slane %v7005_v42, 5  ;;  %s4870_s24 = scalar_lea.vmem [#allocation2], %s7026_s15 }
 0x8c3   :  { %v4074_v58 = vld [vmem:[%s4073_s25] sm:$0x1]  ;;  %v4091_v15 = vrot.slane %v4070_v39, 7  ;;  %v7011_v44 = vld [vmem:[%s6836_s27 + $0x1] sm:$0x1]  ;;  %v4110_v46 = vadd.f32 %v4070_v39, %v4066_v10  ;;  %v4112_v54 = vadd.f32 %v7008_v27, %v7005_v42  ;;  %v4100_v1 = vrot.slane %v7008_v27, 4 }
 0x8c4   :  { %v4094_v52 = vrot.slane %v4074_v58, 6  ;;  %v4103_v48 = vrot.slane %v7011_v44, 3  ;;  %v4204_v42 = vrot.slane %v13232_v30, 5  ;;  %v5145_v27 = vld [vmem:[%s14167_s3 + $0xb0] sm:$0xff]  ;;  %s4874_s25 = scalar_lea.vmem [#allocation2], %s7028_s14  ;;  %s6848_s26 = scalar_lea.vmem [#allocation2], %s7033_s17 }
 0x8c5   :  { %v4105_v49 = vsel %vm93_vm2, %v4066_v10, %v4091_v15  ;;  %v4113_v45 = vadd.f32 %v7011_v44, %v4112_v54  ;;  %v4111_v41 = vadd.f32 %v4110_v46, %v4074_v58  ;;  %v5144_v10 = vld [vmem:[%s14167_s3 + $0xa8] sm:$0xff]  ;;  %v5146_v15 = vld [vmem:[%s14167_s3 + $0xb8] sm:$0xff]  ;;  %v4206_v44 = vrot.slane %v13232_v30, 4  ;;  %s6851_s27 = scalar_lea.vmem [#allocation2], %s7036_s18  ;;  %s7062_s0 = sshll.u32 %s7061_s23, 1 }
 0x8c6   :  { %v4106_v22 = vsel %vm95_vm3, %v4105_v49, %v4094_v52  ;;  %v13444_v58 = vpack.c.bf16 %v5144_v10, %v5143_v40  ;;  %v13457_v46 = vpack.c.bf16 %v5146_v15, %v5145_v27  ;;  %s6860_s29 = scalar_lea.vmem [#allocation2], %s7056_s20  ;;  %s6866_s17 = scalar_lea.vmem [#allocation2], %s7062_s0 }
 0x8c7   :  { %v4107_v31 = vsel %vm97_vm4, %v4106_v22, %v4097_v17  ;;  %v4115_v23 = vrot.slane %v4113_v45, 7 }
 0x8c8   :  { %v4108_v62 = vsel %vm99_vm5, %v4107_v31, %v4100_v1 }
 0x8c9   :  { %v13240_v16 = vsel %vm101_vm6, %v4108_v62, %v4103_v48  ;;  %v13244_v29 = vsel %vm93_vm2, %v4111_v41, %v4115_v23 }
 0x8ca   :  { %9066 = vmatmul.mubr.f32.vlgmr.msra.gmra.mrb[40].mxu1 %v13240_v16  ;;  %9101 = vmatmul.mubr.f32.vlgmr.msra.gmra.mrb[42].mxu0 %v13244_v29 }
 0x8cb   :  { %10493 = vmatpush3.bf16.msra.mxu1 %v12845_v32  ;;  %10505 = vmatpush3.bf16.msra.mxu0 %v12848_v56  ;;  %v4919_v32 = vld [vmem:[%s14166_s2] sm:$0xff]  ;;  %v4920_v56 = vld [vmem:[%s14166_s2 + $0x8] sm:$0xff] }
 0x8cc   :  { %10494 = vmatprep.subr.bf16.mxu1 %v11074_v3  ;;  %10506 = vmatprep.subr.bf16.mxu0 %v11074_v3 }
 0x8cd   :  { %9119 = vmatprep.mubr.msk.f32.mxu1 %vm11076_vm0, %v11075_v8  ;;  %9154 = vmatprep.mubr.msk.f32.mxu0 %vm11076_vm0, %v11075_v8 }
 0x8cf   :  { %10496 = vmatpush3.bf16.msra.mxu1 %v12871_v51  ;;  %10508 = vmatpush3.bf16.msra.mxu0 %v12875_v36  ;;  %v4921_v51 = vld [vmem:[%s14166_s2 + $0x10] sm:$0xff]  ;;  %v13334_v36 = vpack.c.bf16 %v4920_v56, %v4919_v32 }
 0x8d0   :  { %10497 = vmatprep.subr.bf16.mxu1 %v11074_v3  ;;  %10509 = vmatprep.subr.bf16.mxu0 %v11074_v3 }
 0x8d3   :  { %10499 = vmatpush3.bf16.msra.mxu1 %v12895_v19  ;;  %10511 = vmatpush3.bf16.msra.mxu0 %v12899_v4  ;;  %v4922_v19 = vld [vmem:[%s14166_s2 + $0x18] sm:$0xff] }
 0x8d4   :  { %10500 = vmatprep.subr.bf16.mxu1 %v11074_v3  ;;  %10512 = vmatprep.subr.bf16.mxu0 %v11074_v3  ;;  %v13340_v4 = vpack.c.bf16 %v4922_v19, %v4921_v51 }
 0x8d7   :  { %10502 = vmatpush3.bf16.msra.mxu1 %v12915_v13  ;;  %10514 = vmatpush3.bf16.msra.mxu0 %v12919_v6  ;;  %v4923_v13 = vld [vmem:[%s14166_s2 + $0x20] sm:$0xff] }
 0x8d8   :  { %10527 = vmatprep.subr.bf16.mxu1 %v11074_v3  ;;  %10515 = vmatprep.subr.bf16.mxu0 %v11074_v3  ;;  %v5014_v6 = vld [vmem:[%s14167_s3] sm:$0xff] }
 0x8da   :  { %9120 = vmatmul.mubr.msk.f32.vlgmr.msra.gmra.mrb[42].mxu1 %vm119_vm1, %v13171_v11 }
 0x8db   :  { %10529 = vmatpush3.bf16.msra.mxu1 %v12935_v57  ;;  %9173 = vmatprep.mubr.msk.f32.mxu1 %vm11076_vm0, %v11075_v8  ;;  %v5015_v57 = vld [vmem:[%s14167_s3 + $0x8] sm:$0xff] }
 0x8dc   :  { %10517 = vmatpush3.bf16.msra.mxu0 %v12939_v60  ;;  %10530 = vmatprep.subr.bf16.mxu1 %v11074_v3  ;;  %v4924_v60 = vld [vmem:[%s14166_s2 + $0x28] sm:$0xff] }
 0x8dd   :  { %10518 = vmatprep.subr.bf16.mxu0 %v11074_v3 }
 0x8df   :  { %10532 = vmatpush3.bf16.msra.mxu1 %v12957_v33  ;;  %v13355_v33 = vpack.c.bf16 %v5015_v57, %v5014_v6 }
 0x8e0   :  { %10520 = vmatpush3.bf16.msra.mxu0 %v12963_v50  ;;  %10533 = vmatprep.subr.bf16.mxu1 %v11074_v3  ;;  %v5016_v50 = vld [vmem:[%s14167_s3 + $0x10] sm:$0xff] }
 0x8e1   :  { %10521 = vmatprep.subr.bf16.mxu0 %v11074_v3 }
 0x8e3   :  { %10535 = vmatpush3.bf16.msra.mxu1 %v12979_v12  ;;  %v5017_v12 = vld [vmem:[%s14167_s3 + $0x18] sm:$0xff] }
 0x8e4   :  { %10523 = vmatpush3.bf16.msra.mxu0 %v12983_v53  ;;  %10536 = vmatprep.subr.bf16.mxu1 %v11074_v3  ;;  %v13364_v53 = vpack.c.bf16 %v5017_v12, %v5016_v50 }
 0x8e5   :  { %10524 = vmatprep.subr.bf16.mxu0 %v11074_v3 }
 0x8e7   :  { %10538 = vmatpush3.bf16.msra.mxu1 %v12999_v61  ;;  %v13367_v61 = vpack.c.bf16 %v4924_v60, %v4923_v13 }
 0x8e8   :  { %10526 = vmatpush3.bf16.msra.mxu0 %v13003_v34  ;;  %10539 = vmatprep.subr.bf16.mxu1 %v11074_v3  ;;  %v5018_v34 = vld [vmem:[%s14167_s3 + $0x20] sm:$0xff] }
 0x8e9   :  { %10563 = vmatprep.subr.bf16.mxu0 %v11074_v3 }
 0x8ea   :  { %9174 = vmatmul.mubr.msk.f32.vlgmr.msra.gmra.mrb[44].mxu1 %vm119_vm1, %v13171_v11 }
 0x8eb   :  { %9155 = vmatmul.mubr.f32.vlgmr.msra.gmra.mrb[44].mxu0 %v13244_v29  ;;  %10541 = vmatpush3.bf16.msra.mxu1 %v13019_v7  ;;  %v5019_v7 = vld [vmem:[%s14167_s3 + $0x28] sm:$0xff] }
 0x8ec   :  { %10542 = vmatprep.subr.bf16.mxu1 %v11074_v3  ;;  %10565 = vmatpush3.bf16.msra.mxu0 %v13029_v25  ;;  %v4925_v25 = vld [vmem:[%s14166_s2 + $0x30] sm:$0xff] }
 0x8ed   :  { %10566 = vmatprep.subr.bf16.mxu0 %v11074_v3  ;;  %9227 = vmatprep.mubr.msk.f32.mxu0 %vm11076_vm0, %v11075_v8 }
 0x8ee   :  { %9208 = vmatprep.mubr.msk.f32.mxu1 %vm11076_vm0, %v11075_v8 }
 0x8ef   :  { %10544 = vmatpush3.bf16.msra.mxu1 %v13042_v26  ;;  %v4926_v26 = vld [vmem:[%s14166_s2 + $0x38] sm:$0xff] }
 0x8f0   :  { %10545 = vmatprep.subr.bf16.mxu1 %v11074_v3  ;;  %10568 = vmatpush3.bf16.msra.mxu0 %v13052_v18  ;;  %v13384_v18 = vpack.c.bf16 %v5019_v7, %v5018_v34 }
 0x8f1   :  { %10569 = vmatprep.subr.bf16.mxu0 %v11074_v3 }
 0x8f3   :  { %10547 = vmatpush3.bf16.msra.mxu1 %v13066_v59  ;;  %v13387_v59 = vpack.c.bf16 %v4926_v26, %v4925_v25 }
 0x8f4   :  { %10548 = vmatprep.subr.bf16.mxu1 %v11074_v3  ;;  %10571 = vmatpush3.bf16.msra.mxu0 %v13076_v21  ;;  %v5020_v21 = vld [vmem:[%s14167_s3 + $0x30] sm:$0xff] }
 0x8f5   :  { %10572 = vmatprep.subr.bf16.mxu0 %v11074_v3 }
 0x8f7   :  { %10550 = vmatpush3.bf16.msra.mxu1 %v13086_v35  ;;  %v5021_v35 = vld [vmem:[%s14167_s3 + $0x38] sm:$0xff] }
 0x8f8   :  { %10551 = vmatprep.subr.bf16.mxu1 %v11074_v3  ;;  %10574 = vmatpush3.bf16.msra.mxu0 %v13096_v63  ;;  %v5139_v63 = vld [vmem:[%s14167_s3 + $0x80] sm:$0xff] }
 0x8f9   :  { %10575 = vmatprep.subr.bf16.mxu0 %v11074_v3 }
 0x8fb   :  { %10553 = vmatpush3.bf16.msra.mxu1 %v13100_v9  ;;  %9228 = vmatmul.mubr.msk.f32.vlgmr.msra.gmra.mrb[46].mxu0 %vm119_vm1, %v13171_v11  ;;  %v5140_v9 = vld [vmem:[%s14167_s3 + $0x88] sm:$0xff] }
 0x8fc   :  { %10554 = vmatprep.subr.bf16.mxu1 %v11074_v3  ;;  %9246 = vmatprep.mubr.msk.f32.mxu0 %vm11076_vm0, %v11075_v8  ;;  %v13413_v11 = vpack.c.bf16 %v5140_v9, %v5139_v63 }
 0x8fd   :  { %10577 = vmatpush3.bf16.msra.mxu0 %v13334_v36 }
 0x8fe   :  { %10578 = vmatprep.subr.bf16.mxu0 %v11074_v3 }
 0x8ff   :  { %10556 = vmatpush3.bf16.msra.mxu1 %v13112_v0  ;;  %v13404_v0 = vpack.c.bf16 %v5021_v35, %v5020_v21 }
 0x900   :  { %10557 = vmatprep.subr.bf16.mxu1 %v11074_v3 }
 0x901   :  { %10580 = vmatpush3.bf16.msra.mxu0 %v13340_v4 }
 0x902   :  { %10581 = vmatprep.subr.bf16.mxu0 %v11074_v3 }
 0x903   :  { %10559 = vmatpush3.bf16.msra.mxu1 %v13128_v47  ;;  %v4200_v47 = vrot.slane %v13232_v30, 7 }
 0x904   :  { %10560 = vmatprep.subr.bf16.mxu1 %v11074_v3 }
 0x905   :  { %10583 = vmatpush3.bf16.msra.mxu0 %v13367_v61  ;;  %v4208_v38 = vsel %vm93_vm2, %v13232_v30, %v4200_v47 }
 0x906   :  { %10584 = vmatprep.subr.bf16.mxu0 %v11074_v3  ;;  %v4209_v39 = vsel %vm95_vm3, %v4208_v38, %v4202_v55 }
 0x907   :  { %10562 = vmatpush3.bf16.msra.mxu1 %v13140_v5  ;;  %v13411_v5 = vld [vmem:[%s14165_s1 + $0xc] sm:$0x3]  ;;  %v4210_v52 = vsel %vm97_vm4, %v4209_v39, %v4202_v55 }
 0x908   :  { %10587 = vmatprep.subr.bf16.mxu1 %v11074_v3  ;;  %v4211_v54 = vsel %vm99_vm5, %v4210_v52, %v4204_v42 }
 0x909   :  { %10586 = vmatpush3.bf16.msra.mxu0 %v13387_v59  ;;  %v4212_v17 = vsel %vm101_vm6, %v4211_v54, %v4206_v44 }
 0x90a   :  { %9209 = vmatmul.mubr.f32.vlgmr.msra.gmra.mrb[46].mxu1 %v13244_v29  ;;  %10611 = vmatprep.subr.bf16.mxu0 %v11074_v3 }
 0x90b   :  { %9281 = vmatprep.mubr.msk.f32.mxu1 %vm11076_vm0, %v11075_v8  ;;  %10589 = vmatpush3.bf16.msra.mxu1 %v13355_v33 }
 0x90c   :  { %10590 = vmatprep.subr.bf16.mxu1 %v11074_v3  ;;  %9247 = vmatmul.mubr.msk.f32.vlgmr.msra.gmra.mrb[48].mxu0 %vm119_vm1, %v13411_v5 }
 0x90d   :  { %10613 = vmatpush3.bf16.msra.mxu0 %v13413_v11  ;;  %9316 = vmatprep.mubr.msk.f32.mxu0 %vm11076_vm0, %v11075_v8 }
 0x90e   :  { %10614 = vmatprep.subr.bf16.mxu0 %v11074_v3 }
 0x90f   :  { %10592 = vmatpush3.bf16.msra.mxu1 %v13364_v53 }
 0x910   :  { %10593 = vmatprep.subr.bf16.mxu1 %v11074_v3 }
 0x911   :  { %10616 = vmatpush3.bf16.msra.mxu0 %v13430_v24 }
 0x912   :  { %10617 = vmatprep.subr.bf16.mxu0 %v11074_v3 }
 0x913   :  { %10595 = vmatpush3.bf16.msra.mxu1 %v13384_v18 }
 0x914   :  { %10596 = vmatprep.subr.bf16.mxu1 %v11074_v3 }
 0x915   :  { %10619 = vmatpush3.bf16.msra.mxu0 %v13444_v58 }
 0x916   :  { %10620 = vmatprep.subr.bf16.mxu0 %v11074_v3 }
 0x917   :  { %10598 = vmatpush3.bf16.msra.mxu1 %v13404_v0 }
 0x918   :  { %10599 = vmatprep.subr.bf16.mxu1 %v11074_v3 }
 0x919   :  { %10622 = vmatpush3.bf16.msra.mxu0 %v13457_v46 }
 0x91a   :  { %10623 = vmatprep.subr.bf16.mxu0 %v11074_v3 }
 0x99d   :  { %v4295_v49 = vpop.f32.mrb[40].mxu1  ;;  %v4420_v22 = vpop.f32.mrb[42].mxu0 }
 0x99e   :  { %v4296_v1 = vadd.f32 %v4295_v49, %v4212_v17  ;;  %v9067_v45 = vpop.f32.mrb[41].mxu1  ;;  %v9102_v48 = vpop.f32.mrb[43].mxu0 }
 0x9a0   :  { %v4304_v30 = vadd.f32 %v13206_v14, %v4296_v1 }
 0x9a2   :  { %v7014_v31 = vmul.f32 -1.442695, %v4304_v30  ;;  %v5023_v30 = vld [vmem:[%s14167_s3 + $0x48] sm:$0xff] }
 0x9a4   :  { %10979 = vpow2.f32 %v7014_v31  ;;  %v5147_v31 = vld [vmem:[%s14167_s3 + $0xc0] sm:$0xff] }
 0x9ad   :  { %v4490_v62 = vpop.f32.mrb[42].mxu1 }
 0x9ae   :  { %v4491_v41 = vadd.f32 %v4490_v62, %v4420_v22  ;;  %v9121_v23 = vpop.f32.mrb[43].mxu1  ;;  %v10980_v29 = vpop.eup %10979 }
 0x9af   :  { %v4308_v32 = vadd.f32 1.0, %v10980_v29  ;;  %v5024_v29 = vld [vmem:[%s14167_s3 + $0x50] sm:$0xff] }
 0x9b0   :  { %v4499_v60 = vadd.f32 %v13212_v28, %v4491_v41  ;;  %v5148_v41 = vld [vmem:[%s14167_s3 + $0xc8] sm:$0xff] }
 0x9b1   :  { %10981 = vrcp.f32 %v4308_v32  ;;  %v13486_v23 = vpack.c.bf16 %v5148_v41, %v5147_v31  ;;  %v5025_v32 = vld [vmem:[%s14167_s3 + $0x58] sm:$0xff] }
 0x9b2   :  { %v7017_v12 = vmul.f32 -1.442695, %v4499_v60  ;;  %v5151_v60 = vld [vmem:[%s14167_s3 + $0xe0] sm:$0xff] }
 0x9b3   :  { %10625 = vmatpush3.bf16.msra.mxu0 %v13486_v23 }
 0x9b4   :  { %10983 = vpow2.f32 %v7017_v12  ;;  %10626 = vmatprep.subr.bf16.mxu0 %v11074_v3 }
 0x9bb   :  { %v10982_v57 = vpop.eup %10981 }
 0x9bc   :  { %v4311_v50 = vmul.f32 %v10982_v57, %v13240_v16 }
 0x9bd   :  { %v4666_v56 = vpop.f32.mrb[44].mxu1 }
 0x9be   :  { %v4596_v51 = vpop.f32.mrb[44].mxu0  ;;  %v9175_v19 = vpop.f32.mrb[45].mxu1  ;;  %v4320_v34 = vrot.slane %v4311_v50, 3  ;;  %v4312_v26 = vsel %vm306_vm7, %v4311_v50, 0.0  ;;  %v5152_v50 = vld [vmem:[%s14167_s3 + $0xe8] sm:$0xff] }
 0x9bf   :  { %v4667_v13 = vadd.f32 %v4666_v56, %v4596_v51  ;;  %v9156_v6 = vpop.f32.mrb[45].mxu0  ;;  %v4313_v63 = vrot.slane %v4312_v26, 4  ;;  %v10984_v9 = vpop.eup %10983  ;;  %v5149_v56 = vld [vmem:[%s14167_s3 + $0xd0] sm:$0xff]  ;;  %v13500_v51 = vpack.c.bf16 %v5025_v32, %v5024_v29  ;;  %v5150_v19 = vld [vmem:[%s14167_s3 + $0xd8] sm:$0xff] }
 0x9c0   :  { %v4322_v25 = vsel %vm306_vm7, %v4320_v34, 0.0  ;;  %v4503_v28 = vadd.f32 1.0, %v10984_v9  ;;  %v5027_v6 = vld [vmem:[%s14167_s3 + $0x68] sm:$0xff]  ;;  %v13512_v57 = vpack.c.bf16 %v5150_v19, %v5149_v56  ;;  %v5028_v34 = vld [vmem:[%s14167_s3 + $0x70] sm:$0xff] }
 0x9c1   :  { %v4323_v21 = vrot.slane %v4322_v25, 4  ;;  %v4675_v35 = vadd.f32 %v13220_v20, %v4667_v13  ;;  %v4314_v43 = vadd.f32 %v4313_v63, %v4312_v26  ;;  %v5026_v13 = vld [vmem:[%s14167_s3 + $0x60] sm:$0xff]  ;;  %v5154_v26 = vld [vmem:[%s14167_s3 + $0xf8] sm:$0xff] }
 0x9c2   :  { %v13521_v12 = vpack.c.bf16 %v5027_v6, %v5026_v13  ;;  %10628 = vmatpush3.bf16.msra.mxu0 %v13512_v57  ;;  %v5133_v13 = vld [vmem:[%s14166_s2 + $0x50] sm:$0xff]  ;;  %v5134_v6 = vld [vmem:[%s14166_s2 + $0x58] sm:$0xff] }
 0x9c3   :  { %v4324_v47 = vadd.f32 %v4323_v21, %v4322_v25  ;;  %v7020_v2 = vmul.f32 -1.442695, %v4675_v35  ;;  %v4315_v10 = vrot.slane %v4314_v43, 2  ;;  %10629 = vmatprep.subr.bf16.mxu0 %v11074_v3  ;;  %v5153_v25 = vld [vmem:[%s14167_s3 + $0xf0] sm:$0xff] }
 0x9c4   :  { %v13545_v9 = vpack.c.bf16 %v5154_v26, %v5153_v25  ;;  %v13597_v25 = vpack.c.bf16 %v5134_v6, %v5133_v13  ;;  %v5313_v13 = vld [vmem:[%s14166_s2 + $0xb0] sm:$0xff]  ;;  %v5314_v6 = vld [vmem:[%s14166_s2 + $0xb8] sm:$0xff] }
 0x9c5   :  { %v4325_v16 = vrot.slane %v4324_v47, 2  ;;  %10985 = vpow2.f32 %v7020_v2  ;;  %v4316_v27 = vadd.f32 %v4315_v10, %v4314_v43 }
 0x9c6   :  { %10987 = vrcp.f32 %v4503_v28 }
 0x9c7   :  { %v4326_v42 = vadd.f32 %v4325_v16, %v4324_v47  ;;  %v4317_v20 = vrot.slane %v4316_v27, 1 }
 0x9c9   :  { %v4327_v15 = vrot.slane %v4326_v42, 1  ;;  %v4318_v1 = vadd.f32 %v4317_v20, %v4316_v27 }
 0x9cb   :  { %v4328_v44 = vadd.f32 %v4327_v15, %v4326_v42 }
 0x9cd   :  { %v4329_v45 = vsel %vm93_vm2, %v4318_v1, %v4328_v44  ;;  %v5131_v44 = vld [vmem:[%s14166_s2 + $0x40] sm:$0xff] }
 0x9ce   :  { %v4842_v14 = vpop.f32.mrb[46].mxu0  ;;  %v5315_v1 = vld [vmem:[%s14167_s3 + $0x100] sm:$0xff] }
 0x9cf   :  { %v9229_v7 = vpop.f32.mrb[47].mxu0  ;;  %v10986_v52 = vpop.eup %10985 }
 0x9d0   :  { %v10988_v54 = vpop.eup %10987  ;;  %v4679_v49 = vadd.f32 1.0, %v10986_v52  ;;  %v5029_v7 = vld [vmem:[%s14167_s3 + $0x78] sm:$0xff] }
 0x9d1   :  { %v13541_v35 = vpack.c.bf16 %v5029_v7, %v5028_v34  ;;  %v5318_v34 = vld [vmem:[%s14167_s3 + $0x118] sm:$0xff] }
 0x9dd   :  { %v4772_v55 = vpop.f32.mrb[46].mxu1 }
 0x9de   :  { %v4843_v38 = vadd.f32 %v4842_v14, %v4772_v55  ;;  %v9210_v40 = vpop.f32.mrb[47].mxu1  ;;  %v13525_v14 = vpack.c.bf16 %v5152_v50, %v5151_v60  ;;  %v5317_v50 = vld [vmem:[%s14167_s3 + $0x110] sm:$0xff] }
 0x9df   :  { %v13553_v2 = vpop.f32.mrb[48].mxu0  ;;  %v13601_v26 = vpack.c.bf16 %v5318_v34, %v5317_v50  ;;  %v5329_v50 = vld [vmem:[%s14167_s3 + $0x170] sm:$0xff]  ;;  %v5330_v34 = vld [vmem:[%s14167_s3 + $0x178] sm:$0xff] }
 0x9e0   :  { %v4851_v39 = vadd.f32 %v13227_v37, %v4843_v38  ;;  %v5022_v37 = vld [vmem:[%s14167_s3 + $0x40] sm:$0xff]  ;;  %10631 = vmatpush3.bf16.msra.mxu0 %v13525_v14  ;;  %v9248_v43 = vpop.f32.mrb[49].mxu0 }
 0x9e1   :  { %v13481_v62 = vpack.c.bf16 %v5023_v30, %v5022_v37  ;;  %10632 = vmatprep.subr.bf16.mxu0 %v11074_v3  ;;  %v5320_v43 = vld [vmem:[%s14167_s3 + $0x128] sm:$0xff] }
 0x9e2   :  { %10989 = vtanh.f32 %v4851_v39 }
 0x9e3   :  { %10991 = vrcp.f32 %v4679_v49  ;;  %10601 = vmatpush3.bf16.msra.mxu1 %v13481_v62 }
 0x9e4   :  { %10602 = vmatprep.subr.bf16.mxu1 %v11074_v3  ;;  %10634 = vmatpush3.bf16.msra.mxu0 %v13545_v9 }
 0x9e5   :  { %10647 = vmatprep.subr.bf16.mxu0 %v11074_v3 }
 0x9e7   :  { %10604 = vmatpush3.bf16.msra.mxu1 %v13500_v51 }
 0x9e8   :  { %10605 = vmatprep.subr.bf16.mxu1 %v11074_v3 }
 0x9eb   :  { %10607 = vmatpush3.bf16.msra.mxu1 %v13521_v12 }
 0x9ec   :  { %v10990_v17 = vpop.eup %10989  ;;  %10608 = vmatprep.subr.bf16.mxu1 %v11074_v3 }
 0x9ed   :  { %v4853_v22 = vmul.f32 %v10990_v17, %v10988_v54  ;;  %v10992_v21 = vpop.eup %10991  ;;  %v5132_v54 = vld [vmem:[%s14166_s2 + $0x48] sm:$0xff] }
 0x9ee   :  { %v13571_v41 = vpack.c.bf16 %v5132_v54, %v5131_v44 }
 0x9ef   :  { %v4854_v48 = vadd.f32 %v4853_v22, %v4329_v45  ;;  %10610 = vmatpush3.bf16.msra.mxu1 %v13541_v35  ;;  %v5316_v22 = vld [vmem:[%s14167_s3 + $0x108] sm:$0xff] }
 0x9f0   :  { %10635 = vmatprep.subr.bf16.mxu1 %v11074_v3  ;;  %v13574_v19 = vpack.c.bf16 %v5316_v22, %v5315_v1  ;;  %v5325_v1 = vld [vmem:[%s14167_s3 + $0x150] sm:$0xff]  ;;  %v5326_v22 = vld [vmem:[%s14167_s3 + $0x158] sm:$0xff] }
 0x9f1   :  { %10993 = vtanh.f32 %v4854_v48 }
 0x9fb   :  { %v10994_v63 = vpop.eup %10993 }
 0x9fc   :  { %v4856_v47 = vmul.f32 %v10994_v63, %v10992_v21  ;;  %v5135_v21 = vld [vmem:[%s14166_s2 + $0x60] sm:$0xff]  ;;  %v5136_v63 = vld [vmem:[%s14166_s2 + $0x68] sm:$0xff] }
 0x9fe   :  { %4858 = vrot.lane.b32.xlu1 %v4856_v47, %s11077_s12  ;;  %v5319_v47 = vld [vmem:[%s14167_s3 + $0x120] sm:$0xff] }
 0xa70   :  { %v4859_v28 = vpop.permute.xlu1 %4858 }
 0xa71   :  { %v4861_v55 = vsel %vm119_vm1, %v4854_v48, %v4859_v28  ;;  %v13621_v28 = vpack.c.bf16 %v5136_v63, %v5135_v21  ;;  %v13725_v21 = vpack.c.bf16 %v5314_v6, %v5313_v13  ;;  %v13729_v63 = vpack.c.bf16 %v5330_v34, %v5329_v50  ;;  %v5498_v13 = vld [vmem:[%s14167_s3 + $0x1b8] sm:$0xff]  ;;  %v5489_v50 = vld [vmem:[%s14166_s2 + $0xf0] sm:$0xff] }
 0xa72   :  { %4862 = vst [vmem:[#allocation2 + $0xa] sm:$0x3] %v4861_v55  ;;  %v13625_v55 = vpack.c.bf16 %v5320_v43, %v5319_v47  ;;  %v5491_v47 = vld [vmem:[%s14167_s3 + $0x180] sm:$0xff]  ;;  %v5492_v43 = vld [vmem:[%s14167_s3 + $0x188] sm:$0xff]  ;;  %v5490_v34 = vld [vmem:[%s14166_s2 + $0xf8] sm:$0xff] }
 0xa79   :  { %v4867_v16 = vld [vmem:[%s4866_s22] sm:$0x1]  ;;  %v7031_v10 = vld [vmem:[%s6845_s13 + $0x1] sm:$0x1] }
 0xa7a   :  { %v4871_v38 = vld [vmem:[%s4870_s24] sm:$0x1]  ;;  %v7034_v39 = vld [vmem:[%s6848_s26 + $0x1] sm:$0x1]  ;;  %v4898_v17 = vrot.slane %v7031_v10, 5 }
 0xa7b   :  { %v4875_v40 = vld [vmem:[%s4874_s25] sm:$0x1]  ;;  %v4892_v42 = vrot.slane %v4871_v38, 7  ;;  %v7037_v15 = vld [vmem:[%s6851_s27 + $0x1] sm:$0x1]  ;;  %v4911_v20 = vadd.f32 %v4871_v38, %v4867_v16  ;;  %v4913_v52 = vadd.f32 %v7034_v39, %v7031_v10  ;;  %v4901_v45 = vrot.slane %v7034_v39, 4 }
 0xa7c   :  { %v4895_v27 = vrot.slane %v4875_v40, 6  ;;  %v4904_v30 = vrot.slane %v7037_v15, 3  ;;  %v5138_v38 = vld [vmem:[%s14166_s2 + $0x78] sm:$0xff]  ;;  %s7051_s27 = sld [smem:[#allocation3 + $0x2b]] }
 0xa7d   :  { %v4906_v49 = vsel %vm93_vm2, %v4867_v16, %v4892_v42  ;;  %v4914_v37 = vadd.f32 %v7037_v15, %v4913_v52  ;;  %v4912_v32 = vadd.f32 %v4911_v20, %v4875_v40  ;;  %v5137_v16 = vld [vmem:[%s14166_s2 + $0x70] sm:$0xff]  ;;  %v5322_v10 = vld [vmem:[%s14167_s3 + $0x138] sm:$0xff]  ;;  %v5308_v15 = vld [vmem:[%s14166_s2 + $0x88] sm:$0xff] }
 0xa7e   :  { %v4907_v48 = vsel %vm95_vm3, %v4906_v49, %v4895_v27  ;;  %v5321_v40 = vld [vmem:[%s14167_s3 + $0x130] sm:$0xff]  ;;  %v13641_v39 = vpack.c.bf16 %v5138_v38, %v5137_v16  ;;  %v5307_v27 = vld [vmem:[%s14166_s2 + $0x80] sm:$0xff]  ;;  %v5324_v52 = vld [vmem:[%s14167_s3 + $0x148] sm:$0xff] }
 0xa7f   :  { %v4908_v31 = vsel %vm97_vm4, %v4907_v48, %v4898_v17  ;;  %v4916_v56 = vrot.slane %v4914_v37, 7  ;;  %v13645_v42 = vpack.c.bf16 %v5322_v10, %v5321_v40  ;;  %v5323_v20 = vld [vmem:[%s14167_s3 + $0x140] sm:$0xff]  ;;  %v13661_v44 = vpack.c.bf16 %v5308_v15, %v5307_v27  ;;  %v5309_v17 = vld [vmem:[%s14166_s2 + $0x90] sm:$0xff]  ;;  %v5310_v49 = vld [vmem:[%s14166_s2 + $0x98] sm:$0xff] }
 0xa80   :  { %v4909_v29 = vsel %vm99_vm5, %v4908_v31, %v4901_v45  ;;  %v13665_v54 = vpack.c.bf16 %v5324_v52, %v5323_v20  ;;  %v13683_v45 = vpack.c.bf16 %v5310_v49, %v5309_v17  ;;  %v13689_v48 = vpack.c.bf16 %v5326_v22, %v5325_v1  ;;  %v5311_v37 = vld [vmem:[%s14166_s2 + $0xa0] sm:$0xff]  ;;  %v5484_v38 = vld [vmem:[%s14166_s2 + $0xc8] sm:$0xff]  ;;  %v5493_v10 = vld [vmem:[%s14167_s3 + $0x190] sm:$0xff] }
 0xa81   :  { %v13583_v60 = vsel %vm101_vm6, %v4909_v29, %v4904_v30  ;;  %v13593_v7 = vsel %vm93_vm2, %v4912_v32, %v4916_v56  ;;  %v5312_v30 = vld [vmem:[%s14166_s2 + $0xa8] sm:$0xff]  ;;  %v5327_v31 = vld [vmem:[%s14167_s3 + $0x160] sm:$0xff]  ;;  %v13745_v40 = vpack.c.bf16 %v5492_v43, %v5491_v47  ;;  %v5494_v27 = vld [vmem:[%s14167_s3 + $0x198] sm:$0xff] }
 0xa82   :  { %9282 = vmatmul.mubr.f32.vlgmr.msra.gmra.mrb[48].mxu1 %v13583_v60  ;;  %9317 = vmatmul.mubr.f32.vlgmr.msra.gmra.mrb[50].mxu0 %v13593_v7  ;;  %v5328_v29 = vld [vmem:[%s14167_s3 + $0x168] sm:$0xff]  ;;  %v13705_v32 = vpack.c.bf16 %v5312_v30, %v5311_v37  ;;  %v5483_v16 = vld [vmem:[%s14166_s2 + $0xc0] sm:$0xff]  ;;  %v5485_v20 = vld [vmem:[%s14166_s2 + $0xd0] sm:$0xff]  ;;  %v13768_v17 = vpack.c.bf16 %v5494_v27, %v5493_v10  ;;  %s7052_s16 = sshll.u32 %s7051_s27, 1 }
 0xa83   :  { %10637 = vmatpush3.bf16.msra.mxu1 %v13571_v41  ;;  %10649 = vmatpush3.bf16.msra.mxu0 %v13574_v19  ;;  %v13709_v56 = vpack.c.bf16 %v5328_v29, %v5327_v31  ;;  %v13755_v15 = vpack.c.bf16 %v5484_v38, %v5483_v16  ;;  %v5486_v52 = vld [vmem:[%s14166_s2 + $0xd8] sm:$0xff]  ;;  %v5495_v49 = vld [vmem:[%s14167_s3 + $0x1a0] sm:$0xff]  ;;  %v5496_v1 = vld [vmem:[%s14167_s3 + $0x1a8] sm:$0xff]  ;;  %v13822_v38 = vpack.c.bf16 %v5490_v34, %v5489_v50  ;;  %s5671_s14 = scalar_lea.vmem [#allocation2], %s7052_s16 }
 0xa84   :  { %10638 = vmatprep.subr.bf16.mxu1 %v11074_v3  ;;  %10650 = vmatprep.subr.bf16.mxu0 %v11074_v3  ;;  %v13778_v22 = vpack.c.bf16 %v5486_v52, %v5485_v20  ;;  %v5487_v37 = vld [vmem:[%s14166_s2 + $0xe0] sm:$0xff]  ;;  %v5488_v30 = vld [vmem:[%s14166_s2 + $0xe8] sm:$0xff]  ;;  %v13792_v31 = vpack.c.bf16 %v5496_v1, %v5495_v49  ;;  %v5497_v29 = vld [vmem:[%s14167_s3 + $0x1b0] sm:$0xff]  ;;  %s7053_s2 = sld [smem:[#allocation3 + $0x2c]] }
 0xa85   :  { %9335 = vmatprep.mubr.msk.f32.mxu1 %vm11076_vm0, %v11075_v8  ;;  %9370 = vmatprep.mubr.msk.f32.mxu0 %vm11076_vm0, %v11075_v8  ;;  %v13802_v6 = vpack.c.bf16 %v5488_v30, %v5487_v37  ;;  %v13812_v47 = vpack.c.bf16 %v5498_v13, %v5497_v29  ;;  %v5499_v43 = vld [vmem:[%s14167_s3 + $0x1c0] sm:$0xff]  ;;  %v5500_v16 = vld [vmem:[%s14167_s3 + $0x1c8] sm:$0xff]  ;;  %v5501_v27 = vld [vmem:[%s14167_s3 + $0x1d0] sm:$0xff] }
 0xa86   :  { %v13826_v10 = vpack.c.bf16 %v5500_v16, %v5499_v43  ;;  %v5502_v20 = vld [vmem:[%s14167_s3 + $0x1d8] sm:$0xff]  ;;  %v5503_v49 = vld [vmem:[%s14167_s3 + $0x1e0] sm:$0xff]  ;;  %v5504_v1 = vld [vmem:[%s14167_s3 + $0x1e8] sm:$0xff] }
 0xa87   :  { %10640 = vmatpush3.bf16.msra.mxu1 %v13597_v25  ;;  %10652 = vmatpush3.bf16.msra.mxu0 %v13601_v26  ;;  %v13838_v52 = vpack.c.bf16 %v5502_v20, %v5501_v27  ;;  %v5505_v37 = vld [vmem:[%s14167_s3 + $0x1f0] sm:$0xff]  ;;  %v5506_v30 = vld [vmem:[%s14167_s3 + $0x1f8] sm:$0xff]  ;;  %v13938_v20 = vld [vmem:[%s14168_s4 + $0x1] ss:$0 sm:$0xff] }
 0xa88   :  { %10641 = vmatprep.subr.bf16.mxu1 %v11074_v3  ;;  %10653 = vmatprep.subr.bf16.mxu0 %v11074_v3 }
 0xa8a   :  { %s7054_s19 = sshll.u32 %s7053_s2, 1 }
 0xa8b   :  { %10643 = vmatpush3.bf16.msra.mxu1 %v13621_v28  ;;  %10655 = vmatpush3.bf16.msra.mxu0 %v13625_v55  ;;  %s5675_s3 = scalar_lea.vmem [#allocation2], %s7054_s19 }
 0xa8c   :  { %10644 = vmatprep.subr.bf16.mxu1 %v11074_v3  ;;  %10656 = vmatprep.subr.bf16.mxu0 %v11074_v3 }
 0xa8f   :  { %10646 = vmatpush3.bf16.msra.mxu1 %v13641_v39  ;;  %10658 = vmatpush3.bf16.msra.mxu0 %v13645_v42 }
 0xa90   :  { %10671 = vmatprep.subr.bf16.mxu1 %v11074_v3  ;;  %10659 = vmatprep.subr.bf16.mxu0 %v11074_v3 }
 0xa92   :  { %9336 = vmatmul.mubr.msk.f32.vlgmr.msra.gmra.mrb[50].mxu1 %vm119_vm1, %v13411_v5 }
 0xa93   :  { %10673 = vmatpush3.bf16.msra.mxu1 %v13661_v44  ;;  %9389 = vmatprep.mubr.msk.f32.mxu1 %vm11076_vm0, %v11075_v8 }
 0xa94   :  { %10661 = vmatpush3.bf16.msra.mxu0 %v13665_v54  ;;  %10674 = vmatprep.subr.bf16.mxu1 %v11074_v3 }
 0xa95   :  { %10662 = vmatprep.subr.bf16.mxu0 %v11074_v3 }
 0xa97   :  { %10676 = vmatpush3.bf16.msra.mxu1 %v13683_v45 }
 0xa98   :  { %10664 = vmatpush3.bf16.msra.mxu0 %v13689_v48  ;;  %10677 = vmatprep.subr.bf16.mxu1 %v11074_v3 }
 0xa99   :  { %10665 = vmatprep.subr.bf16.mxu0 %v11074_v3 }
 0xa9b   :  { %10679 = vmatpush3.bf16.msra.mxu1 %v13705_v32 }
 0xa9c   :  { %10667 = vmatpush3.bf16.msra.mxu0 %v13709_v56  ;;  %10680 = vmatprep.subr.bf16.mxu1 %v11074_v3 }
 0xa9d   :  { %10668 = vmatprep.subr.bf16.mxu0 %v11074_v3 }
 0xa9f   :  { %10682 = vmatpush3.bf16.msra.mxu1 %v13725_v21 }
 0xaa0   :  { %10670 = vmatpush3.bf16.msra.mxu0 %v13729_v63  ;;  %10683 = vmatprep.subr.bf16.mxu1 %v11074_v3 }
 0xaa1   :  { %10707 = vmatprep.subr.bf16.mxu0 %v11074_v3 }
 0xaa2   :  { %9390 = vmatmul.mubr.msk.f32.vlgmr.msra.gmra.mrb[52].mxu1 %vm119_vm1, %v13411_v5 }
 0xaa3   :  { %9371 = vmatmul.mubr.f32.vlgmr.msra.gmra.mrb[52].mxu0 %v13593_v7  ;;  %10685 = vmatpush3.bf16.msra.mxu1 %v13745_v40 }
 0xaa4   :  { %10686 = vmatprep.subr.bf16.mxu1 %v11074_v3  ;;  %10709 = vmatpush3.bf16.msra.mxu0 %v13755_v15 }
 0xaa5   :  { %10710 = vmatprep.subr.bf16.mxu0 %v11074_v3  ;;  %9443 = vmatprep.mubr.msk.f32.mxu0 %vm11076_vm0, %v11075_v8 }
 0xaa6   :  { %9424 = vmatprep.mubr.msk.f32.mxu1 %vm11076_vm0, %v11075_v8 }
 0xaa7   :  { %10688 = vmatpush3.bf16.msra.mxu1 %v13768_v17 }
 0xaa8   :  { %10689 = vmatprep.subr.bf16.mxu1 %v11074_v3  ;;  %10712 = vmatpush3.bf16.msra.mxu0 %v13778_v22 }
 0xaa9   :  { %10713 = vmatprep.subr.bf16.mxu0 %v11074_v3 }
 0xaab   :  { %10691 = vmatpush3.bf16.msra.mxu1 %v13792_v31 }
 0xaac   :  { %10692 = vmatprep.subr.bf16.mxu1 %v11074_v3  ;;  %10715 = vmatpush3.bf16.msra.mxu0 %v13802_v6 }
 0xaad   :  { %10716 = vmatprep.subr.bf16.mxu0 %v11074_v3 }
 0xaaf   :  { %10694 = vmatpush3.bf16.msra.mxu1 %v13812_v47 }
 0xab0   :  { %10695 = vmatprep.subr.bf16.mxu1 %v11074_v3  ;;  %10718 = vmatpush3.bf16.msra.mxu0 %v13822_v38 }
 0xab1   :  { %10719 = vmatprep.subr.bf16.mxu0 %v11074_v3 }
 0xab3   :  { %10697 = vmatpush3.bf16.msra.mxu1 %v13826_v10  ;;  %9444 = vmatmul.mubr.msk.f32.vlgmr.msra.gmra.mrb[54].mxu0 %vm119_vm1, %v13411_v5  ;;  %v13854_v5 = vpack.c.bf16 %v5504_v1, %v5503_v49 }
 0xab4   :  { %10698 = vmatprep.subr.bf16.mxu1 %v11074_v3  ;;  %10721 = vmatpush3.bf16.msra.mxu0 %v13334_v36  ;;  %v13866_v36 = vpack.c.bf16 %v5506_v30, %v5505_v37 }
 0xab5   :  { %10722 = vmatprep.subr.bf16.mxu0 %v11074_v3  ;;  %9462 = vmatprep.mubr.msk.f32.mxu0 %vm11076_vm0, %v11075_v8 }
 0xab7   :  { %10700 = vmatpush3.bf16.msra.mxu1 %v13838_v52 }
 0xab8   :  { %10701 = vmatprep.subr.bf16.mxu1 %v11074_v3  ;;  %10724 = vmatpush3.bf16.msra.mxu0 %v13340_v4  ;;  %v13897_v4 = vld [vmem:[%s14165_s1 + $0xe] sm:$0x3]  ;;  %s6863_s1 = scalar_lea.vmem [#allocation2], %s7059_s21 }
 0xab9   :  { %10725 = vmatprep.subr.bf16.mxu0 %v11074_v3 }
 0xabb   :  { %10703 = vmatpush3.bf16.msra.mxu1 %v13854_v5 }
 0xabc   :  { %10704 = vmatprep.subr.bf16.mxu1 %v11074_v3  ;;  %10727 = vmatpush3.bf16.msra.mxu0 %v13367_v61 }
 0xabd   :  { %10728 = vmatprep.subr.bf16.mxu0 %v11074_v3 }
 0xabf   :  { %10706 = vmatpush3.bf16.msra.mxu1 %v13866_v36 }
 0xac0   :  { %10730 = vmatpush3.bf16.msra.mxu0 %v13387_v59  ;;  %10731 = vmatprep.subr.bf16.mxu1 %v11074_v3  ;;  %v5005_v59 = vrot.slane %v13553_v2, 5 }
 0xac1   :  { %10755 = vmatprep.subr.bf16.mxu0 %v11074_v3 }
 0xac2   :  { %9425 = vmatmul.mubr.f32.vlgmr.msra.gmra.mrb[54].mxu1 %v13593_v7 }
 0xac3   :  { %10733 = vmatpush3.bf16.msra.mxu1 %v13355_v33  ;;  %9497 = vmatprep.mubr.msk.f32.mxu1 %vm11076_vm0, %v11075_v8  ;;  %v5001_v33 = vrot.slane %v13553_v2, 7 }
 0xac4   :  { %10734 = vmatprep.subr.bf16.mxu1 %v11074_v3  ;;  %9463 = vmatmul.mubr.msk.f32.vlgmr.msra.gmra.mrb[56].mxu0 %vm119_vm1, %v13897_v4 }
 0xac5   :  { %10757 = vmatpush3.bf16.msra.mxu0 %v13413_v11  ;;  %9532 = vmatprep.mubr.msk.f32.mxu0 %vm11076_vm0, %v11075_v8  ;;  %v5009_v61 = vsel %vm93_vm2, %v13553_v2, %v5001_v33  ;;  %v5007_v11 = vrot.slane %v13553_v2, 4 }
 0xac6   :  { %10758 = vmatprep.subr.bf16.mxu0 %v11074_v3 }
 0xac7   :  { %10736 = vmatpush3.bf16.msra.mxu1 %v13364_v53  ;;  %v5003_v53 = vrot.slane %v13553_v2, 6 }
 0xac8   :  { %10737 = vmatprep.subr.bf16.mxu1 %v11074_v3 }
 0xac9   :  { %10760 = vmatpush3.bf16.msra.mxu0 %v13430_v24 }
 0xaca   :  { %10761 = vmatprep.subr.bf16.mxu0 %v11074_v3 }
 0xacb   :  { %10739 = vmatpush3.bf16.msra.mxu1 %v13384_v18  ;;  %v5010_v18 = vsel %vm95_vm3, %v5009_v61, %v5003_v53 }
 0xacc   :  { %10740 = vmatprep.subr.bf16.mxu1 %v11074_v3 }
 0xacd   :  { %10763 = vmatpush3.bf16.msra.mxu0 %v13444_v58 }
 0xace   :  { %10764 = vmatprep.subr.bf16.mxu0 %v11074_v3 }
 0xacf   :  { %10742 = vmatpush3.bf16.msra.mxu1 %v13404_v0  ;;  %v5011_v0 = vsel %vm97_vm4, %v5010_v18, %v5003_v53 }
 0xad0   :  { %10743 = vmatprep.subr.bf16.mxu1 %v11074_v3  ;;  %v5012_v24 = vsel %vm99_vm5, %v5011_v0, %v5005_v59  ;;  %v13946_v59 = vld [vmem:[%s14168_s4 + $0x2] ss:$0 sm:$0xff] }
 0xad1   :  { %10766 = vmatpush3.bf16.msra.mxu0 %v13457_v46  ;;  %v5013_v58 = vsel %vm101_vm6, %v5012_v24, %v5007_v11 }
 0xad2   :  { %10767 = vmatprep.subr.bf16.mxu0 %v11074_v3 }
 0xad3   :  { %10745 = vmatpush3.bf16.msra.mxu1 %v13481_v62 }
 0xad4   :  { %10746 = vmatprep.subr.bf16.mxu1 %v11074_v3 }
 0xad5   :  { %10769 = vmatpush3.bf16.msra.mxu0 %v13486_v23 }
 0xad6   :  { %10770 = vmatprep.subr.bf16.mxu0 %v11074_v3 }
 0xad7   :  { %10748 = vmatpush3.bf16.msra.mxu1 %v13500_v51 }
 0xad8   :  { %10749 = vmatprep.subr.bf16.mxu1 %v11074_v3 }
 0xad9   :  { %10772 = vmatpush3.bf16.msra.mxu0 %v13512_v57 }
 0xada   :  { %10773 = vmatprep.subr.bf16.mxu0 %v11074_v3 }
 0xadb   :  { %10751 = vmatpush3.bf16.msra.mxu1 %v13521_v12  ;;  %v13932_v12 = vld [vmem:[%s14168_s4] ss:$0 sm:$0xff] }
 0xadc   :  { %10752 = vmatprep.subr.bf16.mxu1 %v11074_v3 }
 0xadd   :  { %10775 = vmatpush3.bf16.msra.mxu0 %v13525_v14 }
 0xade   :  { %10776 = vmatprep.subr.bf16.mxu0 %v11074_v3 }
 0xadf   :  { %10754 = vmatpush3.bf16.msra.mxu1 %v13541_v35 }
 0xae0   :  { %10779 = vmatprep.subr.bf16.mxu1 %v11074_v3 }
 0xae1   :  { %10778 = vmatpush3.bf16.msra.mxu0 %v13545_v9 }
 0xae2   :  { %10791 = vmatprep.subr.bf16.mxu0 %v11074_v3 }
 0xb55   :  { %v5096_v46 = vpop.f32.mrb[48].mxu1  ;;  %v5221_v23 = vpop.f32.mrb[50].mxu0 }
 0xb56   :  { %v5097_v62 = vadd.f32 %v5096_v46, %v5013_v58  ;;  %v9283_v51 = vpop.f32.mrb[49].mxu1  ;;  %v9318_v57 = vpop.f32.mrb[51].mxu0 }
 0xb58   :  { %v5105_v14 = vadd.f32 %v13932_v12, %v5097_v62 }
 0xb5a   :  { %v7040_v35 = vmul.f32 -1.442695, %v5105_v14  ;;  %v13953_v14 = vld [vmem:[%s14168_s4 + $0x3] ss:$0 sm:$0xff]  ;;  %s7049_s4 = sld [smem:[#allocation3 + $0x2a]] }
 0xb5c   :  { %10995 = vpow2.f32 %v7040_v35 }
 0xb60   :  { %s7050_s28 = sshll.u32 %s7049_s4, 1 }
 0xb61   :  { %s5667_s15 = scalar_lea.vmem [#allocation2], %s7050_s28 }
 0xb65   :  { %v5291_v2 = vpop.f32.mrb[50].mxu1 }
 0xb66   :  { %v5292_v9 = vadd.f32 %v5291_v2, %v5221_v23  ;;  %v9337_v7 = vpop.f32.mrb[51].mxu1  ;;  %v10996_v29 = vpop.eup %10995 }
 0xb67   :  { %v5109_v13 = vadd.f32 1.0, %v10996_v29 }
 0xb68   :  { %v5300_v1 = vadd.f32 %v13938_v20, %v5292_v9 }
 0xb69   :  { %10997 = vrcp.f32 %v5109_v13 }
 0xb6a   :  { %v7043_v30 = vmul.f32 -1.442695, %v5300_v1 }
 0xb6c   :  { %10999 = vpow2.f32 %v7043_v30 }
 0xb73   :  { %v10998_v49 = vpop.eup %10997 }
 0xb74   :  { %v5112_v37 = vmul.f32 %v10998_v49, %v13583_v60 }
 0xb75   :  { %v5467_v50 = vpop.f32.mrb[52].mxu1 }
 0xb76   :  { %v5397_v34 = vpop.f32.mrb[52].mxu0  ;;  %v9391_v43 = vpop.f32.mrb[53].mxu1  ;;  %v5121_v53 = vrot.slane %v5112_v37, 3  ;;  %v5113_v0 = vsel %vm306_vm7, %v5112_v37, 0.0 }
 0xb77   :  { %v5468_v16 = vadd.f32 %v5467_v50, %v5397_v34  ;;  %v9372_v27 = vpop.f32.mrb[53].mxu0  ;;  %v5114_v58 = vrot.slane %v5113_v0, 4  ;;  %v11000_v46 = vpop.eup %10999 }
 0xb78   :  { %v5123_v18 = vsel %vm306_vm7, %v5121_v53, 0.0  ;;  %v5304_v51 = vadd.f32 1.0, %v11000_v46 }
 0xb79   :  { %v5124_v11 = vrot.slane %v5123_v18, 4  ;;  %v5476_v24 = vadd.f32 %v13946_v59, %v5468_v16  ;;  %v5115_v23 = vadd.f32 %v5114_v58, %v5113_v0 }
 0xb7b   :  { %v5125_v60 = vadd.f32 %v5124_v11, %v5123_v18  ;;  %v7046_v62 = vmul.f32 -1.442695, %v5476_v24  ;;  %v5116_v7 = vrot.slane %v5115_v23, 2 }
 0xb7d   :  { %v5126_v35 = vrot.slane %v5125_v60, 2  ;;  %11001 = vpow2.f32 %v7046_v62  ;;  %v5117_v50 = vadd.f32 %v5116_v7, %v5115_v23 }
 0xb7e   :  { %11003 = vrcp.f32 %v5304_v51 }
 0xb7f   :  { %v5127_v13 = vadd.f32 %v5126_v35, %v5125_v60  ;;  %v5118_v43 = vrot.slane %v5117_v50, 1 }
 0xb81   :  { %v5128_v34 = vrot.slane %v5127_v13, 1  ;;  %v5119_v30 = vadd.f32 %v5118_v43, %v5117_v50 }
 0xb83   :  { %v5129_v27 = vadd.f32 %v5128_v34, %v5127_v13 }
 0xb86   :  { %v5643_v33 = vpop.f32.mrb[54].mxu0 }
 0xb87   :  { %v9445_v61 = vpop.f32.mrb[55].mxu0  ;;  %v11002_v16 = vpop.eup %11001 }
 0xb88   :  { %v11004_v49 = vpop.eup %11003  ;;  %v5480_v37 = vadd.f32 1.0, %v11002_v16 }
 0xb95   :  { %v5573_v57 = vpop.f32.mrb[54].mxu1 }
 0xb96   :  { %v5644_v2 = vadd.f32 %v5643_v33, %v5573_v57  ;;  %v9426_v9 = vpop.f32.mrb[55].mxu1  ;;  %v5130_v33 = vsel %vm93_vm2, %v5119_v30, %v5129_v27 }
 0xb97   :  { %v13958_v24 = vpop.f32.mrb[56].mxu0 }
 0xb98   :  { %v5652_v29 = vadd.f32 %v13953_v14, %v5644_v2  ;;  %v9464_v58 = vpop.f32.mrb[57].mxu0 }
 0xb9a   :  { %11005 = vtanh.f32 %v5652_v29 }
 0xb9b   :  { %11007 = vrcp.f32 %v5480_v37 }
 0xba4   :  { %v11006_v1 = vpop.eup %11005 }
 0xba5   :  { %v5654_v53 = vmul.f32 %v11006_v1, %v11004_v49  ;;  %v11008_v18 = vpop.eup %11007 }
 0xba7   :  { %v5655_v61 = vadd.f32 %v5654_v53, %v5130_v33 }
 0xba9   :  { %11009 = vtanh.f32 %v5655_v61 }
 0xbb3   :  { %v11010_v0 = vpop.eup %11009 }
 0xbb4   :  { %v5657_v11 = vmul.f32 %v11010_v0, %v11008_v18 }
 0xbb6   :  { %5659 = vrot.lane.b32.xlu0 %v5657_v11, %s11077_s12 }
 0xc28   :  { %v5660_v46 = vpop.permute.xlu0 %5659 }
 0xc29   :  { %v5662_v60 = vsel %vm119_vm1, %v5655_v61, %v5660_v46 }
 0xc2a   :  { %5663 = vst [vmem:[#allocation2 + $0xc] sm:$0x3] %v5662_v60 }
 0xc31   :  { %v5668_v62 = vld [vmem:[%s5667_s15] sm:$0x1]  ;;  %v7057_v57 = vld [vmem:[%s6860_s29 + $0x1] sm:$0x1] }
 0xc32   :  { %v5672_v23 = vld [vmem:[%s5671_s14] sm:$0x1]  ;;  %v7060_v35 = vld [vmem:[%s6863_s1 + $0x1] sm:$0x1]  ;;  %v5699_v50 = vrot.slane %v7057_v57, 5 }
 0xc33   :  { %v5676_v51 = vld [vmem:[%s5675_s3] sm:$0x1]  ;;  %v5693_v2 = vrot.slane %v5672_v23, 7  ;;  %v7063_v7 = vld [vmem:[%s6866_s17 + $0x1] sm:$0x1]  ;;  %v5712_v29 = vadd.f32 %v5672_v23, %v5668_v62  ;;  %v5714_v13 = vadd.f32 %v7060_v35, %v7057_v57  ;;  %v5702_v43 = vrot.slane %v7060_v35, 4 }
 0xc34   :  { %v5696_v9 = vrot.slane %v5676_v51, 6  ;;  %v5705_v49 = vrot.slane %v7063_v7, 3 }
 0xc35   :  { %v5707_v34 = vsel %vm93_vm2, %v5668_v62, %v5693_v2  ;;  %v5715_v27 = vadd.f32 %v7063_v7, %v5714_v13  ;;  %v5713_v30 = vadd.f32 %v5712_v29, %v5676_v51 }
 0xc36   :  { %v5708_v16 = vsel %vm95_vm3, %v5707_v34, %v5696_v9 }
 0xc37   :  { %v5709_v1 = vsel %vm97_vm4, %v5708_v16, %v5699_v50  ;;  %v5717_v53 = vrot.slane %v5715_v27, 7 }
 0xc38   :  { %v5710_v37 = vsel %vm99_vm5, %v5709_v1, %v5702_v43 }
 0xc39   :  { %v13966_v33 = vsel %vm101_vm6, %v5710_v37, %v5705_v49  ;;  %v13970_v61 = vsel %vm93_vm2, %v5713_v30, %v5717_v53 }
 0xc3a   :  { %9498 = vmatmul.mubr.f32.vlgmr.msra.gmra.mrb[56].mxu1 %v13966_v33  ;;  %9533 = vmatmul.mubr.f32.vlgmr.msra.gmra.mrb[58].mxu0 %v13970_v61 }
 0xc3b   :  { %10781 = vmatpush3.bf16.msra.mxu1 %v13571_v41  ;;  %10793 = vmatpush3.bf16.msra.mxu0 %v13574_v19  ;;  %v6471_v41 = vld [vmem:[%s14169_s5] sm:$0xff]  ;;  %v6472_v19 = vld [vmem:[%s14169_s5 + $0x8] sm:$0xff] }
 0xc3c   :  { %10782 = vmatprep.subr.bf16.mxu1 %v11074_v3  ;;  %10794 = vmatprep.subr.bf16.mxu0 %v11074_v3 }
 0xc3d   :  { %9551 = vmatprep.mubr.msk.f32.mxu1 %vm11076_vm0, %v11075_v8  ;;  %9586 = vmatprep.mubr.msk.f32.mxu0 %vm11076_vm0, %v11075_v8 }
 0xc3f   :  { %10784 = vmatpush3.bf16.msra.mxu1 %v13597_v25  ;;  %10796 = vmatpush3.bf16.msra.mxu0 %v13601_v26  ;;  %v6479_v25 = vld [vmem:[%s14170_s6] sm:$0xff]  ;;  %v10876_v26 = vpack.c.bf16 %v6472_v19, %v6471_v41 }
 0xc40   :  { %10785 = vmatprep.subr.bf16.mxu1 %v11074_v3  ;;  %10797 = vmatprep.subr.bf16.mxu0 %v11074_v3 }
 0xc43   :  { %10787 = vmatpush3.bf16.msra.mxu1 %v13621_v28  ;;  %10799 = vmatpush3.bf16.msra.mxu0 %v13625_v55  ;;  %v6480_v28 = vld [vmem:[%s14170_s6 + $0x8] sm:$0xff]  ;;  %v6473_v55 = vld [vmem:[%s14169_s5 + $0x10] sm:$0xff] }
 0xc44   :  { %10788 = vmatprep.subr.bf16.mxu1 %v11074_v3  ;;  %10800 = vmatprep.subr.bf16.mxu0 %v11074_v3 }
 0xc47   :  { %10790 = vmatpush3.bf16.msra.mxu1 %v13641_v39  ;;  %10802 = vmatpush3.bf16.msra.mxu0 %v13645_v42  ;;  %v6474_v39 = vld [vmem:[%s14169_s5 + $0x18] sm:$0xff]  ;;  %v10864_v42 = vpack.c.bf16 %v6480_v28, %v6479_v25 }
 0xc48   :  { %10815 = vmatprep.subr.bf16.mxu1 %v11074_v3  ;;  %10803 = vmatprep.subr.bf16.mxu0 %v11074_v3 }
 0xc4a   :  { %9552 = vmatmul.mubr.msk.f32.vlgmr.msra.gmra.mrb[58].mxu1 %vm119_vm1, %v13897_v4 }
 0xc4b   :  { %10817 = vmatpush3.bf16.msra.mxu1 %v13661_v44  ;;  %9605 = vmatprep.mubr.msk.f32.mxu1 %vm11076_vm0, %v11075_v8  ;;  %v6481_v44 = vld [vmem:[%s14170_s6 + $0x10] sm:$0xff] }
 0xc4c   :  { %10805 = vmatpush3.bf16.msra.mxu0 %v13665_v54  ;;  %10818 = vmatprep.subr.bf16.mxu1 %v11074_v3  ;;  %v6482_v54 = vld [vmem:[%s14170_s6 + $0x18] sm:$0xff] }
 0xc4d   :  { %10806 = vmatprep.subr.bf16.mxu0 %v11074_v3 }
 0xc4f   :  { %10820 = vmatpush3.bf16.msra.mxu1 %v13683_v45  ;;  %v10879_v45 = vpack.c.bf16 %v6474_v39, %v6473_v55 }
 0xc50   :  { %10808 = vmatpush3.bf16.msra.mxu0 %v13689_v48  ;;  %10821 = vmatprep.subr.bf16.mxu1 %v11074_v3  ;;  %v10867_v48 = vpack.c.bf16 %v6482_v54, %v6481_v44 }
 0xc51   :  { %10809 = vmatprep.subr.bf16.mxu0 %v11074_v3 }
 0xc53   :  { %10823 = vmatpush3.bf16.msra.mxu1 %v13705_v32  ;;  %v6475_v32 = vld [vmem:[%s14169_s5 + $0x20] sm:$0xff] }
 0xc54   :  { %10811 = vmatpush3.bf16.msra.mxu0 %v13709_v56  ;;  %10824 = vmatprep.subr.bf16.mxu1 %v11074_v3  ;;  %v6476_v56 = vld [vmem:[%s14169_s5 + $0x28] sm:$0xff] }
 0xc55   :  { %10812 = vmatprep.subr.bf16.mxu0 %v11074_v3 }
 0xc57   :  { %10826 = vmatpush3.bf16.msra.mxu1 %v13725_v21  ;;  %v10882_v21 = vpack.c.bf16 %v6476_v56, %v6475_v32 }
 0xc58   :  { %10814 = vmatpush3.bf16.msra.mxu0 %v13729_v63  ;;  %10827 = vmatprep.subr.bf16.mxu1 %v11074_v3  ;;  %v5802_v63 = vrot.slane %v13958_v24, 7 }
 0xc59   :  { %10851 = vmatprep.subr.bf16.mxu0 %v11074_v3 }
 0xc5a   :  { %9606 = vmatmul.mubr.msk.f32.vlgmr.msra.gmra.mrb[60].mxu1 %vm119_vm1, %v13897_v4 }
 0xc5b   :  { %9587 = vmatmul.mubr.f32.vlgmr.msra.gmra.mrb[60].mxu0 %v13970_v61  ;;  %10829 = vmatpush3.bf16.msra.mxu1 %v13745_v40  ;;  %v5804_v40 = vrot.slane %v13958_v24, 6 }
 0xc5c   :  { %10830 = vmatprep.subr.bf16.mxu1 %v11074_v3  ;;  %10853 = vmatpush3.bf16.msra.mxu0 %v13755_v15  ;;  %v5810_v15 = vsel %vm93_vm2, %v13958_v24, %v5802_v63 }
 0xc5d   :  { %10854 = vmatprep.subr.bf16.mxu0 %v11074_v3  ;;  %9659 = vmatprep.mubr.msk.f32.mxu0 %vm11076_vm0, %v11075_v8 }
 0xc5e   :  { %9640 = vmatprep.mubr.msk.f32.mxu1 %vm11076_vm0, %v11075_v8 }
 0xc5f   :  { %10832 = vmatpush3.bf16.msra.mxu1 %v13768_v17  ;;  %v5811_v17 = vsel %vm95_vm3, %v5810_v15, %v5804_v40 }
 0xc60   :  { %10833 = vmatprep.subr.bf16.mxu1 %v11074_v3  ;;  %10856 = vmatpush3.bf16.msra.mxu0 %v13778_v22  ;;  %v5806_v22 = vrot.slane %v13958_v24, 5 }
 0xc61   :  { %10857 = vmatprep.subr.bf16.mxu0 %v11074_v3 }
 0xc63   :  { %10835 = vmatpush3.bf16.msra.mxu1 %v13792_v31  ;;  %v5812_v31 = vsel %vm97_vm4, %v5811_v17, %v5804_v40  ;;  %v6484_v40 = vld [vmem:[%s14170_s6 + $0x28] sm:$0xff]  ;;  %v6477_v17 = vld [vmem:[%s14169_s5 + $0x30] sm:$0xff] }
 0xc64   :  { %10836 = vmatprep.subr.bf16.mxu1 %v11074_v3  ;;  %10859 = vmatpush3.bf16.msra.mxu0 %v13802_v6  ;;  %v5808_v6 = vrot.slane %v13958_v24, 4 }
 0xc65   :  { %10860 = vmatprep.subr.bf16.mxu0 %v11074_v3 }
 0xc67   :  { %10838 = vmatpush3.bf16.msra.mxu1 %v13812_v47  ;;  %v5813_v47 = vsel %vm99_vm5, %v5812_v31, %v5806_v22  ;;  %v6478_v22 = vld [vmem:[%s14169_s5 + $0x38] sm:$0xff] }
 0xc68   :  { %10839 = vmatprep.subr.bf16.mxu1 %v11074_v3  ;;  %10862 = vmatpush3.bf16.msra.mxu0 %v13822_v38  ;;  %v5814_v38 = vsel %vm101_vm6, %v5813_v47, %v5808_v6  ;;  %v10885_v31 = vpack.c.bf16 %v6478_v22, %v6477_v17  ;;  %v6485_v6 = vld [vmem:[%s14170_s6 + $0x30] sm:$0xff]  ;;  %v6486_v47 = vld [vmem:[%s14170_s6 + $0x38] sm:$0xff] }
 0xc69   :  { %10863 = vmatprep.subr.bf16.mxu0 %v11074_v3 }
 0xc6b   :  { %10841 = vmatpush3.bf16.msra.mxu1 %v13826_v10  ;;  %9660 = vmatmul.mubr.msk.f32.vlgmr.msra.gmra.mrb[62].mxu0 %vm119_vm1, %v13897_v4 }
 0xc6c   :  { %10842 = vmatprep.subr.bf16.mxu1 %v11074_v3  ;;  %9678 = vmatprep.mubr.msk.f32.mxu0 %vm11076_vm0, %v11075_v8 }
 0xc6d   :  { %10865 = vmatpush3.bf16.msra.mxu0 %v10864_v42 }
 0xc6e   :  { %10866 = vmatprep.subr.bf16.mxu0 %v11074_v3 }
 0xc6f   :  { %10844 = vmatpush3.bf16.msra.mxu1 %v13838_v52 }
 0xc70   :  { %10845 = vmatprep.subr.bf16.mxu1 %v11074_v3 }
 0xc71   :  { %10868 = vmatpush3.bf16.msra.mxu0 %v10867_v48 }
 0xc72   :  { %10869 = vmatprep.subr.bf16.mxu0 %v11074_v3 }
 0xc73   :  { %10847 = vmatpush3.bf16.msra.mxu1 %v13854_v5 }
 0xc74   :  { %10848 = vmatprep.subr.bf16.mxu1 %v11074_v3 }
 0xc77   :  { %10850 = vmatpush3.bf16.msra.mxu1 %v13866_v36 }
 0xc78   :  { %10875 = vmatprep.subr.bf16.mxu1 %v11074_v3 }
 0xc7a   :  { %9641 = vmatmul.mubr.f32.vlgmr.msra.gmra.mrb[62].mxu1 %v13970_v61 }
 0xc7b   :  { %9697 = vmatprep.mubr.msk.f32.mxu1 %vm11076_vm0, %v11075_v8  ;;  %10877 = vmatpush3.bf16.msra.mxu1 %v10876_v26 }
 0xc7c   :  { %10878 = vmatprep.subr.bf16.mxu1 %v11074_v3 }
 0xc7f   :  { %10880 = vmatpush3.bf16.msra.mxu1 %v10879_v45 }
 0xc80   :  { %10881 = vmatprep.subr.bf16.mxu1 %v11074_v3 }
 0xc83   :  { %10883 = vmatpush3.bf16.msra.mxu1 %v10882_v21 }
 0xc84   :  { %10884 = vmatprep.subr.bf16.mxu1 %v11074_v3 }
 0xc87   :  { %10886 = vmatpush3.bf16.msra.mxu1 %v10885_v31 }
 0xd0d   :  { %v5897_v10 = vpop.f32.mrb[56].mxu1  ;;  %v6022_v5 = vpop.f32.mrb[58].mxu0 }
 0xd0e   :  { %v5898_v52 = vadd.f32 %v5897_v10, %v5814_v38  ;;  %v9499_v36 = vpop.f32.mrb[57].mxu1  ;;  %v9534_v4 = vpop.f32.mrb[59].mxu0  ;;  %v10873_v38 = vpack.c.bf16 %v6486_v47, %v6485_v6 }
 0xd10   :  { %v5906_v18 = vadd.f32 %v13932_v12, %v5898_v52 }
 0xd12   :  { %v7066_v0 = vmul.f32 -1.442695, %v5906_v18 }
 0xd14   :  { %11011 = vpow2.f32 %v7066_v0 }
 0xd1d   :  { %v6092_v11 = vpop.f32.mrb[58].mxu1 }
 0xd1e   :  { %v6093_v58 = vadd.f32 %v6092_v11, %v6022_v5  ;;  %v9553_v46 = vpop.f32.mrb[59].mxu1  ;;  %v11012_v60 = vpop.eup %11011 }
 0xd1f   :  { %v5910_v62 = vadd.f32 1.0, %v11012_v60  ;;  %v6641_v46 = vld [vmem:[%s14172_s8] sm:$0xff]  ;;  %v6642_v60 = vld [vmem:[%s14172_s8 + $0x8] sm:$0xff] }
 0xd20   :  { %v6101_v9 = vadd.f32 %v13938_v20, %v6093_v58 }
 0xd21   :  { %11013 = vrcp.f32 %v5910_v62  ;;  %v6643_v62 = vld [vmem:[%s14172_s8 + $0x10] sm:$0xff] }
 0xd22   :  { %v7069_v29 = vmul.f32 -1.442695, %v6101_v9 }
 0xd24   :  { %11015 = vpow2.f32 %v7069_v29 }
 0xd2b   :  { %v11014_v2 = vpop.eup %11013 }
 0xd2c   :  { %v5913_v7 = vmul.f32 %v11014_v2, %v13966_v33  ;;  %v6633_v2 = vld [vmem:[%s14171_s7] sm:$0x1]  ;;  %s11078_s7 = smov [#allocation6]  }
 0xd2d   :  { %v6268_v23 = vpop.f32.mrb[60].mxu1  ;;  %s6739_s21 = sshll.u32 %s11078_s7, 4  ;;  %s6740_s21 = int_to_ptr.vmem [resolvable:$true] %s6739_s21 }
 0xd2e   :  { %v6198_v24 = vpop.f32.mrb[60].mxu0  ;;  %v9607_v51 = vpop.f32.mrb[61].mxu1  ;;  %v5922_v13 = vrot.slane %v5913_v7, 3  ;;  %v5914_v43 = vsel %vm306_vm7, %v5913_v7, 0.0  ;;  %s11051_s0 = scalar_lea.vmem %s6740_s21, 32  ;;  %p11052_p6 = scmp.lt.s32.totalorder %s6740_s21, %s6740_s21 }
 0xd2f   :  { %v6269_v57 = vadd.f32 %v6268_v23, %v6198_v24  ;;  %v9588_v35 = vpop.f32.mrb[61].mxu0  ;;  %v5915_v49 = vrot.slane %v5914_v43, 4  ;;  %v11016_v1 = vpop.eup %11015  ;;  %v10888_v23 = vpack.c.bf16 %v6642_v60, %v6641_v46  ;;  %v6644_v24 = vld [vmem:[%s14172_s8 + $0x18] sm:$0xff] }
 0xd30   :  { %v5924_v34 = vsel %vm306_vm7, %v5922_v13, 0.0  ;;  %v6105_v20 = vadd.f32 1.0, %v11016_v1  ;;  %v10891_v51 = vpack.c.bf16 %v6644_v24, %v6643_v62 }
 0xd31   :  { %v5925_v16 = vrot.slane %v5924_v34, 4  ;;  %v6277_v27 = vadd.f32 %v13946_v59, %v6269_v57  ;;  %v5916_v53 = vadd.f32 %v5915_v49, %v5914_v43 }
 0xd33   :  { %v5926_v37 = vadd.f32 %v5925_v16, %v5924_v34  ;;  %v7072_v30 = vmul.f32 -1.442695, %v6277_v27  ;;  %v5917_v25 = vrot.slane %v5916_v53, 2 }
 0xd35   :  { %v5927_v33 = vrot.slane %v5926_v37, 2  ;;  %11017 = vpow2.f32 %v7072_v30  ;;  %v5918_v55 = vadd.f32 %v5917_v25, %v5916_v53 }
 0xd36   :  { %11019 = vrcp.f32 %v6105_v20 }
 0xd37   :  { %v5928_v28 = vadd.f32 %v5927_v33, %v5926_v37  ;;  %v5919_v59 = vrot.slane %v5918_v55, 1 }
 0xd39   :  { %v5929_v39 = vrot.slane %v5928_v28, 1  ;;  %v5920_v32 = vadd.f32 %v5919_v59, %v5918_v55 }
 0xd3b   :  { %v5930_v44 = vadd.f32 %v5929_v39, %v5928_v28 }
 0xd3d   :  { %v5931_v21 = vsel %vm93_vm2, %v5920_v32, %v5930_v44 }
 0xd3e   :  { %v6444_v12 = vpop.f32.mrb[62].mxu0 }
 0xd3f   :  { %v9661_v50 = vpop.f32.mrb[63].mxu0  ;;  %v11018_v42 = vpop.eup %11017 }
 0xd40   :  { %v11020_v54 = vpop.eup %11019  ;;  %v6281_v48 = vadd.f32 1.0, %v11018_v42 }
 0xd4d   :  { %v6374_v61 = vpop.f32.mrb[62].mxu1 }
 0xd4e   :  { %v6445_v41 = vadd.f32 %v6444_v12, %v6374_v61  ;;  %v9642_v19 = vpop.f32.mrb[63].mxu1 }
 0xd50   :  { %v6453_v26 = vadd.f32 %v13953_v14, %v6445_v41  ;;  %v6483_v14 = vld [vmem:[%s14170_s6 + $0x20] sm:$0xff] }
 0xd51   :  { %v10870_v15 = vpack.c.bf16 %v6484_v40, %v6483_v14 }
 0xd52   :  { %11021 = vtanh.f32 %v6453_v26 }
 0xd53   :  { %11023 = vrcp.f32 %v6281_v48  ;;  %10871 = vmatpush3.bf16.msra.mxu0 %v10870_v15 }
 0xd54   :  { %10872 = vmatprep.subr.bf16.mxu0 %v11074_v3 }
 0xd57   :  { %10874 = vmatpush3.bf16.msra.mxu0 %v10873_v38 }
 0xd58   :  { %10887 = vmatprep.subr.bf16.mxu0 %v11074_v3 }
 0xd5c   :  { %v11022_v45 = vpop.eup %11021 }
 0xd5d   :  { %v6455_v56 = vmul.f32 %v11022_v45, %v11020_v54  ;;  %v11024_v10 = vpop.eup %11023 }
 0xd5f   :  { %v6456_v63 = vadd.f32 %v6455_v56, %v5931_v21 }
 0xd61   :  { %11025 = vtanh.f32 %v6456_v63 }
 0xd6b   :  { %v11026_v52 = vpop.eup %11025 }
 0xd6c   :  { %v6458_v5 = vmul.f32 %v11026_v52, %v11024_v10 }
 0xd6e   :  { %6460 = vrot.lane.b32.xlu1 %v6458_v5, %s11077_s12 }
 0xde0   :  { %v6461_v36 = vpop.permute.xlu1 %6460 }
 0xde1   :  { %v6463_v4 = vsel %vm119_vm1, %v6456_v63, %v6461_v36 }
 0xde2   :  { %6464 = vst [vmem:[#allocation2 + $0xe] sm:$0x3] %v6463_v4  ;;  %v6466_v18 = vrot.slane %v6463_v4, 1 }
 0xde4   :  { %v6468_v0 = vmul.f32 %v6466_v18, %v6463_v4  ;;  %v6469_v11 = vsub.f32 %v6463_v4, %v6466_v18 }
 0xde6   :  { %v6470_v58 = vand.u32 2147483647, %v6469_v11  ;;  %9698 = vmatmul.mubr.msk.f32.vlgmr.msra.gmra.mrb[64].mxu1 %vm119_vm1, %v6468_v0 }
 0xde8   :  { %9679 = vmatmul.mubr.msk.f32.vlgmr.msra.gmra.mrb[64].mxu0 %vm119_vm1, %v6470_v58 }
 0xde9   :  { %9708 = vmatprep.mubr.msk.f32.mxu0 %vm11076_vm0, %v11075_v8  ;;  %10889 = vmatpush3.bf16.msra.mxu0 %v10888_v23 }
 0xdea   :  { %10890 = vmatprep.subr.bf16.mxu0 %v11074_v3  ;;  %v6645_v3 = vld [vmem:[%s14173_s9] sm:$0x1]  ;;  %s11047_s9 = scalar_lea.vmem %s6740_s21, 16 }
 0xdeb   :  { %p11048_p5 = scmp.ne.s32.totalorder %s6740_s21, %s11047_s9  ;;  %p11053_p7 = scmp.lt.s32.totalorder %s11051_s0, %s11047_s9 }
 0xded   :  { %10892 = vmatpush3.bf16.msra.mxu0 %v10891_v51  ;;  %p11054_p8 = por %p11053_p7, %p11052_p6 }
 0xdef   :  { %p11055_p9 = pnand %p11054_p8, %p11048_p5 }
 0xeb9   :  { %v6629_v8 = vpop.f32.mrb[64].mxu1 }
 0xeba   :  { %v9699_v57 = vpop.f32.mrb[65].mxu1 }
 0xebb   :  { %v6556_v35 = vpop.f32.mrb[64].mxu0 }
 0xebc   :  { %v6630_v9 = vadd.f32 %v6629_v8, %v6556_v35  ;;  %v9680_v7 = vpop.f32.mrb[65].mxu0 }
 0xebe   :  { %v6634_v29 = vadd.f32 %v6633_v2, %v6630_v9 }
 0xec0   :  { %v7077_v12 = vmul.f32 -1.442695, %v6634_v29 }
 0xec2   :  { %11027 = vpow2.f32 %v7077_v12 }
 0xecc   :  { %v11028_v13 = vpop.eup %11027 }
 0xecd   :  { %v6638_v50 = vadd.f32 1.0, %v11028_v13 }
 0xecf   :  { %11029 = vrcp.f32 %v6638_v50 }
 0xed9   :  { %v11030_v34 = vpop.eup %11029 }
 0xeda   :  { %9709 = vmatmul.mubr.msk.f32.vlgmr.msra.gmra.mrb[66].mxu0 %vm6646_vm8, %v11030_v34 }
 0xfad   :  { %v6716_v43 = vpop.f32.mrb[66].mxu0 }
 0xfae   :  { %v6717_v16 = vadd.f32 %v6716_v43, %v6645_v3  ;;  %v9710_v27 = vpop.f32.mrb[67].mxu0 }
 0xfb0   :  { %v6721_v49 = vsel %vm6720_vm9, %v6717_v16, -inf }
 0xfb1   :  { %6722 = vmax.xlane.f32.xlu0 %v6721_v49 }
0x103e   :  { %v6723_v1 = vpop.xlane.xlu0 %6722 }
0x103f   :  { %v6724_v37 = vsub.f32 %v6717_v16, %v6723_v1 }
0x1041   :  { %v6725_v30 = vmul.f32 1.442695, %v6724_v37 }
0x1043   :  { %11031 = vpow2.f32 %v6725_v30 }
0x104d   :  { %v11032_v53 = vpop.eup %11031 }
0x104e   :  { %v6727_v20 = vsel %vm6720_vm9, %v11032_v53, 0.0 }
0x104f   :  { %6728 = vadd.xlane.f32.xlu1 %v6727_v20 }
0x10dc   :  { %v6729_v61 = vpop.xlane.xlu1 %6728 }
0x10dd   :  { %11033 = vrcp.f32 %v6729_v61 }
0x10e7   :  { %v11034_v33 = vpop.eup %11033 }
0x10e8   :  { %v6731_v41 = vmul.f32 %v11034_v33, %v11032_v53 }
0x10ea   :  { %6732 = vst.msk [vmem:[#allocation6] sm:$0x1] %vm6720_vm9, %v6731_v41 }
0x10eb   :  { %11058 = shalt.err (!%p11055_p9)
}
0x10ec   :  { %s11059_s3 = scalar_lea.hbm %s14174_s10, 16 }
0x10ed   :  { %p11060_p10 = scmp.ne.s32.totalorder %s14174_s10, %s11059_s3  ;;  %p11063_p11 = scmp.lt.u32.totalorder %s11059_s3, %s14174_s10 }
0x10ef   :  { %p11065_p12 = pnand %p11063_p11, %p11060_p10 }
0x10f1   :  { %11068 = shalt.err (!%p11065_p12)
}
0x10f2   :  { %6742 = dma.vmem_to_hbm [thread:$0]  %s6740_s21, 16, %s14174_s10, [#allocation4]  }
0x10f3   :  { %11071 = dma.done.wait [#allocation4], 16  }
0x10f4   :  { %11072 = vsyncadd [#allocation4], 4294967280 }
0x10f5   :  { %6746 = vsyncpa [#allocation4], 1 }
0x10f6   :  { %6747 = vsyncpa [#allocation5], 1 }

</bundles_post_ra>
